<compile_context>
chip_gen: v7x
topology: tpu7x:2x2x1
jax: 0.10.0
libtpu: 0.0.40
codegen_flags: <defaults>
</compile_context>

<pallas_src>
import functools

import jax
import jax.numpy as jnp
from jax import lax
from jax.experimental import pallas as pl
from jax.experimental.pallas import tpu as pltpu

# ----------------------------- model constants ------------------------------
CIN = 3          # module fixes in_channels=3
CIN_P = 8        # sublane-padded input channels (K=8 matmuls instead of K=3)
CMID = 16        # hidden channels of the proxy seg stack
CMID_P = 128     # lane-padded hidden channels (MXU / vst friendly)
CSEG = 3         # seg classes (fixed by module: classes=3)
CSEG_P = 128     # lane-padded seg output channels
CLS_HID = 512    # fine_tune hidden size (fixed by module)
CLS_P = 128      # lane-padded cls output channels


def _round_up(x, m):
    return (x + m - 1) // m * m


# =============================================================================
# Fully fused kernel: seg conv stack + classification head, one image per step
# =============================================================================
def _fused_kernel(xp_ref, w1_ref, b1_ref, w2_ref, b2_ref, w3_ref, b3_ref,
                  fw1_ref, fb1_ref, fw2_ref, fb2_ref,
                  o_seg_ref, o_cls_ref, a1_ref, *, H, W, MP):
    """Grid step = one image.

    Layout: a spatially zero-padded image (H+2, W+2, C) flattened to ((H+2)*(W+2), C)
    turns every 3x3 tap (di, dj) into a static sublane slice at offset di*(W+2)+dj,
    so a SAME conv is a sum of shifted (M, Cin)@(Cin, Cout) matmuls.  Garbage columns
    (j >= W) are masked to zero so the intermediate slab doubles as the zero-padding
    ring for the next conv.
    """
    WP = W + 2
    M = H * WP
    SLAB = a1_ref.shape[0]
    f32, bf16 = jnp.float32, jnp.bfloat16

    def tap_off(k):
        return (k // 3) * WP + (k % 3)

    # ---- conv1 (3x3, SAME): 9 shifted matmuls, register accumulation ----
    acc = None
    for k in range(9):
        xs = xp_ref[0, pl.ds(tap_off(k), MP), :].astype(bf16)          # (MP, CIN_P)
        d = jnp.dot(xs, w1_ref[k], preferred_element_type=f32)         # (MP, CMID_P)
        acc = d if acc is None else acc + d
    a1 = jnp.maximum(acc + b1_ref[...], 0.0)                           # ReLU, f32

    # ---- write a1 into the padded slab; zero only the padding ring ----
    row = lax.broadcasted_iota(jnp.int32, (MP, 1), 0)
    valid = ((row % WP) < W) & (row < M)                               # (MP, 1) mask
    a1_ref[pl.ds(0, WP + 1), :] = jnp.zeros((WP + 1, CMID_P), f32)     # top ring
    bot = (H + 1) * WP
    a1_ref[pl.ds(bot, SLAB - bot), :] = jnp.zeros((SLAB - bot, CMID_P), f32)  # bottom ring/tail
    a1_ref[pl.ds(WP + 1, MP), :] = jnp.where(valid, a1, 0.0)           # interior (masked cols)

    # ---- conv2 (3x3, SAME): taps merged pairwise (K = 256), register accumulation ----
    acc2 = None
    for p in range(5):
        k0, k1 = 2 * p, min(2 * p + 1, 8)                              # pair 4's 2nd half is zero wt
        h0 = a1_ref[pl.ds(tap_off(k0), MP), :].astype(bf16)
        h1 = a1_ref[pl.ds(tap_off(k1), MP), :].astype(bf16)
        hc = jnp.concatenate([h0, h1], axis=-1)                        # (MP, 2*CMID_P)
        d = jnp.dot(hc, w2_ref[p], preferred_element_type=f32)
        acc2 = d if acc2 is None else acc2 + d
    a2 = jnp.maximum(acc2 + b2_ref[...], 0.0).astype(bf16)             # ReLU

    # ---- 1x1 seg conv (lane-dense 128-wide output, sliced to 3 outside) ----
    seg = jnp.dot(a2, w3_ref[...], preferred_element_type=f32) + b3_ref[...]   # (MP, CSEG_P) f32
    o_seg_ref[0] = seg

    # ---- fused cls head on the in-VMEM activation ----
    # fc1 weights are pre-permuted to padded-slab row order (zeros at garbage columns /
    # tail rows) and transposed so they are the matmul LHS; contraction runs over the
    # slab rows (sublanes of `seg`), so no activation transpose is needed.
    seg_bf = seg.astype(bf16)
    h = fb1_ref[...]                                                   # (CLS_HID, 1) f32, start at bias
    for c in range(CSEG):
        r = jnp.dot(fw1_ref[c], seg_bf, preferred_element_type=f32)    # (CLS_HID, CSEG_P)
        h = h + r[:, c:c + 1]
    h = jnp.where(h > 0, h, 0.01 * h)                                  # nn.LeakyReLU default slope
    # TODO(synk): nn.Dropout is identity at inference; training-mode dropout not implemented.
    cls = jnp.dot(fw2_ref[...], h.astype(bf16),
                  preferred_element_type=f32) + fb2_ref[...]           # (CLS_P, 1)
    o_cls_ref[0] = cls


def fused_forward(xslab, pp, *, B, H, W, MP, SLAB):
    kernel = functools.partial(_fused_kernel, H=H, W=W, MP=MP)
    return pl.pallas_call(
        kernel,
        out_shape=(jax.ShapeDtypeStruct((B, MP, CSEG_P), jnp.float32),
                   jax.ShapeDtypeStruct((B, CLS_P, 1), jnp.float32)),
        grid=(B,),
        in_specs=[
            pl.BlockSpec((1, SLAB, CIN_P), lambda b: (b, 0, 0)),          # padded image slab (f32)
            pl.BlockSpec((9, CIN_P, CMID_P), lambda b: (0, 0, 0)),        # conv1 weights (bf16)
            pl.BlockSpec((1, CMID_P), lambda b: (0, 0)),                  # conv1 bias (f32)
            pl.BlockSpec((5, 2 * CMID_P, CMID_P), lambda b: (0, 0, 0)),   # conv2 weights, pair-merged
            pl.BlockSpec((1, CMID_P), lambda b: (0, 0)),                  # conv2 bias
            pl.BlockSpec((CMID_P, CSEG_P), lambda b: (0, 0)),             # 1x1 seg weights (bf16)
            pl.BlockSpec((1, CSEG_P), lambda b: (0, 0)),                  # seg bias
            pl.BlockSpec((CSEG, CLS_HID, MP), lambda b: (0, 0, 0)),       # fc1 weights, slab order
            pl.BlockSpec((CLS_HID, 1), lambda b: (0, 0)),                 # fc1 bias (column)
            pl.BlockSpec((CLS_P, CLS_HID), lambda b: (0, 0)),             # fc2 weights (transposed)
            pl.BlockSpec((CLS_P, 1), lambda b: (0, 0)),                   # fc2 bias (column)
        ],
        out_specs=(pl.BlockSpec((1, MP, CSEG_P), lambda b: (b, 0, 0)),
                   pl.BlockSpec((1, CLS_P, 1), lambda b: (b, 0, 0))),
        scratch_shapes=[pltpu.VMEM((SLAB, CMID_P), jnp.float32)],         # padded a1 slab
        compiler_params=pltpu.CompilerParams(dimension_semantics=("parallel",)),
    )(xslab, pp["w1"], pp["b1"], pp["w2"], pp["b2"], pp["w3"], pp["b3"],
      pp["fc1_wT"], pp["fc1_b"], pp["fc2_wT"], pp["fc2_b"])


# =============================================================================
# Parameters
# =============================================================================
def init_params(key, img_size, num_classes):
    ks = jax.random.split(key, 6)
    s = 0.05
    F = CSEG * img_size * img_size
    return {
        # segmentation proxy (stand-in for UNet++ / EfficientNet-B6)
        "conv1_w": jax.random.normal(ks[0], (CMID, CIN, 3, 3), jnp.float32) * s,
        "conv1_b": jnp.zeros((CMID,), jnp.float32),
        "conv2_w": jax.random.normal(ks[1], (CMID, CMID, 3, 3), jnp.float32) * s,
        "conv2_b": jnp.zeros((CMID,), jnp.float32),
        "seg_w":   jax.random.normal(ks[2], (CSEG, CMID, 1, 1), jnp.float32) * s,
        "seg_b":   jnp.zeros((CSEG,), jnp.float32),
        # fine_tune head: Linear(3*H*W, 512) -> LeakyReLU -> Dropout -> Linear(512, num_classes)
        "fc1_w": jax.random.normal(ks[3], (F, CLS_HID), jnp.float32) * s,
        "fc1_b": jnp.zeros((CLS_HID,), jnp.float32),
        "fc2_w": jax.random.normal(ks[4], (CLS_HID, num_classes), jnp.float32) * s,
        "fc2_b": jnp.zeros((num_classes,), jnp.float32),
    }


def pack_params(p, *, H, W):
    """Repack PyTorch-layout params into kernel-friendly, 128-padded bf16 slabs."""
    WP = W + 2
    M = H * WP
    MP = _round_up(M, 16)
    bf16 = jnp.bfloat16

    def conv3_to_taps(w, cin_p, cout_p):
        co, ci, kh, kw = w.shape
        t = jnp.transpose(w, (2, 3, 1, 0)).reshape(kh * kw, ci, co)     # (k, ci, co)
        return jnp.pad(t, ((0, 0), (0, cin_p - ci), (0, cout_p - co)))

    def bias_row(b, pad):
        return jnp.pad(b, (0, pad - b.shape[0])).reshape(1, pad).astype(jnp.float32)

    # conv1 taps
    w1 = conv3_to_taps(p["conv1_w"], CIN_P, CMID_P).astype(bf16)         # (9, 8, 128)
    # conv2 taps, merged pairwise along K (10th tap = zeros)
    w2 = conv3_to_taps(p["conv2_w"], CMID_P, CMID_P)                     # (9, 128, 128)
    w2 = jnp.concatenate([w2, jnp.zeros((1, CMID_P, CMID_P), w2.dtype)], axis=0)
    w2 = w2.reshape(5, 2 * CMID_P, CMID_P).astype(bf16)                  # (5, 256, 128)
    # 1x1 seg conv
    w3 = p["seg_w"].reshape(CSEG, CMID).T
    w3 = jnp.pad(w3, ((0, CMID_P - CMID), (0, CSEG_P - CSEG))).astype(bf16)
    # fc1: rows are torch.flatten(NCHW) order (c*H*W + h*W + w); re-permute per channel
    # to padded-slab row order (q = h*(W+2)+w), zero garbage columns / tail, transpose.
    fc1 = p["fc1_w"].reshape(CSEG, H, W, CLS_HID)
    fc1 = jnp.pad(fc1, ((0, 0), (0, 0), (0, WP - W), (0, 0)))            # zeros at w >= W
    fc1 = fc1.reshape(CSEG, M, CLS_HID)
    fc1 = jnp.pad(fc1, ((0, 0), (0, MP - M), (0, 0)))                    # zeros at tail rows
    fc1_wT = jnp.transpose(fc1, (0, 2, 1)).astype(bf16)                  # (3, 512, MP)
    # fc2 (transposed so it is the matmul LHS), rows padded to 128
    nc = p["fc2_w"].shape[1]
    fc2_wT = jnp.pad(p["fc2_w"].T, ((0, CLS_P - nc), (0, 0))).astype(bf16)   # (128, 512)
    return {
        "w1": w1, "b1": bias_row(p["conv1_b"], CMID_P),
        "w2": w2, "b2": bias_row(p["conv2_b"], CMID_P),
        "w3": w3, "b3": bias_row(p["seg_b"], CSEG_P),
        "fc1_wT": fc1_wT,
        "fc1_b": p["fc1_b"].reshape(CLS_HID, 1).astype(jnp.float32),
        "fc2_wT": fc2_wT,
        "fc2_b": jnp.pad(p["fc2_b"], (0, CLS_P - nc)).reshape(CLS_P, 1).astype(jnp.float32),
    }


# =============================================================================
# Forward
# =============================================================================
def b6_seg_cls_forward(pp, x, *, num_classes):
    """x: (B, 3, H, W) NCHW. Returns (seg_out (B,3,H,W) f32, cls_out (B,num_classes) f32)."""
    B, C, H, W = x.shape
    WP, HP = W + 2, H + 2
    M = H * WP
    MP = _round_up(M, 16)
    SLAB = _round_up(MP + 2 * WP + 2, 8)   # shifted tap reads stay in-bounds

    # One cheap layout pass: NCHW -> zero-padded, flattened NHWC slab (NOT im2col).
    xt = jnp.transpose(x, (0, 2, 3, 1))
    xpad = jnp.pad(xt, ((0, 0), (1, 1), (1, 1), (0, 0)))
    xslab = xpad.reshape(B, HP * WP, C)
    xslab = jnp.pad(xslab, ((0, 0), (0, SLAB - HP * WP), (0, CIN_P - C))).astype(jnp.float32)

    # Single fused pallas_call: conv stack + cls head, all intermediates in VMEM.
    seg_slab, cls_col = fused_forward(xslab, pp, B=B, H=H, W=W, MP=MP, SLAB=SLAB)

    # Drop padded columns / channels once at the end (PyTorch NCHW seg output).
    seg_out = seg_slab[:, :M, :CSEG].reshape(B, H, WP, CSEG)[:, :, :W, :]
    seg_out = jnp.transpose(seg_out, (0, 3, 1, 2))            # (B, 3, H, W)
    cls_out = cls_col[:, :num_classes, 0]                     # (B, num_classes)
    return seg_out, cls_out


if __name__ == "__main__":
    # Small shapes consistent with the module: batch=2, in_channels=3 (fixed by the
    # module), img_size=16, num_classes=4.
    B, C, IMG, NUM_CLASSES = 2, 3, 16, 4

    key = jax.random.PRNGKey(0)
    k_param, k_x = jax.random.split(key)
    params = init_params(k_param, IMG, NUM_CLASSES)
    packed = pack_params(params, H=IMG, W=IMG)
    x = jax.random.normal(k_x, (B, C, IMG, IMG), jnp.float32)

    fwd = jax.jit(functools.partial(b6_seg_cls_forward, num_classes=NUM_CLASSES))
    seg_out, cls_out = fwd(packed, x)
    jax.block_until_ready((seg_out, cls_out))

    assert seg_out.shape == (B, 3, IMG, IMG), seg_out.shape
    assert cls_out.shape == (B, NUM_CLASSES), cls_out.shape
    assert seg_out.dtype == jnp.float32 and cls_out.dtype == jnp.float32
    assert bool(jnp.isfinite(seg_out).all()) and bool(jnp.isfinite(cls_out).all())
    print("KERNEL_OK")
</pallas_src>

<mosaic_0001>
module attributes {stable_mosaic.version = 11 : i64} {
  func.func @_fused_kernel(%arg0: i32, %arg1: memref<1x328x8xf32, #tpu.memory_space<vmem>>, %arg2: memref<9x8x128xbf16, #tpu.memory_space<vmem>>, %arg3: memref<1x128xf32, #tpu.memory_space<vmem>>, %arg4: memref<5x256x128xbf16, #tpu.memory_space<vmem>>, %arg5: memref<1x128xf32, #tpu.memory_space<vmem>>, %arg6: memref<128x128xbf16, #tpu.memory_space<vmem>>, %arg7: memref<1x128xf32, #tpu.memory_space<vmem>>, %arg8: memref<3x512x288xbf16, #tpu.memory_space<vmem>>, %arg9: memref<512x1xf32, #tpu.memory_space<vmem>>, %arg10: memref<128x512xbf16, #tpu.memory_space<vmem>>, %arg11: memref<128x1xf32, #tpu.memory_space<vmem>>, %arg12: memref<1x288x128xf32, #tpu.memory_space<vmem>>, %arg13: memref<1x128x1xf32, #tpu.memory_space<vmem>>, %arg14: memref<328x128xf32, #tpu.memory_space<vmem>>) attributes {dimension_semantics = [#tpu.dimension_semantics<parallel>], iteration_bounds = array<i64: 2>, scalar_prefetch = 0 : i64, scratch_operands = 1 : i64, tpu.core_type = #tpu.core_type<tc>, window_params = [{transform_indices = @transform_0, window_bounds = array<i64: 1, 328, 8>}, {pipeline_mode = #tpu.pipeline_mode<synchronous>, transform_indices = @transform_1, window_bounds = array<i64: 9, 8, 128>}, {pipeline_mode = #tpu.pipeline_mode<synchronous>, transform_indices = @transform_2, window_bounds = array<i64: 1, 128>}, {pipeline_mode = #tpu.pipeline_mode<synchronous>, transform_indices = @transform_3, window_bounds = array<i64: 5, 256, 128>}, {pipeline_mode = #tpu.pipeline_mode<synchronous>, transform_indices = @transform_4, window_bounds = array<i64: 1, 128>}, {pipeline_mode = #tpu.pipeline_mode<synchronous>, transform_indices = @transform_5, window_bounds = array<i64: 128, 128>}, {pipeline_mode = #tpu.pipeline_mode<synchronous>, transform_indices = @transform_6, window_bounds = array<i64: 1, 128>}, {pipeline_mode = #tpu.pipeline_mode<synchronous>, transform_indices = @transform_7, window_bounds = array<i64: 3, 512, 288>}, {pipeline_mode = #tpu.pipeline_mode<synchronous>, transform_indices = @transform_8, window_bounds = array<i64: 512, 1>}, {pipeline_mode = #tpu.pipeline_mode<synchronous>, transform_indices = @transform_9, window_bounds = array<i64: 128, 512>}, {pipeline_mode = #tpu.pipeline_mode<synchronous>, transform_indices = @transform_10, window_bounds = array<i64: 128, 1>}, {transform_indices = @transform_11, window_bounds = array<i64: 1, 288, 128>}, {transform_indices = @transform_12, window_bounds = array<i64: 1, 128, 1>}]} {
    %c0 = arith.constant 0 : index
    %c0_0 = arith.constant 0 : index
    %c0_1 = arith.constant 0 : index
    %0 = vector.load %arg1[%c0, %c0_0, %c0_1] : memref<1x328x8xf32, #tpu.memory_space<vmem>>, vector<1x288x8xf32>
    %1 = vector.shape_cast %0 : vector<1x288x8xf32> to vector<288x8xf32>
    %2 = arith.truncf %1 : vector<288x8xf32> to vector<288x8xbf16>
    %c0_2 = arith.constant 0 : index
    %c0_3 = arith.constant 0 : index
    %c0_4 = arith.constant 0 : index
    %3 = vector.load %arg2[%c0_2, %c0_3, %c0_4] : memref<9x8x128xbf16, #tpu.memory_space<vmem>>, vector<1x8x128xbf16>
    %4 = vector.shape_cast %3 : vector<1x8x128xbf16> to vector<8x128xbf16>
    %cst = arith.constant dense<0.000000e+00> : vector<288x128xf32>
    %5 = tpu.matmul %2, %4, %cst {dimension_numbers = #tpu.dot_dimension_numbers<[1], [0], [0], [1], [0, 0, 1, 1], [], []>} : vector<288x8xbf16>, vector<8x128xbf16>, vector<288x128xf32> -> vector<288x128xf32>
    %c0_5 = arith.constant 0 : index
    %c1 = arith.constant 1 : index
    %c0_6 = arith.constant 0 : index
    %6 = vector.load %arg1[%c0_5, %c1, %c0_6] : memref<1x328x8xf32, #tpu.memory_space<vmem>>, vector<1x288x8xf32>
    %7 = vector.shape_cast %6 : vector<1x288x8xf32> to vector<288x8xf32>
    %8 = arith.truncf %7 : vector<288x8xf32> to vector<288x8xbf16>
    %c1_7 = arith.constant 1 : index
    %c0_8 = arith.constant 0 : index
    %c0_9 = arith.constant 0 : index
    %9 = vector.load %arg2[%c1_7, %c0_8, %c0_9] : memref<9x8x128xbf16, #tpu.memory_space<vmem>>, vector<1x8x128xbf16>
    %10 = vector.shape_cast %9 : vector<1x8x128xbf16> to vector<8x128xbf16>
    %cst_10 = arith.constant dense<0.000000e+00> : vector<288x128xf32>
    %11 = tpu.matmul %8, %10, %cst_10 {dimension_numbers = #tpu.dot_dimension_numbers<[1], [0], [0], [1], [0, 0, 1, 1], [], []>} : vector<288x8xbf16>, vector<8x128xbf16>, vector<288x128xf32> -> vector<288x128xf32>
    %12 = arith.addf %5, %11 : vector<288x128xf32>
    %c0_11 = arith.constant 0 : index
    %c2 = arith.constant 2 : index
    %c0_12 = arith.constant 0 : index
    %13 = vector.load %arg1[%c0_11, %c2, %c0_12] : memref<1x328x8xf32, #tpu.memory_space<vmem>>, vector<1x288x8xf32>
    %14 = vector.shape_cast %13 : vector<1x288x8xf32> to vector<288x8xf32>
    %15 = arith.truncf %14 : vector<288x8xf32> to vector<288x8xbf16>
    %c2_13 = arith.constant 2 : index
    %c0_14 = arith.constant 0 : index
    %c0_15 = arith.constant 0 : index
    %16 = vector.load %arg2[%c2_13, %c0_14, %c0_15] : memref<9x8x128xbf16, #tpu.memory_space<vmem>>, vector<1x8x128xbf16>
    %17 = vector.shape_cast %16 : vector<1x8x128xbf16> to vector<8x128xbf16>
    %cst_16 = arith.constant dense<0.000000e+00> : vector<288x128xf32>
    %18 = tpu.matmul %15, %17, %cst_16 {dimension_numbers = #tpu.dot_dimension_numbers<[1], [0], [0], [1], [0, 0, 1, 1], [], []>} : vector<288x8xbf16>, vector<8x128xbf16>, vector<288x128xf32> -> vector<288x128xf32>
    %19 = arith.addf %12, %18 : vector<288x128xf32>
    %c0_17 = arith.constant 0 : index
    %c18 = arith.constant 18 : index
    %c0_18 = arith.constant 0 : index
    %20 = vector.load %arg1[%c0_17, %c18, %c0_18] : memref<1x328x8xf32, #tpu.memory_space<vmem>>, vector<1x288x8xf32>
    %21 = vector.shape_cast %20 : vector<1x288x8xf32> to vector<288x8xf32>
    %22 = arith.truncf %21 : vector<288x8xf32> to vector<288x8xbf16>
    %c3 = arith.constant 3 : index
    %c0_19 = arith.constant 0 : index
    %c0_20 = arith.constant 0 : index
    %23 = vector.load %arg2[%c3, %c0_19, %c0_20] : memref<9x8x128xbf16, #tpu.memory_space<vmem>>, vector<1x8x128xbf16>
    %24 = vector.shape_cast %23 : vector<1x8x128xbf16> to vector<8x128xbf16>
    %cst_21 = arith.constant dense<0.000000e+00> : vector<288x128xf32>
    %25 = tpu.matmul %22, %24, %cst_21 {dimension_numbers = #tpu.dot_dimension_numbers<[1], [0], [0], [1], [0, 0, 1, 1], [], []>} : vector<288x8xbf16>, vector<8x128xbf16>, vector<288x128xf32> -> vector<288x128xf32>
    %26 = arith.addf %19, %25 : vector<288x128xf32>
    %c0_22 = arith.constant 0 : index
    %c19 = arith.constant 19 : index
    %c0_23 = arith.constant 0 : index
    %27 = vector.load %arg1[%c0_22, %c19, %c0_23] : memref<1x328x8xf32, #tpu.memory_space<vmem>>, vector<1x288x8xf32>
    %28 = vector.shape_cast %27 : vector<1x288x8xf32> to vector<288x8xf32>
    %29 = arith.truncf %28 : vector<288x8xf32> to vector<288x8xbf16>
    %c4 = arith.constant 4 : index
    %c0_24 = arith.constant 0 : index
    %c0_25 = arith.constant 0 : index
    %30 = vector.load %arg2[%c4, %c0_24, %c0_25] : memref<9x8x128xbf16, #tpu.memory_space<vmem>>, vector<1x8x128xbf16>
    %31 = vector.shape_cast %30 : vector<1x8x128xbf16> to vector<8x128xbf16>
    %cst_26 = arith.constant dense<0.000000e+00> : vector<288x128xf32>
    %32 = tpu.matmul %29, %31, %cst_26 {dimension_numbers = #tpu.dot_dimension_numbers<[1], [0], [0], [1], [0, 0, 1, 1], [], []>} : vector<288x8xbf16>, vector<8x128xbf16>, vector<288x128xf32> -> vector<288x128xf32>
    %33 = arith.addf %26, %32 : vector<288x128xf32>
    %c0_27 = arith.constant 0 : index
    %c20 = arith.constant 20 : index
    %c0_28 = arith.constant 0 : index
    %34 = vector.load %arg1[%c0_27, %c20, %c0_28] : memref<1x328x8xf32, #tpu.memory_space<vmem>>, vector<1x288x8xf32>
    %35 = vector.shape_cast %34 : vector<1x288x8xf32> to vector<288x8xf32>
    %36 = arith.truncf %35 : vector<288x8xf32> to vector<288x8xbf16>
    %c5 = arith.constant 5 : index
    %c0_29 = arith.constant 0 : index
    %c0_30 = arith.constant 0 : index
    %37 = vector.load %arg2[%c5, %c0_29, %c0_30] : memref<9x8x128xbf16, #tpu.memory_space<vmem>>, vector<1x8x128xbf16>
    %38 = vector.shape_cast %37 : vector<1x8x128xbf16> to vector<8x128xbf16>
    %cst_31 = arith.constant dense<0.000000e+00> : vector<288x128xf32>
    %39 = tpu.matmul %36, %38, %cst_31 {dimension_numbers = #tpu.dot_dimension_numbers<[1], [0], [0], [1], [0, 0, 1, 1], [], []>} : vector<288x8xbf16>, vector<8x128xbf16>, vector<288x128xf32> -> vector<288x128xf32>
    %40 = arith.addf %33, %39 : vector<288x128xf32>
    %c0_32 = arith.constant 0 : index
    %c36 = arith.constant 36 : index
    %c0_33 = arith.constant 0 : index
    %41 = vector.load %arg1[%c0_32, %c36, %c0_33] : memref<1x328x8xf32, #tpu.memory_space<vmem>>, vector<1x288x8xf32>
    %42 = vector.shape_cast %41 : vector<1x288x8xf32> to vector<288x8xf32>
    %43 = arith.truncf %42 : vector<288x8xf32> to vector<288x8xbf16>
    %c6 = arith.constant 6 : index
    %c0_34 = arith.constant 0 : index
    %c0_35 = arith.constant 0 : index
    %44 = vector.load %arg2[%c6, %c0_34, %c0_35] : memref<9x8x128xbf16, #tpu.memory_space<vmem>>, vector<1x8x128xbf16>
    %45 = vector.shape_cast %44 : vector<1x8x128xbf16> to vector<8x128xbf16>
    %cst_36 = arith.constant dense<0.000000e+00> : vector<288x128xf32>
    %46 = tpu.matmul %43, %45, %cst_36 {dimension_numbers = #tpu.dot_dimension_numbers<[1], [0], [0], [1], [0, 0, 1, 1], [], []>} : vector<288x8xbf16>, vector<8x128xbf16>, vector<288x128xf32> -> vector<288x128xf32>
    %47 = arith.addf %40, %46 : vector<288x128xf32>
    %c0_37 = arith.constant 0 : index
    %c37 = arith.constant 37 : index
    %c0_38 = arith.constant 0 : index
    %48 = vector.load %arg1[%c0_37, %c37, %c0_38] : memref<1x328x8xf32, #tpu.memory_space<vmem>>, vector<1x288x8xf32>
    %49 = vector.shape_cast %48 : vector<1x288x8xf32> to vector<288x8xf32>
    %50 = arith.truncf %49 : vector<288x8xf32> to vector<288x8xbf16>
    %c7 = arith.constant 7 : index
    %c0_39 = arith.constant 0 : index
    %c0_40 = arith.constant 0 : index
    %51 = vector.load %arg2[%c7, %c0_39, %c0_40] : memref<9x8x128xbf16, #tpu.memory_space<vmem>>, vector<1x8x128xbf16>
    %52 = vector.shape_cast %51 : vector<1x8x128xbf16> to vector<8x128xbf16>
    %cst_41 = arith.constant dense<0.000000e+00> : vector<288x128xf32>
    %53 = tpu.matmul %50, %52, %cst_41 {dimension_numbers = #tpu.dot_dimension_numbers<[1], [0], [0], [1], [0, 0, 1, 1], [], []>} : vector<288x8xbf16>, vector<8x128xbf16>, vector<288x128xf32> -> vector<288x128xf32>
    %54 = arith.addf %47, %53 : vector<288x128xf32>
    %c0_42 = arith.constant 0 : index
    %c38 = arith.constant 38 : index
    %c0_43 = arith.constant 0 : index
    %55 = vector.load %arg1[%c0_42, %c38, %c0_43] : memref<1x328x8xf32, #tpu.memory_space<vmem>>, vector<1x288x8xf32>
    %56 = vector.shape_cast %55 : vector<1x288x8xf32> to vector<288x8xf32>
    %57 = arith.truncf %56 : vector<288x8xf32> to vector<288x8xbf16>
    %c8 = arith.constant 8 : index
    %c0_44 = arith.constant 0 : index
    %c0_45 = arith.constant 0 : index
    %58 = vector.load %arg2[%c8, %c0_44, %c0_45] : memref<9x8x128xbf16, #tpu.memory_space<vmem>>, vector<1x8x128xbf16>
    %59 = vector.shape_cast %58 : vector<1x8x128xbf16> to vector<8x128xbf16>
    %cst_46 = arith.constant dense<0.000000e+00> : vector<288x128xf32>
    %60 = tpu.matmul %57, %59, %cst_46 {dimension_numbers = #tpu.dot_dimension_numbers<[1], [0], [0], [1], [0, 0, 1, 1], [], []>} : vector<288x8xbf16>, vector<8x128xbf16>, vector<288x128xf32> -> vector<288x128xf32>
    %61 = arith.addf %54, %60 : vector<288x128xf32>
    %c0_47 = arith.constant 0 : index
    %c0_48 = arith.constant 0 : index
    %62 = vector.load %arg3[%c0_47, %c0_48] : memref<1x128xf32, #tpu.memory_space<vmem>>, vector<1x128xf32>
    %63 = vector.broadcast %62 : vector<1x128xf32> to vector<288x128xf32>
    %64 = arith.addf %61, %63 : vector<288x128xf32>
    %cst_49 = arith.constant 0.000000e+00 : f32
    %65 = vector.broadcast %cst_49 : f32 to vector<288x128xf32>
    %66 = arith.maximumf %64, %65 : vector<288x128xf32>
    %67 = tpu.iota {dimensions = array<i32: 0>} : vector<288x1xi32>
    %c18_i32 = arith.constant 18 : i32
    %c0_i32 = arith.constant 0 : i32
    %68 = arith.cmpi eq, %c18_i32, %c0_i32 : i32
    %c1_i32 = arith.constant 1 : i32
    %69 = arith.select %68, %c1_i32, %c18_i32 : i32
    %70 = vector.broadcast %69 : i32 to vector<288x1xi32>
    %71 = arith.remsi %67, %70 : vector<288x1xi32>
    %c0_i32_50 = arith.constant 0 : i32
    %72 = vector.broadcast %c0_i32_50 : i32 to vector<288x1xi32>
    %73 = arith.cmpi ne, %71, %72 : vector<288x1xi32>
    %c0_i32_51 = arith.constant 0 : i32
    %74 = vector.broadcast %c0_i32_51 : i32 to vector<288x1xi32>
    %75 = arith.cmpi slt, %71, %74 : vector<288x1xi32>
    %c0_i32_52 = arith.constant 0 : i32
    %76 = arith.cmpi slt, %69, %c0_i32_52 : i32
    %77 = vector.broadcast %76 : i1 to vector<288x1xi1>
    %78 = vector.broadcast %77 : vector<288x1xi1> to vector<288x1xi1>
    %79 = arith.xori %75, %78 : vector<288x1xi1>
    %80 = arith.andi %79, %73 : vector<288x1xi1>
    %81 = vector.broadcast %69 : i32 to vector<288x1xi32>
    %82 = arith.addi %71, %81 : vector<288x1xi32>
    %83 = arith.select %80, %82, %71 : vector<288x1xi1>, vector<288x1xi32>
    %c16_i32 = arith.constant 16 : i32
    %84 = vector.broadcast %c16_i32 : i32 to vector<288x1xi32>
    %85 = arith.cmpi slt, %83, %84 : vector<288x1xi32>
    %c288_i32 = arith.constant 288 : i32
    %86 = vector.broadcast %c288_i32 : i32 to vector<288x1xi32>
    %87 = arith.cmpi slt, %67, %86 : vector<288x1xi32>
    %88 = arith.andi %85, %87 : vector<288x1xi1>
    %cst_53 = arith.constant 0.000000e+00 : f32
    %89 = vector.broadcast %cst_53 : f32 to vector<19x128xf32>
    %c0_54 = arith.constant 0 : index
    %c0_55 = arith.constant 0 : index
    %90 = vector.load %arg14[%c0_54, %c0_55] : memref<328x128xf32, #tpu.memory_space<vmem>>, vector<19x128xf32>
    tpu.vector_store %arg14[%c0_54, %c0_55], %89 {strides = array<i32>} : memref<328x128xf32, #tpu.memory_space<vmem>>, vector<19x128xf32>,
    %cst_56 = arith.constant 0.000000e+00 : f32
    %91 = vector.broadcast %cst_56 : f32 to vector<22x128xf32>
    %c306 = arith.constant 306 : index
    %c0_57 = arith.constant 0 : index
    %92 = vector.load %arg14[%c306, %c0_57] : memref<328x128xf32, #tpu.memory_space<vmem>>, vector<22x128xf32>
    tpu.vector_store %arg14[%c306, %c0_57], %91 {strides = array<i32>} : memref<328x128xf32, #tpu.memory_space<vmem>>, vector<22x128xf32>,
    %cst_58 = arith.constant 0.000000e+00 : f32
    %93 = vector.shape_cast %88 : vector<288x1xi1> to vector<288x1xi1>
    %94 = vector.broadcast %93 : vector<288x1xi1> to vector<288x128xi1>
    %95 = vector.broadcast %cst_58 : f32 to vector<288x128xf32>
    %96 = arith.select %94, %66, %95 : vector<288x128xi1>, vector<288x128xf32>
    %c19_59 = arith.constant 19 : index
    %c0_60 = arith.constant 0 : index
    %97 = vector.load %arg14[%c19_59, %c0_60] : memref<328x128xf32, #tpu.memory_space<vmem>>, vector<288x128xf32>
    tpu.vector_store %arg14[%c19_59, %c0_60], %96 {strides = array<i32>} : memref<328x128xf32, #tpu.memory_space<vmem>>, vector<288x128xf32>,
    %c0_61 = arith.constant 0 : index
    %c0_62 = arith.constant 0 : index
    %98 = vector.load %arg14[%c0_61, %c0_62] : memref<328x128xf32, #tpu.memory_space<vmem>>, vector<288x128xf32>
    %99 = arith.truncf %98 : vector<288x128xf32> to vector<288x128xbf16>
    %c1_63 = arith.constant 1 : index
    %c0_64 = arith.constant 0 : index
    %100 = vector.load %arg14[%c1_63, %c0_64] : memref<328x128xf32, #tpu.memory_space<vmem>>, vector<288x128xf32>
    %101 = arith.truncf %100 : vector<288x128xf32> to vector<288x128xbf16>
    %102 = tpu.concatenate %99, %101 in 1 : vector<288x128xbf16>, vector<288x128xbf16> -> vector<288x256xbf16>
    %c0_65 = arith.constant 0 : index
    %c0_66 = arith.constant 0 : index
    %c0_67 = arith.constant 0 : index
    %103 = vector.load %arg4[%c0_65, %c0_66, %c0_67] : memref<5x256x128xbf16, #tpu.memory_space<vmem>>, vector<1x256x128xbf16>
    %104 = vector.shape_cast %103 : vector<1x256x128xbf16> to vector<256x128xbf16>
    %cst_68 = arith.constant dense<0.000000e+00> : vector<288x128xf32>
    %105 = tpu.matmul %102, %104, %cst_68 {dimension_numbers = #tpu.dot_dimension_numbers<[1], [0], [0], [1], [0, 0, 1, 1], [], []>} : vector<288x256xbf16>, vector<256x128xbf16>, vector<288x128xf32> -> vector<288x128xf32>
    %c2_69 = arith.constant 2 : index
    %c0_70 = arith.constant 0 : index
    %106 = vector.load %arg14[%c2_69, %c0_70] : memref<328x128xf32, #tpu.memory_space<vmem>>, vector<288x128xf32>
    %107 = arith.truncf %106 : vector<288x128xf32> to vector<288x128xbf16>
    %c18_71 = arith.constant 18 : index
    %c0_72 = arith.constant 0 : index
    %108 = vector.load %arg14[%c18_71, %c0_72] : memref<328x128xf32, #tpu.memory_space<vmem>>, vector<288x128xf32>
    %109 = arith.truncf %108 : vector<288x128xf32> to vector<288x128xbf16>
    %110 = tpu.concatenate %107, %109 in 1 : vector<288x128xbf16>, vector<288x128xbf16> -> vector<288x256xbf16>
    %c1_73 = arith.constant 1 : index
    %c0_74 = arith.constant 0 : index
    %c0_75 = arith.constant 0 : index
    %111 = vector.load %arg4[%c1_73, %c0_74, %c0_75] : memref<5x256x128xbf16, #tpu.memory_space<vmem>>, vector<1x256x128xbf16>
    %112 = vector.shape_cast %111 : vector<1x256x128xbf16> to vector<256x128xbf16>
    %cst_76 = arith.constant dense<0.000000e+00> : vector<288x128xf32>
    %113 = tpu.matmul %110, %112, %cst_76 {dimension_numbers = #tpu.dot_dimension_numbers<[1], [0], [0], [1], [0, 0, 1, 1], [], []>} : vector<288x256xbf16>, vector<256x128xbf16>, vector<288x128xf32> -> vector<288x128xf32>
    %114 = arith.addf %105, %113 : vector<288x128xf32>
    %c19_77 = arith.constant 19 : index
    %c0_78 = arith.constant 0 : index
    %115 = vector.load %arg14[%c19_77, %c0_78] : memref<328x128xf32, #tpu.memory_space<vmem>>, vector<288x128xf32>
    %116 = arith.truncf %115 : vector<288x128xf32> to vector<288x128xbf16>
    %c20_79 = arith.constant 20 : index
    %c0_80 = arith.constant 0 : index
    %117 = vector.load %arg14[%c20_79, %c0_80] : memref<328x128xf32, #tpu.memory_space<vmem>>, vector<288x128xf32>
    %118 = arith.truncf %117 : vector<288x128xf32> to vector<288x128xbf16>
    %119 = tpu.concatenate %116, %118 in 1 : vector<288x128xbf16>, vector<288x128xbf16> -> vector<288x256xbf16>
    %c2_81 = arith.constant 2 : index
    %c0_82 = arith.constant 0 : index
    %c0_83 = arith.constant 0 : index
    %120 = vector.load %arg4[%c2_81, %c0_82, %c0_83] : memref<5x256x128xbf16, #tpu.memory_space<vmem>>, vector<1x256x128xbf16>
    %121 = vector.shape_cast %120 : vector<1x256x128xbf16> to vector<256x128xbf16>
    %cst_84 = arith.constant dense<0.000000e+00> : vector<288x128xf32>
    %122 = tpu.matmul %119, %121, %cst_84 {dimension_numbers = #tpu.dot_dimension_numbers<[1], [0], [0], [1], [0, 0, 1, 1], [], []>} : vector<288x256xbf16>, vector<256x128xbf16>, vector<288x128xf32> -> vector<288x128xf32>
    %123 = arith.addf %114, %122 : vector<288x128xf32>
    %c36_85 = arith.constant 36 : index
    %c0_86 = arith.constant 0 : index
    %124 = vector.load %arg14[%c36_85, %c0_86] : memref<328x128xf32, #tpu.memory_space<vmem>>, vector<288x128xf32>
    %125 = arith.truncf %124 : vector<288x128xf32> to vector<288x128xbf16>
    %c37_87 = arith.constant 37 : index
    %c0_88 = arith.constant 0 : index
    %126 = vector.load %arg14[%c37_87, %c0_88] : memref<328x128xf32, #tpu.memory_space<vmem>>, vector<288x128xf32>
    %127 = arith.truncf %126 : vector<288x128xf32> to vector<288x128xbf16>
    %128 = tpu.concatenate %125, %127 in 1 : vector<288x128xbf16>, vector<288x128xbf16> -> vector<288x256xbf16>
    %c3_89 = arith.constant 3 : index
    %c0_90 = arith.constant 0 : index
    %c0_91 = arith.constant 0 : index
    %129 = vector.load %arg4[%c3_89, %c0_90, %c0_91] : memref<5x256x128xbf16, #tpu.memory_space<vmem>>, vector<1x256x128xbf16>
    %130 = vector.shape_cast %129 : vector<1x256x128xbf16> to vector<256x128xbf16>
    %cst_92 = arith.constant dense<0.000000e+00> : vector<288x128xf32>
    %131 = tpu.matmul %128, %130, %cst_92 {dimension_numbers = #tpu.dot_dimension_numbers<[1], [0], [0], [1], [0, 0, 1, 1], [], []>} : vector<288x256xbf16>, vector<256x128xbf16>, vector<288x128xf32> -> vector<288x128xf32>
    %132 = arith.addf %123, %131 : vector<288x128xf32>
    %c38_93 = arith.constant 38 : index
    %c0_94 = arith.constant 0 : index
    %133 = vector.load %arg14[%c38_93, %c0_94] : memref<328x128xf32, #tpu.memory_space<vmem>>, vector<288x128xf32>
    %134 = arith.truncf %133 : vector<288x128xf32> to vector<288x128xbf16>
    %c38_95 = arith.constant 38 : index
    %c0_96 = arith.constant 0 : index
    %135 = vector.load %arg14[%c38_95, %c0_96] : memref<328x128xf32, #tpu.memory_space<vmem>>, vector<288x128xf32>
    %136 = arith.truncf %135 : vector<288x128xf32> to vector<288x128xbf16>
    %137 = tpu.concatenate %134, %136 in 1 : vector<288x128xbf16>, vector<288x128xbf16> -> vector<288x256xbf16>
    %c4_97 = arith.constant 4 : index
    %c0_98 = arith.constant 0 : index
    %c0_99 = arith.constant 0 : index
    %138 = vector.load %arg4[%c4_97, %c0_98, %c0_99] : memref<5x256x128xbf16, #tpu.memory_space<vmem>>, vector<1x256x128xbf16>
    %139 = vector.shape_cast %138 : vector<1x256x128xbf16> to vector<256x128xbf16>
    %cst_100 = arith.constant dense<0.000000e+00> : vector<288x128xf32>
    %140 = tpu.matmul %137, %139, %cst_100 {dimension_numbers = #tpu.dot_dimension_numbers<[1], [0], [0], [1], [0, 0, 1, 1], [], []>} : vector<288x256xbf16>, vector<256x128xbf16>, vector<288x128xf32> -> vector<288x128xf32>
    %141 = arith.addf %132, %140 : vector<288x128xf32>
    %c0_101 = arith.constant 0 : index
    %c0_102 = arith.constant 0 : index
    %142 = vector.load %arg5[%c0_101, %c0_102] : memref<1x128xf32, #tpu.memory_space<vmem>>, vector<1x128xf32>
    %143 = vector.broadcast %142 : vector<1x128xf32> to vector<288x128xf32>
    %144 = arith.addf %141, %143 : vector<288x128xf32>
    %cst_103 = arith.constant 0.000000e+00 : f32
    %145 = vector.broadcast %cst_103 : f32 to vector<288x128xf32>
    %146 = arith.maximumf %144, %145 : vector<288x128xf32>
    %147 = arith.truncf %146 : vector<288x128xf32> to vector<288x128xbf16>
    %c0_104 = arith.constant 0 : index
    %c0_105 = arith.constant 0 : index
    %148 = vector.load %arg6[%c0_104, %c0_105] : memref<128x128xbf16, #tpu.memory_space<vmem>>, vector<128x128xbf16>
    %cst_106 = arith.constant dense<0.000000e+00> : vector<288x128xf32>
    %149 = tpu.matmul %147, %148, %cst_106 {dimension_numbers = #tpu.dot_dimension_numbers<[1], [0], [0], [1], [0, 0, 1, 1], [], []>} : vector<288x128xbf16>, vector<128x128xbf16>, vector<288x128xf32> -> vector<288x128xf32>
    %c0_107 = arith.constant 0 : index
    %c0_108 = arith.constant 0 : index
    %150 = vector.load %arg7[%c0_107, %c0_108] : memref<1x128xf32, #tpu.memory_space<vmem>>, vector<1x128xf32>
    %151 = vector.broadcast %150 : vector<1x128xf32> to vector<288x128xf32>
    %152 = arith.addf %149, %151 : vector<288x128xf32>
    %c0_109 = arith.constant 0 : index
    %c0_110 = arith.constant 0 : index
    %c0_111 = arith.constant 0 : index
    %153 = vector.load %arg12[%c0_109, %c0_110, %c0_111] : memref<1x288x128xf32, #tpu.memory_space<vmem>>, vector<1x288x128xf32>
    %154 = vector.shape_cast %153 : vector<1x288x128xf32> to vector<288x128xf32>
    %155 = vector.shape_cast %152 : vector<288x128xf32> to vector<1x288x128xf32>
    tpu.vector_store %arg12[%c0_109, %c0_110, %c0_111], %155 {strides = array<i32>} : memref<1x288x128xf32, #tpu.memory_space<vmem>>, vector<1x288x128xf32>,
    %156 = arith.truncf %152 : vector<288x128xf32> to vector<288x128xbf16>
    %c0_112 = arith.constant 0 : index
    %c0_113 = arith.constant 0 : index
    %157 = vector.load %arg9[%c0_112, %c0_113] : memref<512x1xf32, #tpu.memory_space<vmem>>, vector<512x1xf32>
    %c0_114 = arith.constant 0 : index
    %c0_115 = arith.constant 0 : index
    %c0_116 = arith.constant 0 : index
    %158 = vector.load %arg8[%c0_114, %c0_115, %c0_116] : memref<3x512x288xbf16, #tpu.memory_space<vmem>>, vector<1x512x288xbf16>
    %159 = vector.shape_cast %158 : vector<1x512x288xbf16> to vector<512x288xbf16>
    %cst_117 = arith.constant dense<0.000000e+00> : vector<512x128xf32>
    %160 = tpu.matmul %159, %156, %cst_117 {dimension_numbers = #tpu.dot_dimension_numbers<[1], [0], [0], [1], [0, 0, 1, 1], [], []>} : vector<512x288xbf16>, vector<288x128xbf16>, vector<512x128xf32> -> vector<512x128xf32>
    %161 = vector.extract_strided_slice %160 {offsets = [0, 0], sizes = [512, 1], strides = [1, 1]} : vector<512x128xf32> to vector<512x1xf32>
    %162 = arith.addf %157, %161 : vector<512x1xf32>
    %c1_118 = arith.constant 1 : index
    %c0_119 = arith.constant 0 : index
    %c0_120 = arith.constant 0 : index
    %163 = vector.load %arg8[%c1_118, %c0_119, %c0_120] : memref<3x512x288xbf16, #tpu.memory_space<vmem>>, vector<1x512x288xbf16>
    %164 = vector.shape_cast %163 : vector<1x512x288xbf16> to vector<512x288xbf16>
    %cst_121 = arith.constant dense<0.000000e+00> : vector<512x128xf32>
    %165 = tpu.matmul %164, %156, %cst_121 {dimension_numbers = #tpu.dot_dimension_numbers<[1], [0], [0], [1], [0, 0, 1, 1], [], []>} : vector<512x288xbf16>, vector<288x128xbf16>, vector<512x128xf32> -> vector<512x128xf32>
    %166 = vector.extract_strided_slice %165 {offsets = [0, 1], sizes = [512, 1], strides = [1, 1]} : vector<512x128xf32> to vector<512x1xf32>
    %167 = arith.addf %162, %166 : vector<512x1xf32>
    %c2_122 = arith.constant 2 : index
    %c0_123 = arith.constant 0 : index
    %c0_124 = arith.constant 0 : index
    %168 = vector.load %arg8[%c2_122, %c0_123, %c0_124] : memref<3x512x288xbf16, #tpu.memory_space<vmem>>, vector<1x512x288xbf16>
    %169 = vector.shape_cast %168 : vector<1x512x288xbf16> to vector<512x288xbf16>
    %cst_125 = arith.constant dense<0.000000e+00> : vector<512x128xf32>
    %170 = tpu.matmul %169, %156, %cst_125 {dimension_numbers = #tpu.dot_dimension_numbers<[1], [0], [0], [1], [0, 0, 1, 1], [], []>} : vector<512x288xbf16>, vector<288x128xbf16>, vector<512x128xf32> -> vector<512x128xf32>
    %171 = vector.extract_strided_slice %170 {offsets = [0, 2], sizes = [512, 1], strides = [1, 1]} : vector<512x128xf32> to vector<512x1xf32>
    %172 = arith.addf %167, %171 : vector<512x1xf32>
    %cst_126 = arith.constant 0.000000e+00 : f32
    %173 = vector.broadcast %cst_126 : f32 to vector<512x1xf32>
    %174 = arith.cmpf ogt, %172, %173 : vector<512x1xf32>
    %cst_127 = arith.constant 0.00999999977 : f32
    %175 = vector.broadcast %cst_127 : f32 to vector<512x1xf32>
    %176 = arith.mulf %175, %172 : vector<512x1xf32>
    %177 = arith.select %174, %172, %176 : vector<512x1xi1>, vector<512x1xf32>
    %c0_128 = arith.constant 0 : index
    %c0_129 = arith.constant 0 : index
    %178 = vector.load %arg10[%c0_128, %c0_129] : memref<128x512xbf16, #tpu.memory_space<vmem>>, vector<128x512xbf16>
    %179 = arith.truncf %177 : vector<512x1xf32> to vector<512x1xbf16>
    %cst_130 = arith.constant dense<0.000000e+00> : vector<128x1xf32>
    %180 = tpu.matmul %178, %179, %cst_130 {dimension_numbers = #tpu.dot_dimension_numbers<[1], [0], [0], [1], [0, 0, 1, 1], [], []>} : vector<128x512xbf16>, vector<512x1xbf16>, vector<128x1xf32> -> vector<128x1xf32>
    %c0_131 = arith.constant 0 : index
    %c0_132 = arith.constant 0 : index
    %181 = vector.load %arg11[%c0_131, %c0_132] : memref<128x1xf32, #tpu.memory_space<vmem>>, vector<128x1xf32>
    %182 = arith.addf %180, %181 : vector<128x1xf32>
    %c0_133 = arith.constant 0 : index
    %c0_134 = arith.constant 0 : index
    %c0_135 = arith.constant 0 : index
    %183 = vector.load %arg13[%c0_133, %c0_134, %c0_135] : memref<1x128x1xf32, #tpu.memory_space<vmem>>, vector<1x128x1xf32>
    %184 = vector.shape_cast %183 : vector<1x128x1xf32> to vector<128x1xf32>
    %185 = vector.shape_cast %182 : vector<128x1xf32> to vector<1x128x1xf32>
    tpu.vector_store %arg13[%c0_133, %c0_134, %c0_135], %185 {strides = array<i32>} : memref<1x128x1xf32, #tpu.memory_space<vmem>>, vector<1x128x1xf32>,
    return
  }
  func.func @transform_0(%arg0: i32) -> (i32, i32, i32) {
    %c0_i32 = arith.constant 0 : i32
    %c0_i32_0 = arith.constant 0 : i32
    %c0_i32_1 = arith.constant 0 : i32
    return %arg0, %c0_i32, %c0_i32_0 : i32, i32, i32
  }
  func.func @transform_1(%arg0: i32) -> (i32, i32, i32) {
    %c0_i32 = arith.constant 0 : i32
    %c0_i32_0 = arith.constant 0 : i32
    %c0_i32_1 = arith.constant 0 : i32
    %c0_i32_2 = arith.constant 0 : i32
    return %c0_i32, %c0_i32_0, %c0_i32_1 : i32, i32, i32
  }
  func.func @transform_2(%arg0: i32) -> (i32, i32) {
    %c0_i32 = arith.constant 0 : i32
    %c0_i32_0 = arith.constant 0 : i32
    %c0_i32_1 = arith.constant 0 : i32
    return %c0_i32, %c0_i32_0 : i32, i32
  }
  func.func @transform_3(%arg0: i32) -> (i32, i32, i32) {
    %c0_i32 = arith.constant 0 : i32
    %c0_i32_0 = arith.constant 0 : i32
    %c0_i32_1 = arith.constant 0 : i32
    %c0_i32_2 = arith.constant 0 : i32
    return %c0_i32, %c0_i32_0, %c0_i32_1 : i32, i32, i32
  }
  func.func @transform_4(%arg0: i32) -> (i32, i32) {
    %c0_i32 = arith.constant 0 : i32
    %c0_i32_0 = arith.constant 0 : i32
    %c0_i32_1 = arith.constant 0 : i32
    return %c0_i32, %c0_i32_0 : i32, i32
  }
  func.func @transform_5(%arg0: i32) -> (i32, i32) {
    %c0_i32 = arith.constant 0 : i32
    %c0_i32_0 = arith.constant 0 : i32
    %c0_i32_1 = arith.constant 0 : i32
    return %c0_i32, %c0_i32_0 : i32, i32
  }
  func.func @transform_6(%arg0: i32) -> (i32, i32) {
    %c0_i32 = arith.constant 0 : i32
    %c0_i32_0 = arith.constant 0 : i32
    %c0_i32_1 = arith.constant 0 : i32
    return %c0_i32, %c0_i32_0 : i32, i32
  }
  func.func @transform_7(%arg0: i32) -> (i32, i32, i32) {
    %c0_i32 = arith.constant 0 : i32
    %c0_i32_0 = arith.constant 0 : i32
    %c0_i32_1 = arith.constant 0 : i32
    %c0_i32_2 = arith.constant 0 : i32
    return %c0_i32, %c0_i32_0, %c0_i32_1 : i32, i32, i32
  }
  func.func @transform_8(%arg0: i32) -> (i32, i32) {
    %c0_i32 = arith.constant 0 : i32
    %c0_i32_0 = arith.constant 0 : i32
    %c0_i32_1 = arith.constant 0 : i32
    return %c0_i32, %c0_i32_0 : i32, i32
  }
  func.func @transform_9(%arg0: i32) -> (i32, i32) {
    %c0_i32 = arith.constant 0 : i32
    %c0_i32_0 = arith.constant 0 : i32
    %c0_i32_1 = arith.constant 0 : i32
    return %c0_i32, %c0_i32_0 : i32, i32
  }
  func.func @transform_10(%arg0: i32) -> (i32, i32) {
    %c0_i32 = arith.constant 0 : i32
    %c0_i32_0 = arith.constant 0 : i32
    %c0_i32_1 = arith.constant 0 : i32
    return %c0_i32, %c0_i32_0 : i32, i32
  }
  func.func @transform_11(%arg0: i32) -> (i32, i32, i32) {
    %c0_i32 = arith.constant 0 : i32
    %c0_i32_0 = arith.constant 0 : i32
    %c0_i32_1 = arith.constant 0 : i32
    return %arg0, %c0_i32, %c0_i32_0 : i32, i32, i32
  }
  func.func @transform_12(%arg0: i32) -> (i32, i32, i32) {
    %c0_i32 = arith.constant 0 : i32
    %c0_i32_0 = arith.constant 0 : i32
    %c0_i32_1 = arith.constant 0 : i32
    return %arg0, %c0_i32, %c0_i32_0 : i32, i32, i32
  }
}

</mosaic_0001>

<bundles_post_ra>
// kernel: b6_seg_cls_forward.1
= control target key start
LH: loop header
LB: loop body
LE: loop exit
PB: predicated region body
PF: predicated region fallthrough
CT: control target
= control target key end

     0   :  { %s15155_s21 = smov 0   ;;  %s20504_s0 = inlined_call_operand.vmem [shape: f32[2,328,8], index: 0, kind: input, shape index: {}]   ;;  %s20505_s1 = inlined_call_operand.vmem [shape: bf16[9,8,128], index: 1, kind: input, shape index: {}]   ;;  %s20506_s2 = inlined_call_operand.vmem [shape: f32[1,128], index: 2, kind: input, shape index: {}]   ;;  %s20507_s3 = inlined_call_operand.vmem [shape: bf16[5,256,128], index: 3, kind: input, shape index: {}]   ;;  %s20508_s4 = inlined_call_operand.vmem [shape: f32[1,128], index: 4, kind: input, shape index: {}]   ;;  %s20509_s5 = inlined_call_operand.vmem [shape: bf16[128,128], index: 5, kind: input, shape index: {}]   ;;  %s20510_s6 = inlined_call_operand.vmem [shape: f32[1,128], index: 6, kind: input, shape index: {}]   ;;  %s20511_s7 = inlined_call_operand.vmem [shape: bf16[3,512,288], index: 7, kind: input, shape index: {}]   ;;  %s20512_s8 = inlined_call_operand.vmem [shape: f32[512,1], index: 8, kind: input, shape index: {}]   ;;  %s20513_s9 = inlined_call_operand.vmem [shape: bf16[128,512], index: 9, kind: input, shape index: {}]   ;;  %s20514_s10 = inlined_call_operand.vmem [shape: f32[128,1], index: 10, kind: input, shape index: {}]   ;;  %s20515_s11 = inlined_call_operand.vmem [shape: f32[2,288,128], index: 11, kind: output, shape index: {0}]   ;;  %s20516_s12 = inlined_call_operand.vmem [shape: f32[2,128,1], index: 12, kind: output, shape index: {1}]  }
   0x1 LB: > { %s12060_s22 = sadd.s32 4294967295, %s15084_s21   ;;  %p12064_p0 = scmp.ge.s32.totalorder %s15084_s21, 1  ;;  %s15084_s21 = sphi %s15155_s21, %s23_s21  }
   0x2   : > { %p365_p1 = scmp.lt.s32.totalorder %s15084_s21, 3 }
   0x4   : > { %p366_p2 = pnand %p12064_p0, %p365_p1 }
   0x6   : > { %369 = sbr.rel (%p366_p2) target bundleno = 3231 (0xc9f), region = 64 }
   0xd   : > { %v12069_v0 = vld [vmem:[%s20505_s1 + $0x4] sm:$0xf]  ;;  %vm594_vm0 = vcmask 1043456   ;;  %p412_p3 = scmp.lt.s32.totalorder %s12060_s22, 1  ;;  %v482_v2 = vld [vmem:[%s20505_s1] sm:$0xf] }
   0xe   : > { %14462 = vmatprep.subr.msk.bf16.mxu0 %vm594_vm0, %v12069_v0  ;;  %v596_v1 = vsel %vm594_vm0, %v12069_v0, 0  ;;  %vm539_vm1 = vcmask 64512   ;;  %v830_v12 = vsel %vm594_vm0, %v482_v2, 0  ;;  %v15191_v13 = vld [vmem:[%s20505_s1 + $0x8] sm:$0xf] }
   0xf   : > { %13561 = vmatpush3.bf16.msra.mxu0 %v596_v1  ;;  %s20941_s22 = smov (!%p412_p3, %s12060_s22), 1 }
  0x10   : > { %14463 = vmatprep.subr.msk.bf16.mxu0 %vm594_vm0, %v482_v2  ;;  %s14471_s27 = smul.u32 328, %s20941_s22  ;;  %v1120_v2 = vsel %vm594_vm0, %v15191_v13, 0  ;;  %s13132_s28 = sshll.u32 %s20941_s22, 7 }
  0x11   : > { %s14472_s17 = smul.u32 288, %s20941_s22  ;;  %s20417_s14 = scalar_lea.vmem %s20516_s12, %s13132_s28 }
  0x12   : > { %s15178_s30 = scalar_lea.vmem %s20504_s0, %s14471_s27 }
  0x13   : > { %v483_v3 = vld [vmem:[%s15178_s30 + $0x1] sm:$0xff]  ;;  %v484_v4 = vld [vmem:[%s15178_s30 + $0x9] sm:$0xff]  ;;  %v485_v5 = vld [vmem:[%s15178_s30 + $0x11] sm:$0xff]  ;;  %s17922_s26 = scalar_lea.vmem %s20515_s11, %s14472_s17  ;;  %s15088_s17 = smov 127  }
  0x14   : > { %v519_v6 = vpack.c.bf16 %v484_v4, %v483_v3  ;;  %v486_v7 = vld [vmem:[%s15178_s30 + $0x19] sm:$0xff]  ;;  %v487_v8 = vld [vmem:[%s15178_s30 + $0x21] sm:$0xff]  ;;  %v488_v9 = vld [vmem:[%s15178_s30 + $0x29] sm:$0xff] }
  0x15   : > { %v520_v10 = vpack.c.bf16 %v486_v7, %v485_v5  ;;  %v521_v11 = vpack.c.bf16 %v488_v9, %v487_v8  ;;  %v489_v14 = vld [vmem:[%s15178_s30 + $0x31] sm:$0xff]  ;;  %v490_v15 = vld [vmem:[%s15178_s30 + $0x39] sm:$0xff]  ;;  %v491_v16 = vld [vmem:[%s15178_s30 + $0x41] sm:$0xff] }
  0x16   : > { %13562 = vmatprep.mubr.msk.bf16.mxu0 %vm539_vm1, %v519_v6  ;;  %v492_v17 = vld [vmem:[%s15178_s30 + $0x49] sm:$0xff]  ;;  %v522_v18 = vpack.c.bf16 %v490_v15, %v489_v14  ;;  %v493_v20 = vld [vmem:[%s15178_s30 + $0x51] sm:$0xff]  ;;  %v494_v21 = vld [vmem:[%s15178_s30 + $0x59] sm:$0xff] }
  0x17   : > { %13563 = vmatmul.mubr.msk.bf16.vlgmr.msra.gmra.mrb[0].mxu0 %vm539_vm1, %v520_v10  ;;  %v523_v19 = vpack.c.bf16 %v492_v17, %v491_v16  ;;  %v495_v22 = vld [vmem:[%s15178_s30 + $0x61] sm:$0xff]  ;;  %v496_v23 = vld [vmem:[%s15178_s30 + $0x69] sm:$0xff]  ;;  %v524_v24 = vpack.c.bf16 %v494_v21, %v493_v20  ;;  %v497_v26 = vld [vmem:[%s15178_s30 + $0x71] sm:$0xff] }
  0x18   : > { %13566 = vmatprep.mubr.msk.bf16.mxu0 %vm539_vm1, %v521_v11  ;;  %13599 = vmatpush3.bf16.msra.mxu0 %v830_v12  ;;  %v525_v25 = vpack.c.bf16 %v496_v23, %v495_v22  ;;  %v498_v27 = vld [vmem:[%s15178_s30 + $0x79] sm:$0xff]  ;;  %v499_v28 = vld [vmem:[%s15178_s30 + $0x81] sm:$0xff]  ;;  %v500_v29 = vld [vmem:[%s15178_s30 + $0x89] sm:$0xff] }
  0x19   : > { %14464 = vmatprep.subr.msk.bf16.mxu0 %vm594_vm0, %v15191_v13  ;;  %v526_v30 = vpack.c.bf16 %v498_v27, %v497_v26  ;;  %v527_v31 = vpack.c.bf16 %v500_v29, %v499_v28  ;;  %v501_v32 = vld [vmem:[%s15178_s30 + $0x91] sm:$0xff]  ;;  %v502_v33 = vld [vmem:[%s15178_s30 + $0x99] sm:$0xff]  ;;  %v503_v34 = vld [vmem:[%s15178_s30 + $0xa1] sm:$0xff] }
  0x1a   : > { %v504_v35 = vld [vmem:[%s15178_s30 + $0xa9] sm:$0xff]  ;;  %v528_v36 = vpack.c.bf16 %v502_v33, %v501_v32  ;;  %v505_v38 = vld [vmem:[%s15178_s30 + $0xb1] sm:$0xff]  ;;  %v506_v39 = vld [vmem:[%s15178_s30 + $0xb9] sm:$0xff] }
  0x1b   : > { %v529_v37 = vpack.c.bf16 %v504_v35, %v503_v34  ;;  %v507_v40 = vld [vmem:[%s15178_s30 + $0xc1] sm:$0xff]  ;;  %v508_v41 = vld [vmem:[%s15178_s30 + $0xc9] sm:$0xff]  ;;  %v530_v42 = vpack.c.bf16 %v506_v39, %v505_v38  ;;  %v509_v44 = vld [vmem:[%s15178_s30 + $0xd1] sm:$0xff] }
  0x1c   : > { %v531_v43 = vpack.c.bf16 %v508_v41, %v507_v40  ;;  %v510_v45 = vld [vmem:[%s15178_s30 + $0xd9] sm:$0xff]  ;;  %v511_v46 = vld [vmem:[%s15178_s30 + $0xe1] sm:$0xff]  ;;  %v512_v47 = vld [vmem:[%s15178_s30 + $0xe9] sm:$0xff] }
  0x1d   : > { %v532_v48 = vpack.c.bf16 %v510_v45, %v509_v44  ;;  %v533_v49 = vpack.c.bf16 %v512_v47, %v511_v46  ;;  %v513_v50 = vld [vmem:[%s15178_s30 + $0xf1] sm:$0xff]  ;;  %v514_v51 = vld [vmem:[%s15178_s30 + $0xf9] sm:$0xff]  ;;  %v515_v52 = vld [vmem:[%s15178_s30 + $0x101] sm:$0xff] }
  0x1e   : > { %v516_v53 = vld [vmem:[%s15178_s30 + $0x109] sm:$0xff]  ;;  %v534_v54 = vpack.c.bf16 %v514_v51, %v513_v50  ;;  %v517_v56 = vld [vmem:[%s15178_s30 + $0x111] sm:$0xff]  ;;  %v518_v57 = vld [vmem:[%s15178_s30 + $0x119] sm:$0xff] }
  0x1f   : > { %13567 = vmatmul.mubr.msk.bf16.gmra.mrb[4].mxu0 %vm539_vm1, %v522_v18  ;;  %v535_v55 = vpack.c.bf16 %v516_v53, %v515_v52  ;;  %v428_v58 = vld [vmem:[%s15178_s30] sm:$0xff]  ;;  %v429_v59 = vld [vmem:[%s15178_s30 + $0x8] sm:$0xff]  ;;  %v536_v60 = vpack.c.bf16 %v518_v57, %v517_v56  ;;  %v430_v62 = vld [vmem:[%s15178_s30 + $0x10] sm:$0xff] }
  0x20   : > { %13570 = vmatprep.mubr.msk.bf16.mxu0 %vm539_vm1, %v523_v19  ;;  %v464_v61 = vpack.c.bf16 %v429_v59, %v428_v58  ;;  %v431_v63 = vld [vmem:[%s15178_s30 + $0x18] sm:$0xff]  ;;  %v432_v0 = vld [vmem:[%s15178_s30 + $0x20] sm:$0xff]  ;;  %v433_v1 = vld [vmem:[%s15178_s30 + $0x28] sm:$0xff] }
  0x21   : > { %v465_v3 = vpack.c.bf16 %v431_v63, %v430_v62  ;;  %v466_v4 = vpack.c.bf16 %v433_v1, %v432_v0  ;;  %v15254_v5 = vld [vmem:[%s20505_s1 + $0xc] sm:$0xf]  ;;  %v434_v6 = vld [vmem:[%s15178_s30 + $0x30] sm:$0xff]  ;;  %v435_v7 = vld [vmem:[%s15178_s30 + $0x38] sm:$0xff] }
  0x22   : > { %v436_v8 = vld [vmem:[%s15178_s30 + $0x40] sm:$0xff]  ;;  %v437_v9 = vld [vmem:[%s15178_s30 + $0x48] sm:$0xff]  ;;  %v467_v10 = vpack.c.bf16 %v435_v7, %v434_v6  ;;  %v438_v12 = vld [vmem:[%s15178_s30 + $0x50] sm:$0xff] }
  0x23   : > { %v468_v11 = vpack.c.bf16 %v437_v9, %v436_v8  ;;  %v439_v13 = vld [vmem:[%s15178_s30 + $0x58] sm:$0xff]  ;;  %v440_v14 = vld [vmem:[%s15178_s30 + $0x60] sm:$0xff]  ;;  %v441_v15 = vld [vmem:[%s15178_s30 + $0x68] sm:$0xff] }
  0x24   : > { %v469_v16 = vpack.c.bf16 %v439_v13, %v438_v12  ;;  %v470_v17 = vpack.c.bf16 %v441_v15, %v440_v14  ;;  %v442_v18 = vld [vmem:[%s15178_s30 + $0x70] sm:$0xff]  ;;  %v443_v19 = vld [vmem:[%s15178_s30 + $0x78] sm:$0xff]  ;;  %v444_v20 = vld [vmem:[%s15178_s30 + $0x80] sm:$0xff] }
  0x25   : > { %v445_v21 = vld [vmem:[%s15178_s30 + $0x88] sm:$0xff]  ;;  %v471_v22 = vpack.c.bf16 %v443_v19, %v442_v18  ;;  %v448_v26 = vld [vmem:[%s15178_s30 + $0xa0] sm:$0xff]  ;;  %v1015_v62 = vld [vmem:[%s15178_s30 + $0x32] sm:$0xff] }
  0x26   : > { %v472_v23 = vpack.c.bf16 %v445_v21, %v444_v20  ;;  %v449_v27 = vld [vmem:[%s15178_s30 + $0xa8] sm:$0xff]  ;;  %v452_v32 = vld [vmem:[%s15178_s30 + $0xc0] sm:$0xff] }
  0x27   : > { %13571 = vmatmul.mubr.msk.bf16.gmra.mrb[8].mxu0 %vm539_vm1, %v524_v24  ;;  %v446_v24 = vld [vmem:[%s15178_s30 + $0x90] sm:$0xff]  ;;  %v474_v29 = vpack.c.bf16 %v449_v27, %v448_v26  ;;  %v453_v33 = vld [vmem:[%s15178_s30 + $0xc8] sm:$0xff]  ;;  %v456_v38 = vld [vmem:[%s15178_s30 + $0xe0] sm:$0xff] }
  0x28   : > { %13574 = vmatprep.mubr.msk.bf16.mxu0 %vm539_vm1, %v525_v25  ;;  %v447_v25 = vld [vmem:[%s15178_s30 + $0x98] sm:$0xff]  ;;  %v476_v35 = vpack.c.bf16 %v453_v33, %v452_v32  ;;  %v457_v39 = vld [vmem:[%s15178_s30 + $0xe8] sm:$0xff]  ;;  %v460_v44 = vld [vmem:[%s15178_s30 + $0x100] sm:$0xff] }
  0x29   : > { %v473_v28 = vpack.c.bf16 %v447_v25, %v446_v24  ;;  %v478_v41 = vpack.c.bf16 %v457_v39, %v456_v38  ;;  %v461_v45 = vld [vmem:[%s15178_s30 + $0x108] sm:$0xff]  ;;  %v1016_v63 = vld [vmem:[%s15178_s30 + $0x3a] sm:$0xff] }
  0x2a   : > { %v480_v47 = vpack.c.bf16 %v461_v45, %v460_v44  ;;  %v1009_v50 = vld [vmem:[%s15178_s30 + $0x2] sm:$0xff]  ;;  %v1010_v51 = vld [vmem:[%s15178_s30 + $0xa] sm:$0xff] }
  0x2b   : > { %v1045_v53 = vpack.c.bf16 %v1010_v51, %v1009_v50  ;;  %v1013_v56 = vld [vmem:[%s15178_s30 + $0x22] sm:$0xff]  ;;  %v1014_v57 = vld [vmem:[%s15178_s30 + $0x2a] sm:$0xff] }
  0x2c   : > { %v15314_v59 = vpack.c.bf16 %v1014_v57, %v1013_v56  ;;  %v1017_v0 = vld [vmem:[%s15178_s30 + $0x42] sm:$0xff]  ;;  %v1018_v1 = vld [vmem:[%s15178_s30 + $0x4a] sm:$0xff] }
  0x2d   : > { %v1021_v6 = vld [vmem:[%s15178_s30 + $0x62] sm:$0xff]  ;;  %v1022_v7 = vld [vmem:[%s15178_s30 + $0x6a] sm:$0xff] }
  0x2e   : > { %v1051_v9 = vpack.c.bf16 %v1022_v7, %v1021_v6  ;;  %v1025_v12 = vld [vmem:[%s15178_s30 + $0x82] sm:$0xff]  ;;  %v1026_v13 = vld [vmem:[%s15178_s30 + $0x8a] sm:$0xff] }
  0x2f   : > { %13575 = vmatmul.mubr.msk.bf16.gmra.mrb[12].mxu0 %vm539_vm1, %v526_v30  ;;  %v450_v30 = vld [vmem:[%s15178_s30 + $0xb0] sm:$0xff]  ;;  %v1053_v15 = vpack.c.bf16 %v1026_v13, %v1025_v12  ;;  %v1029_v18 = vld [vmem:[%s15178_s30 + $0xa2] sm:$0xff] }
  0x30   : > { %13578 = vmatprep.mubr.msk.bf16.mxu0 %vm539_vm1, %v527_v31  ;;  %v451_v31 = vld [vmem:[%s15178_s30 + $0xb8] sm:$0xff]  ;;  %v1030_v19 = vld [vmem:[%s15178_s30 + $0xaa] sm:$0xff]  ;;  %v1033_v24 = vld [vmem:[%s15178_s30 + $0xc2] sm:$0xff] }
  0x31   : > { %v475_v34 = vpack.c.bf16 %v451_v31, %v450_v30  ;;  %v1055_v21 = vpack.c.bf16 %v1030_v19, %v1029_v18  ;;  %v1034_v25 = vld [vmem:[%s15178_s30 + $0xca] sm:$0xff]  ;;  %v1037_v30 = vld [vmem:[%s15178_s30 + $0xe2] sm:$0xff] }
  0x32   : > { %v1057_v27 = vpack.c.bf16 %v1034_v25, %v1033_v24  ;;  %v1038_v31 = vld [vmem:[%s15178_s30 + $0xea] sm:$0xff]  ;;  %v1369_v45 = vld [vmem:[%s15178_s30 + $0x122] sm:$0xff] }
  0x33   : > { %v1059_v33 = vpack.c.bf16 %v1038_v31, %v1037_v30  ;;  %v1663_v51 = vld [vmem:[%s15178_s30 + $0x23] sm:$0xff] }
  0x34   : > { %v1675_v7 = vld [vmem:[%s15178_s30 + $0x83] sm:$0xff] }
  0x35   : > { %v1679_v13 = vld [vmem:[%s15178_s30 + $0xa3] sm:$0xff] }
  0x36   : > { %v1683_v19 = vld [vmem:[%s15178_s30 + $0xc3] sm:$0xff] }
  0x37   : > { %13579 = vmatmul.mubr.msk.bf16.gmra.mrb[16].mxu0 %vm539_vm1, %v528_v36  ;;  %v454_v36 = vld [vmem:[%s15178_s30 + $0xd0] sm:$0xff]  ;;  %v1687_v25 = vld [vmem:[%s15178_s30 + $0xe3] sm:$0xff] }
  0x38   : > { %13582 = vmatprep.mubr.msk.bf16.mxu0 %vm539_vm1, %v529_v37  ;;  %v455_v37 = vld [vmem:[%s15178_s30 + $0xd8] sm:$0xff]  ;;  %v1691_v31 = vld [vmem:[%s15178_s30 + $0x103] sm:$0xff] }
  0x39   : > { %v477_v40 = vpack.c.bf16 %v455_v37, %v454_v36  ;;  %v1041_v36 = vld [vmem:[%s15178_s30 + $0x102] sm:$0xff]  ;;  %v1042_v37 = vld [vmem:[%s15178_s30 + $0x10a] sm:$0xff] }
  0x3a   : > { %v1061_v39 = vpack.c.bf16 %v1042_v37, %v1041_v36  ;;  %v1695_v37 = vld [vmem:[%s15178_s30 + $0x123] sm:$0xff] }
  0x3f   : > { %13583 = vmatmul.mubr.msk.bf16.gmra.mrb[20].mxu0 %vm539_vm1, %v530_v42  ;;  %v458_v42 = vld [vmem:[%s15178_s30 + $0xf0] sm:$0xff] }
  0x40   : > { %13586 = vmatprep.mubr.msk.bf16.mxu0 %vm539_vm1, %v531_v43  ;;  %v459_v43 = vld [vmem:[%s15178_s30 + $0xf8] sm:$0xff] }
  0x41   : > { %v479_v46 = vpack.c.bf16 %v459_v43, %v458_v42  ;;  %v12163_v43 = vld [vmem:[%s20505_s1 + $0x14] sm:$0xf] }
  0x42   : > { %v2098_v57 = vsel %vm594_vm0, %v12163_v43, 0 }
  0x47   : > { %13587 = vmatmul.mubr.msk.bf16.gmra.mrb[24].mxu0 %vm539_vm1, %v532_v48  ;;  %v462_v48 = vld [vmem:[%s15178_s30 + $0x110] sm:$0xff] }
  0x48   : > { %13590 = vmatprep.mubr.msk.bf16.mxu0 %vm539_vm1, %v533_v49  ;;  %v463_v49 = vld [vmem:[%s15178_s30 + $0x118] sm:$0xff] }
  0x49   : > { %v481_v52 = vpack.c.bf16 %v463_v49, %v462_v48  ;;  %v1662_v48 = vld [vmem:[%s15178_s30 + $0x1b] sm:$0xff] }
  0x4f   : > { %13591 = vmatmul.mubr.msk.bf16.gmra.mrb[28].mxu0 %vm539_vm1, %v534_v54  ;;  %v1011_v54 = vld [vmem:[%s15178_s30 + $0x12] sm:$0xff] }
  0x50   : > { %13594 = vmatprep.mubr.msk.bf16.mxu0 %vm539_vm1, %v535_v55  ;;  %v1012_v55 = vld [vmem:[%s15178_s30 + $0x1a] sm:$0xff] }
  0x51   : > { %v15312_v58 = vpack.c.bf16 %v1012_v55, %v1011_v54  ;;  %v1666_v54 = vld [vmem:[%s15178_s30 + $0x3b] sm:$0xff] }
  0x57   : > { %13595 = vmatmul.mubr.msk.bf16.gmra.mrb[32].mxu0 %vm539_vm1, %v536_v60  ;;  %v15319_v60 = vld [vmem:[%s20505_s1 + $0x10] sm:$0xf] }
  0x58   : > { %13600 = vmatprep.mubr.msk.bf16.mxu0 %vm539_vm1, %v464_v61  ;;  %v1446_v61 = vsel %vm594_vm0, %v15254_v5, 0  ;;  %v1772_v44 = vsel %vm594_vm0, %v15319_v60, 0 }
  0x5f   : > { %13601 = vmatmul.mubr.msk.bf16.vlgmr.msra.gmra.mrb[0].mxu0 %vm539_vm1, %v465_v3  ;;  %v1049_v3 = vpack.c.bf16 %v1018_v1, %v1017_v0  ;;  %v1671_v1 = vld [vmem:[%s15178_s30 + $0x63] sm:$0xff] }
  0x60   : > { %13604 = vmatprep.mubr.msk.bf16.mxu0 %vm539_vm1, %v466_v4  ;;  %13637 = vmatpush3.bf16.msra.mxu0 %v1120_v2  ;;  %v1048_v2 = vpack.c.bf16 %v1016_v63, %v1015_v62  ;;  %v1019_v4 = vld [vmem:[%s15178_s30 + $0x52] sm:$0xff]  ;;  %v1670_v62 = vld [vmem:[%s15178_s30 + $0x5b] sm:$0xff] }
  0x61   : > { %14465 = vmatprep.subr.msk.bf16.mxu0 %vm594_vm0, %v15254_v5  ;;  %v1020_v5 = vld [vmem:[%s15178_s30 + $0x5a] sm:$0xff] }
  0x62   : > { %v1050_v8 = vpack.c.bf16 %v1020_v5, %v1019_v4  ;;  %v1674_v4 = vld [vmem:[%s15178_s30 + $0x7b] sm:$0xff] }
  0x67   : > { %13605 = vmatmul.mubr.msk.bf16.gmra.mrb[4].mxu0 %vm539_vm1, %v467_v10  ;;  %v1023_v10 = vld [vmem:[%s15178_s30 + $0x72] sm:$0xff] }
  0x68   : > { %13608 = vmatprep.mubr.msk.bf16.mxu0 %vm539_vm1, %v468_v11  ;;  %v1024_v11 = vld [vmem:[%s15178_s30 + $0x7a] sm:$0xff] }
  0x69   : > { %v1052_v14 = vpack.c.bf16 %v1024_v11, %v1023_v10  ;;  %v1678_v10 = vld [vmem:[%s15178_s30 + $0x9b] sm:$0xff] }
  0x6f   : > { %13609 = vmatmul.mubr.msk.bf16.gmra.mrb[8].mxu0 %vm539_vm1, %v469_v16  ;;  %v1027_v16 = vld [vmem:[%s15178_s30 + $0x92] sm:$0xff] }
  0x70   : > { %13612 = vmatprep.mubr.msk.bf16.mxu0 %vm539_vm1, %v470_v17  ;;  %v1028_v17 = vld [vmem:[%s15178_s30 + $0x9a] sm:$0xff] }
  0x71   : > { %v1054_v20 = vpack.c.bf16 %v1028_v17, %v1027_v16  ;;  %v1682_v16 = vld [vmem:[%s15178_s30 + $0xbb] sm:$0xff] }
  0x77   : > { %13613 = vmatmul.mubr.msk.bf16.gmra.mrb[12].mxu0 %vm539_vm1, %v471_v22  ;;  %v1031_v22 = vld [vmem:[%s15178_s30 + $0xb2] sm:$0xff] }
  0x78   : > { %13616 = vmatprep.mubr.msk.bf16.mxu0 %vm539_vm1, %v472_v23  ;;  %v1032_v23 = vld [vmem:[%s15178_s30 + $0xba] sm:$0xff] }
  0x79   : > { %v1056_v26 = vpack.c.bf16 %v1032_v23, %v1031_v22  ;;  %v1686_v22 = vld [vmem:[%s15178_s30 + $0xdb] sm:$0xff] }
  0x7f   : > { %13617 = vmatmul.mubr.msk.bf16.gmra.mrb[16].mxu0 %vm539_vm1, %v473_v28  ;;  %v1035_v28 = vld [vmem:[%s15178_s30 + $0xd2] sm:$0xff] }
  0x80   : > { %13620 = vmatprep.mubr.msk.bf16.mxu0 %vm539_vm1, %v474_v29  ;;  %v1036_v29 = vld [vmem:[%s15178_s30 + $0xda] sm:$0xff] }
  0x81   : > { %v1058_v32 = vpack.c.bf16 %v1036_v29, %v1035_v28  ;;  %v1690_v28 = vld [vmem:[%s15178_s30 + $0xfb] sm:$0xff] }
  0x87   : > { %13621 = vmatmul.mubr.msk.bf16.gmra.mrb[20].mxu0 %vm539_vm1, %v475_v34  ;;  %v1039_v34 = vld [vmem:[%s15178_s30 + $0xf2] sm:$0xff] }
  0x88   : > { %13624 = vmatprep.mubr.msk.bf16.mxu0 %vm539_vm1, %v476_v35  ;;  %v1040_v35 = vld [vmem:[%s15178_s30 + $0xfa] sm:$0xff] }
  0x89   : > { %v1060_v38 = vpack.c.bf16 %v1040_v35, %v1039_v34  ;;  %v1694_v34 = vld [vmem:[%s15178_s30 + $0x11b] sm:$0xff] }
  0x8f   : > { %13625 = vmatmul.mubr.msk.bf16.gmra.mrb[24].mxu0 %vm539_vm1, %v477_v40  ;;  %v1043_v40 = vld [vmem:[%s15178_s30 + $0x112] sm:$0xff] }
  0x90   : > { %13628 = vmatprep.mubr.msk.bf16.mxu0 %vm539_vm1, %v478_v41  ;;  %v1044_v41 = vld [vmem:[%s15178_s30 + $0x11a] sm:$0xff] }
  0x91   : > { %v1062_v42 = vpack.c.bf16 %v1044_v41, %v1043_v40  ;;  %v1988_v40 = vld [vmem:[%s15178_s30 + $0x1c] sm:$0xff] }
  0x97   : > { %13629 = vmatmul.mubr.msk.bf16.gmra.mrb[28].mxu0 %vm539_vm1, %v479_v46  ;;  %v1370_v46 = vld [vmem:[%s15178_s30 + $0x12a] sm:$0xff] }
  0x98   : > { %13632 = vmatprep.mubr.msk.bf16.mxu0 %vm539_vm1, %v480_v47  ;;  %v1661_v47 = vld [vmem:[%s15178_s30 + $0x13] sm:$0xff]  ;;  %v1388_v49 = vpack.c.bf16 %v1370_v46, %v1369_v45  ;;  %v1992_v46 = vld [vmem:[%s15178_s30 + $0x3c] sm:$0xff] }
  0x99   : > { %v1697_v50 = vpack.c.bf16 %v1662_v48, %v1661_v47  ;;  %v1991_v45 = vld [vmem:[%s15178_s30 + $0x34] sm:$0xff] }
  0x9a   : > { %v15473_v48 = vpack.c.bf16 %v1992_v46, %v1991_v45 }
  0x9f   : > { %13633 = vmatmul.mubr.msk.bf16.gmra.mrb[32].mxu0 %vm539_vm1, %v481_v52  ;;  %v1664_v52 = vld [vmem:[%s15178_s30 + $0x2b] sm:$0xff] }
  0xa0   : > { %13638 = vmatprep.mubr.msk.bf16.mxu0 %vm539_vm1, %v1045_v53  ;;  %v1665_v53 = vld [vmem:[%s15178_s30 + $0x33] sm:$0xff]  ;;  %v1698_v55 = vpack.c.bf16 %v1664_v52, %v1663_v51  ;;  %v1993_v51 = vld [vmem:[%s15178_s30 + $0x44] sm:$0xff] }
  0xa1   : > { %v1699_v56 = vpack.c.bf16 %v1666_v54, %v1665_v53  ;;  %v1994_v52 = vld [vmem:[%s15178_s30 + $0x4c] sm:$0xff]  ;;  %v1995_v53 = vld [vmem:[%s15178_s30 + $0x54] sm:$0xff]  ;;  %v1996_v54 = vld [vmem:[%s15178_s30 + $0x5c] sm:$0xff] }
  0xa7   : > { %13639 = vmatmul.mubr.msk.bf16.vlgmr.msra.gmra.mrb[0].mxu0 %vm539_vm1, %v15312_v58 }
  0xa8   : > { %13642 = vmatprep.mubr.msk.bf16.mxu0 %vm539_vm1, %v15314_v59  ;;  %13675 = vmatpush3.bf16.msra.mxu0 %v1446_v61  ;;  %v1669_v61 = vld [vmem:[%s15178_s30 + $0x53] sm:$0xff] }
  0xa9   : > { %14466 = vmatprep.subr.msk.bf16.mxu0 %vm594_vm0, %v15319_v60  ;;  %v1668_v60 = vld [vmem:[%s15178_s30 + $0x4b] sm:$0xff]  ;;  %v1701_v0 = vpack.c.bf16 %v1670_v62, %v1669_v61 }
  0xaf   : > { %13643 = vmatmul.mubr.msk.bf16.gmra.mrb[4].mxu0 %vm539_vm1, %v1048_v2 }
  0xb0   : > { %13646 = vmatprep.mubr.msk.bf16.mxu0 %vm539_vm1, %v1049_v3 }
  0xb7   : > { %13647 = vmatmul.mubr.msk.bf16.gmra.mrb[8].mxu0 %vm539_vm1, %v1050_v8 }
  0xb8   : > { %13650 = vmatprep.mubr.msk.bf16.mxu0 %vm539_vm1, %v1051_v9 }
  0xbf   : > { %13651 = vmatmul.mubr.msk.bf16.gmra.mrb[12].mxu0 %vm539_vm1, %v1052_v14 }
  0xc0   : > { %13654 = vmatprep.mubr.msk.bf16.mxu0 %vm539_vm1, %v1053_v15 }
  0xc7   : > { %13655 = vmatmul.mubr.msk.bf16.gmra.mrb[16].mxu0 %vm539_vm1, %v1054_v20 }
  0xc8   : > { %13658 = vmatprep.mubr.msk.bf16.mxu0 %vm539_vm1, %v1055_v21 }
  0xcf   : > { %13659 = vmatmul.mubr.msk.bf16.gmra.mrb[20].mxu0 %vm539_vm1, %v1056_v26 }
  0xd0   : > { %13662 = vmatprep.mubr.msk.bf16.mxu0 %vm539_vm1, %v1057_v27 }
  0xd7   : > { %13663 = vmatmul.mubr.msk.bf16.gmra.mrb[24].mxu0 %vm539_vm1, %v1058_v32 }
  0xd8   : > { %13666 = vmatprep.mubr.msk.bf16.mxu0 %vm539_vm1, %v1059_v33 }
  0xdf   : > { %13667 = vmatmul.mubr.msk.bf16.gmra.mrb[28].mxu0 %vm539_vm1, %v1060_v38 }
  0xe0   : > { %13670 = vmatprep.mubr.msk.bf16.mxu0 %vm539_vm1, %v1061_v39 }
  0xe7   : > { %13671 = vmatmul.mubr.msk.bf16.gmra.mrb[32].mxu0 %vm539_vm1, %v1062_v42 }
  0xe8   : > { %13676 = vmatprep.mubr.msk.bf16.mxu0 %vm539_vm1, %v15312_v58  ;;  %v15413_v58 = vld [vmem:[%s20505_s1 + $0x18] sm:$0xf] }
  0xef   : > { %13677 = vmatmul.mubr.msk.bf16.vlgmr.msra.gmra.mrb[0].mxu0 %vm539_vm1, %v15314_v59  ;;  %v1667_v59 = vld [vmem:[%s15178_s30 + $0x43] sm:$0xff] }
  0xf0   : > { %13680 = vmatprep.mubr.msk.bf16.mxu0 %vm539_vm1, %v1048_v2  ;;  %13713 = vmatpush3.bf16.msra.mxu0 %v1772_v44  ;;  %v1700_v63 = vpack.c.bf16 %v1668_v60, %v1667_v59  ;;  %v1672_v2 = vld [vmem:[%s15178_s30 + $0x6b] sm:$0xff]  ;;  %v1999_v59 = vld [vmem:[%s15178_s30 + $0x74] sm:$0xff]  ;;  %v2000_v60 = vld [vmem:[%s15178_s30 + $0x7c] sm:$0xff] }
  0xf1   : > { %14467 = vmatprep.subr.msk.bf16.mxu0 %vm594_vm0, %v12163_v43  ;;  %v1702_v5 = vpack.c.bf16 %v1672_v2, %v1671_v1  ;;  %v1989_v43 = vld [vmem:[%s15178_s30 + $0x24] sm:$0xff]  ;;  %v1990_v44 = vld [vmem:[%s15178_s30 + $0x2c] sm:$0xff]  ;;  %v2029_v62 = vpack.c.bf16 %v2000_v60, %v1999_v59  ;;  %v2003_v1 = vld [vmem:[%s15178_s30 + $0x94] sm:$0xff] }
  0xf2   : > { %v15471_v47 = vpack.c.bf16 %v1990_v44, %v1989_v43  ;;  %v2004_v2 = vld [vmem:[%s15178_s30 + $0x9c] sm:$0xff]  ;;  %v2644_v43 = vld [vmem:[%s15178_s30 + $0x4d] sm:$0xff] }
  0xf3   : > { %v14558_v59 = vld [vmem:[%s20507_s3 + $0x88] sm:$0xff]  }
  0xf7   : > { %13681 = vmatmul.mubr.msk.bf16.gmra.mrb[4].mxu0 %vm539_vm1, %v1049_v3  ;;  %v1673_v3 = vld [vmem:[%s15178_s30 + $0x73] sm:$0xff] }
  0xf8   : > { %13684 = vmatprep.mubr.msk.bf16.mxu0 %vm539_vm1, %v1050_v8  ;;  %v1703_v6 = vpack.c.bf16 %v1674_v4, %v1673_v3  ;;  %v1676_v8 = vld [vmem:[%s15178_s30 + $0x8b] sm:$0xff]  ;;  %v2031_v4 = vpack.c.bf16 %v2004_v2, %v2003_v1 }
  0xf9   : > { %v1704_v11 = vpack.c.bf16 %v1676_v8, %v1675_v7  ;;  %v2007_v7 = vld [vmem:[%s15178_s30 + $0xb4] sm:$0xff]  ;;  %v2008_v8 = vld [vmem:[%s15178_s30 + $0xbc] sm:$0xff]  ;;  %v2655_v1 = vld [vmem:[%s15178_s30 + $0xa5] sm:$0xff] }
  0xfa   : > { %v2656_v2 = vld [vmem:[%s15178_s30 + $0xad] sm:$0xff] }
  0xff   : > { %13685 = vmatmul.mubr.msk.bf16.gmra.mrb[8].mxu0 %vm539_vm1, %v1051_v9  ;;  %v1677_v9 = vld [vmem:[%s15178_s30 + $0x93] sm:$0xff] }
 0x100   : > { %13688 = vmatprep.mubr.msk.bf16.mxu0 %vm539_vm1, %v1052_v14  ;;  %v1705_v12 = vpack.c.bf16 %v1678_v10, %v1677_v9  ;;  %v1680_v14 = vld [vmem:[%s15178_s30 + $0xab] sm:$0xff]  ;;  %v2033_v10 = vpack.c.bf16 %v2008_v8, %v2007_v7  ;;  %v2657_v7 = vld [vmem:[%s15178_s30 + $0xb5] sm:$0xff]  ;;  %v2658_v8 = vld [vmem:[%s15178_s30 + $0xbd] sm:$0xff] }
 0x101   : > { %v1706_v17 = vpack.c.bf16 %v1680_v14, %v1679_v13  ;;  %v2011_v13 = vld [vmem:[%s15178_s30 + $0xd4] sm:$0xff]  ;;  %v2012_v14 = vld [vmem:[%s15178_s30 + $0xdc] sm:$0xff] }
 0x107   : > { %13689 = vmatmul.mubr.msk.bf16.gmra.mrb[12].mxu0 %vm539_vm1, %v1053_v15  ;;  %v1681_v15 = vld [vmem:[%s15178_s30 + $0xb3] sm:$0xff] }
 0x108   : > { %13692 = vmatprep.mubr.msk.bf16.mxu0 %vm539_vm1, %v1054_v20  ;;  %v1707_v18 = vpack.c.bf16 %v1682_v16, %v1681_v15  ;;  %v1684_v20 = vld [vmem:[%s15178_s30 + $0xcb] sm:$0xff]  ;;  %v2035_v16 = vpack.c.bf16 %v2012_v14, %v2011_v13 }
 0x109   : > { %v1708_v23 = vpack.c.bf16 %v1684_v20, %v1683_v19  ;;  %v2015_v19 = vld [vmem:[%s15178_s30 + $0xf4] sm:$0xff]  ;;  %v2016_v20 = vld [vmem:[%s15178_s30 + $0xfc] sm:$0xff] }
 0x10a   : > { %v14563_v14 = vld [vmem:[%s20507_s3 + $0xb0] sm:$0xff]  }
 0x10f   : > { %13693 = vmatmul.mubr.msk.bf16.gmra.mrb[16].mxu0 %vm539_vm1, %v1055_v21  ;;  %v1685_v21 = vld [vmem:[%s15178_s30 + $0xd3] sm:$0xff] }
 0x110   : > { %13696 = vmatprep.mubr.msk.bf16.mxu0 %vm539_vm1, %v1056_v26  ;;  %v1709_v24 = vpack.c.bf16 %v1686_v22, %v1685_v21  ;;  %v1688_v26 = vld [vmem:[%s15178_s30 + $0xeb] sm:$0xff]  ;;  %v2037_v22 = vpack.c.bf16 %v2016_v20, %v2015_v19  ;;  %v14564_v19 = vld [vmem:[%s20507_s3 + $0xb8] sm:$0xff]  }
 0x111   : > { %v1710_v29 = vpack.c.bf16 %v1688_v26, %v1687_v25  ;;  %v2019_v25 = vld [vmem:[%s15178_s30 + $0x114] sm:$0xff]  ;;  %v2020_v26 = vld [vmem:[%s15178_s30 + $0x11c] sm:$0xff] }
 0x117   : > { %13697 = vmatmul.mubr.msk.bf16.gmra.mrb[20].mxu0 %vm539_vm1, %v1057_v27  ;;  %v1689_v27 = vld [vmem:[%s15178_s30 + $0xf3] sm:$0xff] }
 0x118   : > { %13700 = vmatprep.mubr.msk.bf16.mxu0 %vm539_vm1, %v1058_v32  ;;  %v1711_v30 = vpack.c.bf16 %v1690_v28, %v1689_v27  ;;  %v1692_v32 = vld [vmem:[%s15178_s30 + $0x10b] sm:$0xff]  ;;  %v2039_v28 = vpack.c.bf16 %v2020_v26, %v2019_v25 }
 0x119   : > { %v1712_v35 = vpack.c.bf16 %v1692_v32, %v1691_v31  ;;  %v2667_v25 = vld [vmem:[%s15178_s30 + $0x105] sm:$0xff]  ;;  %v2668_v26 = vld [vmem:[%s15178_s30 + $0x10d] sm:$0xff] }
 0x11f   : > { %13701 = vmatmul.mubr.msk.bf16.gmra.mrb[24].mxu0 %vm539_vm1, %v1059_v33  ;;  %v1693_v33 = vld [vmem:[%s15178_s30 + $0x113] sm:$0xff] }
 0x120   : > { %13704 = vmatprep.mubr.msk.bf16.mxu0 %vm539_vm1, %v1060_v38  ;;  %v1713_v36 = vpack.c.bf16 %v1694_v34, %v1693_v33  ;;  %v1696_v38 = vld [vmem:[%s15178_s30 + $0x12b] sm:$0xff]  ;;  %v12220_v33 = vld [vmem:[%s20505_s1 + $0x20] sm:$0xf]  ;;  %v2347_v34 = vld [vmem:[%s15178_s30 + $0x134] sm:$0xff] }
 0x121   : > { %v1714_v41 = vpack.c.bf16 %v1696_v38, %v1695_v37  ;;  %v2640_v37 = vld [vmem:[%s15178_s30 + $0x2d] sm:$0xff]  ;;  %v3076_v46 = vsel %vm594_vm0, %v12220_v33, 0 }
 0x127   : > { %13705 = vmatmul.mubr.msk.bf16.gmra.mrb[28].mxu0 %vm539_vm1, %v1061_v39  ;;  %v1987_v39 = vld [vmem:[%s15178_s30 + $0x14] sm:$0xff] }
 0x128   : > { %13708 = vmatprep.mubr.msk.bf16.mxu0 %vm539_vm1, %v1062_v42  ;;  %v2023_v42 = vpack.c.bf16 %v1988_v40, %v1987_v39  ;;  %v2641_v40 = vld [vmem:[%s15178_s30 + $0x35] sm:$0xff] }
 0x12f   : > { %13709 = vmatmul.mubr.msk.bf16.gmra.mrb[32].mxu0 %vm539_vm1, %v1388_v49  ;;  %v2424_v49 = vsel %vm594_vm0, %v15413_v58, 0 }
 0x130   : > { %13714 = vmatprep.mubr.msk.bf16.mxu0 %vm539_vm1, %v1697_v50  ;;  %v15480_v50 = vld [vmem:[%s20505_s1 + $0x1c] sm:$0xf] }
 0x131   : > { %v2750_v32 = vsel %vm594_vm0, %v15480_v50, 0 }
 0x137   : > { %13715 = vmatmul.mubr.msk.bf16.vlgmr.msra.gmra.mrb[0].mxu0 %vm539_vm1, %v1698_v55  ;;  %v2026_v55 = vpack.c.bf16 %v1994_v52, %v1993_v51 }
 0x138   : > { %13718 = vmatprep.mubr.msk.bf16.mxu0 %vm539_vm1, %v1699_v56  ;;  %13751 = vmatpush3.bf16.msra.mxu0 %v2098_v57  ;;  %v2027_v56 = vpack.c.bf16 %v1996_v54, %v1995_v53  ;;  %v1997_v57 = vld [vmem:[%s15178_s30 + $0x64] sm:$0xff]  ;;  %v2649_v54 = vld [vmem:[%s15178_s30 + $0x75] sm:$0xff] }
 0x139   : > { %14468 = vmatprep.subr.msk.bf16.mxu0 %vm594_vm0, %v15413_v58  ;;  %v1998_v58 = vld [vmem:[%s15178_s30 + $0x6c] sm:$0xff]  ;;  %v14557_v53 = vld [vmem:[%s20507_s3 + $0x80] sm:$0xff]  }
 0x13a   : > { %v2028_v61 = vpack.c.bf16 %v1998_v58, %v1997_v57  ;;  %v2651_v57 = vld [vmem:[%s15178_s30 + $0x85] sm:$0xff]  ;;  %v2652_v58 = vld [vmem:[%s15178_s30 + $0x8d] sm:$0xff] }
 0x13f   : > { %13719 = vmatmul.mubr.msk.bf16.gmra.mrb[4].mxu0 %vm539_vm1, %v1700_v63  ;;  %v2001_v63 = vld [vmem:[%s15178_s30 + $0x84] sm:$0xff] }
 0x140   : > { %13722 = vmatprep.mubr.msk.bf16.mxu0 %vm539_vm1, %v1701_v0  ;;  %v2002_v0 = vld [vmem:[%s15178_s30 + $0x8c] sm:$0xff] }
 0x141   : > { %v2030_v3 = vpack.c.bf16 %v2002_v0, %v2001_v63  ;;  %v2653_v63 = vld [vmem:[%s15178_s30 + $0x95] sm:$0xff]  ;;  %v2654_v0 = vld [vmem:[%s15178_s30 + $0x9d] sm:$0xff] }
 0x147   : > { %13723 = vmatmul.mubr.msk.bf16.gmra.mrb[8].mxu0 %vm539_vm1, %v1702_v5  ;;  %v2005_v5 = vld [vmem:[%s15178_s30 + $0xa4] sm:$0xff] }
 0x148   : > { %13726 = vmatprep.mubr.msk.bf16.mxu0 %vm539_vm1, %v1703_v6  ;;  %v2006_v6 = vld [vmem:[%s15178_s30 + $0xac] sm:$0xff] }
 0x149   : > { %v2032_v9 = vpack.c.bf16 %v2006_v6, %v2005_v5  ;;  %v2683_v5 = vpack.c.bf16 %v2656_v2, %v2655_v1  ;;  %v14561_v6 = vld [vmem:[%s20507_s3 + $0xa0] sm:$0xff]   ;;  %v2982_v1 = vld [vmem:[%s15178_s30 + $0xae] sm:$0xff] }
 0x14f   : > { %13727 = vmatmul.mubr.msk.bf16.gmra.mrb[12].mxu0 %vm539_vm1, %v1704_v11  ;;  %v2009_v11 = vld [vmem:[%s15178_s30 + $0xc4] sm:$0xff] }
 0x150   : > { %13730 = vmatprep.mubr.msk.bf16.mxu0 %vm539_vm1, %v1705_v12  ;;  %v2010_v12 = vld [vmem:[%s15178_s30 + $0xcc] sm:$0xff] }
 0x151   : > { %v2034_v15 = vpack.c.bf16 %v2010_v12, %v2009_v11  ;;  %v14562_v11 = vld [vmem:[%s20507_s3 + $0xa8] sm:$0xff]   ;;  %v2684_v12 = vpack.c.bf16 %v2658_v8, %v2657_v7 }
 0x152   : > { %v2986_v7 = vld [vmem:[%s15178_s30 + $0xce] sm:$0xff] }
 0x157   : > { %13731 = vmatmul.mubr.msk.bf16.gmra.mrb[16].mxu0 %vm539_vm1, %v1706_v17  ;;  %v2013_v17 = vld [vmem:[%s15178_s30 + $0xe4] sm:$0xff] }
 0x158   : > { %13734 = vmatprep.mubr.msk.bf16.mxu0 %vm539_vm1, %v1707_v18  ;;  %v2014_v18 = vld [vmem:[%s15178_s30 + $0xec] sm:$0xff] }
 0x159   : > { %v2036_v21 = vpack.c.bf16 %v2014_v18, %v2013_v17  ;;  %v2663_v17 = vld [vmem:[%s15178_s30 + $0xe5] sm:$0xff]  ;;  %v2664_v18 = vld [vmem:[%s15178_s30 + $0xed] sm:$0xff] }
 0x15f   : > { %13735 = vmatmul.mubr.msk.bf16.gmra.mrb[20].mxu0 %vm539_vm1, %v1708_v23  ;;  %v2017_v23 = vld [vmem:[%s15178_s30 + $0x104] sm:$0xff] }
 0x160   : > { %13738 = vmatprep.mubr.msk.bf16.mxu0 %vm539_vm1, %v1709_v24  ;;  %v2018_v24 = vld [vmem:[%s15178_s30 + $0x10c] sm:$0xff] }
 0x161   : > { %v2038_v27 = vpack.c.bf16 %v2018_v24, %v2017_v23  ;;  %v2665_v23 = vld [vmem:[%s15178_s30 + $0xf5] sm:$0xff]  ;;  %v2666_v24 = vld [vmem:[%s15178_s30 + $0xfd] sm:$0xff] }
 0x167   : > { %13739 = vmatmul.mubr.msk.bf16.gmra.mrb[24].mxu0 %vm539_vm1, %v1710_v29  ;;  %v2021_v29 = vld [vmem:[%s15178_s30 + $0x124] sm:$0xff] }
 0x168   : > { %13742 = vmatprep.mubr.msk.bf16.mxu0 %vm539_vm1, %v1711_v30  ;;  %v2022_v30 = vld [vmem:[%s15178_s30 + $0x12c] sm:$0xff] }
 0x169   : > { %v2040_v31 = vpack.c.bf16 %v2022_v30, %v2021_v29  ;;  %v2689_v29 = vpack.c.bf16 %v2668_v26, %v2667_v25  ;;  %v14567_v30 = vld [vmem:[%s20507_s3 + $0xd0] sm:$0xff]  }
 0x16a   : > { %v2998_v25 = vld [vmem:[%s15178_s30 + $0x12e] sm:$0xff] }
 0x16f   : > { %13743 = vmatmul.mubr.msk.bf16.gmra.mrb[28].mxu0 %vm539_vm1, %v1712_v35  ;;  %v2348_v35 = vld [vmem:[%s15178_s30 + $0x13c] sm:$0xff] }
 0x170   : > { %13746 = vmatprep.mubr.msk.bf16.mxu0 %vm539_vm1, %v1713_v36  ;;  %v2639_v36 = vld [vmem:[%s15178_s30 + $0x25] sm:$0xff]  ;;  %v2366_v38 = vpack.c.bf16 %v2348_v35, %v2347_v34  ;;  %v2672_v34 = vld [vmem:[%s15178_s30 + $0x12d] sm:$0xff] }
 0x171   : > { %v2675_v39 = vpack.c.bf16 %v2640_v37, %v2639_v36  ;;  %v2673_v37 = vld [vmem:[%s15178_s30 + $0x135] sm:$0xff] }
 0x177   : > { %13747 = vmatmul.mubr.msk.bf16.gmra.mrb[32].mxu0 %vm539_vm1, %v1714_v41  ;;  %v2642_v41 = vld [vmem:[%s15178_s30 + $0x3d] sm:$0xff] }
 0x178   : > { %13752 = vmatprep.mubr.msk.bf16.mxu0 %vm539_vm1, %v2023_v42  ;;  %v2643_v42 = vld [vmem:[%s15178_s30 + $0x45] sm:$0xff]  ;;  %v2676_v44 = vpack.c.bf16 %v2642_v41, %v2641_v40  ;;  %v2966_v40 = vld [vmem:[%s15178_s30 + $0x2e] sm:$0xff] }
 0x179   : > { %v2677_v45 = vpack.c.bf16 %v2644_v43, %v2643_v42  ;;  %v2967_v43 = vld [vmem:[%s15178_s30 + $0x36] sm:$0xff] }
 0x17f   : > { %13753 = vmatmul.mubr.msk.bf16.vlgmr.msra.gmra.mrb[0].mxu0 %vm539_vm1, %v15471_v47 }
 0x180   : > { %13756 = vmatprep.mubr.msk.bf16.mxu0 %vm539_vm1, %v15473_v48  ;;  %13789 = vmatpush3.bf16.msra.mxu0 %v2424_v49  ;;  %v2647_v49 = vld [vmem:[%s15178_s30 + $0x65] sm:$0xff] }
 0x181   : > { %14469 = vmatprep.subr.msk.bf16.mxu0 %vm594_vm0, %v15480_v50  ;;  %v2648_v50 = vld [vmem:[%s15178_s30 + $0x6d] sm:$0xff] }
 0x182   : > { %v2679_v52 = vpack.c.bf16 %v2648_v50, %v2647_v49  ;;  %v2971_v49 = vld [vmem:[%s15178_s30 + $0x56] sm:$0xff]  ;;  %v2972_v50 = vld [vmem:[%s15178_s30 + $0x5e] sm:$0xff] }
 0x187   : > { %13757 = vmatmul.mubr.msk.bf16.gmra.mrb[4].mxu0 %vm539_vm1, %v2026_v55 }
 0x188   : > { %13760 = vmatprep.mubr.msk.bf16.mxu0 %vm539_vm1, %v2027_v56 }
 0x18f   : > { %13761 = vmatmul.mubr.msk.bf16.gmra.mrb[8].mxu0 %vm539_vm1, %v2028_v61 }
 0x190   : > { %13764 = vmatprep.mubr.msk.bf16.mxu0 %vm539_vm1, %v2029_v62 }
 0x197   : > { %13765 = vmatmul.mubr.msk.bf16.gmra.mrb[12].mxu0 %vm539_vm1, %v2030_v3 }
 0x198   : > { %13768 = vmatprep.mubr.msk.bf16.mxu0 %vm539_vm1, %v2031_v4 }
 0x19f   : > { %13769 = vmatmul.mubr.msk.bf16.gmra.mrb[16].mxu0 %vm539_vm1, %v2032_v9 }
 0x1a0   : > { %13772 = vmatprep.mubr.msk.bf16.mxu0 %vm539_vm1, %v2033_v10 }
 0x1a7   : > { %13773 = vmatmul.mubr.msk.bf16.gmra.mrb[20].mxu0 %vm539_vm1, %v2034_v15 }
 0x1a8   : > { %13776 = vmatprep.mubr.msk.bf16.mxu0 %vm539_vm1, %v2035_v16 }
 0x1af   : > { %13777 = vmatmul.mubr.msk.bf16.gmra.mrb[24].mxu0 %vm539_vm1, %v2036_v21 }
 0x1b0   : > { %13780 = vmatprep.mubr.msk.bf16.mxu0 %vm539_vm1, %v2037_v22 }
 0x1b7   : > { %13781 = vmatmul.mubr.msk.bf16.gmra.mrb[28].mxu0 %vm539_vm1, %v2038_v27 }
 0x1b8   : > { %13784 = vmatprep.mubr.msk.bf16.mxu0 %vm539_vm1, %v2039_v28 }
 0x1bf   : > { %13785 = vmatmul.mubr.msk.bf16.gmra.mrb[32].mxu0 %vm539_vm1, %v2040_v31 }
 0x1c0   : > { %13790 = vmatprep.mubr.msk.bf16.mxu0 %vm539_vm1, %v15471_v47  ;;  %v2645_v47 = vld [vmem:[%s15178_s30 + $0x55] sm:$0xff] }
 0x1c7   : > { %13791 = vmatmul.mubr.msk.bf16.vlgmr.msra.gmra.mrb[0].mxu0 %vm539_vm1, %v15473_v48  ;;  %v2646_v48 = vld [vmem:[%s15178_s30 + $0x5d] sm:$0xff] }
 0x1c8   : > { %13794 = vmatprep.mubr.msk.bf16.mxu0 %vm539_vm1, %v2026_v55  ;;  %13827 = vmatpush3.bf16.msra.mxu0 %v2750_v32  ;;  %v2678_v51 = vpack.c.bf16 %v2646_v48, %v2645_v47  ;;  %v2650_v55 = vld [vmem:[%s15178_s30 + $0x7d] sm:$0xff] }
 0x1c9   : > { %14470 = vmatprep.subr.msk.bf16.mxu0 %vm594_vm0, %v12220_v33  ;;  %v2680_v60 = vpack.c.bf16 %v2650_v55, %v2649_v54  ;;  %v2670_v32 = vld [vmem:[%s15178_s30 + $0x11d] sm:$0xff]  ;;  %v2671_v33 = vld [vmem:[%s15178_s30 + $0x125] sm:$0xff] }
 0x1ca   : > { %v2691_v36 = vpack.c.bf16 %v2672_v34, %v2671_v33  ;;  %v2975_v55 = vld [vmem:[%s15178_s30 + $0x76] sm:$0xff]  ;;  %v14570_v33 = vld [vmem:[%s20507_s3 + $0xe8] sm:$0xff]  }
 0x1cb   : > { %v14571_v34 = vld [vmem:[%s20507_s3 + $0xf0] sm:$0xff]  }
 0x1cf   : > { %13795 = vmatmul.mubr.msk.bf16.gmra.mrb[4].mxu0 %vm539_vm1, %v2027_v56  ;;  %v20517_v56 = vmov 0  }
 0x1d0   : > { %13798 = vmatprep.mubr.msk.bf16.mxu0 %vm539_vm1, %v2028_v61  ;;  %4567 = vmatprep.subr.bf16.mxu1 %v20517_v56  ;;  %v2681_v61 = vpack.c.bf16 %v2652_v58, %v2651_v57  ;;  %v2976_v57 = vld [vmem:[%s15178_s30 + $0x7e] sm:$0xff]  ;;  %v2977_v58 = vld [vmem:[%s15178_s30 + $0x86] sm:$0xff] }
 0x1d1   : > { %4568 = vmatpush1.bf16.msra.mxu1 %v14557_v53  ;;  %v3004_v53 = vpack.c.bf16 %v2972_v50, %v2971_v49 }
 0x1d2   : > { %4569 = vmatprep.subr.bf16.mxu1 %v20517_v56 }
 0x1d5   : > { %4570 = vmatpush1.bf16.msra.mxu1 %v14558_v59  ;;  %v2978_v59 = vld [vmem:[%s15178_s30 + $0x8e] sm:$0xff] }
 0x1d6   : > { %4571 = vmatprep.subr.bf16.mxu1 %v20517_v56 }
 0x1d7   : > { %13799 = vmatmul.mubr.msk.bf16.gmra.mrb[8].mxu0 %vm539_vm1, %v2029_v62  ;;  %v14559_v62 = vld [vmem:[%s20507_s3 + $0x90] sm:$0xff]  }
 0x1d8   : > { %13802 = vmatprep.mubr.msk.bf16.mxu0 %vm539_vm1, %v2030_v3  ;;  %v14560_v3 = vld [vmem:[%s20507_s3 + $0x98] sm:$0xff]  }
 0x1d9   : > { %4572 = vmatpush1.bf16.msra.mxu1 %v14559_v62  ;;  %v2979_v62 = vld [vmem:[%s15178_s30 + $0x96] sm:$0xff] }
 0x1da   : > { %4573 = vmatprep.subr.bf16.mxu1 %v20517_v56 }
 0x1dd   : > { %4574 = vmatpush1.bf16.msra.mxu1 %v14560_v3 }
 0x1de   : > { %4575 = vmatprep.subr.bf16.mxu1 %v20517_v56 }
 0x1df   : > { %13803 = vmatmul.mubr.msk.bf16.gmra.mrb[12].mxu0 %vm539_vm1, %v2031_v4  ;;  %v2682_v4 = vpack.c.bf16 %v2654_v0, %v2653_v63  ;;  %v2980_v63 = vld [vmem:[%s15178_s30 + $0x9e] sm:$0xff]  ;;  %v2981_v0 = vld [vmem:[%s15178_s30 + $0xa6] sm:$0xff] }
 0x1e0   : > { %13806 = vmatprep.mubr.msk.bf16.mxu0 %vm539_vm1, %v2032_v9  ;;  %v2659_v9 = vld [vmem:[%s15178_s30 + $0xc5] sm:$0xff]  ;;  %v3008_v2 = vpack.c.bf16 %v2980_v63, %v2979_v62  ;;  %v3009_v3 = vpack.c.bf16 %v2982_v1, %v2981_v0 }
 0x1e1   : > { %4576 = vmatpush1.bf16.msra.mxu1 %v14561_v6  ;;  %v2985_v6 = vld [vmem:[%s15178_s30 + $0xc6] sm:$0xff] }
 0x1e2   : > { %4577 = vmatprep.subr.bf16.mxu1 %v20517_v56 }
 0x1e5   : > { %4578 = vmatpush1.bf16.msra.mxu1 %v14562_v11  ;;  %v2988_v11 = vld [vmem:[%s15178_s30 + $0xde] sm:$0xff] }
 0x1e6   : > { %4579 = vmatprep.subr.bf16.mxu1 %v20517_v56 }
 0x1e7   : > { %13807 = vmatmul.mubr.msk.bf16.gmra.mrb[16].mxu0 %vm539_vm1, %v2033_v10  ;;  %v2660_v10 = vld [vmem:[%s15178_s30 + $0xcd] sm:$0xff] }
 0x1e8   : > { %13810 = vmatprep.mubr.msk.bf16.mxu0 %vm539_vm1, %v2034_v15  ;;  %v2685_v13 = vpack.c.bf16 %v2660_v10, %v2659_v9  ;;  %v2661_v15 = vld [vmem:[%s15178_s30 + $0xd5] sm:$0xff]  ;;  %v3011_v9 = vpack.c.bf16 %v2986_v7, %v2985_v6 }
 0x1e9   : > { %4580 = vmatpush1.bf16.msra.mxu1 %v14563_v14  ;;  %v2987_v10 = vld [vmem:[%s15178_s30 + $0xd6] sm:$0xff] }
 0x1ea   : > { %4581 = vmatprep.subr.bf16.mxu1 %v20517_v56  ;;  %v3012_v14 = vpack.c.bf16 %v2988_v11, %v2987_v10 }
 0x1ed   : > { %4582 = vmatpush1.bf16.msra.mxu1 %v14564_v19  ;;  %v2994_v19 = vld [vmem:[%s15178_s30 + $0x10e] sm:$0xff] }
 0x1ee   : > { %4583 = vmatprep.subr.bf16.mxu1 %v20517_v56 }
 0x1ef   : > { %13811 = vmatmul.mubr.msk.bf16.gmra.mrb[20].mxu0 %vm539_vm1, %v2035_v16  ;;  %v2662_v16 = vld [vmem:[%s15178_s30 + $0xdd] sm:$0xff] }
 0x1f0   : > { %13814 = vmatprep.mubr.msk.bf16.mxu0 %vm539_vm1, %v2036_v21  ;;  %v2686_v20 = vpack.c.bf16 %v2662_v16, %v2661_v15  ;;  %v2687_v21 = vpack.c.bf16 %v2664_v18, %v2663_v17  ;;  %v2991_v16 = vld [vmem:[%s15178_s30 + $0xf6] sm:$0xff]  ;;  %v2992_v17 = vld [vmem:[%s15178_s30 + $0xfe] sm:$0xff]  ;;  %v2993_v18 = vld [vmem:[%s15178_s30 + $0x106] sm:$0xff] }
 0x1f7   : > { %13815 = vmatmul.mubr.msk.bf16.gmra.mrb[24].mxu0 %vm539_vm1, %v2037_v22  ;;  %v14565_v22 = vld [vmem:[%s20507_s3 + $0xc0] sm:$0xff]  }
 0x1f8   : > { %13818 = vmatprep.mubr.msk.bf16.mxu0 %vm539_vm1, %v2038_v27  ;;  %4584 = vmatpush1.bf16.msra.mxu1 %v14565_v22  ;;  %v14566_v27 = vld [vmem:[%s20507_s3 + $0xc8] sm:$0xff]   ;;  %v2995_v22 = vld [vmem:[%s15178_s30 + $0x116] sm:$0xff] }
 0x1f9   : > { %4585 = vmatprep.subr.bf16.mxu1 %v20517_v56 }
 0x1fc   : > { %4586 = vmatpush1.bf16.msra.mxu1 %v14566_v27 }
 0x1fd   : > { %4587 = vmatprep.subr.bf16.mxu1 %v20517_v56 }
 0x1ff   : > { %13819 = vmatmul.mubr.msk.bf16.gmra.mrb[28].mxu0 %vm539_vm1, %v2039_v28  ;;  %v2688_v28 = vpack.c.bf16 %v2666_v24, %v2665_v23  ;;  %v2996_v23 = vld [vmem:[%s15178_s30 + $0x11e] sm:$0xff]  ;;  %v2997_v24 = vld [vmem:[%s15178_s30 + $0x126] sm:$0xff] }
 0x200   : > { %13822 = vmatprep.mubr.msk.bf16.mxu0 %vm539_vm1, %v2040_v31  ;;  %v2669_v31 = vld [vmem:[%s15178_s30 + $0x115] sm:$0xff]  ;;  %4588 = vmatpush1.bf16.msra.mxu1 %v14567_v30  ;;  %v3016_v26 = vpack.c.bf16 %v2996_v23, %v2995_v22  ;;  %v3017_v27 = vpack.c.bf16 %v2998_v25, %v2997_v24 }
 0x201   : > { %4589 = vmatprep.subr.bf16.mxu1 %v20517_v56  ;;  %v2690_v35 = vpack.c.bf16 %v2670_v32, %v2669_v31  ;;  %v14568_v31 = vld [vmem:[%s20507_s3 + $0xd8] sm:$0xff]   ;;  %v14569_v32 = vld [vmem:[%s20507_s3 + $0xe0] sm:$0xff]  }
 0x204   : > { %4590 = vmatpush1.bf16.msra.mxu1 %v14568_v31 }
 0x205   : > { %4591 = vmatprep.subr.bf16.mxu1 %v20517_v56 }
 0x207   : > { %13823 = vmatmul.mubr.msk.bf16.gmra.mrb[32].mxu0 %vm539_vm1, %v2366_v38  ;;  %v2674_v38 = vld [vmem:[%s15178_s30 + $0x13d] sm:$0xff] }
 0x208   : > { %13828 = vmatprep.mubr.msk.bf16.mxu0 %vm539_vm1, %v2675_v39  ;;  %v2965_v39 = vld [vmem:[%s15178_s30 + $0x26] sm:$0xff]  ;;  %v2692_v41 = vpack.c.bf16 %v2674_v38, %v2673_v37  ;;  %4592 = vmatpush1.bf16.msra.mxu1 %v14569_v32  ;;  %v3370_v37 = vlaneseq }
 0x209   : > { %v3001_v42 = vpack.c.bf16 %v2966_v40, %v2965_v39  ;;  %4593 = vmatprep.subr.bf16.mxu1 %v20517_v56 }
 0x20a   : > { %v15735_v38 = vshrl.u32 %v3370_v37, 7 }
 0x20c   : > { %4594 = vmatpush1.bf16.msra.mxu1 %v14570_v33  ;;  %v3373_v39 = vadd.s32 16, %v15735_v38  ;;  %v3374_v40 = vadd.s32 24, %v15735_v38  ;;  %v15820_v31 = vadd.s32 72, %v15735_v38 }
 0x20d   : > { %4595 = vmatprep.subr.bf16.mxu1 %v20517_v56 }
 0x20f   : > { %13829 = vmatmul.mubr.msk.bf16.vlgmr.msra.gmra.mrb[0].mxu0 %vm539_vm1, %v2676_v44  ;;  %v2968_v44 = vld [vmem:[%s15178_s30 + $0x3e] sm:$0xff] }
 0x210   : > { %13832 = vmatprep.mubr.msk.bf16.mxu0 %vm539_vm1, %v2677_v45  ;;  %13865 = vmatpush3.bf16.msra.mxu0 %v3076_v46  ;;  %v2969_v45 = vld [vmem:[%s15178_s30 + $0x46] sm:$0xff]  ;;  %v2970_v46 = vld [vmem:[%s15178_s30 + $0x4e] sm:$0xff]  ;;  %v3002_v47 = vpack.c.bf16 %v2968_v44, %v2967_v43  ;;  %v3372_v43 = vadd.s32 8, %v15735_v38 }
 0x211   : > { %v3003_v48 = vpack.c.bf16 %v2970_v46, %v2969_v45  ;;  %4596 = vmatpush1.bf16.msra.mxu1 %v14571_v34  ;;  %v15744_v44 = vmul.u32.u64.low 3817748708, %v15735_v38  ;;  %v15745_v45 = vmul.u32.u64.high 3817748708, %v15735_v38, %v15744_v44 }
 0x212   : > { %4597 = vmatprep.subr.bf16.mxu1 %v20517_v56  ;;  %v15751_v49 = vmul.u32.u64.low 3817748708, %v3372_v43  ;;  %v15752_v50 = vmul.u32.u64.high 3817748708, %v3372_v43, %v15751_v49 }
 0x217   : > { %13833 = vmatmul.mubr.msk.bf16.gmra.mrb[4].mxu0 %vm539_vm1, %v2678_v51  ;;  %v2973_v51 = vld [vmem:[%s15178_s30 + $0x66] sm:$0xff] }
 0x218   : > { %13836 = vmatprep.mubr.msk.bf16.mxu0 %vm539_vm1, %v2679_v52  ;;  %v2974_v52 = vld [vmem:[%s15178_s30 + $0x6e] sm:$0xff] }
 0x219   : > { %v3005_v54 = vpack.c.bf16 %v2974_v52, %v2973_v51  ;;  %v3375_v51 = vadd.s32 32, %v15735_v38  ;;  %v3378_v52 = vadd.s32 56, %v15735_v38 }
 0x21b   : > { %v15766_v62 = vmul.u32.u64.low 3817748708, %v3378_v52  ;;  %v15767_v63 = vmul.u32.u64.high 3817748708, %v3378_v52, %v15766_v62 }
 0x21f   : > { %13837 = vmatmul.mubr.msk.bf16.gmra.mrb[8].mxu0 %vm539_vm1, %v2680_v60  ;;  %v3006_v60 = vpack.c.bf16 %v2976_v57, %v2975_v55  ;;  %v3376_v55 = vadd.s32 40, %v15735_v38 }
 0x220   : > { %13840 = vmatprep.mubr.msk.bf16.mxu0 %vm539_vm1, %v2681_v61  ;;  %v3007_v61 = vpack.c.bf16 %v2978_v59, %v2977_v58  ;;  %v15761_v58 = vmul.u32.u64.low 3817748708, %v3375_v51  ;;  %v15762_v59 = vmul.u32.u64.high 3817748708, %v3375_v51, %v15761_v58 }
 0x227   : > { %13841 = vmatmul.mubr.msk.bf16.gmra.mrb[12].mxu0 %vm539_vm1, %v2682_v4  ;;  %v2983_v4 = vld [vmem:[%s15178_s30 + $0xb6] sm:$0xff] }
 0x228   : > { %13844 = vmatprep.mubr.msk.bf16.mxu0 %vm539_vm1, %v2683_v5  ;;  %v2984_v5 = vld [vmem:[%s15178_s30 + $0xbe] sm:$0xff] }
 0x229   : > { %v3010_v8 = vpack.c.bf16 %v2984_v5, %v2983_v4  ;;  %v3424_v4 = vshrl.u32 %v15752_v50, 4 }
 0x22b   : > { %v3425_v11 = vmul.u32 18, %v3424_v4  ;;  %v20555_v4 = vmov 0 }
 0x22f   : > { %13845 = vmatmul.mubr.msk.bf16.gmra.mrb[16].mxu0 %vm539_vm1, %v2684_v12  ;;  %v2989_v12 = vld [vmem:[%s15178_s30 + $0xe6] sm:$0xff] }
 0x230   : > { %13848 = vmatprep.mubr.msk.bf16.mxu0 %vm539_vm1, %v2685_v13  ;;  %v2990_v13 = vld [vmem:[%s15178_s30 + $0xee] sm:$0xff] }
 0x231   : > { %v3013_v15 = vpack.c.bf16 %v2990_v13, %v2989_v12  ;;  %v15781_v12 = vadd.s32 64, %v15735_v38  ;;  %v3457_v13 = vshrl.u32 %v15762_v59, 4 }
 0x233   : > { %v3458_v23 = vmul.u32 18, %v3457_v13 }
 0x235   : > { %v15826_v33 = vsub.s32 %v3375_v51, %v3458_v23  ;;  %v15873_v51 = vadd.s32 104, %v15735_v38 }
 0x237   : > { %13849 = vmatmul.mubr.msk.bf16.gmra.mrb[20].mxu0 %vm539_vm1, %v2686_v20  ;;  %v3014_v20 = vpack.c.bf16 %v2992_v17, %v2991_v16  ;;  %vm3807_vm12 = vcmp.ne.s32.totalorder %v15826_v33, 0  ;;  %vm3843_vm13 = vcmp.lt.s32.totalorder %v15826_v33, 0 }
 0x238   : > { %13852 = vmatprep.mubr.msk.bf16.mxu0 %vm539_vm1, %v2687_v21  ;;  %v3015_v21 = vpack.c.bf16 %v2994_v19, %v2993_v18  ;;  %v15792_v19 = vsub.s32 %v3372_v43, %v3425_v11  ;;  %v15846_v43 = vmul.u32.u64.low 3817748708, %v15820_v31  ;;  %v15847_v44 = vmul.u32.u64.high 3817748708, %v15820_v31, %v15846_v43 }
 0x239   : > { %v20557_v11 = vmov 0 }
 0x23a   : > { %vm3804_vm8 = vcmp.ne.s32.totalorder %v15792_v19, 0  ;;  %vm3840_vm9 = vcmp.lt.s32.totalorder %v15792_v19, 0  ;;  %v15824_v32 = vadd.s32 18, %v15792_v19 }
 0x23f   : > { %13853 = vmatmul.mubr.msk.bf16.gmra.mrb[24].mxu0 %vm539_vm1, %v2688_v28  ;;  %v2999_v28 = vld [vmem:[%s15178_s30 + $0x136] sm:$0xff] }
 0x240   : > { %13856 = vmatprep.mubr.msk.bf16.mxu0 %vm539_vm1, %v2689_v29  ;;  %v3000_v29 = vld [vmem:[%s15178_s30 + $0x13e] sm:$0xff] }
 0x241   : > { %v3018_v30 = vpack.c.bf16 %v3000_v29, %v2999_v28 }
 0x247   : > { %13857 = vmatmul.mubr.msk.bf16.gmra.mrb[28].mxu0 %vm539_vm1, %v2690_v35  ;;  %v15087_v35 = vmov 0.0  }
 0x248   : > { %13860 = vmatprep.mubr.msk.bf16.mxu0 %vm539_vm1, %v2691_v36  ;;  %4093 = vst [vmem:[#allocation2 + $0x10] sm:$0x7] %v15087_v35  ;;  %4091 = vst [vmem:[#allocation2] sm:$0xff] %v15087_v35  ;;  %v14572_v36 = vld [vmem:[%s20507_s3 + $0xf8] sm:$0xff]  }
 0x249   : > { %4092 = vst [vmem:[#allocation2 + $0x8] sm:$0xff] %v15087_v35  ;;  %4094 = vst [vmem:[#allocation2 + $0x132] sm:$0xff] %v15087_v35  ;;  %4598 = vmatpush1.bf16.msra.mxu1 %v14572_v36 }
 0x24a   : > { %4095 = vst [vmem:[#allocation2 + $0x13a] sm:$0xff] %v15087_v35  ;;  %4096 = vst [vmem:[#allocation2 + $0x142] sm:$0x3f] %v15087_v35  ;;  %4840 = vmatprep.subr.bf16.mxu1 %v20517_v56  ;;  %v16044_v56 = vadd.s32 176, %v15735_v38 }
 0x24f   : > { %13861 = vmatmul.mubr.msk.bf16.gmra.mrb[32].mxu0 %vm539_vm1, %v2692_v41 }
 0x250   : > { %13866 = vmatprep.mubr.msk.bf16.mxu0 %vm539_vm1, %v3001_v42  ;;  %v15739_v41 = vmul.u32.u64.low 3817748708, %v3373_v39  ;;  %v15740_v42 = vmul.u32.u64.high 3817748708, %v3373_v39, %v15739_v41 }
 0x252   : > { %v3435_v57 = vshrl.u32 %v15740_v42, 4 }
 0x257   : > { %13867 = vmatmul.mubr.msk.bf16.vlgmr.msra.gmra.mrb[0].mxu0 %vm539_vm1, %v3002_v47  ;;  %v15747_v46 = vmul.u32.u64.low 3817748708, %v3374_v40  ;;  %v15748_v47 = vmul.u32.u64.high 3817748708, %v3374_v40, %v15747_v46 }
 0x258   : > { %13870 = vmatprep.mubr.msk.bf16.mxu0 %vm539_vm1, %v3003_v48  ;;  %v3377_v48 = vadd.s32 48, %v15735_v38 }
 0x259   : > { %v3446_v0 = vshrl.u32 %v15748_v47, 4  ;;  %v15857_v47 = vadd.s32 120, %v15735_v38 }
 0x25f   : > { %13871 = vmatmul.mubr.msk.bf16.gmra.mrb[4].mxu0 %vm539_vm1, %v3004_v53 }
 0x260   : > { %13874 = vmatprep.mubr.msk.bf16.mxu0 %vm539_vm1, %v3005_v54  ;;  %v15756_v53 = vmul.u32.u64.low 3817748708, %v3377_v48  ;;  %v15757_v54 = vmul.u32.u64.high 3817748708, %v3377_v48, %v15756_v53 }
 0x261   : > { %v15886_v53 = vadd.s32 144, %v15735_v38 }
 0x267   : > { %13875 = vmatmul.mubr.msk.bf16.gmra.mrb[8].mxu0 %vm539_vm1, %v3006_v60  ;;  %v3381_v60 = vadd.s32 80, %v15735_v38 }
 0x268   : > { %13878 = vmatprep.mubr.msk.bf16.mxu0 %vm539_vm1, %v3007_v61  ;;  %v3413_v61 = vshrl.u32 %v15745_v45, 4  ;;  %v15850_v45 = vadd.s32 96, %v15735_v38 }
 0x269   : > { %v15774_v5 = vmul.u32.u64.low 3817748708, %v3381_v60  ;;  %v15775_v6 = vmul.u32.u64.high 3817748708, %v3381_v60, %v15774_v5 }
 0x26a   : > { %v3414_v7 = vmul.u32 18, %v3413_v61  ;;  %v15901_v58 = vmul.u32.u64.low 3817748708, %v15850_v45  ;;  %v15902_v59 = vmul.u32.u64.high 3817748708, %v15850_v45, %v15901_v58 }
 0x26b   : > { %v3523_v24 = vshrl.u32 %v15775_v6, 4  ;;  %v15914_v61 = vmul.u32.u64.low 3817748708, %v15857_v47  ;;  %v15915_v62 = vmul.u32.u64.high 3817748708, %v15857_v47, %v15914_v61  ;;  %v16017_v58 = vld [vmem:[#allocation2 + $0xa] sm:$0xff] }
 0x26c   : > { %v15943_v5 = vmul.u32.u64.low 3817748708, %v15886_v53  ;;  %v15944_v6 = vmul.u32.u64.high 3817748708, %v15886_v53, %v15943_v5  ;;  %20564 = vst [vmem:[#allocation5_spill] sm:$0xff] %v16017_v58 }
 0x26d   : > { %v3524_v34 = vmul.u32 18, %v3523_v24  ;;  %v16025_v5 = vadd.s32 136, %v15735_v38 }
 0x26f   : > { %13879 = vmatmul.mubr.msk.bf16.gmra.mrb[12].mxu0 %vm539_vm1, %v3008_v2  ;;  %v15770_v1 = vmul.u32.u64.low 3817748708, %v3376_v55  ;;  %v15771_v2 = vmul.u32.u64.high 3817748708, %v3376_v55, %v15770_v1  ;;  %v15854_v46 = vsub.s32 %v3381_v60, %v3524_v34  ;;  %v20561_v34 = vmov 0 }
 0x270   : > { %13882 = vmatprep.mubr.msk.bf16.mxu0 %vm539_vm1, %v3009_v3  ;;  %v3436_v3 = vmul.u32 18, %v3435_v57 }
 0x271   : > { %v3468_v18 = vshrl.u32 %v15771_v2, 4  ;;  %20544 = vst [vmem:[#allocation3_spill] sm:$0xff] %v15854_v46 }
 0x272   : > { %v15778_v10 = vsub.s32 %v3373_v39, %v3436_v3  ;;  %v15835_v39 = vadd.s32 112, %v15735_v38  ;;  %v15931_v2 = vmul.u32.u64.low 3817748708, %v15873_v51  ;;  %v15932_v3 = vmul.u32.u64.high 3817748708, %v15873_v51, %v15931_v2 }
 0x273   : > { %v3469_v29 = vmul.u32 18, %v3468_v18  ;;  %v3545_v2 = vshrl.u32 %v15902_v59, 4  ;;  %v3578_v59 = vshrl.u32 %v15915_v62, 4 }
 0x274   : > { %vm3805_vm2 = vcmp.ne.s32.totalorder %v15778_v10, 0  ;;  %vm3841_vm3 = vcmp.lt.s32.totalorder %v15778_v10, 0  ;;  %v15800_v22 = vadd.s32 18, %v15778_v10 }
 0x275   : > { %v15842_v41 = vsub.s32 %v3376_v55, %v3469_v29  ;;  %vm15863_vm14 = vmand %vm3841_vm3, %vm3805_vm2  ;;  %v15869_v49 = vmul.u32.u64.low 3817748708, %v15835_v39  ;;  %v15870_v50 = vmul.u32.u64.high 3817748708, %v15835_v39, %v15869_v49 }
 0x276   : > { %v3949_v24 = vsel %vm15863_vm14, %v15800_v22, %v15778_v10  ;;  %v16015_v49 = vld [vmem:[#allocation2 + $0x2] sm:$0xff]  ;;  %v16417_v22 = vadd.s32 216, %v15735_v38 }
 0x277   : > { %13883 = vmatmul.mubr.msk.bf16.gmra.mrb[16].mxu0 %vm539_vm1, %v3010_v8  ;;  %v3447_v8 = vmul.u32 18, %v3446_v0  ;;  %vm3808_vm2 = vcmp.ne.s32.totalorder %v15842_v41, 0  ;;  %v20553_v0 = vmov 0  ;;  %v15974_v18 = vadd.s32 18, %v15842_v41  ;;  %20563 = vst [vmem:[#allocation4_spill] sm:$0xff] %v16015_v49 }
 0x278   : > { %13886 = vmatprep.mubr.msk.bf16.mxu0 %vm539_vm1, %v3011_v9  ;;  %v3479_v9 = vshrl.u32 %v15757_v54, 4  ;;  %v15889_v54 = vadd.s32 128, %v15735_v38 }
 0x279   : > { %v15788_v16 = vsub.s32 %v3374_v40, %v3447_v8 }
 0x27a   : > { %v3480_v17 = vmul.u32 18, %v3479_v9  ;;  %v15951_v9 = vadd.s32 18, %v15826_v33 }
 0x27b   : > { %vm3806_vm6 = vcmp.ne.s32.totalorder %v15788_v16, 0  ;;  %vm3842_vm7 = vcmp.lt.s32.totalorder %v15788_v16, 0 }
 0x27c   : > { %v15812_v28 = vsub.s32 %v3377_v48, %v3480_v17  ;;  %vm15895_vm3 = vmand %vm3842_vm7, %vm3806_vm6  ;;  %vm3813_vm6 = vcmp.ne.s32.totalorder %v15854_v46, 0  ;;  %v20559_v17 = vmov 0 }
 0x27e   : > { %vm3809_vm10 = vcmp.ne.s32.totalorder %v15812_v28, 0  ;;  %vm3845_vm11 = vcmp.lt.s32.totalorder %v15812_v28, 0  ;;  %v15840_v40 = vadd.s32 18, %v15812_v28 }
 0x27f   : > { %13887 = vmatmul.mubr.msk.bf16.gmra.mrb[20].mxu0 %vm539_vm1, %v3012_v14  ;;  %v15785_v14 = vsub.s32 %v15735_v38, %v3414_v7  ;;  %vm15924_vm7 = vmand %vm3845_vm11, %vm3809_vm10  ;;  %v15947_v7 = vmul.u32.u64.low 3817748708, %v15889_v54  ;;  %v15948_v8 = vmul.u32.u64.high 3817748708, %v15889_v54, %v15947_v7 }
 0x280   : > { %13890 = vmatprep.mubr.msk.bf16.mxu0 %vm539_vm1, %v3013_v15  ;;  %v3490_v15 = vshrl.u32 %v15767_v63, 4  ;;  %v15918_v63 = vadd.s32 152, %v15735_v38  ;;  %v20554_v0 = vsel %vm15924_vm7, 4294967295, %v20553_v0 }
 0x281   : > { %vm3803_vm4 = vcmp.ne.s32.totalorder %v15785_v14, 0  ;;  %vm3839_vm5 = vcmp.lt.s32.totalorder %v15785_v14, 0 }
 0x282   : > { %v3491_v25 = vmul.u32 18, %v3490_v15  ;;  %vm15879_vm0 = vmand %vm3839_vm5, %vm3803_vm4  ;;  %vm3844_vm4 = vcmp.lt.s32.totalorder %v15842_v41, 0  ;;  %v3512_v15 = vshrl.u32 %v15847_v44, 4 }
 0x283   : > { %vm15908_vm5 = vmand %vm3840_vm9, %vm3804_vm8  ;;  %vm3849_vm8 = vcmp.lt.s32.totalorder %v15854_v46, 0 }
 0x284   : > { %v15828_v35 = vsub.s32 %v3378_v52, %v3491_v25  ;;  %vm15938_vm9 = vmand %vm3843_vm13, %vm3807_vm12  ;;  %v3513_v61 = vmul.u32 18, %v3512_v15  ;;  %v20598_v52 = vmov 0 }
 0x285   : > { %v20556_v4 = vsel %vm15938_vm9, 4294967295, %v20555_v4  ;;  %vm15969_vm11 = vmand %vm3844_vm4, %vm3808_vm2 }
 0x286   : > { %vm3810_vm15 = vcmp.ne.s32.totalorder %v15828_v35, 0  ;;  %v15962_v13 = vadd.s32 18, %v15828_v35  ;;  %v20560_v17 = vsel %vm15969_vm11, 4294967295, %v20559_v17  ;;  %vm15999_vm12 = vmand %vm3849_vm8, %vm3813_vm6  ;;  %v16053_v62 = vsub.s32 %v15820_v31, %v3513_v61 }
 0x287   : > { %13891 = vmatmul.mubr.msk.bf16.gmra.mrb[24].mxu0 %vm539_vm1, %v3014_v20  ;;  %v20562_v34 = vsel %vm15999_vm12, 4294967295, %v20561_v34 }
 0x288   : > { %13894 = vmatprep.mubr.msk.bf16.mxu0 %vm539_vm1, %v3015_v21  ;;  %v15795_v20 = vmul.u32.u64.low 3817748708, %v15781_v12  ;;  %v15796_v21 = vmul.u32.u64.high 3817748708, %v15781_v12, %v15795_v20  ;;  %20565 = vst [vmem:[#allocation6_spill] sm:$0xff] %v16053_v62  ;;  %vm20574_vm6 = vcmp.ne.s32.totalorder %v16053_v62, 0  ;;  %vm20575_vm12 = vcmp.lt.s32.totalorder %v16053_v62, 0 }
 0x289   : > { %v15977_v20 = vadd.s32 18, %v15854_v46 }
 0x28a   : > { %v3501_v42 = vshrl.u32 %v15796_v21, 4  ;;  %v15980_v21 = vmul.u32.u64.low 3817748708, %v15918_v63  ;;  %v15981_v23 = vmul.u32.u64.high 3817748708, %v15918_v63, %v15980_v21 }
 0x28b   : > { %v3556_v21 = vshrl.u32 %v15932_v3, 4  ;;  %v3579_v3 = vmul.u32 18, %v3578_v59  ;;  %v16075_v59 = vadd.s32 184, %v15735_v38 }
 0x28c   : > { %v3502_v57 = vmul.u32 18, %v3501_v42  ;;  %v3622_v42 = vshrl.u32 %v15981_v23, 4 }
 0x28d   : > { %v16084_v23 = vsub.s32 %v15857_v47, %v3579_v3 }
 0x28e   : > { %v16013_v43 = vsub.s32 %v15781_v12, %v3502_v57  ;;  %v3611_v12 = vshrl.u32 %v15944_v6, 4 }
 0x28f   : > { %13895 = vmatmul.mubr.msk.bf16.gmra.mrb[28].mxu0 %vm539_vm1, %v3016_v26  ;;  %v15806_v26 = vadd.s32 88, %v15735_v38 }
 0x290   : > { %13898 = vmatprep.mubr.msk.bf16.mxu0 %vm539_vm1, %v3017_v27  ;;  %v15809_v27 = vadd.s32 18, %v15785_v14  ;;  %vm3811_vm13 = vcmp.ne.s32.totalorder %v16013_v43, 0  ;;  %v16072_v61 = vadd.s32 18, %v16013_v43 }
 0x291   : > { %v15831_v36 = vmul.u32.u64.low 3817748708, %v15806_v26  ;;  %v15832_v37 = vmul.u32.u64.high 3817748708, %v15806_v26, %v15831_v36 }
 0x292   : > { %v3567_v36 = vshrl.u32 %v15870_v50, 4  ;;  %v3546_v50 = vmul.u32 18, %v3545_v2  ;;  %v3612_v2 = vmul.u32 18, %v3611_v12  ;;  %v20595_v10 = vsel %vm15879_vm0, %v15809_v27, %v15785_v14 }
 0x293   : > { %v3534_v1 = vshrl.u32 %v15832_v37, 4  ;;  %vm16207_vm14 = vcmp.lt.s32.totalorder %v20595_v10, 16 }
 0x294   : > { %v3568_v15 = vmul.u32 18, %v3567_v36  ;;  %v16056_v36 = vmul.u32.u64.low 3817748708, %v16025_v5  ;;  %v16057_v7 = vmul.u32.u64.high 3817748708, %v16025_v5, %v16056_v36  ;;  %v16105_v47 = vsub.s32 %v15886_v53, %v3612_v2 }
 0x295   : > { %v3535_v44 = vmul.u32 18, %v3534_v1  ;;  %v3589_v1 = vshrl.u32 %v15948_v8, 4  ;;  %v3557_v8 = vmul.u32 18, %v3556_v21  ;;  %v16145_v2 = vadd.s32 18, %v16053_v62 }
 0x296   : > { %v16065_v6 = vsub.s32 %v15835_v39, %v3568_v15  ;;  %v16081_v39 = vsub.s32 %v15850_v45, %v3546_v50  ;;  %v3623_v15 = vmul.u32 18, %v3622_v42  ;;  %20569 = vst [vmem:[#allocation8_spill] sm:$0xff] %v16105_v47  ;;  %v3600_v53 = vshrl.u32 %v16057_v7, 4 }
 0x297   : > { %13899 = vmatmul.mubr.msk.bf16.gmra.mrb[32].mxu0 %vm539_vm1, %v3018_v30  ;;  %v15816_v30 = vadd.s32 18, %v15788_v16  ;;  %vm3846_vm1 = vcmp.lt.s32.totalorder %v15828_v35, 0  ;;  %v16048_v57 = vsub.s32 %v15806_v26, %v3535_v44  ;;  %v16062_v26 = vadd.s32 160, %v15735_v38 }
 0x298   : > { %vm15957_vm10 = vmand %vm3846_vm1, %vm3810_vm15  ;;  %vm3847_vm15 = vcmp.lt.s32.totalorder %v16013_v43, 0  ;;  %v16068_v31 = vmul.u32.u64.low 3817748708, %v16044_v56  ;;  %v16069_v44 = vmul.u32.u64.high 3817748708, %v16044_v56, %v16068_v31  ;;  %v3590_v36 = vmul.u32 18, %v3589_v1 }
 0x299   : > { %v20558_v11 = vsel %vm15957_vm10, 4294967295, %v20557_v11  ;;  %vm3850_vm2 = vcmp.lt.s32.totalorder %v16048_v57, 0  ;;  %v16087_v21 = vmul.u32.u64.low 3817748708, %v16062_v26  ;;  %v16088_v12 = vmul.u32.u64.high 3817748708, %v16062_v26, %v16087_v21  ;;  %vm16100_vm4 = vmand %vm3847_vm15, %vm3811_vm13 }
 0x29a   : > { %v16094_v1 = vsub.s32 %v15873_v51, %v3557_v8  ;;  %v16108_v42 = vsub.s32 %v15889_v54, %v3590_v36  ;;  %v16111_v50 = vmul.u32.u64.low 3817748708, %v16075_v59  ;;  %v16112_v3 = vmul.u32.u64.high 3817748708, %v16075_v59, %v16111_v50 }
 0x29b   : > { %vm20570_vm1 = vcmp.ne.s32.totalorder %v16048_v57, 0  ;;  %v20571_v51 = vmov 0  ;;  %vm3851_vm15 = vcmp.lt.s32.totalorder %v16081_v39, 0  ;;  %v16126_v54 = vadd.s32 168, %v15735_v38 }
 0x29c   : > { %20566 = vst [vmem:[#allocation7_spill] sm:$0xff] %v16094_v1  ;;  %vm16118_vm8 = vmand %vm3850_vm2, %vm20570_vm1  ;;  %v16129_v8 = vadd.s32 18, %v16048_v57  ;;  %v20576_v31 = vmov 0  ;;  %vm3854_vm13 = vcmp.lt.s32.totalorder %v16084_v23, 0  ;;  %v16142_v7 = vsub.s32 %v15918_v63, %v3623_v15 }
 0x29d   : > { %v20572_v51 = vsel %vm16118_vm8, 4294967295, %v20571_v51  ;;  %20573 = vst [vmem:[#allocation9_spill] sm:$0xff] %v16126_v54  ;;  %vm16135_vm1 = vmand %vm20575_vm12, %vm20574_vm6  ;;  %vm20579_vm11 = vcmp.ne.s32.totalorder %v16065_v6, 0  ;;  %vm20580_vm10 = vcmp.lt.s32.totalorder %v16065_v6, 0  ;;  %v20581_v36 = vmov 0 }
 0x29e   : > { %v20577_v31 = vsel %vm16135_vm1, 4294967295, %v20576_v31  ;;  %20578 = vst [vmem:[#allocation10_spill] sm:$0xff] %v16142_v7  ;;  %vm16151_vm9 = vmand %vm20580_vm10, %vm20579_vm11  ;;  %vm3852_vm6 = vcmp.lt.s32.totalorder %v16094_v1, 0  ;;  %v3655_v21 = vshrl.u32 %v16069_v44, 4  ;;  %vm20583_vm2 = vcmp.ne.s32.totalorder %v16081_v39, 0 }
 0x29f   : > { %v20582_v36 = vsel %vm16151_vm9, 4294967295, %v20581_v36  ;;  %vm16160_vm7 = vmand %vm3851_vm15, %vm20583_vm2  ;;  %v20584_v63 = vmov 0  ;;  %vm3821_vm1 = vcmp.ne.s32.totalorder %v16105_v47, 0  ;;  %vm3857_vm8 = vcmp.lt.s32.totalorder %v16105_v47, 0 }
 0x2a0   : > { %v20585_v63 = vsel %vm16160_vm7, 4294967295, %v20584_v63  ;;  %v16168_v15 = vadd.s32 208, %v15735_v38  ;;  %vm20587_vm11 = vcmp.ne.s32.totalorder %v16084_v23, 0  ;;  %v20588_v50 = vmov 0 }
 0x2a1   : > { %vm16172_vm12 = vmand %vm3854_vm13, %vm20587_vm11  ;;  %v3601_v44 = vmul.u32 18, %v3600_v53  ;;  %v16178_v37 = vmul.u32.u64.low 3817748708, %v16126_v54  ;;  %v16179_v29 = vmul.u32.u64.high 3817748708, %v16126_v54, %v16178_v37  ;;  %vm16186_vm2 = vcmp.lt.s32.totalorder %v3949_v24, 16 }
 0x2a2   : > { %20586 = vst [vmem:[#allocation11_spill] sm:$0xff] %v16168_v15  ;;  %v20589_v50 = vsel %vm16172_vm12, 4294967295, %v20588_v50  ;;  %v16191_v49 = vadd.s32 18, %v16065_v6  ;;  %vm20592_vm13 = vcmp.ne.s32.totalorder %v16094_v1, 0  ;;  %v20593_v53 = vmov 0 }
 0x2a3   : > { %vm16195_vm11 = vmand %vm3852_vm6, %vm20592_vm13  ;;  %vm3822_vm15 = vcmp.ne.s32.totalorder %v16142_v7, 0  ;;  %vm3858_vm10 = vcmp.lt.s32.totalorder %v16142_v7, 0  ;;  %v3633_v48 = vshrl.u32 %v16088_v12, 4  ;;  %v16212_v24 = vadd.s32 18, %v16081_v39 }
 0x2a4   : > { %v20594_v53 = vsel %vm16195_vm11, 4294967295, %v20593_v53  ;;  %v16215_v37 = vadd.s32 18, %v16084_v23  ;;  %v16218_v58 = vadd.s32 18, %v16094_v1  ;;  %vm16224_vm6 = vmand %vm3857_vm8, %vm3821_vm1  ;;  %v3656_v14 = vmul.u32 18, %v3655_v21 }
 0x2a5   : > { %v20599_v52 = vsel %vm16224_vm6, 4294967295, %v20598_v52  ;;  %v20600_v27 = vsel %vm15895_vm3, %v15816_v30, %v15788_v16  ;;  %v16238_v10 = vadd.s32 18, %v16105_v47  ;;  %vm20603_vm13 = vcmp.ne.s32.totalorder %v16108_v42, 0 }
 0x2a6   : > { %vm16233_vm0 = vcmp.lt.s32.totalorder %v20600_v27, 16  ;;  %vm20604_vm8 = vcmp.lt.s32.totalorder %v16108_v42, 0  ;;  %v20605_v54 = vmov 0  ;;  %v16249_v55 = vadd.s32 18, %v16108_v42 }
 0x2a7   : > { %vm16244_vm1 = vmand %vm20604_vm8, %vm20603_vm13  ;;  %v16252_v16 = vadd.s32 18, %v16142_v7  ;;  %v3666_v30 = vshrl.u32 %v16112_v3, 4  ;;  %v20608_v21 = vsel %vm15908_vm5, %v15824_v32, %v15792_v19  ;;  %v20611_v3 = vmov 0 }
 0x2a8   : > { %v20606_v54 = vsel %vm16244_vm1, 4294967295, %v20605_v54  ;;  %vm16260_vm3 = vcmp.lt.s32.totalorder %v20608_v21, 16  ;;  %vm16272_vm13 = vmand %vm3858_vm10, %vm3822_vm15  ;;  %v16277_v60 = vsub.s32 %v16025_v5, %v3601_v44  ;;  %v16286_v21 = vld [vmem:[%s20506_s2] ss:$0 sm:$0xff]  ;;  %vm20613_vm5 = vnez %v20572_v51 }
 0x2a9   : > { %20607 = vst [vmem:[#allocation12_spill] sm:$0xff] %v20606_v54  ;;  %v20612_v3 = vsel %vm16272_vm13, 4294967295, %v20611_v3  ;;  %v16280_v19 = vmul.u32.u64.low 3817748708, %v16168_v15  ;;  %v16281_v32 = vmul.u32.u64.high 3817748708, %v16168_v15, %v16280_v19  ;;  %vm20614_vm10 = vnez %v20577_v31 }
 0x2aa   : > { %v3634_v19 = vmul.u32 18, %v3633_v48  ;;  %v16313_v62 = vsub.s32 %v16044_v56, %v3656_v14  ;;  %v3667_v5 = vmul.u32 18, %v3666_v30  ;;  %v3644_v1 = vshrl.u32 %v16179_v29, 4 }
 0x2ab   : > { %v16331_v48 = vadd.s32 192, %v15735_v38  ;;  %vm20615_vm8 = vnez %v20554_v0  ;;  %vm20619_vm15 = vnez %v20556_v4  ;;  %vm20623_vm11 = vnez %v20558_v11 }
 0x2ac   : > { %v20616_v15 = vsel %vm20615_vm8, %v15840_v40, %v15812_v28  ;;  %v16348_v29 = vsub.s32 %v16062_v26, %v3634_v19  ;;  %v20620_v28 = vsel %vm20619_vm15, %v15951_v9, %v15826_v33  ;;  %v16373_v33 = vadd.s32 18, %v16313_v62 }
 0x2ad   : > { %vm16339_vm13 = vcmp.lt.s32.totalorder %v20616_v15, 16  ;;  %vm16356_vm8 = vcmp.lt.s32.totalorder %v20620_v28, 16  ;;  %v16376_v9 = vsub.s32 %v16075_v59, %v3667_v5  ;;  %vm20627_vm15 = vnez %v20560_v17 }
 0x2ae   : > { %v20628_v11 = vsel %vm20627_vm15, %v15974_v18, %v15842_v41  ;;  %vm20631_vm6 = vcmp.ne.s32.totalorder %v16277_v60, 0  ;;  %vm20632_vm1 = vcmp.lt.s32.totalorder %v16277_v60, 0  ;;  %v3645_v25 = vmul.u32 18, %v3644_v1 }
 0x2af   : > { %vm16393_vm7 = vmand %vm20632_vm1, %vm20631_vm6  ;;  %vm20636_vm15 = vcmp.lt.s32.totalorder %v16313_v62, 0  ;;  %vm3823_vm6 = vcmp.ne.s32.totalorder %v16348_v29, 0  ;;  %v16426_v12 = vadd.s32 18, %v16348_v29  ;;  %vm3862_vm1 = vcmp.lt.s32.totalorder %v16376_v9, 0 }
 0x2b0   : > { %v16514_v31 = vadd.s32 240, %v15735_v38  ;;  %v16643_v45 = vadd.s32 272, %v15735_v38 }
 0x32a   : > { %v13868_v44 = vpop.f32.mrb[0].mxu0 }
 0x32b   : > { %v3300_v56 = vadd.f32 %v13868_v44, %v16286_v21  ;;  %v3112_v14 = vpop.f32.mrb[1].mxu0  ;;  %v16345_v44 = vadd.s32 18, %v16277_v60 }
 0x32c   : > { %v3298_v47 = vadd.f32 %v16286_v21, %v3112_v14  ;;  %v13869_v54 = vpop.f32.mrb[2].mxu0 }
 0x32d   : > { %v3336_v46 = vmax.f32 %v3300_v56, 0.0  ;;  %v3301_v14 = vadd.f32 %v13869_v54, %v16286_v21  ;;  %v3115_v7 = vpop.f32.mrb[3].mxu0  ;;  %v20624_v54 = vsel %vm20623_vm11, %v15962_v13, %v15828_v35  ;;  %vm16385_vm11 = vcmp.lt.s32.totalorder %v20628_v11, 16 }
 0x32e   : > { %v3334_v0 = vmax.f32 %v3298_v47, 0.0  ;;  %v3299_v26 = vadd.f32 %v16286_v21, %v3115_v7  ;;  %vm16368_vm12 = vcmp.lt.s32.totalorder %v20624_v54, 16  ;;  %v16429_v56 = vadd.s32 200, %v15735_v38  ;;  %v20640_v54 = vld [vmem:[#allocation3_spill] sm:$0xff] }
 0x32f   : > { %v4171_v47 = vsel %vm16186_vm2, %v3336_v46, 0.0  ;;  %v3337_v15 = vmax.f32 %v3301_v14, 0.0  ;;  %v3699_v46 = vshrl.u32 %v16281_v32, 4  ;;  %vm20635_vm2 = vcmp.ne.s32.totalorder %v16313_v62, 0 }
 0x330   : > { %4207 = vst [vmem:[#allocation2 + $0x23] sm:$0xff] %v4171_v47  ;;  %v4169_v17 = vsel %vm16207_vm14, %v3334_v0, 0.0  ;;  %v3335_v41 = vmax.f32 %v3299_v26, 0.0  ;;  %vm16404_vm9 = vmand %vm20636_vm15, %vm20635_vm2  ;;  %v16409_v59 = vmul.u32.u64.low 3817748708, %v16331_v48  ;;  %v16410_v7 = vmul.u32.u64.high 3817748708, %v16331_v48, %v16409_v59 }
 0x331   : > { %4205 = vst [vmem:[#allocation2 + $0x13] sm:$0xff] %v4169_v17  ;;  %v4172_v1 = vsel %vm16233_vm0, %v3337_v15, 0.0  ;;  %vm3859_vm14 = vcmp.lt.s32.totalorder %v16348_v29, 0  ;;  %vm3826_vm0 = vcmp.ne.s32.totalorder %v16376_v9, 0  ;;  %v16457_v17 = vadd.s32 18, %v16376_v9 }
 0x332   : > { %4208 = vst [vmem:[#allocation2 + $0x2b] sm:$0xff] %v4172_v1  ;;  %v4170_v32 = vsel %vm16260_vm3, %v3335_v41, 0.0  ;;  %v13872_v5 = vpop.f32.mrb[4].mxu0  ;;  %vm20639_vm3 = vnez %v20562_v34  ;;  %vm16452_vm15 = vmand %vm3859_vm14, %vm3823_vm6  ;;  %v20646_v41 = vld [vmem:[#allocation9_spill] sm:$0xff]  ;;  %v3700_v59 = vmul.u32 18, %v3699_v46 }
 0x333   : > { %4206 = vst [vmem:[#allocation2 + $0x1b] sm:$0xff] %v4170_v32  ;;  %v3304_v14 = vadd.f32 %v13872_v5, %v16286_v21  ;;  %v3128_v28 = vpop.f32.mrb[5].mxu0  ;;  %v20641_v47 = vsel %vm20639_vm3, %v15977_v20, %v20640_v54  ;;  %v16460_v34 = vsub.s32 %v20646_v41, %v3645_v25  ;;  %v20647_v5 = vsel %vm16100_vm4, %v16072_v61, %v16013_v43 }
 0x334   : > { %v3302_v0 = vadd.f32 %v16286_v21, %v3128_v28  ;;  %v13873_v26 = vpop.f32.mrb[6].mxu0  ;;  %vm16444_vm2 = vcmp.lt.s32.totalorder %v20641_v47, 16  ;;  %vm16468_vm6 = vcmp.lt.s32.totalorder %v20647_v5, 16 }
 0x335   : > { %v3340_v20 = vmax.f32 %v3304_v14, 0.0  ;;  %v3305_v1 = vadd.f32 %v13873_v26, %v16286_v21  ;;  %v3131_v32 = vpop.f32.mrb[7].mxu0  ;;  %v16473_v54 = vmul.u32.u64.low 3817748708, %v16417_v22  ;;  %v16474_v47 = vmul.u32.u64.high 3817748708, %v16417_v22, %v16473_v54 }
 0x336   : > { %v3338_v25 = vmax.f32 %v3302_v0, 0.0  ;;  %v3303_v46 = vadd.f32 %v16286_v21, %v3131_v32  ;;  %v20650_v14 = vsel %vm20613_vm5, %v16129_v8, %v16048_v57  ;;  %v20653_v0 = vld [vmem:[#allocation6_spill] sm:$0xff]  ;;  %v20657_v8 = vmov 0 }
 0x337   : > { %vm16482_vm14 = vcmp.lt.s32.totalorder %v20650_v14, 16  ;;  %v16487_v43 = vmul.u32.u64.low 3817748708, %v16429_v56  ;;  %v16488_v61 = vmul.u32.u64.high 3817748708, %v16429_v56, %v16487_v43  ;;  %v4175_v26 = vsel %vm16339_vm13, %v3340_v20, 0.0  ;;  %vm16509_vm13 = vmand %vm3862_vm1, %vm3826_vm0  ;;  %v14573_v57 = vld [vmem:[%s20507_s3] sm:$0xff]  }
 0x338   : > { %v3341_v41 = vmax.f32 %v3305_v1, 0.0  ;;  %v20654_v51 = vsel %vm20614_vm10, %v16145_v2, %v20653_v0  ;;  %v20658_v8 = vsel %vm16509_vm13, 4294967295, %v20657_v8  ;;  %4211 = vst [vmem:[#allocation2 + $0x43] sm:$0xff] %v4175_v26  ;;  %v4173_v2 = vsel %vm16356_vm8, %v3338_v25, 0.0  ;;  %v4383_v54 = vld [vmem:[#allocation2 + $0x12] sm:$0xff] }
 0x339   : > { %vm16497_vm4 = vcmp.lt.s32.totalorder %v20654_v51, 16  ;;  %v3339_v30 = vmax.f32 %v3303_v46, 0.0  ;;  %v3677_v20 = vshrl.u32 %v16410_v7, 4  ;;  %v16520_v1 = vadd.s32 224, %v15735_v38  ;;  %4209 = vst [vmem:[#allocation2 + $0x33] sm:$0xff] %v4173_v2  ;;  %v4386_v26 = vld [vmem:[#allocation2 + $0x2a] sm:$0xff] }
 0x33a   : > { %v4176_v5 = vsel %vm16368_vm12, %v3341_v41, 0.0  ;;  %vm3824_vm5 = vcmp.ne.s32.totalorder %v16460_v34, 0  ;;  %v16526_v14 = vadd.s32 248, %v15735_v38  ;;  %v16529_v43 = vadd.s32 232, %v15735_v38  ;;  %v13876_v7 = vpop.f32.mrb[8].mxu0  ;;  %v4384_v25 = vld [vmem:[#allocation2 + $0x1a] sm:$0xff] }
 0x33b   : > { %4212 = vst [vmem:[#allocation2 + $0x4b] sm:$0xff] %v4176_v5  ;;  %v4174_v40 = vsel %vm16385_vm11, %v3339_v30, 0.0  ;;  %v4385_v46 = vld [vmem:[#allocation2 + $0x22] sm:$0xff]  ;;  %vm3860_vm12 = vcmp.lt.s32.totalorder %v16460_v34, 0  ;;  %v3308_v51 = vadd.f32 %v13876_v7, %v16286_v21  ;;  %v3144_v2 = vpop.f32.mrb[9].mxu0  ;;  %v16542_v35 = vpack.c.bf16 %v4384_v25, %v4383_v54 }
 0x33c   : > { %v20659_v41 = vld [vmem:[#allocation11_spill] sm:$0xff]  ;;  %4210 = vst [vmem:[#allocation2 + $0x3b] sm:$0xff] %v4174_v40  ;;  %v16545_v30 = vmul.u32.u64.low 3817748708, %v16514_v31  ;;  %v16546_v5 = vmul.u32.u64.high 3817748708, %v16514_v31, %v16545_v30  ;;  %v3306_v4 = vadd.f32 %v16286_v21, %v3144_v2  ;;  %v13877_v27 = vpop.f32.mrb[10].mxu0  ;;  %vm20660_vm10 = vnez %v20582_v36 }
 0x33d   : > { %v16539_v0 = vsub.s32 %v20659_v41, %v3700_v59  ;;  %v20661_v59 = vsel %vm20660_vm10, %v16191_v49, %v16065_v6  ;;  %v3678_v54 = vmul.u32 18, %v3677_v20  ;;  %v3344_v41 = vmax.f32 %v3308_v51, 0.0  ;;  %v3147_v19 = vpop.f32.mrb[11].mxu0  ;;  %4599 = vmatprep.mubr.bf16.mxu1 %v16542_v35 }
 0x33e   : > { %vm16557_vm8 = vcmp.lt.s32.totalorder %v20661_v59, 16  ;;  %v16562_v7 = vmul.u32.u64.low 3817748708, %v16520_v1  ;;  %v16563_v25 = vmul.u32.u64.high 3817748708, %v16520_v1, %v16562_v7  ;;  %v3309_v30 = vadd.f32 %v13877_v27, %v16286_v21  ;;  %v20668_v27 = vld [vmem:[#allocation5_spill] sm:$0xff]  ;;  %v20669_v59 = vld [vmem:[#allocation4_spill] sm:$0xff] }
 0x33f   : > { %v16567_v2 = vpack.c.bf16 %v4386_v26, %v4385_v46  ;;  %vm20664_vm11 = vnez %v20585_v63  ;;  %v3710_v36 = vshrl.u32 %v16474_v47, 4  ;;  %v3342_v20 = vmax.f32 %v3306_v4, 0.0 }
 0x340   : > { %v20665_v49 = vsel %vm20664_vm11, %v16212_v24, %v16081_v39  ;;  %v3307_v51 = vadd.f32 %v16286_v21, %v3147_v19  ;;  %v20670_v7 = vpack.c.bf16 %v20668_v27, %v20669_v59  ;;  %vm20671_vm1 = vnez %v20589_v50  ;;  %v20676_v50 = vld [vmem:[#allocation7_spill] sm:$0xff] }
 0x341   : > { %vm16574_vm0 = vcmp.lt.s32.totalorder %v20665_v49, 16  ;;  %v20672_v63 = vsel %vm20671_vm1, %v16215_v37, %v16084_v23  ;;  %v16593_v24 = vadd.s32 18, %v16460_v34  ;;  %v3688_v47 = vshrl.u32 %v16488_v61, 4  ;;  %vm16612_vm1 = vmand %vm3860_vm12, %vm3824_vm5 }
 0x342   : > { %4600 = vmatmul.mubr.bf16.vlgmr.msra.gmra.mrb[0].mxu1 %v20670_v7  ;;  %vm16588_vm3 = vcmp.lt.s32.totalorder %v20672_v63, 16  ;;  %v4179_v19 = vsel %vm16444_vm2, %v3344_v41, 0.0  ;;  %v3345_v46 = vmax.f32 %v3309_v30, 0.0  ;;  %vm20675_vm10 = vnez %v20594_v53 }
 0x343   : > { %4607 = vmatprep.mubr.bf16.mxu1 %v16567_v2  ;;  %v20677_v23 = vsel %vm20675_vm10, %v16218_v58, %v20676_v50  ;;  %vm3829_vm2 = vcmp.ne.s32.totalorder %v16539_v0, 0  ;;  %vm3865_vm13 = vcmp.lt.s32.totalorder %v16539_v0, 0  ;;  %4841 = vmatpush1.bf16.msra.mxu1 %v14573_v57  ;;  %v14574_v58 = vld [vmem:[%s20507_s3 + $0x8] sm:$0xff]   ;;  %4215 = vst [vmem:[#allocation2 + $0x63] sm:$0xff] %v4179_v19  ;;  %v4177_v53 = vsel %vm16468_vm6, %v3342_v20, 0.0  ;;  %v13880_v20 = vpop.f32.mrb[12].mxu0 }
 0x344   : > { %vm16604_vm11 = vcmp.lt.s32.totalorder %v20677_v23, 16  ;;  %v3343_v15 = vmax.f32 %v3307_v51, 0.0  ;;  %v16624_v26 = vadd.s32 18, %v16539_v0  ;;  %v16627_v4 = vsub.s32 %v16331_v48, %v3678_v54  ;;  %4213 = vst [vmem:[#allocation2 + $0x53] sm:$0xff] %v4177_v53  ;;  %v4388_v51 = vld [vmem:[#allocation2 + $0x3a] sm:$0xff]  ;;  %v3160_v59 = vpop.f32.mrb[13].mxu0 }
 0x345   : > { %v20682_v41 = vmov 0   ;;  %v4180_v57 = vsel %vm16482_vm14, %v3345_v46, 0.0  ;;  %v3711_v30 = vmul.u32 18, %v3710_v36  ;;  %v3968_v48 = vsel %vm16612_vm1, %v16593_v24, %v16460_v34  ;;  %v14575_v19 = vld [vmem:[%s20507_s3 + $0x10] sm:$0xff]   ;;  %v13881_v46 = vpop.f32.mrb[14].mxu0 }
 0x346   : > { %4842 = vmatprep.subr.bf16.mxu1 %v20682_v41  ;;  %v16633_v49 = vmul.u32.u64.low 3817748708, %v16526_v14  ;;  %v16634_v27 = vmul.u32.u64.high 3817748708, %v16526_v14, %v16633_v49  ;;  %4216 = vst [vmem:[#allocation2 + $0x6b] sm:$0xff] %v4180_v57  ;;  %v4178_v28 = vsel %vm16497_vm4, %v3343_v15, 0.0  ;;  %v3689_v54 = vmul.u32 18, %v3688_v47  ;;  %v4387_v50 = vld [vmem:[#allocation2 + $0x32] sm:$0xff] }
 0x347   : > { %4214 = vst [vmem:[#allocation2 + $0x5b] sm:$0xff] %v4178_v28  ;;  %v3312_v36 = vadd.f32 %v13880_v20, %v16286_v21  ;;  %v3743_v7 = vshrl.u32 %v16546_v5, 4  ;;  %v16648_v32 = vmul.u32.u64.low 3817748708, %v16529_v43  ;;  %v16649_v63 = vmul.u32.u64.high 3817748708, %v16529_v43, %v16648_v32  ;;  %4843 = vmatpush1.bf16.msra.mxu1 %v14574_v58  ;;  %v20684_v23 = vld [vmem:[#allocation8_spill] sm:$0xff]  ;;  %v3163_v49 = vpop.f32.mrb[15].mxu0 }
 0x348   : > { %v3310_v47 = vadd.f32 %v16286_v21, %v3160_v59  ;;  %vm20683_vm6 = vnez %v20599_v52  ;;  %vm3827_vm4 = vcmp.ne.s32.totalorder %v16627_v4, 0  ;;  %v3721_v58 = vshrl.u32 %v16563_v25, 4  ;;  %4844 = vmatprep.subr.bf16.mxu1 %v20682_v41  ;;  %v20688_v28 = vld [vmem:[#allocation12_spill] sm:$0xff]  ;;  %v14578_v5 = vld [vmem:[%s20507_s3 + $0x28] sm:$0xff]  }
 0x349   : > { %v20685_v53 = vsel %vm20683_vm6, %v16238_v10, %v20684_v23  ;;  %v3348_v15 = vmax.f32 %v3312_v36, 0.0  ;;  %v3313_v57 = vadd.f32 %v13881_v46, %v16286_v21  ;;  %v16669_v52 = vpack.c.bf16 %v4388_v51, %v4387_v50  ;;  %vm16684_vm6 = vmand %vm3865_vm13, %vm3829_vm2 }
 0x34a   : > { %vm16660_vm14 = vcmp.lt.s32.totalorder %v20685_v53, 16  ;;  %vm20689_vm12 = vnez %v20688_v28  ;;  %v16689_v51 = vsub.s32 %v16417_v22, %v3711_v30  ;;  %v3346_v36 = vmax.f32 %v3310_v47, 0.0  ;;  %4608 = vmatmul.mubr.bf16.gmra.mrb[4].mxu1 %v16542_v35  ;;  %v14577_v28 = vld [vmem:[%s20507_s3 + $0x20] sm:$0xff]  }
 0x34b   : > { %v20690_v10 = vsel %vm20689_vm12, %v16249_v55, %v16108_v42  ;;  %v3311_v59 = vadd.f32 %v16286_v21, %v3163_v49  ;;  %vm20695_vm12 = vnez %v20612_v3  ;;  %v20696_v42 = vld [vmem:[#allocation10_spill] sm:$0xff]  ;;  %v16703_v46 = vadd.s32 18, %v16627_v4  ;;  %4615 = vmatprep.mubr.bf16.mxu1 %v16669_v52  ;;  %4845 = vmatpush1.bf16.msra.mxu1 %v14575_v19  ;;  %v13884_v19 = vpop.f32.mrb[16].mxu0 }
 0x34c   : > { %vm16676_vm10 = vcmp.lt.s32.totalorder %v20690_v10, 16  ;;  %v20697_v55 = vsel %vm20695_vm12, %v16252_v16, %v20696_v42  ;;  %v16706_v22 = vadd.s32 256, %v15735_v38  ;;  %v4183_v30 = vsel %vm16557_vm8, %v3348_v15, 0.0  ;;  %4846 = vmatprep.subr.bf16.mxu1 %v20682_v41  ;;  %v4389_v15 = vld [vmem:[#allocation2 + $0x42] sm:$0xff]  ;;  %v3176_v49 = vpop.f32.mrb[17].mxu0  ;;  %v14580_v42 = vld [vmem:[%s20507_s3 + $0x38] sm:$0xff]  }
 0x34d   : > { %vm16698_vm5 = vcmp.lt.s32.totalorder %v20697_v55, 16  ;;  %v3349_v47 = vmax.f32 %v3313_v57, 0.0  ;;  %v20700_v16 = vsel %vm16393_vm7, %v16345_v44, %v16277_v60  ;;  %vm20703_vm2 = vcmp.lt.s32.totalorder %v16627_v4, 0  ;;  %v14576_v60 = vld [vmem:[%s20507_s3 + $0x18] sm:$0xff]   ;;  %4219 = vst [vmem:[#allocation2 + $0x83] sm:$0xff] %v4183_v30 }
 0x34e   : > { %vm16716_vm13 = vcmp.lt.s32.totalorder %v20700_v16, 16  ;;  %vm16724_vm12 = vmand %vm20703_vm2, %vm3827_vm4  ;;  %v16729_v40 = vsub.s32 %v16429_v56, %v3689_v54  ;;  %v3744_v50 = vmul.u32 18, %v3743_v7  ;;  %v4181_v44 = vsel %vm16574_vm0, %v3346_v36, 0.0  ;;  %v13885_v36 = vpop.f32.mrb[18].mxu0 }
 0x34f   : > { %v3347_v13 = vmax.f32 %v3311_v59, 0.0  ;;  %v3973_v23 = vsel %vm16684_vm6, %v16624_v26, %v16539_v0  ;;  %v3722_v53 = vmul.u32 18, %v3721_v58  ;;  %4217 = vst [vmem:[#allocation2 + $0x73] sm:$0xff] %v4181_v44  ;;  %v4184_v56 = vsel %vm16588_vm3, %v3349_v47, 0.0  ;;  %v4390_v58 = vld [vmem:[#allocation2 + $0x4a] sm:$0xff]  ;;  %4847 = vmatpush1.bf16.msra.mxu1 %v14576_v60  ;;  %v3179_v16 = vpop.f32.mrb[19].mxu0 }
 0x350   : > { %vm3830_vm7 = vcmp.ne.s32.totalorder %v16689_v51, 0  ;;  %v3754_v54 = vshrl.u32 %v16634_v27, 4  ;;  %v16746_v6 = vadd.s32 280, %v15735_v38  ;;  %4220 = vst [vmem:[#allocation2 + $0x8b] sm:$0xff] %v4184_v56  ;;  %v3971_v39 = vsel %vm16724_vm12, %v16703_v46, %v16627_v4  ;;  %4848 = vmatprep.subr.bf16.mxu1 %v20682_v41 }
 0x351   : > { %v4182_v7 = vsel %vm16604_vm11, %v3347_v13, 0.0  ;;  %vm3866_vm8 = vcmp.lt.s32.totalorder %v16689_v51, 0  ;;  %v16756_v57 = vadd.s32 18, %v16689_v51  ;;  %v3316_v27 = vadd.f32 %v13884_v19, %v16286_v21 }
 0x352   : > { %4218 = vst [vmem:[#allocation2 + $0x7b] sm:$0xff] %v4182_v7  ;;  %vm3828_vm0 = vcmp.ne.s32.totalorder %v16729_v40, 0  ;;  %vm3864_vm3 = vcmp.lt.s32.totalorder %v16729_v40, 0  ;;  %v16762_v37 = vsub.s32 %v16514_v31, %v3744_v50  ;;  %v3314_v10 = vadd.f32 %v16286_v21, %v3176_v49  ;;  %4616 = vmatmul.mubr.bf16.gmra.mrb[8].mxu1 %v16567_v2  ;;  %v13888_v19 = vpop.f32.mrb[20].mxu0 }
 0x353   : > { %v20706_v59 = vsel %vm16404_vm9, %v16373_v33, %v16313_v62  ;;  %v16778_v31 = vsub.s32 %v16520_v1, %v3722_v53  ;;  %v3732_v55 = vshrl.u32 %v16649_v63, 4  ;;  %v16782_v30 = vadd.s32 264, %v15735_v38  ;;  %4849 = vmatpush1.bf16.msra.mxu1 %v14577_v28  ;;  %vm16901_vm6 = vmand %vm3864_vm3, %vm3828_vm0 }
 0x354   : > { %vm16773_vm11 = vcmp.lt.s32.totalorder %v20706_v59, 16  ;;  %v3352_v47 = vmax.f32 %v3316_v27, 0.0  ;;  %v3317_v18 = vadd.f32 %v13885_v36, %v16286_v21  ;;  %v16786_v50 = vpack.c.bf16 %v4390_v58, %v4389_v15  ;;  %4850 = vmatprep.subr.bf16.mxu1 %v20682_v41  ;;  %v4392_v15 = vld [vmem:[#allocation2 + $0x5a] sm:$0xff] }
 0x355   : > { %v20709_v62 = vsel %vm16452_vm15, %v16426_v12, %v16348_v29  ;;  %v3755_v1 = vmul.u32 18, %v3754_v54  ;;  %v3350_v38 = vmax.f32 %v3314_v10, 0.0  ;;  %v3315_v63 = vadd.f32 %v16286_v21, %v3179_v16  ;;  %vm16812_vm15 = vmand %vm3866_vm8, %vm3830_vm7  ;;  %v4391_v10 = vld [vmem:[#allocation2 + $0x52] sm:$0xff] }
 0x356   : > { %vm16793_vm9 = vcmp.lt.s32.totalorder %v20709_v62, 16  ;;  %vm20712_vm4 = vnez %v20658_v8  ;;  %v16817_v12 = vmul.u32.u64.low 3817748708, %v16643_v45  ;;  %v16818_v2 = vmul.u32.u64.high 3817748708, %v16643_v45, %v16817_v12  ;;  %4623 = vmatprep.mubr.bf16.mxu1 %v16786_v50 }
 0x357   : > { %v20713_v60 = vsel %vm20712_vm4, %v16457_v17, %v16376_v9  ;;  %v4187_v8 = vsel %vm16660_vm14, %v3352_v47, 0.0  ;;  %v3353_v9 = vmax.f32 %v3317_v18, 0.0  ;;  %vm16828_vm4 = vcmp.lt.s32.totalorder %v3968_v48, 16  ;;  %4851 = vmatpush1.bf16.msra.mxu1 %v14578_v5 }
 0x358   : > { %vm16804_vm2 = vcmp.lt.s32.totalorder %v20713_v60, 16  ;;  %v16833_v44 = vmul.u32.u64.low 3817748708, %v16706_v22  ;;  %v16834_v13 = vmul.u32.u64.high 3817748708, %v16706_v22, %v16833_v44  ;;  %4223 = vst [vmem:[#allocation2 + $0xa3] sm:$0xff] %v4187_v8  ;;  %v4185_v61 = vsel %vm16676_vm10, %v3350_v38, 0.0  ;;  %4852 = vmatprep.subr.bf16.mxu1 %v20682_v41 }
 0x359   : > { %v3351_v53 = vmax.f32 %v3315_v63, 0.0  ;;  %v16842_v34 = vmul.u32.u64.low 3817748708, %v16746_v6  ;;  %v16843_v24 = vmul.u32.u64.high 3817748708, %v16746_v6, %v16842_v34  ;;  %4221 = vst [vmem:[#allocation2 + $0x93] sm:$0xff] %v4185_v61  ;;  %v4188_v48 = vsel %vm16698_vm5, %v3353_v9, 0.0  ;;  %v4393_v9 = vld [vmem:[#allocation2 + $0x62] sm:$0xff] }
 0x35a   : > { %v3974_v56 = vsel %vm16812_vm15, %v16756_v57, %v16689_v51  ;;  %v16853_v54 = vadd.s32 18, %v16729_v40  ;;  %v3733_v20 = vmul.u32 18, %v3732_v55  ;;  %4224 = vst [vmem:[#allocation2 + $0xab] sm:$0xff] %v4188_v48  ;;  %v16858_v58 = vsub.s32 %v16526_v14, %v3755_v1  ;;  %v3192_v57 = vpop.f32.mrb[21].mxu0  ;;  %v14579_v14 = vld [vmem:[%s20507_s3 + $0x30] sm:$0xff]   ;;  %4624 = vmatmul.mubr.bf16.gmra.mrb[12].mxu1 %v16669_v52  ;;  %v14581_v34 = vld [vmem:[%s20507_s3 + $0x40] sm:$0xff]  }
 0x35b   : > { %v4186_v7 = vsel %vm16716_vm13, %v3351_v53, 0.0  ;;  %v16861_v32 = vmul.u32.u64.low 3817748708, %v16782_v30  ;;  %v16862_v27 = vmul.u32.u64.high 3817748708, %v16782_v30, %v16861_v32  ;;  %v3320_v51 = vadd.f32 %v13888_v19, %v16286_v21  ;;  %v13889_v28 = vpop.f32.mrb[22].mxu0  ;;  %4853 = vmatpush1.bf16.msra.mxu1 %v14579_v14  ;;  %v4394_v44 = vld [vmem:[#allocation2 + $0x6a] sm:$0xff] }
 0x35c   : > { %4222 = vst [vmem:[#allocation2 + $0x9b] sm:$0xff] %v4186_v7  ;;  %vm3833_vm1 = vcmp.ne.s32.totalorder %v16762_v37, 0  ;;  %vm3869_vm14 = vcmp.lt.s32.totalorder %v16762_v37, 0  ;;  %v16868_v3 = vadd.s32 18, %v16762_v37  ;;  %v3318_v49 = vadd.f32 %v16286_v21, %v3192_v57  ;;  %v3195_v25 = vpop.f32.mrb[23].mxu0  ;;  %4854 = vmatprep.subr.bf16.mxu1 %v20682_v41 }
 0x35d   : > { %vm16879_vm5 = vcmp.lt.s32.totalorder %v3973_v23, 16  ;;  %vm3831_vm10 = vcmp.ne.s32.totalorder %v16778_v31, 0  ;;  %vm3867_vm13 = vcmp.lt.s32.totalorder %v16778_v31, 0  ;;  %v16886_v59 = vadd.s32 18, %v16778_v31  ;;  %vm16914_vm8 = vmand %vm3869_vm14, %vm3833_vm1  ;;  %v13892_v8 = vpop.f32.mrb[24].mxu0 }
 0x35e   : > { %v3356_v55 = vmax.f32 %v3320_v51, 0.0  ;;  %v3321_v47 = vadd.f32 %v13889_v28, %v16286_v21  ;;  %v16890_v18 = vpack.c.bf16 %v4392_v15, %v4391_v10  ;;  %v16893_v0 = vsub.s32 %v16529_v43, %v3733_v20  ;;  %v3208_v61 = vpop.f32.mrb[25].mxu0 }
 0x35f   : > { %v3354_v26 = vmax.f32 %v3318_v49, 0.0  ;;  %v3319_v23 = vadd.f32 %v16286_v21, %v3195_v25  ;;  %vm3834_vm7 = vcmp.ne.s32.totalorder %v16858_v58, 0  ;;  %v3787_v62 = vshrl.u32 %v16818_v2, 4  ;;  %4855 = vmatpush1.bf16.msra.mxu1 %v14580_v42  ;;  %v13893_v48 = vpop.f32.mrb[26].mxu0 }
 0x360   : > { %v4191_v43 = vsel %vm16773_vm11, %v3356_v55, 0.0  ;;  %v3357_v1 = vmax.f32 %v3321_v47, 0.0  ;;  %4631 = vmatprep.mubr.bf16.mxu1 %v16890_v18  ;;  %vm3870_vm0 = vcmp.lt.s32.totalorder %v16858_v58, 0  ;;  %v3765_v38 = vshrl.u32 %v16834_v13, 4  ;;  %vm16938_vm11 = vmand %vm3867_vm13, %vm3831_vm10  ;;  %4856 = vmatprep.subr.bf16.mxu1 %v20682_v41  ;;  %v3211_v7 = vpop.f32.mrb[27].mxu0  ;;  %v14588_v47 = vld [vmem:[%s20507_s3 + $0x78] sm:$0xff]  }
 0x361   : > { %4227 = vst [vmem:[#allocation2 + $0xc3] sm:$0xff] %v4191_v43  ;;  %v4189_v63 = vsel %vm16793_vm9, %v3354_v26, 0.0  ;;  %v3355_v60 = vmax.f32 %v3319_v23, 0.0  ;;  %vm16930_vm3 = vcmp.lt.s32.totalorder %v3971_v39, 16  ;;  %v3798_v33 = vshrl.u32 %v16843_v24, 4  ;;  %vm16965_vm9 = vmand %vm3870_vm0, %vm3834_vm7  ;;  %v4396_v23 = vld [vmem:[#allocation2 + $0x7a] sm:$0xff] }
 0x362   : > { %4225 = vst [vmem:[#allocation2 + $0xb3] sm:$0xff] %v4189_v63  ;;  %v4192_v4 = vsel %vm16804_vm2, %v3357_v1, 0.0  ;;  %vm16946_vm12 = vcmp.lt.s32.totalorder %v3974_v56, 16  ;;  %v3972_v35 = vsel %vm16901_vm6, %v16853_v54, %v16729_v40  ;;  %v3942_v39 = vadd.s32 18, %v16858_v58  ;;  %4632 = vmatmul.mubr.bf16.gmra.mrb[16].mxu1 %v16786_v50  ;;  %v13896_v25 = vpop.f32.mrb[28].mxu0  ;;  %v4296_v40 = vld [vmem:[#allocation2 + $0x9] sm:$0xff] }
 0x363   : > { %4228 = vst [vmem:[#allocation2 + $0xcb] sm:$0xff] %v4192_v4  ;;  %v4190_v2 = vsel %vm16828_vm4, %v3355_v60, 0.0  ;;  %v3977_v11 = vsel %vm16914_vm8, %v16868_v3, %v16762_v37  ;;  %v3788_v13 = vmul.u32 18, %v3787_v62  ;;  %v3776_v17 = vshrl.u32 %v16862_v27, 4  ;;  %4857 = vmatpush1.bf16.msra.mxu1 %v14581_v34  ;;  %v3224_v43 = vpop.f32.mrb[29].mxu0 }
 0x364   : > { %4226 = vst [vmem:[#allocation2 + $0xbb] sm:$0xff] %v4190_v2  ;;  %v3324_v5 = vadd.f32 %v13892_v8, %v16286_v21  ;;  %v3975_v37 = vsel %vm16938_vm11, %v16886_v59, %v16778_v31  ;;  %vm3832_vm2 = vcmp.ne.s32.totalorder %v16893_v0, 0  ;;  %v3766_v53 = vmul.u32 18, %v3765_v38  ;;  %4858 = vmatprep.subr.bf16.mxu1 %v20682_v41  ;;  %v13897_v38 = vpop.f32.mrb[30].mxu0  ;;  %v4399_v59 = vld [vmem:[#allocation2 + $0x92] sm:$0xff] }
 0x365   : > { %v3322_v24 = vadd.f32 %v16286_v21, %v3208_v61  ;;  %vm3868_vm15 = vcmp.lt.s32.totalorder %v16893_v0, 0  ;;  %v16982_v56 = vadd.s32 18, %v16893_v0  ;;  %v3799_v54 = vmul.u32 18, %v3798_v33  ;;  %v3227_v29 = vpop.f32.mrb[31].mxu0  ;;  %v4298_v61 = vld [vmem:[#allocation2 + $0x19] sm:$0xff] }
 0x366   : > { %v3360_v31 = vmax.f32 %v3324_v5, 0.0  ;;  %v3325_v20 = vadd.f32 %v13893_v48, %v16286_v21  ;;  %v16986_v19 = vpack.c.bf16 %v4394_v44, %v4393_v9  ;;  %v3978_v15 = vsel %vm16965_vm9, %v3942_v39, %v16858_v58  ;;  %vm17007_vm1 = vmand %vm3868_vm15, %vm3832_vm2  ;;  %v14582_v58 = vld [vmem:[%s20507_s3 + $0x48] sm:$0xff]   ;;  %v14584_v9 = vld [vmem:[%s20507_s3 + $0x58] sm:$0xff]  }
 0x367   : > { %v3358_v32 = vmax.f32 %v3322_v24, 0.0  ;;  %v3323_v27 = vadd.f32 %v16286_v21, %v3211_v7  ;;  %v16994_v51 = vsub.s32 %v16643_v45, %v3788_v13  ;;  %v3777_v57 = vmul.u32 18, %v3776_v17  ;;  %4859 = vmatpush1.bf16.msra.mxu1 %v14582_v58  ;;  %v4397_v24 = vld [vmem:[#allocation2 + $0x82] sm:$0xff]  ;;  %v4398_v48 = vld [vmem:[#allocation2 + $0x8a] sm:$0xff] }
 0x368   : > { %v4195_v3 = vsel %vm16879_vm5, %v3360_v31, 0.0  ;;  %v3361_v14 = vmax.f32 %v3325_v20, 0.0  ;;  %vm16998_vm4 = vcmp.lt.s32.totalorder %v3972_v35, 16  ;;  %4639 = vmatprep.mubr.bf16.mxu1 %v16986_v19  ;;  %v17012_v45 = vsub.s32 %v16706_v22, %v3766_v53  ;;  %4860 = vmatprep.subr.bf16.mxu1 %v20682_v41  ;;  %v14585_v20 = vld [vmem:[%s20507_s3 + $0x60] sm:$0xff]   ;;  %v14586_v58 = vld [vmem:[%s20507_s3 + $0x68] sm:$0xff]  }
 0x369   : > { %4231 = vst [vmem:[#allocation2 + $0xe3] sm:$0xff] %v4195_v3  ;;  %v4193_v28 = vsel %vm16930_vm3, %v3358_v32, 0.0  ;;  %v3359_v10 = vmax.f32 %v3323_v27, 0.0  ;;  %v17020_v36 = vsub.s32 %v16746_v6, %v3799_v54  ;;  %vm17025_vm14 = vcmp.lt.s32.totalorder %v3977_v11, 16 }
 0x36a   : > { %4229 = vst [vmem:[#allocation2 + $0xd3] sm:$0xff] %v4193_v28  ;;  %v4196_v22 = vsel %vm16946_vm12, %v3361_v14, 0.0  ;;  %vm17029_vm5 = vcmp.lt.s32.totalorder %v3975_v37, 16  ;;  %vm17033_vm10 = vcmp.lt.s32.totalorder %v3978_v15, 16  ;;  %v3976_v26 = vsel %vm17007_vm1, %v16982_v56, %v16893_v0  ;;  %v14583_v0 = vld [vmem:[%s20507_s3 + $0x50] sm:$0xff]   ;;  %4640 = vmatmul.mubr.bf16.gmra.mrb[20].mxu1 %v16890_v18  ;;  %v13900_v53 = vpop.f32.mrb[32].mxu0 }
 0x36b   : > { %4232 = vst [vmem:[#allocation2 + $0xeb] sm:$0xff] %v4196_v22  ;;  %v4194_v6 = vsel %vm16998_vm4, %v3359_v10, 0.0  ;;  %vm3837_vm13 = vcmp.ne.s32.totalorder %v16994_v51, 0  ;;  %v17045_v16 = vsub.s32 %v16782_v30, %v3777_v57  ;;  %v3328_v62 = vadd.f32 %v13896_v25, %v16286_v21  ;;  %v4395_v30 = vld [vmem:[#allocation2 + $0x72] sm:$0xff]  ;;  %4861 = vmatpush1.bf16.msra.mxu1 %v14583_v0  ;;  %v3240_v54 = vpop.f32.mrb[33].mxu0  ;;  %v4400_v22 = vld [vmem:[#allocation2 + $0x9a] sm:$0xff] }
 0x36c   : > { %4230 = vst [vmem:[#allocation2 + $0xdb] sm:$0xff] %v4194_v6  ;;  %vm3873_vm6 = vcmp.lt.s32.totalorder %v16994_v51, 0  ;;  %v3945_v1 = vadd.s32 18, %v16994_v51  ;;  %vm3835_vm7 = vcmp.ne.s32.totalorder %v17012_v45, 0  ;;  %v3326_v52 = vadd.f32 %v16286_v21, %v3224_v43  ;;  %4862 = vmatprep.subr.bf16.mxu1 %v20682_v41  ;;  %v13901_v15 = vpop.f32.mrb[34].mxu0  ;;  %v4401_v6 = vld [vmem:[#allocation2 + $0xa2] sm:$0xff] }
 0x36d   : > { %vm3871_vm8 = vcmp.lt.s32.totalorder %v17012_v45, 0  ;;  %v3943_v42 = vadd.s32 18, %v17012_v45  ;;  %vm3838_vm0 = vcmp.ne.s32.totalorder %v17020_v36, 0  ;;  %v3364_v63 = vmax.f32 %v3328_v62, 0.0  ;;  %vm17069_vm11 = vmand %vm3873_vm6, %vm3837_vm13  ;;  %v3243_v57 = vpop.f32.mrb[35].mxu0  ;;  %v4402_v25 = vld [vmem:[#allocation2 + $0xaa] sm:$0xff] }
 0x36e   : > { %v3329_v60 = vadd.f32 %v13897_v38, %v16286_v21  ;;  %v17060_v12 = vpack.c.bf16 %v4396_v23, %v4395_v30  ;;  %vm3874_vm3 = vcmp.lt.s32.totalorder %v17020_v36, 0  ;;  %v3362_v33 = vmax.f32 %v3326_v52, 0.0  ;;  %vm17086_vm15 = vmand %vm3871_vm8, %vm3835_vm7  ;;  %v4404_v23 = vld [vmem:[#allocation2 + $0xba] sm:$0xff]  ;;  %v4405_v43 = vld [vmem:[#allocation2 + $0xc2] sm:$0xff] }
 0x36f   : > { %v3327_v4 = vadd.f32 %v16286_v21, %v3227_v29  ;;  %vm3836_vm12 = vcmp.ne.s32.totalorder %v17045_v16, 0  ;;  %vm3872_vm9 = vcmp.lt.s32.totalorder %v17045_v16, 0  ;;  %v4199_v35 = vsel %vm17025_vm14, %v3364_v63, 0.0  ;;  %vm17100_vm4 = vmand %vm3874_vm3, %vm3838_vm0  ;;  %4863 = vmatpush1.bf16.msra.mxu1 %v14584_v9 }
 0x370   : > { %v3365_v39 = vmax.f32 %v3329_v60, 0.0  ;;  %vm17077_vm2 = vcmp.lt.s32.totalorder %v3976_v26, 16  ;;  %4647 = vmatprep.mubr.bf16.mxu1 %v17060_v12  ;;  %v3946_v8 = vadd.s32 18, %v17020_v36  ;;  %4235 = vst [vmem:[#allocation2 + $0x103] sm:$0xff] %v4199_v35  ;;  %v4197_v44 = vsel %vm17029_vm5, %v3362_v33, 0.0  ;;  %vm17115_vm1 = vmand %vm3872_vm9, %vm3836_vm12  ;;  %4864 = vmatprep.subr.bf16.mxu1 %v20682_v41 }
 0x371   : > { %v3363_v11 = vmax.f32 %v3327_v4, 0.0  ;;  %v3944_v13 = vadd.s32 18, %v17045_v16  ;;  %4233 = vst [vmem:[#allocation2 + $0xf3] sm:$0xff] %v4197_v44  ;;  %v3981_v5 = vsel %vm17069_vm11, %v3945_v1, %v16994_v51  ;;  %v3979_v34 = vsel %vm17086_vm15, %v3943_v42, %v17012_v45  ;;  %v4406_v1 = vld [vmem:[#allocation2 + $0xca] sm:$0xff]  ;;  %v4407_v38 = vld [vmem:[#allocation2 + $0xd2] sm:$0xff] }
 0x372   : > { %v4200_v17 = vsel %vm17033_vm10, %v3365_v39, 0.0  ;;  %v3332_v56 = vadd.f32 %v13900_v53, %v16286_v21  ;;  %v3982_v31 = vsel %vm17100_vm4, %v3946_v8, %v17020_v36  ;;  %vm4017_vm14 = vcmp.lt.s32.totalorder %v3981_v5, 16  ;;  %4648 = vmatmul.mubr.bf16.gmra.mrb[24].mxu1 %v16986_v19  ;;  %v14587_v19 = vld [vmem:[%s20507_s3 + $0x70] sm:$0xff]  }
 0x373   : > { %4236 = vst [vmem:[#allocation2 + $0x10b] sm:$0xff] %v4200_v17  ;;  %v4198_v37 = vsel %vm17077_vm2, %v3363_v11, 0.0  ;;  %v3330_v7 = vadd.f32 %v16286_v21, %v3240_v54  ;;  %v3980_v32 = vsel %vm17115_vm1, %v3944_v13, %v17045_v16  ;;  %vm4015_vm5 = vcmp.lt.s32.totalorder %v3979_v34, 16  ;;  %4865 = vmatpush1.bf16.msra.mxu1 %v14585_v20  ;;  %v4403_v16 = vld [vmem:[#allocation2 + $0xb2] sm:$0xff]  ;;  %v4408_v52 = vld [vmem:[#allocation2 + $0xda] sm:$0xff]  ;;  %v4409_v42 = vld [vmem:[#allocation2 + $0xe2] sm:$0xff] }
 0x374   : > { %4234 = vst [vmem:[#allocation2 + $0xfb] sm:$0xff] %v4198_v37  ;;  %v3368_v27 = vmax.f32 %v3332_v56, 0.0  ;;  %v3333_v51 = vadd.f32 %v13901_v15, %v16286_v21  ;;  %v4425_v3 = vpack.c.bf16 %v4398_v48, %v4397_v24  ;;  %vm4018_vm10 = vcmp.lt.s32.totalorder %v3982_v31, 16  ;;  %4866 = vmatprep.subr.bf16.mxu1 %v20682_v41  ;;  %v4410_v63 = vld [vmem:[#allocation2 + $0xea] sm:$0xff]  ;;  %v4295_v11 = vld [vmem:[#allocation2 + $0x1] sm:$0xff]  ;;  %v4244_v48 = vld [vmem:[#allocation2 + $0x18] sm:$0xff] }
 0x375   : > { %v3366_v14 = vmax.f32 %v3330_v7, 0.0  ;;  %v3331_v49 = vadd.f32 %v16286_v21, %v3243_v57  ;;  %vm4016_vm13 = vcmp.lt.s32.totalorder %v3980_v32, 16  ;;  %v4426_v55 = vpack.c.bf16 %v4400_v22, %v4399_v59  ;;  %v15077_v17 = vld [vmem:[#allocation2] sm:$0xff]  ;;  %v4297_v53 = vld [vmem:[#allocation2 + $0x11] sm:$0xff]  ;;  %v14590_v24 = vld [vmem:[%s20507_s3 + $0x108] sm:$0xff]  }
 0x376   : > { %v4203_v50 = vsel %vm4017_vm14, %v3368_v27, 0.0  ;;  %v3369_v45 = vmax.f32 %v3333_v51, 0.0  ;;  %4655 = vmatprep.mubr.bf16.mxu1 %v4425_v3  ;;  %v4427_v26 = vpack.c.bf16 %v4402_v25, %v4401_v6  ;;  %v4428_v62 = vpack.c.bf16 %v4404_v23, %v4403_v16  ;;  %v14589_v37 = vld [vmem:[%s20507_s3 + $0x100] sm:$0xff]   ;;  %v4300_v54 = vld [vmem:[#allocation2 + $0x29] sm:$0xff]  ;;  %v14592_v32 = vld [vmem:[%s20507_s3 + $0x118] sm:$0xff]  }
 0x377   : > { %4239 = vst [vmem:[#allocation2 + $0x123] sm:$0xff] %v4203_v50  ;;  %v4201_v28 = vsel %vm4015_vm5, %v3366_v14, 0.0  ;;  %v3367_v10 = vmax.f32 %v3331_v49, 0.0  ;;  %4867 = vmatpush1.bf16.msra.mxu1 %v14586_v58  ;;  %v4429_v0 = vpack.c.bf16 %v4406_v1, %v4405_v43  ;;  %v4430_v30 = vpack.c.bf16 %v4408_v52, %v4407_v38  ;;  %v4299_v56 = vld [vmem:[#allocation2 + $0x21] sm:$0xff]  ;;  %v4243_v31 = vld [vmem:[#allocation2 + $0x10] sm:$0xff]  ;;  %v4302_v57 = vld [vmem:[#allocation2 + $0x39] sm:$0xff] }
 0x378   : > { %4237 = vst [vmem:[#allocation2 + $0x113] sm:$0xff] %v4201_v28  ;;  %v4204_v36 = vsel %vm4018_vm10, %v3369_v45, 0.0  ;;  %4868 = vmatprep.subr.bf16.mxu1 %v20682_v41  ;;  %v4431_v60 = vpack.c.bf16 %v4410_v63, %v4409_v42  ;;  %v4331_v13 = vpack.c.bf16 %v4296_v40, %v4295_v11  ;;  %v4277_v5 = vpack.c.bf16 %v15077_v17, %v15077_v17  ;;  %v14591_v20 = vld [vmem:[%s20507_s3 + $0x110] sm:$0xff]   ;;  %v4245_v27 = vld [vmem:[#allocation2 + $0x20] sm:$0xff]  ;;  %v4246_v51 = vld [vmem:[#allocation2 + $0x28] sm:$0xff] }
 0x379   : > { %4240 = vst [vmem:[#allocation2 + $0x12b] sm:$0xff] %v4204_v36  ;;  %v4202_v21 = vsel %vm4016_vm13, %v3367_v10, 0.0  ;;  %v4332_v34 = vpack.c.bf16 %v4298_v61, %v4297_v53  ;;  %v4278_v7 = vpack.c.bf16 %v4244_v48, %v4243_v31  ;;  %v4333_v15 = vpack.c.bf16 %v4300_v54, %v4299_v56  ;;  %v4301_v49 = vld [vmem:[#allocation2 + $0x31] sm:$0xff]  ;;  %v14594_v45 = vld [vmem:[%s20507_s3 + $0x128] sm:$0xff]   ;;  %v4306_v6 = vld [vmem:[#allocation2 + $0x59] sm:$0xff] }
 0x37a   : > { %4238 = vst [vmem:[#allocation2 + $0x11b] sm:$0xff] %v4202_v21  ;;  %4656 = vmatmul.mubr.bf16.gmra.mrb[28].mxu1 %v17060_v12  ;;  %v4411_v12 = vld [vmem:[#allocation2 + $0xf2] sm:$0xff]  ;;  %v4414_v46 = vld [vmem:[#allocation2 + $0x10a] sm:$0xff]  ;;  %v4279_v14 = vpack.c.bf16 %v4246_v51, %v4245_v27  ;;  %v4334_v50 = vpack.c.bf16 %v4302_v57, %v4301_v49  ;;  %v4303_v28 = vld [vmem:[#allocation2 + $0x41] sm:$0xff]  ;;  %vm7384_vm6 = vcmask 261120  }
 0x37b   : > { %4663 = vmatprep.mubr.bf16.mxu1 %v4426_v55  ;;  %4869 = vmatpush1.bf16.msra.mxu1 %v14587_v19  ;;  %v4412_v29 = vld [vmem:[#allocation2 + $0xfa] sm:$0xff]  ;;  %v4413_v4 = vld [vmem:[#allocation2 + $0x102] sm:$0xff]  ;;  %v4247_v36 = vld [vmem:[#allocation2 + $0x30] sm:$0xff] }
 0x37c   : > { %4870 = vmatprep.subr.bf16.mxu1 %v20682_v41  ;;  %v4432_v33 = vpack.c.bf16 %v4412_v29, %v4411_v12  ;;  %v4433_v35 = vpack.c.bf16 %v4414_v46, %v4413_v4  ;;  %v4248_v58 = vld [vmem:[#allocation2 + $0x38] sm:$0xff]  ;;  %v4304_v10 = vld [vmem:[#allocation2 + $0x49] sm:$0xff]  ;;  %v14597_v25 = vld [vmem:[%s20507_s3 + $0x140] sm:$0xff]  }
 0x37d   : > { %v14595_v21 = vld [vmem:[%s20507_s3 + $0x130] sm:$0xff]   ;;  %v4280_v22 = vpack.c.bf16 %v4248_v58, %v4247_v36  ;;  %v4335_v19 = vpack.c.bf16 %v4304_v10, %v4303_v28  ;;  %v14596_v59 = vld [vmem:[%s20507_s3 + $0x138] sm:$0xff]   ;;  %v4307_v1 = vld [vmem:[#allocation2 + $0x61] sm:$0xff] }
 0x37e   : > { %v4305_v23 = vld [vmem:[#allocation2 + $0x51] sm:$0xff]  ;;  %v4254_v29 = vld [vmem:[#allocation2 + $0x68] sm:$0xff]  ;;  %v4310_v12 = vld [vmem:[#allocation2 + $0x79] sm:$0xff] }
 0x37f   : > { %4871 = vmatpush1.bf16.msra.mxu1 %v14588_v47  ;;  %v4415_v2 = vld [vmem:[#allocation2 + $0x112] sm:$0xff]  ;;  %v4250_v47 = vld [vmem:[#allocation2 + $0x48] sm:$0xff]  ;;  %v4336_v16 = vpack.c.bf16 %v4306_v6, %v4305_v23  ;;  %v4257_v17 = vld [vmem:[#allocation2 + $0x80] sm:$0xff] }
 0x380   : > { %5254 = vmatprep.subr.bf16.mxu1 %v20682_v41  ;;  %v4436_v9 = vld [vmem:[#allocation2 + $0x12a] sm:$0xff]  ;;  %v4252_v43 = vld [vmem:[#allocation2 + $0x58] sm:$0xff]  ;;  %v4315_v54 = vld [vmem:[#allocation2 + $0xa1] sm:$0xff] }
 0x381   : > { %v4416_v39 = vld [vmem:[#allocation2 + $0x11a] sm:$0xff]  ;;  %v4435_v8 = vld [vmem:[#allocation2 + $0x122] sm:$0xff]  ;;  %v4251_v52 = vld [vmem:[#allocation2 + $0x50] sm:$0xff] }
 0x382   : > { %4664 = vmatmul.mubr.bf16.gmra.mrb[32].mxu1 %v4425_v3  ;;  %v4434_v18 = vpack.c.bf16 %v4416_v39, %v4415_v2  ;;  %v4437_v44 = vpack.c.bf16 %v4436_v9, %v4435_v8  ;;  %v14593_v3 = vld [vmem:[%s20507_s3 + $0x120] sm:$0xff]   ;;  %v14599_v38 = vld [vmem:[%s20507_s3 + $0x150] sm:$0xff]   ;;  %v14600_v63 = vld [vmem:[%s20507_s3 + $0x158] sm:$0xff]  }
 0x383   : > { %4671 = vmatprep.mubr.bf16.mxu1 %v4427_v26  ;;  %v4309_v46 = vld [vmem:[#allocation2 + $0x71] sm:$0xff]  ;;  %v14602_v39 = vld [vmem:[%s20507_s3 + $0x168] sm:$0xff]   ;;  %v4314_v61 = vld [vmem:[#allocation2 + $0x99] sm:$0xff] }
 0x384   : > { %v4256_v2 = vld [vmem:[#allocation2 + $0x78] sm:$0xff]  ;;  %v4312_v8 = vld [vmem:[#allocation2 + $0x89] sm:$0xff]  ;;  %v4261_v57 = vld [vmem:[#allocation2 + $0xa0] sm:$0xff] }
 0x385   : > { %v4255_v9 = vld [vmem:[#allocation2 + $0x70] sm:$0xff]  ;;  %v4260_v48 = vld [vmem:[#allocation2 + $0x98] sm:$0xff] }
 0x386   : > { %v4284_v11 = vpack.c.bf16 %v4256_v2, %v4255_v9  ;;  %v4313_v53 = vld [vmem:[#allocation2 + $0x91] sm:$0xff]  ;;  %v4316_v31 = vld [vmem:[#allocation2 + $0xa9] sm:$0xff]  ;;  %v4318_v49 = vld [vmem:[#allocation2 + $0xb9] sm:$0xff] }
 0x387   : > { %v4341_v27 = vpack.c.bf16 %v4316_v31, %v4315_v54  ;;  %v4317_v28 = vld [vmem:[#allocation2 + $0xb1] sm:$0xff]  ;;  %v4270_v9 = vld [vmem:[#allocation2 + $0xe8] sm:$0xff] }
 0x388   : > { %v4342_v10 = vpack.c.bf16 %v4318_v49, %v4317_v28  ;;  %v4271_v31 = vld [vmem:[#allocation2 + $0xf0] sm:$0xff]  ;;  %v4330_v49 = vld [vmem:[#allocation2 + $0x119] sm:$0xff] }
 0x38a   : > { %4672 = vmatmul.mubr.bf16.gmra.mrb[36].mxu1 %v4426_v55  ;;  %v4249_v55 = vld [vmem:[#allocation2 + $0x40] sm:$0xff] }
 0x38b   : > { %4679 = vmatprep.mubr.bf16.mxu1 %v4428_v62 }
 0x392   : > { %4680 = vmatmul.mubr.bf16.gmra.mrb[40].mxu1 %v4427_v26  ;;  %v4281_v26 = vpack.c.bf16 %v4250_v47, %v4249_v55  ;;  %v4263_v47 = vld [vmem:[#allocation2 + $0xb0] sm:$0xff] }
 0x393   : > { %4687 = vmatprep.mubr.bf16.mxu1 %v4429_v0 }
 0x39a   : > { %4688 = vmatmul.mubr.bf16.gmra.mrb[44].mxu1 %v4428_v62  ;;  %v14598_v62 = vld [vmem:[%s20507_s3 + $0x148] sm:$0xff]  }
 0x39b   : > { %4695 = vmatprep.mubr.bf16.mxu1 %v4430_v30 }
 0x3a2   : > { %4696 = vmatmul.mubr.bf16.gmra.mrb[48].mxu1 %v4429_v0  ;;  %v4308_v0 = vld [vmem:[#allocation2 + $0x69] sm:$0xff] }
 0x3a3   : > { %4703 = vmatprep.mubr.bf16.mxu1 %v4431_v60  ;;  %v4337_v42 = vpack.c.bf16 %v4308_v0, %v4307_v1  ;;  %v4322_v1 = vld [vmem:[#allocation2 + $0xd9] sm:$0xff] }
 0x3aa   : > { %4704 = vmatmul.mubr.bf16.gmra.mrb[52].mxu1 %v4430_v30  ;;  %v4282_v30 = vpack.c.bf16 %v4252_v43, %v4251_v52 }
 0x3ab   : > { %4711 = vmatprep.mubr.bf16.mxu1 %v4432_v33 }
 0x3b2   : > { %4712 = vmatmul.mubr.bf16.gmra.mrb[56].mxu1 %v4431_v60  ;;  %v4253_v60 = vld [vmem:[#allocation2 + $0x60] sm:$0xff] }
 0x3b3   : > { %4719 = vmatprep.mubr.bf16.mxu1 %v4433_v35  ;;  %v4283_v4 = vpack.c.bf16 %v4254_v29, %v4253_v60  ;;  %v4268_v60 = vld [vmem:[#allocation2 + $0xd8] sm:$0xff] }
 0x3ba   : > { %4720 = vmatmul.mubr.bf16.gmra.mrb[60].mxu1 %v4432_v33  ;;  %v14601_v33 = vld [vmem:[%s20507_s3 + $0x160] sm:$0xff]  }
 0x3bb   : > { %4727 = vmatprep.mubr.bf16.mxu1 %v4434_v18 }
 0x3c2   : > { %4728 = vmatmul.mubr.bf16.gmra.mrb[64].mxu1 %v4433_v35  ;;  %v4338_v35 = vpack.c.bf16 %v4310_v12, %v4309_v46  ;;  %v4323_v12 = vld [vmem:[#allocation2 + $0xe1] sm:$0xff]  ;;  %v4267_v46 = vld [vmem:[#allocation2 + $0xd0] sm:$0xff] }
 0x3c3   : > { %4735 = vmatprep.mubr.bf16.mxu1 %v4437_v44  ;;  %v14603_v44 = vld [vmem:[%s20507_s3 + $0x170] sm:$0xff]  }
 0x3ca   : > { %4736 = vmatmul.mubr.bf16.gmra.mrb[68].mxu1 %v4434_v18  ;;  %v4311_v18 = vld [vmem:[#allocation2 + $0x81] sm:$0xff] }
 0x3cb   : > { %4872 = vmatprep.mubr.bf16.mxu1 %v4331_v13  ;;  %v4339_v40 = vpack.c.bf16 %v4312_v8, %v4311_v18  ;;  %v14604_v13 = vld [vmem:[%s20507_s3 + $0x178] sm:$0xff]   ;;  %v4269_v8 = vld [vmem:[#allocation2 + $0xe0] sm:$0xff] }
 0x3d2   : > { %4873 = vmatmul.mubr.bf16.vlgmr.msra.gmra.mrb[72].mxu1 %v4277_v5  ;;  %v4258_v5 = vld [vmem:[#allocation2 + $0x88] sm:$0xff] }
 0x3d3   : > { %4880 = vmatprep.mubr.bf16.mxu1 %v4332_v34  ;;  %5255 = vmatpush1.bf16.msra.mxu1 %v14589_v37  ;;  %v4285_v37 = vpack.c.bf16 %v4258_v5, %v4257_v17  ;;  %v4340_v34 = vpack.c.bf16 %v4314_v61, %v4313_v53  ;;  %v4291_v17 = vpack.c.bf16 %v4270_v9, %v4269_v8  ;;  %v4325_v5 = vld [vmem:[#allocation2 + $0xf1] sm:$0xff] }
 0x3d4   : > { %5256 = vmatprep.subr.bf16.mxu1 %v20682_v41  ;;  %v4272_v53 = vld [vmem:[#allocation2 + $0xf8] sm:$0xff]  ;;  %v5020_v8 = vld [vmem:[#allocation2 + $0x2b] sm:$0xff] }
 0x3d7   : > { %5257 = vmatpush1.bf16.msra.mxu1 %v14590_v24 }
 0x3d8   : > { %5258 = vmatprep.subr.bf16.mxu1 %v20682_v41 }
 0x3da   : > { %4881 = vmatmul.mubr.bf16.gmra.mrb[76].mxu1 %v4278_v7  ;;  %v4259_v7 = vld [vmem:[#allocation2 + $0x90] sm:$0xff] }
 0x3db   : > { %4888 = vmatprep.mubr.bf16.mxu1 %v4333_v15  ;;  %5259 = vmatpush1.bf16.msra.mxu1 %v14591_v20 }
 0x3dc   : > { %5260 = vmatprep.subr.bf16.mxu1 %v20682_v41 }
 0x3df   : > { %5261 = vmatpush1.bf16.msra.mxu1 %v14592_v32  ;;  %v4286_v32 = vpack.c.bf16 %v4260_v48, %v4259_v7  ;;  %v4327_v48 = vld [vmem:[#allocation2 + $0x101] sm:$0xff] }
 0x3e0   : > { %5262 = vmatprep.subr.bf16.mxu1 %v20682_v41 }
 0x3e2   : > { %4889 = vmatmul.mubr.bf16.gmra.mrb[80].mxu1 %v4279_v14 }
 0x3e3   : > { %4896 = vmatprep.mubr.bf16.mxu1 %v4334_v50  ;;  %5263 = vmatpush1.bf16.msra.mxu1 %v14593_v3  ;;  %v4262_v3 = vld [vmem:[#allocation2 + $0xa8] sm:$0xff] }
 0x3e4   : > { %5264 = vmatprep.subr.bf16.mxu1 %v20682_v41  ;;  %v4287_v58 = vpack.c.bf16 %v4262_v3, %v4261_v57  ;;  %v4273_v57 = vld [vmem:[#allocation2 + $0x100] sm:$0xff]  ;;  %v4274_v3 = vld [vmem:[#allocation2 + $0x108] sm:$0xff] }
 0x3e5   : > { %v4293_v28 = vpack.c.bf16 %v4274_v3, %v4273_v57  ;;  %v5021_v57 = vld [vmem:[#allocation2 + $0x33] sm:$0xff]  ;;  %v14609_v3 = vld [vmem:[%s20507_s3 + $0x1a0] sm:$0xff]  }
 0x3e7   : > { %5265 = vmatpush1.bf16.msra.mxu1 %v14594_v45 }
 0x3e8   : > { %5266 = vmatprep.subr.bf16.mxu1 %v20682_v41 }
 0x3ea   : > { %4897 = vmatmul.mubr.bf16.gmra.mrb[84].mxu1 %v4280_v22 }
 0x3eb   : > { %4904 = vmatprep.mubr.bf16.mxu1 %v4335_v19  ;;  %5267 = vmatpush1.bf16.msra.mxu1 %v14595_v21  ;;  %v4264_v21 = vld [vmem:[#allocation2 + $0xb8] sm:$0xff]  ;;  %v4319_v19 = vld [vmem:[#allocation2 + $0xc1] sm:$0xff] }
 0x3ec   : > { %5268 = vmatprep.subr.bf16.mxu1 %v20682_v41 }
 0x3ef   : > { %5269 = vmatpush1.bf16.msra.mxu1 %v14596_v59  ;;  %v4320_v59 = vld [vmem:[#allocation2 + $0xc9] sm:$0xff] }
 0x3f0   : > { %5270 = vmatprep.subr.bf16.mxu1 %v20682_v41 }
 0x3f2   : > { %4905 = vmatmul.mubr.bf16.gmra.mrb[88].mxu1 %v4281_v26  ;;  %v4343_v26 = vpack.c.bf16 %v4320_v59, %v4319_v19  ;;  %v4276_v19 = vld [vmem:[#allocation2 + $0x118] sm:$0xff] }
 0x3f3   : > { %4912 = vmatprep.mubr.bf16.mxu1 %v4336_v16  ;;  %5271 = vmatpush1.bf16.msra.mxu1 %v14597_v25  ;;  %v4288_v25 = vpack.c.bf16 %v4264_v21, %v4263_v47  ;;  %v4265_v16 = vld [vmem:[#allocation2 + $0xc0] sm:$0xff]  ;;  %v5071_v47 = vld [vmem:[#allocation2 + $0x14] sm:$0xff] }
 0x3f4   : > { %5272 = vmatprep.subr.bf16.mxu1 %v20682_v41 }
 0x3f7   : > { %5273 = vmatpush1.bf16.msra.mxu1 %v14598_v62  ;;  %v4266_v62 = vld [vmem:[#allocation2 + $0xc8] sm:$0xff] }
 0x3f8   : > { %5274 = vmatprep.subr.bf16.mxu1 %v20682_v41 }
 0x3fa   : > { %4913 = vmatmul.mubr.bf16.gmra.mrb[92].mxu1 %v4282_v30  ;;  %v4321_v30 = vld [vmem:[#allocation2 + $0xd1] sm:$0xff] }
 0x3fb   : > { %4920 = vmatprep.mubr.bf16.mxu1 %v4337_v42  ;;  %5275 = vmatpush1.bf16.msra.mxu1 %v14599_v38  ;;  %v4289_v38 = vpack.c.bf16 %v4266_v62, %v4265_v16  ;;  %v4344_v42 = vpack.c.bf16 %v4322_v1, %v4321_v30  ;;  %v5074_v30 = vld [vmem:[#allocation2 + $0x2c] sm:$0xff] }
 0x3fc   : > { %5276 = vmatprep.subr.bf16.mxu1 %v20682_v41 }
 0x3ff   : > { %5277 = vmatpush1.bf16.msra.mxu1 %v14600_v63 }
 0x400   : > { %5278 = vmatprep.subr.bf16.mxu1 %v20682_v41 }
 0x402   : > { %4921 = vmatmul.mubr.bf16.gmra.mrb[96].mxu1 %v4283_v4 }
 0x403   : > { %4928 = vmatprep.mubr.bf16.mxu1 %v4338_v35  ;;  %5279 = vmatpush1.bf16.msra.mxu1 %v14601_v33  ;;  %v4324_v33 = vld [vmem:[#allocation2 + $0xe9] sm:$0xff] }
 0x404   : > { %5280 = vmatprep.subr.bf16.mxu1 %v20682_v41  ;;  %v4345_v2 = vpack.c.bf16 %v4324_v33, %v4323_v12 }
 0x407   : > { %5281 = vmatpush1.bf16.msra.mxu1 %v14602_v39  ;;  %v4290_v39 = vpack.c.bf16 %v4268_v60, %v4267_v46  ;;  %v5017_v60 = vld [vmem:[#allocation2 + $0x13] sm:$0xff]  ;;  %v5073_v46 = vld [vmem:[#allocation2 + $0x24] sm:$0xff] }
 0x408   : > { %5282 = vmatprep.subr.bf16.mxu1 %v20682_v41 }
 0x40a   : > { %4929 = vmatmul.mubr.bf16.gmra.mrb[100].mxu1 %v4284_v11  ;;  %v4326_v11 = vld [vmem:[#allocation2 + $0xf9] sm:$0xff] }
 0x40b   : > { %4936 = vmatprep.mubr.bf16.mxu1 %v4339_v40  ;;  %5283 = vmatpush1.bf16.msra.mxu1 %v14603_v44  ;;  %v4346_v61 = vpack.c.bf16 %v4326_v11, %v4325_v5  ;;  %v5076_v11 = vld [vmem:[#allocation2 + $0x3c] sm:$0xff]  ;;  %v14607_v5 = vld [vmem:[%s20507_s3 + $0x190] sm:$0xff]  }
 0x40c   : > { %5284 = vmatprep.subr.bf16.mxu1 %v20682_v41 }
 0x40f   : > { %5285 = vmatpush1.bf16.msra.mxu1 %v14604_v13 }
 0x410   : > { %5704 = vmatprep.subr.bf16.mxu1 %v20682_v41 }
 0x412   : > { %4937 = vmatmul.mubr.bf16.gmra.mrb[104].mxu1 %v4285_v37 }
 0x413   : > { %4944 = vmatprep.mubr.bf16.mxu1 %v4340_v34 }
 0x415   : > { %v17217_v24 = vpop.f32.mrb[0].mxu1 }
 0x416   : > { %v4603_v56 = vpop.f32.mrb[1].mxu1 }
 0x417   : > { %v17219_v20 = vpop.f32.mrb[2].mxu1  ;;  %v4328_v56 = vld [vmem:[#allocation2 + $0x109] sm:$0xff] }
 0x418   : > { %v4606_v15 = vpop.f32.mrb[3].mxu1 }
 0x419   : > { %v4292_v15 = vpack.c.bf16 %v4272_v53, %v4271_v31  ;;  %v5022_v31 = vld [vmem:[#allocation2 + $0x3b] sm:$0xff] }
 0x41a   : > { %4945 = vmatmul.mubr.bf16.gmra.mrb[108].mxu1 %v4286_v32  ;;  %v4347_v32 = vpack.c.bf16 %v4328_v56, %v4327_v48  ;;  %v14608_v48 = vld [vmem:[%s20507_s3 + $0x198] sm:$0xff]  }
 0x41b   : > { %4952 = vmatprep.mubr.bf16.mxu1 %v4341_v27 }
 0x41d   : > { %v17221_v51 = vpop.f32.mrb[4].mxu1 }
 0x41e   : > { %v4611_v14 = vpop.f32.mrb[5].mxu1 }
 0x41f   : > { %v17223_v50 = vpop.f32.mrb[6].mxu1 }
 0x420   : > { %v4614_v45 = vpop.f32.mrb[7].mxu1 }
 0x422   : > { %4953 = vmatmul.mubr.bf16.gmra.mrb[112].mxu1 %v4287_v58 }
 0x423   : > { %4960 = vmatprep.mubr.bf16.mxu1 %v4342_v10  ;;  %v4329_v10 = vld [vmem:[#allocation2 + $0x111] sm:$0xff] }
 0x424   : > { %v4348_v21 = vpack.c.bf16 %v4330_v49, %v4329_v10  ;;  %v5055_v49 = vpack.c.bf16 %v5022_v31, %v5021_v57  ;;  %v14610_v10 = vld [vmem:[%s20507_s3 + $0x1a8] sm:$0xff]   ;;  %v5083_v31 = vld [vmem:[#allocation2 + $0x74] sm:$0xff] }
 0x425   : > { %v17225_v36 = vpop.f32.mrb[8].mxu1  ;;  %v5027_v57 = vld [vmem:[#allocation2 + $0x63] sm:$0xff] }
 0x426   : > { %v4619_v22 = vpop.f32.mrb[9].mxu1 }
 0x427   : > { %v17227_v55 = vpop.f32.mrb[10].mxu1 }
 0x428   : > { %v4622_v6 = vpop.f32.mrb[11].mxu1 }
 0x429   : > { %v5072_v6 = vld [vmem:[#allocation2 + $0x1c] sm:$0xff] }
 0x42a   : > { %4961 = vmatmul.mubr.bf16.gmra.mrb[116].mxu1 %v4288_v25 }
 0x42b   : > { %4968 = vmatprep.mubr.bf16.mxu1 %v4343_v26  ;;  %v4275_v26 = vld [vmem:[#allocation2 + $0x110] sm:$0xff] }
 0x42c   : > { %v4294_v62 = vpack.c.bf16 %v4276_v19, %v4275_v26  ;;  %v5024_v19 = vld [vmem:[#allocation2 + $0x4b] sm:$0xff] }
 0x42d   : > { %v17229_v23 = vpop.f32.mrb[12].mxu1 }
 0x42e   : > { %v4627_v43 = vpop.f32.mrb[13].mxu1 }
 0x42f   : > { %v17231_v0 = vpop.f32.mrb[14].mxu1  ;;  %v5107_v43 = vpack.c.bf16 %v5072_v6, %v5071_v47  ;;  %v5079_v47 = vld [vmem:[#allocation2 + $0x54] sm:$0xff]  ;;  %v5080_v6 = vld [vmem:[#allocation2 + $0x5c] sm:$0xff] }
 0x430   : > { %v4630_v52 = vpop.f32.mrb[15].mxu1 }
 0x431   : > { %v5018_v52 = vld [vmem:[#allocation2 + $0x1b] sm:$0xff] }
 0x432   : > { %4969 = vmatmul.mubr.bf16.gmra.mrb[120].mxu1 %v4289_v38  ;;  %v5053_v33 = vpack.c.bf16 %v5018_v52, %v5017_v60 }
 0x433   : > { %4976 = vmatprep.mubr.bf16.mxu1 %v4344_v42 }
 0x435   : > { %v17233_v63 = vpop.f32.mrb[16].mxu1 }
 0x436   : > { %v4635_v29 = vpop.f32.mrb[17].mxu1 }
 0x437   : > { %v17235_v4 = vpop.f32.mrb[18].mxu1  ;;  %v14605_v29 = vld [vmem:[%s20507_s3 + $0x180] sm:$0xff]  }
 0x438   : > { %v4638_v35 = vpop.f32.mrb[19].mxu1 }
 0x439   : > { %v17260_v35 = vpack.c.bf16 %v5074_v30, %v5073_v46  ;;  %v14612_v30 = vld [vmem:[%s20507_s3 + $0x1b8] sm:$0xff]  }
 0x43a   : > { %4977 = vmatmul.mubr.bf16.gmra.mrb[124].mxu1 %v4290_v39  ;;  %v14606_v39 = vld [vmem:[%s20507_s3 + $0x188] sm:$0xff]  }
 0x43b   : > { %4984 = vmatprep.mubr.bf16.mxu1 %v4345_v2 }
 0x43d   : > { %v17237_v18 = vpop.f32.mrb[20].mxu1 }
 0x43e   : > { %v4643_v44 = vpop.f32.mrb[21].mxu1 }
 0x43f   : > { %v17239_v40 = vpop.f32.mrb[22].mxu1  ;;  %v5075_v44 = vld [vmem:[#allocation2 + $0x34] sm:$0xff] }
 0x440   : > { %v4646_v13 = vpop.f32.mrb[23].mxu1 }
 0x442   : > { %4985 = vmatmul.mubr.bf16.gmra.mrb[128].mxu1 %v4291_v17  ;;  %v5019_v17 = vld [vmem:[#allocation2 + $0x23] sm:$0xff] }
 0x443   : > { %4992 = vmatprep.mubr.bf16.mxu1 %v4346_v61  ;;  %v5054_v53 = vpack.c.bf16 %v5020_v8, %v5019_v17  ;;  %v14613_v8 = vld [vmem:[%s20507_s3 + $0x1c0] sm:$0xff]  }
 0x445   : > { %v17241_v37 = vpop.f32.mrb[24].mxu1 }
 0x446   : > { %v4651_v34 = vpop.f32.mrb[25].mxu1 }
 0x447   : > { %v17243_v54 = vpop.f32.mrb[26].mxu1  ;;  %v17275_v34 = vpack.c.bf16 %v5076_v11, %v5075_v44  ;;  %v5081_v11 = vld [vmem:[#allocation2 + $0x64] sm:$0xff] }
 0x448   : > { %v4654_v7 = vpop.f32.mrb[27].mxu1 }
 0x44a   : > { %4993 = vmatmul.mubr.bf16.gmra.mrb[132].mxu1 %v4292_v15  ;;  %v5078_v15 = vld [vmem:[#allocation2 + $0x4c] sm:$0xff] }
 0x44b   : > { %5000 = vmatprep.mubr.bf16.mxu1 %v4347_v32 }
 0x44d   : > { %v17245_v27 = vpop.f32.mrb[28].mxu1 }
 0x44e   : > { %v4659_v14 = vpop.f32.mrb[29].mxu1 }
 0x44f   : > { %v17247_v45 = vpop.f32.mrb[30].mxu1 }
 0x450   : > { %v4662_v58 = vpop.f32.mrb[31].mxu1 }
 0x451   : > { %v5077_v58 = vld [vmem:[#allocation2 + $0x44] sm:$0xff] }
 0x452   : > { %5001 = vmatmul.mubr.bf16.gmra.mrb[136].mxu1 %v4293_v28  ;;  %v17290_v28 = vpack.c.bf16 %v5078_v15, %v5077_v58 }
 0x453   : > { %5008 = vmatprep.mubr.bf16.mxu1 %v4348_v21 }
 0x455   : > { %v17249_v22 = vpop.f32.mrb[32].mxu1 }
 0x456   : > { %v4667_v59 = vpop.f32.mrb[33].mxu1 }
 0x457   : > { %v17251_v25 = vpop.f32.mrb[34].mxu1 }
 0x458   : > { %v4670_v16 = vpop.f32.mrb[35].mxu1 }
 0x459   : > { %v5023_v16 = vld [vmem:[#allocation2 + $0x43] sm:$0xff] }
 0x45a   : > { %5009 = vmatmul.mubr.bf16.gmra.mrb[140].mxu1 %v4294_v62  ;;  %v14611_v62 = vld [vmem:[%s20507_s3 + $0x1b0] sm:$0xff]   ;;  %v5056_v52 = vpack.c.bf16 %v5024_v19, %v5023_v16 }
 0x45b   : > { %5286 = vmatprep.mubr.bf16.mxu1 %v5107_v43 }
 0x45d   : > { %v17253_v1 = vpop.f32.mrb[36].mxu1 }
 0x45e   : > { %v4675_v38 = vpop.f32.mrb[37].mxu1 }
 0x45f   : > { %v17255_v42 = vpop.f32.mrb[38].mxu1  ;;  %v17305_v38 = vpack.c.bf16 %v5080_v6, %v5079_v47  ;;  %v5086_v6 = vld [vmem:[#allocation2 + $0x8c] sm:$0xff] }
 0x460   : > { %v4678_v12 = vpop.f32.mrb[39].mxu1 }
 0x462   : > { %5287 = vmatmul.mubr.bf16.vlgmr.msra.gmra.mrb[144].mxu1 %v5053_v33  ;;  %v5082_v33 = vld [vmem:[#allocation2 + $0x6c] sm:$0xff] }
 0x463   : > { %5294 = vmatprep.mubr.bf16.mxu1 %v17260_v35  ;;  %5705 = vmatpush1.bf16.msra.mxu1 %v14605_v29  ;;  %v5026_v29 = vld [vmem:[#allocation2 + $0x5b] sm:$0xff]  ;;  %v17320_v17 = vpack.c.bf16 %v5082_v33, %v5081_v11  ;;  %v14618_v33 = vld [vmem:[%s20507_s3 + $0x1e8] sm:$0xff]  }
 0x464   : > { %5706 = vmatprep.subr.bf16.mxu1 %v20682_v41  ;;  %v5088_v11 = vld [vmem:[#allocation2 + $0x9c] sm:$0xff] }
 0x465   : > { %v17267_v2 = vpop.f32.mrb[40].mxu1 }
 0x466   : > { %v4683_v9 = vpop.f32.mrb[41].mxu1 }
 0x467   : > { %v17269_v13 = vpop.f32.mrb[42].mxu1  ;;  %5707 = vmatpush1.bf16.msra.mxu1 %v14606_v39  ;;  %v5025_v39 = vld [vmem:[#allocation2 + $0x53] sm:$0xff] }
 0x468   : > { %v4686_v61 = vpop.f32.mrb[43].mxu1  ;;  %5708 = vmatprep.subr.bf16.mxu1 %v20682_v41  ;;  %v5057_v44 = vpack.c.bf16 %v5026_v29, %v5025_v39  ;;  %v5085_v29 = vld [vmem:[#allocation2 + $0x84] sm:$0xff] }
 0x46a   : > { %5295 = vmatmul.mubr.bf16.gmra.mrb[148].mxu1 %v5054_v53  ;;  %v5028_v53 = vld [vmem:[#allocation2 + $0x6b] sm:$0xff] }
 0x46b   : > { %5302 = vmatprep.mubr.bf16.mxu1 %v17275_v34  ;;  %5709 = vmatpush1.bf16.msra.mxu1 %v14607_v5  ;;  %v14614_v5 = vld [vmem:[%s20507_s3 + $0x1c8] sm:$0xff]  }
 0x46c   : > { %5710 = vmatprep.subr.bf16.mxu1 %v20682_v41 }
 0x46d   : > { %v17282_v56 = vpop.f32.mrb[44].mxu1 }
 0x46e   : > { %v4691_v7 = vpop.f32.mrb[45].mxu1 }
 0x46f   : > { %v17284_v32 = vpop.f32.mrb[46].mxu1  ;;  %5711 = vmatpush1.bf16.msra.mxu1 %v14608_v48  ;;  %v5084_v7 = vld [vmem:[#allocation2 + $0x7c] sm:$0xff] }
 0x470   : > { %v4694_v14 = vpop.f32.mrb[47].mxu1  ;;  %5712 = vmatprep.subr.bf16.mxu1 %v20682_v41  ;;  %v17335_v58 = vpack.c.bf16 %v5084_v7, %v5083_v31 }
 0x472   : > { %5303 = vmatmul.mubr.bf16.gmra.mrb[152].mxu1 %v5055_v49  ;;  %v5058_v49 = vpack.c.bf16 %v5028_v53, %v5027_v57  ;;  %v5031_v53 = vld [vmem:[#allocation2 + $0x83] sm:$0xff] }
 0x473   : > { %5310 = vmatprep.mubr.bf16.mxu1 %v17290_v28  ;;  %5713 = vmatpush1.bf16.msra.mxu1 %v14609_v3  ;;  %v14615_v3 = vld [vmem:[%s20507_s3 + $0x1d0] sm:$0xff]  }
 0x474   : > { %5714 = vmatprep.subr.bf16.mxu1 %v20682_v41 }
 0x475   : > { %v17297_v21 = vpop.f32.mrb[48].mxu1 }
 0x476   : > { %v4699_v59 = vpop.f32.mrb[49].mxu1 }
 0x477   : > { %v17299_v26 = vpop.f32.mrb[50].mxu1  ;;  %5715 = vmatpush1.bf16.msra.mxu1 %v14610_v10  ;;  %v14616_v10 = vld [vmem:[%s20507_s3 + $0x1d8] sm:$0xff]  }
 0x478   : > { %v4702_v43 = vpop.f32.mrb[51].mxu1  ;;  %5716 = vmatprep.subr.bf16.mxu1 %v20682_v41  ;;  %v5030_v59 = vld [vmem:[#allocation2 + $0x7b] sm:$0xff] }
 0x479   : > { %v14617_v43 = vld [vmem:[%s20507_s3 + $0x1e0] sm:$0xff]  }
 0x47a   : > { %5311 = vmatmul.mubr.bf16.gmra.mrb[156].mxu1 %v5056_v52 }
 0x47b   : > { %5318 = vmatprep.mubr.bf16.mxu1 %v17305_v38  ;;  %5717 = vmatpush1.bf16.msra.mxu1 %v14611_v62  ;;  %v5029_v62 = vld [vmem:[#allocation2 + $0x73] sm:$0xff] }
 0x47c   : > { %5718 = vmatprep.subr.bf16.mxu1 %v20682_v41 }
 0x47d   : > { %v17312_v60 = vpop.f32.mrb[52].mxu1 }
 0x47e   : > { %v4707_v12 = vpop.f32.mrb[53].mxu1 }
 0x47f   : > { %v17314_v46 = vpop.f32.mrb[54].mxu1  ;;  %5719 = vmatpush1.bf16.msra.mxu1 %v14612_v30  ;;  %v5059_v30 = vpack.c.bf16 %v5030_v59, %v5029_v62  ;;  %v17350_v12 = vpack.c.bf16 %v5086_v6, %v5085_v29  ;;  %v5090_v59 = vld [vmem:[#allocation2 + $0xac] sm:$0xff] }
 0x480   : > { %v4710_v9 = vpop.f32.mrb[55].mxu1  ;;  %5720 = vmatprep.subr.bf16.mxu1 %v20682_v41  ;;  %v5033_v6 = vld [vmem:[#allocation2 + $0x93] sm:$0xff] }
 0x482   : > { %5319 = vmatmul.mubr.bf16.gmra.mrb[160].mxu1 %v5057_v44  ;;  %v5087_v44 = vld [vmem:[#allocation2 + $0x94] sm:$0xff] }
 0x483   : > { %5326 = vmatprep.mubr.bf16.mxu1 %v17320_v17  ;;  %5721 = vmatpush1.bf16.msra.mxu1 %v14613_v8  ;;  %v5032_v8 = vld [vmem:[#allocation2 + $0x8b] sm:$0xff]  ;;  %v17365_v57 = vpack.c.bf16 %v5088_v11, %v5087_v44  ;;  %v5091_v44 = vld [vmem:[#allocation2 + $0xb4] sm:$0xff]  ;;  %v5092_v11 = vld [vmem:[#allocation2 + $0xbc] sm:$0xff] }
 0x484   : > { %5722 = vmatprep.subr.bf16.mxu1 %v20682_v41  ;;  %v5060_v7 = vpack.c.bf16 %v5032_v8, %v5031_v53 }
 0x485   : > { %v17327_v61 = vpop.f32.mrb[56].mxu1 }
 0x486   : > { %v4715_v48 = vpop.f32.mrb[57].mxu1 }
 0x487   : > { %v17329_v15 = vpop.f32.mrb[58].mxu1  ;;  %5723 = vmatpush1.bf16.msra.mxu1 %v14614_v5  ;;  %v14619_v48 = vld [vmem:[%s20507_s3 + $0x1f0] sm:$0xff]  }
 0x488   : > { %v4718_v14 = vpop.f32.mrb[59].mxu1  ;;  %5724 = vmatprep.subr.bf16.mxu1 %v20682_v41 }
 0x48a   : > { %5327 = vmatmul.mubr.bf16.gmra.mrb[164].mxu1 %v5058_v49  ;;  %v5034_v49 = vld [vmem:[#allocation2 + $0x9b] sm:$0xff] }
 0x48b   : > { %5334 = vmatprep.mubr.bf16.mxu1 %v17335_v58  ;;  %5725 = vmatpush1.bf16.msra.mxu1 %v14615_v3  ;;  %v14620_v3 = vld [vmem:[%s20507_s3 + $0x1f8] sm:$0xff]  }
 0x48c   : > { %5726 = vmatprep.subr.bf16.mxu1 %v20682_v41 }
 0x48d   : > { %v17342_v19 = vpop.f32.mrb[60].mxu1 }
 0x48e   : > { %v4723_v47 = vpop.f32.mrb[61].mxu1 }
 0x48f   : > { %v17344_v16 = vpop.f32.mrb[62].mxu1  ;;  %5727 = vmatpush1.bf16.msra.mxu1 %v14616_v10 }
 0x490   : > { %v4726_v52 = vpop.f32.mrb[63].mxu1  ;;  %5728 = vmatprep.subr.bf16.mxu1 %v20682_v41 }
 0x491   : > { %v5089_v52 = vld [vmem:[#allocation2 + $0xa4] sm:$0xff] }
 0x492   : > { %5335 = vmatmul.mubr.bf16.gmra.mrb[168].mxu1 %v5059_v30  ;;  %v17377_v30 = vpack.c.bf16 %v5090_v59, %v5089_v52  ;;  %v5038_v59 = vld [vmem:[#allocation2 + $0xbb] sm:$0xff]  ;;  %v5037_v52 = vld [vmem:[#allocation2 + $0xb3] sm:$0xff] }
 0x493   : > { %5342 = vmatprep.mubr.bf16.mxu1 %v17350_v12  ;;  %5729 = vmatpush1.bf16.msra.mxu1 %v14617_v43  ;;  %v5061_v43 = vpack.c.bf16 %v5034_v49, %v5033_v6  ;;  %v17386_v49 = vpack.c.bf16 %v5092_v11, %v5091_v44 }
 0x494   : > { %5730 = vmatprep.subr.bf16.mxu1 %v20682_v41 }
 0x495   : > { %v17357_v39 = vpop.f32.mrb[64].mxu1 }
 0x496   : > { %v4731_v9 = vpop.f32.mrb[65].mxu1 }
 0x497   : > { %v17359_v5 = vpop.f32.mrb[66].mxu1  ;;  %5731 = vmatpush1.bf16.msra.mxu1 %v14618_v33  ;;  %v5036_v33 = vld [vmem:[#allocation2 + $0xab] sm:$0xff] }
 0x498   : > { %v4734_v31 = vpop.f32.mrb[67].mxu1  ;;  %5732 = vmatprep.subr.bf16.mxu1 %v20682_v41 }
 0x49a   : > { %5343 = vmatmul.mubr.bf16.gmra.mrb[172].mxu1 %v5060_v7 }
 0x49b   : > { %5350 = vmatprep.mubr.bf16.mxu1 %v17365_v57  ;;  %5733 = vmatpush1.bf16.msra.mxu1 %v14619_v48  ;;  %v5035_v48 = vld [vmem:[#allocation2 + $0xa3] sm:$0xff] }
 0x49c   : > { %5734 = vmatprep.subr.bf16.mxu1 %v20682_v41 }
 0x49d   : > { %v17372_v14 = vpop.f32.mrb[68].mxu1 }
 0x49e   : > { %v4739_v10 = vpop.f32.mrb[69].mxu1 }
 0x49f   : > { %v17374_v47 = vpop.f32.mrb[70].mxu1  ;;  %5735 = vmatpush1.bf16.msra.mxu1 %v14620_v3  ;;  %v5062_v3 = vpack.c.bf16 %v5036_v33, %v5035_v48  ;;  %v5093_v33 = vld [vmem:[#allocation2 + $0xc4] sm:$0xff] }
 0x4a0   : > { %v4742_v62 = vpop.f32.mrb[71].mxu1  ;;  %6100 = vmatprep.subr.bf16.mxu1 %v20682_v41 }
 0x4a1   : > { %v5094_v62 = vld [vmem:[#allocation2 + $0xcc] sm:$0xff] }
 0x4a2   : > { %5351 = vmatmul.mubr.bf16.gmra.mrb[176].mxu1 %v5061_v43  ;;  %v17395_v44 = vpack.c.bf16 %v5094_v62, %v5093_v33  ;;  %v5098_v33 = vld [vmem:[#allocation2 + $0xec] sm:$0xff] }
 0x4a3   : > { %5358 = vmatprep.mubr.bf16.mxu1 %v17377_v30 }
 0x4a5   : > { %v4874_v29 = vpop.f32.mrb[72].mxu1 }
 0x4a6   : > { %v17381_v8 = vadd.f32 %v4874_v29, %v17217_v24  ;;  %v4876_v9 = vpop.f32.mrb[73].mxu1 }
 0x4a7   : > { %v4877_v53 = vpop.f32.mrb[74].mxu1  ;;  %v5063_v9 = vpack.c.bf16 %v5038_v59, %v5037_v52 }
 0x4a8   : > { %v17384_v31 = vadd.f32 %v4877_v53, %v17219_v20  ;;  %v4879_v7 = vpop.f32.mrb[75].mxu1  ;;  %v5040_v53 = vld [vmem:[#allocation2 + $0xcb] sm:$0xff] }
 0x4a9   : > { %v5095_v7 = vld [vmem:[#allocation2 + $0xd4] sm:$0xff] }
 0x4aa   : > { %5359 = vmatmul.mubr.bf16.gmra.mrb[180].mxu1 %v5062_v3  ;;  %v5096_v3 = vld [vmem:[#allocation2 + $0xdc] sm:$0xff] }
 0x4ab   : > { %5366 = vmatprep.mubr.bf16.mxu1 %v17386_v49  ;;  %v17404_v62 = vpack.c.bf16 %v5096_v3, %v5095_v7 }
 0x4ad   : > { %v4882_v10 = vpop.f32.mrb[76].mxu1 }
 0x4ae   : > { %v17390_v24 = vadd.f32 %v4882_v10, %v17221_v51  ;;  %v4884_v6 = vpop.f32.mrb[77].mxu1 }
 0x4af   : > { %v4885_v43 = vpop.f32.mrb[78].mxu1  ;;  %v5039_v6 = vld [vmem:[#allocation2 + $0xc3] sm:$0xff] }
 0x4b0   : > { %v17393_v29 = vadd.f32 %v4885_v43, %v17223_v50  ;;  %v4887_v20 = vpop.f32.mrb[79].mxu1  ;;  %v5064_v43 = vpack.c.bf16 %v5040_v53, %v5039_v6  ;;  %v5097_v53 = vld [vmem:[#allocation2 + $0xe4] sm:$0xff] }
 0x4b1   : > { %v5042_v20 = vld [vmem:[#allocation2 + $0xdb] sm:$0xff]  ;;  %v17413_v7 = vpack.c.bf16 %v5098_v33, %v5097_v53  ;;  %v5044_v6 = vld [vmem:[#allocation2 + $0xeb] sm:$0xff] }
 0x4b2   : > { %5367 = vmatmul.mubr.bf16.gmra.mrb[184].mxu1 %v5063_v9  ;;  %v5102_v53 = vld [vmem:[#allocation2 + $0x10c] sm:$0xff] }
 0x4b3   : > { %5374 = vmatprep.mubr.bf16.mxu1 %v17395_v44 }
 0x4b5   : > { %v4890_v11 = vpop.f32.mrb[80].mxu1 }
 0x4b6   : > { %v17399_v51 = vadd.f32 %v4890_v11, %v17225_v36  ;;  %v4892_v48 = vpop.f32.mrb[81].mxu1 }
 0x4b7   : > { %v4893_v10 = vpop.f32.mrb[82].mxu1  ;;  %v5041_v48 = vld [vmem:[#allocation2 + $0xd3] sm:$0xff] }
 0x4b8   : > { %20754 = vst [vmem:[#allocation3_spill] sm:$0xff] %v17399_v51  ;;  %v17402_v50 = vadd.f32 %v4893_v10, %v17227_v55  ;;  %v4895_v59 = vpop.f32.mrb[83].mxu1  ;;  %v5065_v10 = vpack.c.bf16 %v5042_v20, %v5041_v48 }
 0x4ba   : > { %5375 = vmatmul.mubr.bf16.gmra.mrb[188].mxu1 %v5064_v43  ;;  %v5099_v43 = vld [vmem:[#allocation2 + $0xf4] sm:$0xff] }
 0x4bb   : > { %5382 = vmatprep.mubr.bf16.mxu1 %v17404_v62 }
 0x4bd   : > { %v4898_v52 = vpop.f32.mrb[84].mxu1 }
 0x4be   : > { %v17408_v36 = vadd.f32 %v4898_v52, %v17229_v23  ;;  %v4900_v9 = vpop.f32.mrb[85].mxu1  ;;  %v5100_v52 = vld [vmem:[#allocation2 + $0xfc] sm:$0xff] }
 0x4bf   : > { %v4901_v11 = vpop.f32.mrb[86].mxu1  ;;  %v17422_v33 = vpack.c.bf16 %v5100_v52, %v5099_v43  ;;  %v5048_v52 = vld [vmem:[#allocation2 + $0x10b] sm:$0xff] }
 0x4c0   : > { %20755 = vst [vmem:[#allocation9_spill] sm:$0xff] %v17408_v36  ;;  %v17411_v51 = vadd.f32 %v4901_v11, %v17231_v0  ;;  %v4903_v55 = vpop.f32.mrb[87].mxu1  ;;  %v5043_v36 = vld [vmem:[#allocation2 + $0xe3] sm:$0xff] }
 0x4c1   : > { %v5066_v11 = vpack.c.bf16 %v5044_v6, %v5043_v36  ;;  %v5046_v55 = vld [vmem:[#allocation2 + $0xfb] sm:$0xff]  ;;  %v5101_v36 = vld [vmem:[#allocation2 + $0x104] sm:$0xff] }
 0x4c2   : > { %5383 = vmatmul.mubr.bf16.gmra.mrb[192].mxu1 %v5065_v10  ;;  %v17431_v6 = vpack.c.bf16 %v5102_v53, %v5101_v36  ;;  %v5105_v36 = vld [vmem:[#allocation2 + $0x124] sm:$0xff] }
 0x4c3   : > { %5390 = vmatprep.mubr.bf16.mxu1 %v17413_v7 }
 0x4c5   : > { %v4906_v3 = vpop.f32.mrb[88].mxu1 }
 0x4c6   : > { %v17417_v23 = vadd.f32 %v4906_v3, %v17233_v63  ;;  %v4908_v59 = vpop.f32.mrb[89].mxu1 }
 0x4c7   : > { %v4909_v9 = vpop.f32.mrb[90].mxu1  ;;  %v5045_v59 = vld [vmem:[#allocation2 + $0xf3] sm:$0xff] }
 0x4c8   : > { %20756 = vst [vmem:[#allocation6_spill] sm:$0xff] %v17417_v23  ;;  %v17420_v0 = vadd.f32 %v4909_v9, %v17235_v4  ;;  %v4911_v20 = vpop.f32.mrb[91].mxu1  ;;  %v5067_v9 = vpack.c.bf16 %v5046_v55, %v5045_v59 }
 0x4ca   : > { %5391 = vmatmul.mubr.bf16.gmra.mrb[196].mxu1 %v5066_v11  ;;  %v5103_v11 = vld [vmem:[#allocation2 + $0x114] sm:$0xff] }
 0x4cb   : > { %5398 = vmatprep.mubr.bf16.mxu1 %v17422_v33 }
 0x4cd   : > { %v4914_v48 = vpop.f32.mrb[92].mxu1 }
 0x4ce   : > { %v17426_v63 = vadd.f32 %v4914_v48, %v17237_v18  ;;  %v4916_v10 = vpop.f32.mrb[93].mxu1  ;;  %v5104_v48 = vld [vmem:[#allocation2 + $0x11c] sm:$0xff] }
 0x4cf   : > { %v4917_v3 = vpop.f32.mrb[94].mxu1  ;;  %v17440_v53 = vpack.c.bf16 %v5104_v48, %v5103_v11  ;;  %v5052_v48 = vld [vmem:[#allocation2 + $0x12b] sm:$0xff] }
 0x4d0   : > { %20757 = vst [vmem:[#allocation11_spill] sm:$0xff] %v17426_v63  ;;  %v17429_v23 = vadd.f32 %v4917_v3, %v17239_v40  ;;  %v4919_v4 = vpop.f32.mrb[95].mxu1  ;;  %v5047_v63 = vld [vmem:[#allocation2 + $0x103] sm:$0xff] }
 0x4d1   : > { %v5068_v3 = vpack.c.bf16 %v5048_v52, %v5047_v63  ;;  %v5050_v4 = vld [vmem:[#allocation2 + $0x11b] sm:$0xff] }
 0x4d2   : > { %5399 = vmatmul.mubr.bf16.gmra.mrb[200].mxu1 %v5067_v9 }
 0x4d3   : > { %5406 = vmatprep.mubr.bf16.mxu1 %v17431_v6 }
 0x4d5   : > { %v4922_v43 = vpop.f32.mrb[96].mxu1 }
 0x4d6   : > { %v17435_v18 = vadd.f32 %v4922_v43, %v17241_v37  ;;  %v4924_v20 = vpop.f32.mrb[97].mxu1  ;;  %v5106_v43 = vld [vmem:[#allocation2 + $0x12c] sm:$0xff] }
 0x4d7   : > { %v4925_v10 = vpop.f32.mrb[98].mxu1  ;;  %v17449_v52 = vpack.c.bf16 %v5106_v43, %v5105_v36 }
 0x4d8   : > { %20758 = vst [vmem:[#allocation5_spill] sm:$0xff] %v17435_v18  ;;  %v17438_v40 = vadd.f32 %v4925_v10, %v17243_v54  ;;  %v4927_v55 = vpop.f32.mrb[99].mxu1  ;;  %v5049_v18 = vld [vmem:[#allocation2 + $0x113] sm:$0xff] }
 0x4d9   : > { %v5069_v63 = vpack.c.bf16 %v5050_v4, %v5049_v18  ;;  %v5521_v18 = vld [vmem:[#allocation2 + $0x25] sm:$0xff] }
 0x4da   : > { %5407 = vmatmul.mubr.bf16.gmra.mrb[204].mxu1 %v5068_v3  ;;  %v5522_v3 = vld [vmem:[#allocation2 + $0x2d] sm:$0xff] }
 0x4db   : > { %5414 = vmatprep.mubr.bf16.mxu1 %v17440_v53  ;;  %v5557_v4 = vpack.c.bf16 %v5522_v3, %v5521_v18 }
 0x4dd   : > { %v4930_v59 = vpop.f32.mrb[100].mxu1 }
 0x4de   : > { %v17444_v37 = vadd.f32 %v4930_v59, %v17245_v27  ;;  %v4932_v9 = vpop.f32.mrb[101].mxu1 }
 0x4df   : > { %v4933_v20 = vpop.f32.mrb[102].mxu1  ;;  %v5051_v9 = vld [vmem:[#allocation2 + $0x123] sm:$0xff] }
 0x4e0   : > { %20759 = vst [vmem:[#allocation4_spill] sm:$0xff] %v17444_v37  ;;  %v17447_v54 = vadd.f32 %v4933_v20, %v17247_v45  ;;  %v4935_v10 = vpop.f32.mrb[103].mxu1  ;;  %v5070_v20 = vpack.c.bf16 %v5052_v48, %v5051_v9 }
 0x4e2   : > { %5415 = vmatmul.mubr.bf16.gmra.mrb[208].mxu1 %v5069_v63  ;;  %v5524_v63 = vld [vmem:[#allocation2 + $0x3d] sm:$0xff] }
 0x4e3   : > { %5422 = vmatprep.mubr.bf16.mxu1 %v17449_v52 }
 0x4e5   : > { %v4938_v11 = vpop.f32.mrb[104].mxu1 }
 0x4e6   : > { %v17453_v27 = vadd.f32 %v4938_v11, %v17249_v22  ;;  %v4940_v55 = vpop.f32.mrb[105].mxu1  ;;  %v5523_v22 = vld [vmem:[#allocation2 + $0x35] sm:$0xff] }
 0x4e7   : > { %v4941_v59 = vpop.f32.mrb[106].mxu1  ;;  %v14621_v55 = vld [vmem:[%s20507_s3 + $0x200] sm:$0xff]  }
 0x4e8   : > { %v17456_v37 = vadd.f32 %v4941_v59, %v17251_v25  ;;  %v4943_v45 = vpop.f32.mrb[107].mxu1  ;;  %v5558_v59 = vpack.c.bf16 %v5524_v63, %v5523_v22 }
 0x4ea   : > { %5423 = vmatmul.mubr.bf16.gmra.mrb[212].mxu1 %v5070_v20  ;;  %v5526_v20 = vld [vmem:[#allocation2 + $0x4d] sm:$0xff] }
 0x4eb   : > { %5736 = vmatprep.mubr.bf16.mxu1 %v5557_v4 }
 0x4ed   : > { %v4946_v36 = vpop.f32.mrb[108].mxu1 }
 0x4ee   : > { %v17459_v43 = vadd.f32 %v4946_v36, %v17253_v1  ;;  %v4948_v10 = vpop.f32.mrb[109].mxu1  ;;  %v14622_v1 = vld [vmem:[%s20507_s3 + $0x208] sm:$0xff]  }
 0x4ef   : > { %v4949_v11 = vpop.f32.mrb[110].mxu1  ;;  %v5525_v36 = vld [vmem:[#allocation2 + $0x45] sm:$0xff] }
 0x4f0   : > { %v17465_v25 = vadd.f32 %v4949_v11, %v17255_v42  ;;  %v4951_v48 = vpop.f32.mrb[111].mxu1  ;;  %v5559_v10 = vpack.c.bf16 %v5526_v20, %v5525_v36  ;;  %v5527_v11 = vld [vmem:[#allocation2 + $0x55] sm:$0xff] }
 0x4f2   : > { %5737 = vmatmul.mubr.bf16.vlgmr.msra.gmra.mrb[216].mxu1 %v17260_v35  ;;  %v14623_v35 = vld [vmem:[%s20507_s3 + $0x210] sm:$0xff]  }
 0x4f3   : > { %5744 = vmatprep.mubr.bf16.mxu1 %v5558_v59  ;;  %6101 = vmatpush1.bf16.msra.mxu1 %v14621_v55  ;;  %v5528_v55 = vld [vmem:[#allocation2 + $0x5d] sm:$0xff] }
 0x4f4   : > { %6102 = vmatprep.subr.bf16.mxu1 %v20682_v41 }
 0x4f5   : > { %v4954_v3 = vpop.f32.mrb[112].mxu1 }
 0x4f6   : > { %v17473_v9 = vadd.f32 %v4954_v3, %v17267_v2  ;;  %v4956_v45 = vpop.f32.mrb[113].mxu1  ;;  %v14624_v2 = vld [vmem:[%s20507_s3 + $0x218] sm:$0xff]   ;;  %v5560_v3 = vpack.c.bf16 %v5528_v55, %v5527_v11 }
 0x4f7   : > { %v4957_v42 = vpop.f32.mrb[114].mxu1  ;;  %6103 = vmatpush1.bf16.msra.mxu1 %v14622_v1  ;;  %v5531_v11 = vld [vmem:[#allocation2 + $0x75] sm:$0xff]  ;;  %v5532_v55 = vld [vmem:[#allocation2 + $0x7d] sm:$0xff] }
 0x4f8   : > { %v17479_v18 = vadd.f32 %v4957_v42, %v17269_v13  ;;  %v4959_v4 = vpop.f32.mrb[115].mxu1  ;;  %6104 = vmatprep.subr.bf16.mxu1 %v20682_v41  ;;  %v5530_v42 = vld [vmem:[#allocation2 + $0x6d] sm:$0xff] }
 0x4fa   : > { %5745 = vmatmul.mubr.bf16.gmra.mrb[220].mxu1 %v17275_v34  ;;  %v14625_v34 = vld [vmem:[%s20507_s3 + $0x220] sm:$0xff]  }
 0x4fb   : > { %5752 = vmatprep.mubr.bf16.mxu1 %v5559_v10  ;;  %6105 = vmatpush1.bf16.msra.mxu1 %v14623_v35  ;;  %v5529_v10 = vld [vmem:[#allocation2 + $0x65] sm:$0xff] }
 0x4fc   : > { %6106 = vmatprep.subr.bf16.mxu1 %v20682_v41 }
 0x4fd   : > { %v4962_v22 = vpop.f32.mrb[116].mxu1 }
 0x4fe   : > { %v17488_v63 = vadd.f32 %v4962_v22, %v17282_v56  ;;  %v4964_v13 = vpop.f32.mrb[117].mxu1  ;;  %v14626_v56 = vld [vmem:[%s20507_s3 + $0x228] sm:$0xff]  }
 0x4ff   : > { %v4965_v48 = vpop.f32.mrb[118].mxu1  ;;  %6107 = vmatpush1.bf16.msra.mxu1 %v14624_v2  ;;  %v5561_v2 = vpack.c.bf16 %v5530_v42, %v5529_v10 }
 0x500   : > { %v17494_v59 = vadd.f32 %v4965_v48, %v17284_v32  ;;  %v4967_v1 = vpop.f32.mrb[119].mxu1  ;;  %6108 = vmatprep.subr.bf16.mxu1 %v20682_v41 }
 0x502   : > { %5753 = vmatmul.mubr.bf16.gmra.mrb[224].mxu1 %v17290_v28  ;;  %v14627_v28 = vld [vmem:[%s20507_s3 + $0x230] sm:$0xff]  }
 0x503   : > { %5760 = vmatprep.mubr.bf16.mxu1 %v5560_v3  ;;  %6109 = vmatpush1.bf16.msra.mxu1 %v14625_v34  ;;  %v5562_v3 = vpack.c.bf16 %v5532_v55, %v5531_v11 }
 0x504   : > { %6110 = vmatprep.subr.bf16.mxu1 %v20682_v41 }
 0x505   : > { %v4970_v45 = vpop.f32.mrb[120].mxu1 }
 0x506   : > { %v17503_v20 = vadd.f32 %v4970_v45, %v17297_v21  ;;  %v4972_v32 = vpop.f32.mrb[121].mxu1  ;;  %v14628_v21 = vld [vmem:[%s20507_s3 + $0x238] sm:$0xff]  }
 0x507   : > { %v4973_v35 = vpop.f32.mrb[122].mxu1  ;;  %6111 = vmatpush1.bf16.msra.mxu1 %v14626_v56  ;;  %v5534_v32 = vld [vmem:[#allocation2 + $0x8d] sm:$0xff] }
 0x508   : > { %v17509_v4 = vadd.f32 %v4973_v35, %v17299_v26  ;;  %v4975_v36 = vpop.f32.mrb[123].mxu1  ;;  %6112 = vmatprep.subr.bf16.mxu1 %v20682_v41 }
 0x509   : > { %v5533_v36 = vld [vmem:[#allocation2 + $0x85] sm:$0xff] }
 0x50a   : > { %5761 = vmatmul.mubr.bf16.gmra.mrb[228].mxu1 %v17305_v38  ;;  %v14629_v38 = vld [vmem:[%s20507_s3 + $0x240] sm:$0xff]   ;;  %v5563_v10 = vpack.c.bf16 %v5534_v32, %v5533_v36 }
 0x50b   : > { %5768 = vmatprep.mubr.bf16.mxu1 %v5561_v2  ;;  %6113 = vmatpush1.bf16.msra.mxu1 %v14627_v28 }
 0x50c   : > { %6114 = vmatprep.subr.bf16.mxu1 %v20682_v41 }
 0x50d   : > { %v4978_v22 = vpop.f32.mrb[124].mxu1 }
 0x50e   : > { %v17518_v13 = vadd.f32 %v4978_v22, %v17312_v60  ;;  %v4980_v26 = vpop.f32.mrb[125].mxu1  ;;  %v14630_v60 = vld [vmem:[%s20507_s3 + $0x248] sm:$0xff]   ;;  %v5535_v22 = vld [vmem:[#allocation2 + $0x95] sm:$0xff] }
 0x50f   : > { %v4981_v48 = vpop.f32.mrb[126].mxu1  ;;  %6115 = vmatpush1.bf16.msra.mxu1 %v14628_v21  ;;  %v5536_v26 = vld [vmem:[#allocation2 + $0x9d] sm:$0xff] }
 0x510   : > { %v17524_v34 = vadd.f32 %v4981_v48, %v17314_v46  ;;  %v4983_v1 = vpop.f32.mrb[127].mxu1  ;;  %6116 = vmatprep.subr.bf16.mxu1 %v20682_v41 }
 0x512   : > { %5769 = vmatmul.mubr.bf16.gmra.mrb[232].mxu1 %v17320_v17  ;;  %v14631_v17 = vld [vmem:[%s20507_s3 + $0x250] sm:$0xff]  }
 0x513   : > { %5776 = vmatprep.mubr.bf16.mxu1 %v5562_v3  ;;  %6117 = vmatpush1.bf16.msra.mxu1 %v14629_v38  ;;  %v5564_v38 = vpack.c.bf16 %v5536_v26, %v5535_v22 }
 0x514   : > { %6118 = vmatprep.subr.bf16.mxu1 %v20682_v41 }
 0x515   : > { %v4986_v56 = vpop.f32.mrb[128].mxu1 }
 0x516   : > { %v17533_v45 = vadd.f32 %v4986_v56, %v17327_v61  ;;  %v4988_v46 = vpop.f32.mrb[129].mxu1  ;;  %v14632_v61 = vld [vmem:[%s20507_s3 + $0x258] sm:$0xff]  }
 0x517   : > { %v4989_v42 = vpop.f32.mrb[130].mxu1  ;;  %6119 = vmatpush1.bf16.msra.mxu1 %v14630_v60  ;;  %v5538_v60 = vld [vmem:[#allocation2 + $0xad] sm:$0xff] }
 0x518   : > { %v17539_v35 = vadd.f32 %v4989_v42, %v17329_v15  ;;  %v4991_v28 = vpop.f32.mrb[131].mxu1  ;;  %6120 = vmatprep.subr.bf16.mxu1 %v20682_v41  ;;  %v5537_v42 = vld [vmem:[#allocation2 + $0xa5] sm:$0xff] }
 0x51a   : > { %5777 = vmatmul.mubr.bf16.gmra.mrb[236].mxu1 %v17335_v58  ;;  %v14633_v58 = vld [vmem:[%s20507_s3 + $0x260] sm:$0xff]  }
 0x51b   : > { %5784 = vmatprep.mubr.bf16.mxu1 %v5563_v10  ;;  %6121 = vmatpush1.bf16.msra.mxu1 %v14631_v17  ;;  %v5565_v17 = vpack.c.bf16 %v5538_v60, %v5537_v42  ;;  %v5539_v10 = vld [vmem:[#allocation2 + $0xb5] sm:$0xff] }
 0x51c   : > { %6122 = vmatprep.subr.bf16.mxu1 %v20682_v41 }
 0x51d   : > { %v4994_v2 = vpop.f32.mrb[132].mxu1 }
 0x51e   : > { %v17548_v21 = vadd.f32 %v4994_v2, %v17342_v19  ;;  %v4996_v15 = vpop.f32.mrb[133].mxu1  ;;  %v14634_v19 = vld [vmem:[%s20507_s3 + $0x268] sm:$0xff]  }
 0x51f   : > { %v4997_v11 = vpop.f32.mrb[134].mxu1  ;;  %6123 = vmatpush1.bf16.msra.mxu1 %v14632_v61  ;;  %v5540_v61 = vld [vmem:[#allocation2 + $0xbd] sm:$0xff] }
 0x520   : > { %v17554_v55 = vadd.f32 %v4997_v11, %v17344_v16  ;;  %v4999_v48 = vpop.f32.mrb[135].mxu1  ;;  %6124 = vmatprep.subr.bf16.mxu1 %v20682_v41  ;;  %v5566_v22 = vpack.c.bf16 %v5540_v61, %v5539_v10 }
 0x522   : > { %5785 = vmatmul.mubr.bf16.gmra.mrb[240].mxu1 %v17350_v12  ;;  %v14635_v12 = vld [vmem:[%s20507_s3 + $0x270] sm:$0xff]  }
 0x523   : > { %5792 = vmatprep.mubr.bf16.mxu1 %v5564_v38  ;;  %6125 = vmatpush1.bf16.msra.mxu1 %v14633_v58 }
 0x524   : > { %6126 = vmatprep.subr.bf16.mxu1 %v20682_v41 }
 0x525   : > { %v5002_v1 = vpop.f32.mrb[136].mxu1 }
 0x526   : > { %v17563_v3 = vadd.f32 %v5002_v1, %v17357_v39  ;;  %v5004_v16 = vpop.f32.mrb[137].mxu1  ;;  %v14636_v39 = vld [vmem:[%s20507_s3 + $0x278] sm:$0xff]   ;;  %v5541_v1 = vld [vmem:[#allocation2 + $0xc5] sm:$0xff] }
 0x527   : > { %v5005_v56 = vpop.f32.mrb[138].mxu1  ;;  %6127 = vmatpush1.bf16.msra.mxu1 %v14634_v19 }
 0x528   : > { %v17569_v46 = vadd.f32 %v5005_v56, %v17359_v5  ;;  %v5007_v32 = vpop.f32.mrb[139].mxu1  ;;  %6128 = vmatprep.subr.bf16.mxu1 %v20682_v41  ;;  %v5543_v56 = vld [vmem:[#allocation2 + $0xd5] sm:$0xff] }
 0x52a   : > { %5793 = vmatmul.mubr.bf16.gmra.mrb[244].mxu1 %v17365_v57 }
 0x52b   : > { %5800 = vmatprep.mubr.bf16.mxu1 %v5565_v17  ;;  %6129 = vmatpush1.bf16.msra.mxu1 %v14635_v12 }
 0x52c   : > { %6130 = vmatprep.subr.bf16.mxu1 %v20682_v41 }
 0x52d   : > { %v5010_v28 = vpop.f32.mrb[140].mxu1 }
 0x52e   : > { %v17578_v36 = vadd.f32 %v5010_v28, %v17372_v14  ;;  %v5012_v5 = vpop.f32.mrb[141].mxu1  ;;  %v5542_v14 = vld [vmem:[#allocation2 + $0xcd] sm:$0xff] }
 0x52f   : > { %v5013_v2 = vpop.f32.mrb[142].mxu1  ;;  %6131 = vmatpush1.bf16.msra.mxu1 %v14636_v39  ;;  %v5567_v16 = vpack.c.bf16 %v5542_v14, %v5541_v1  ;;  %v20760_v39 = vld [vmem:[#allocation3_spill] sm:$0xff]  ;;  %v5548_v14 = vld [vmem:[#allocation2 + $0xfd] sm:$0xff] }
 0x530   : > { %v17581_v15 = vadd.f32 %v5013_v2, %v17374_v47  ;;  %v5015_v57 = vpop.f32.mrb[143].mxu1  ;;  %v5546_v5 = vld [vmem:[#allocation2 + $0xed] sm:$0xff]  ;;  %v5545_v2 = vld [vmem:[#allocation2 + $0xe5] sm:$0xff] }
 0x531   : > { %v5569_v57 = vpack.c.bf16 %v5546_v5, %v5545_v2  ;;  %v5551_v5 = vld [vmem:[#allocation2 + $0x115] sm:$0xff] }
 0x532   : > { %5801 = vmatmul.mubr.bf16.gmra.mrb[248].mxu1 %v17377_v30 }
 0x533   : > { %5808 = vmatprep.mubr.bf16.mxu1 %v5566_v22  ;;  %v20761_v22 = vld [vmem:[#allocation9_spill] sm:$0xff] }
 0x535   : > { %v5288_v26 = vpop.f32.mrb[144].mxu1 }
 0x536   : > { %v17585_v11 = vadd.f32 %v5288_v26, %v17381_v8  ;;  %v5290_v58 = vpop.f32.mrb[145].mxu1  ;;  %v5544_v8 = vld [vmem:[#allocation2 + $0xdd] sm:$0xff] }
 0x537   : > { %v5291_v48 = vpop.f32.mrb[146].mxu1  ;;  %v5547_v58 = vld [vmem:[#allocation2 + $0xf5] sm:$0xff] }
 0x538   : > { %v17588_v38 = vadd.f32 %v5291_v48, %v17384_v31  ;;  %v5293_v19 = vpop.f32.mrb[147].mxu1  ;;  %v5568_v31 = vpack.c.bf16 %v5544_v8, %v5543_v56  ;;  %v5550_v56 = vld [vmem:[#allocation2 + $0x10d] sm:$0xff] }
 0x53a   : > { %5809 = vmatmul.mubr.bf16.gmra.mrb[252].mxu1 %v17386_v49 }
 0x53b   : > { %5816 = vmatprep.mubr.bf16.mxu1 %v5567_v16 }
 0x53d   : > { %v5296_v47 = vpop.f32.mrb[148].mxu1 }
 0x53e   : > { %v17592_v30 = vadd.f32 %v5296_v47, %v17390_v24  ;;  %v5298_v60 = vpop.f32.mrb[149].mxu1  ;;  %v20762_v47 = vld [vmem:[#allocation6_spill] sm:$0xff] }
 0x53f   : > { %v5299_v12 = vpop.f32.mrb[150].mxu1 }
 0x540   : > { %v17595_v32 = vadd.f32 %v5299_v12, %v17393_v29  ;;  %v5301_v42 = vpop.f32.mrb[151].mxu1 }
 0x542   : > { %5817 = vmatmul.mubr.bf16.gmra.mrb[0].mxu1 %v17395_v44 }
 0x543   : > { %5824 = vmatprep.mubr.bf16.mxu1 %v5568_v31  ;;  %v5549_v31 = vld [vmem:[#allocation2 + $0x105] sm:$0xff] }
 0x545   : > { %v5304_v17 = vpop.f32.mrb[152].mxu1 }
 0x546   : > { %v17599_v49 = vadd.f32 %v5304_v17, %v20760_v39  ;;  %v5306_v28 = vpop.f32.mrb[153].mxu1  ;;  %v5571_v17 = vpack.c.bf16 %v5550_v56, %v5549_v31  ;;  %v20763_v39 = vld [vmem:[#allocation11_spill] sm:$0xff] }
 0x547   : > { %v5307_v24 = vpop.f32.mrb[154].mxu1 }
 0x548   : > { %v17602_v10 = vadd.f32 %v5307_v24, %v17402_v50  ;;  %v5309_v61 = vpop.f32.mrb[155].mxu1  ;;  %v5570_v50 = vpack.c.bf16 %v5548_v14, %v5547_v58  ;;  %v5552_v24 = vld [vmem:[#allocation2 + $0x11d] sm:$0xff]  ;;  %v5553_v58 = vld [vmem:[#allocation2 + $0x125] sm:$0xff]  ;;  %v5554_v14 = vld [vmem:[#allocation2 + $0x12d] sm:$0xff] }
 0x54a   : > { %5825 = vmatmul.mubr.bf16.gmra.mrb[4].mxu1 %v17404_v62 }
 0x54b   : > { %5832 = vmatprep.mubr.bf16.mxu1 %v5569_v57 }
 0x54d   : > { %v5312_v29 = vpop.f32.mrb[156].mxu1 }
 0x54e   : > { %v17606_v44 = vadd.f32 %v5312_v29, %v20761_v22  ;;  %v5314_v26 = vpop.f32.mrb[157].mxu1  ;;  %v20764_v22 = vld [vmem:[#allocation5_spill] sm:$0xff] }
 0x54f   : > { %v5315_v48 = vpop.f32.mrb[158].mxu1 }
 0x550   : > { %v17609_v19 = vadd.f32 %v5315_v48, %v17411_v51  ;;  %v5317_v1 = vpop.f32.mrb[159].mxu1 }
 0x552   : > { %5833 = vmatmul.mubr.bf16.gmra.mrb[8].mxu1 %v17413_v7 }
 0x553   : > { %5840 = vmatprep.mubr.bf16.mxu1 %v5570_v50 }
 0x555   : > { %v5320_v16 = vpop.f32.mrb[160].mxu1 }
 0x556   : > { %v17613_v62 = vadd.f32 %v5320_v16, %v20762_v47  ;;  %v5322_v60 = vpop.f32.mrb[161].mxu1  ;;  %v5573_v16 = vpack.c.bf16 %v5554_v14, %v5553_v58  ;;  %v5556_v47 = vld [vmem:[#allocation2 + $0x13d] sm:$0xff] }
 0x557   : > { %v5323_v8 = vpop.f32.mrb[162].mxu1  ;;  %v20765_v60 = vld [vmem:[#allocation4_spill] sm:$0xff] }
 0x558   : > { %v17616_v12 = vadd.f32 %v5323_v8, %v17420_v0  ;;  %v5325_v42 = vpop.f32.mrb[163].mxu1  ;;  %v5572_v0 = vpack.c.bf16 %v5552_v24, %v5551_v5  ;;  %v5919_v14 = vld [vmem:[#allocation2 + $0x36] sm:$0xff] }
 0x55a   : > { %5841 = vmatmul.mubr.bf16.gmra.mrb[12].mxu1 %v17422_v33 }
 0x55b   : > { %5848 = vmatprep.mubr.bf16.mxu1 %v5571_v17 }
 0x55d   : > { %v5328_v51 = vpop.f32.mrb[164].mxu1 }
 0x55e   : > { %v17620_v7 = vadd.f32 %v5328_v51, %v20763_v39  ;;  %v5330_v28 = vpop.f32.mrb[165].mxu1  ;;  %v5502_v39 = vld [vmem:[#allocation2 + $0x13c] sm:$0xff] }
 0x55f   : > { %v5331_v61 = vpop.f32.mrb[166].mxu1 }
 0x560   : > { %v17623_v2 = vadd.f32 %v5331_v61, %v17429_v23  ;;  %v5333_v57 = vpop.f32.mrb[167].mxu1  ;;  %v5555_v23 = vld [vmem:[#allocation2 + $0x135] sm:$0xff] }
 0x561   : > { %v5574_v31 = vpack.c.bf16 %v5556_v47, %v5555_v23  ;;  %v5918_v61 = vld [vmem:[#allocation2 + $0x2e] sm:$0xff] }
 0x562   : > { %5849 = vmatmul.mubr.bf16.gmra.mrb[16].mxu1 %v17431_v6 }
 0x563   : > { %5856 = vmatprep.mubr.bf16.mxu1 %v5572_v0 }
 0x565   : > { %v5336_v29 = vpop.f32.mrb[168].mxu1 }
 0x566   : > { %v17627_v33 = vadd.f32 %v5336_v29, %v20764_v22  ;;  %v5338_v26 = vpop.f32.mrb[169].mxu1 }
 0x567   : > { %v5339_v48 = vpop.f32.mrb[170].mxu1 }
 0x568   : > { %v17630_v1 = vadd.f32 %v5339_v48, %v17438_v40  ;;  %v5341_v50 = vpop.f32.mrb[171].mxu1  ;;  %v5501_v40 = vld [vmem:[#allocation2 + $0x134] sm:$0xff] }
 0x569   : > { %v5520_v24 = vpack.c.bf16 %v5502_v39, %v5501_v40 }
 0x56a   : > { %5857 = vmatmul.mubr.bf16.gmra.mrb[20].mxu1 %v17440_v53 }
 0x56b   : > { %5864 = vmatprep.mubr.bf16.mxu1 %v5573_v16 }
 0x56d   : > { %v5344_v6 = vpop.f32.mrb[172].mxu1 }
 0x56e   : > { %v17634_v56 = vadd.f32 %v5344_v6, %v20765_v60  ;;  %v5346_v8 = vpop.f32.mrb[173].mxu1  ;;  %v5922_v60 = vld [vmem:[#allocation2 + $0x4e] sm:$0xff] }
 0x56f   : > { %v5347_v42 = vpop.f32.mrb[174].mxu1 }
 0x570   : > { %v17637_v17 = vadd.f32 %v5347_v42, %v17447_v54  ;;  %v5349_v51 = vpop.f32.mrb[175].mxu1  ;;  %v5917_v54 = vld [vmem:[#allocation2 + $0x26] sm:$0xff] }
 0x571   : > { %v5953_v22 = vpack.c.bf16 %v5918_v61, %v5917_v54 }
 0x572   : > { %5865 = vmatmul.mubr.bf16.gmra.mrb[24].mxu1 %v17449_v52 }
 0x573   : > { %5872 = vmatprep.mubr.bf16.mxu1 %v5574_v31  ;;  %v5921_v31 = vld [vmem:[#allocation2 + $0x46] sm:$0xff] }
 0x574   : > { %v5955_v51 = vpack.c.bf16 %v5922_v60, %v5921_v31 }
 0x575   : > { %v5352_v53 = vpop.f32.mrb[176].mxu1 }
 0x576   : > { %v17641_v28 = vadd.f32 %v5352_v53, %v17453_v27  ;;  %v5354_v5 = vpop.f32.mrb[177].mxu1  ;;  %v5920_v27 = vld [vmem:[#allocation2 + $0x3e] sm:$0xff]  ;;  %v5923_v53 = vld [vmem:[#allocation2 + $0x56] sm:$0xff] }
 0x577   : > { %v5355_v57 = vpop.f32.mrb[178].mxu1  ;;  %v5954_v23 = vpack.c.bf16 %v5920_v27, %v5919_v14  ;;  %v5924_v5 = vld [vmem:[#allocation2 + $0x5e] sm:$0xff]  ;;  %v5925_v14 = vld [vmem:[#allocation2 + $0x66] sm:$0xff] }
 0x578   : > { %v17644_v0 = vadd.f32 %v5355_v57, %v17456_v37  ;;  %v5357_v29 = vpop.f32.mrb[179].mxu1  ;;  %v5956_v57 = vpack.c.bf16 %v5924_v5, %v5923_v53  ;;  %v5929_v53 = vld [vmem:[#allocation2 + $0x86] sm:$0xff] }
 0x57a   : > { %5873 = vmatmul.mubr.bf16.gmra.mrb[28].mxu1 %v5520_v24 }
 0x57b   : > { %6132 = vmatprep.mubr.bf16.mxu1 %v5953_v22 }
 0x57d   : > { %v5360_v52 = vpop.f32.mrb[180].mxu1 }
 0x57e   : > { %v17647_v26 = vadd.f32 %v5360_v52, %v17459_v43  ;;  %v5362_v58 = vpop.f32.mrb[181].mxu1 }
 0x57f   : > { %v5363_v48 = vpop.f32.mrb[182].mxu1 }
 0x580   : > { %v17650_v50 = vadd.f32 %v5363_v48, %v17465_v25  ;;  %v5365_v16 = vpop.f32.mrb[183].mxu1 }
 0x582   : > { %6133 = vmatmul.mubr.bf16.vlgmr.msra.gmra.mrb[32].mxu1 %v5953_v22  ;;  %v5926_v22 = vld [vmem:[#allocation2 + $0x6e] sm:$0xff] }
 0x583   : > { %6140 = vmatprep.mubr.bf16.mxu1 %v5954_v23  ;;  %v5957_v27 = vpack.c.bf16 %v5926_v22, %v5925_v14 }
 0x585   : > { %v5368_v37 = vpop.f32.mrb[184].mxu1 }
 0x586   : > { %v17653_v47 = vadd.f32 %v5368_v37, %v17473_v9  ;;  %v5370_v6 = vpop.f32.mrb[185].mxu1  ;;  %v5928_v37 = vld [vmem:[#allocation2 + $0x7e] sm:$0xff] }
 0x587   : > { %v5371_v8 = vpop.f32.mrb[186].mxu1 }
 0x588   : > { %v17656_v43 = vadd.f32 %v5371_v8, %v17479_v18  ;;  %v5373_v42 = vpop.f32.mrb[187].mxu1 }
 0x58a   : > { %6141 = vmatmul.mubr.bf16.gmra.mrb[36].mxu1 %v5954_v23  ;;  %v5927_v23 = vld [vmem:[#allocation2 + $0x76] sm:$0xff] }
 0x58b   : > { %6148 = vmatprep.mubr.bf16.mxu1 %v5955_v51  ;;  %v5958_v8 = vpack.c.bf16 %v5928_v37, %v5927_v23  ;;  %v5933_v23 = vld [vmem:[#allocation2 + $0xa6] sm:$0xff] }
 0x58d   : > { %v5376_v25 = vpop.f32.mrb[188].mxu1 }
 0x58e   : > { %v17659_v40 = vadd.f32 %v5376_v25, %v17488_v63  ;;  %v5378_v39 = vpop.f32.mrb[189].mxu1 }
 0x58f   : > { %v5379_v9 = vpop.f32.mrb[190].mxu1 }
 0x590   : > { %v17662_v24 = vadd.f32 %v5379_v9, %v17494_v59  ;;  %v5381_v61 = vpop.f32.mrb[191].mxu1 }
 0x592   : > { %6149 = vmatmul.mubr.bf16.gmra.mrb[40].mxu1 %v5955_v51  ;;  %v5930_v51 = vld [vmem:[#allocation2 + $0x8e] sm:$0xff] }
 0x593   : > { %6156 = vmatprep.mubr.bf16.mxu1 %v5956_v57  ;;  %v5959_v5 = vpack.c.bf16 %v5930_v51, %v5929_v53 }
 0x595   : > { %v5384_v18 = vpop.f32.mrb[192].mxu1 }
 0x596   : > { %v17665_v29 = vadd.f32 %v5384_v18, %v17503_v20  ;;  %v5386_v54 = vpop.f32.mrb[193].mxu1  ;;  %v5932_v18 = vld [vmem:[#allocation2 + $0x9e] sm:$0xff] }
 0x597   : > { %v5387_v52 = vpop.f32.mrb[194].mxu1 }
 0x598   : > { %v17668_v63 = vadd.f32 %v5387_v52, %v17509_v4  ;;  %v5389_v58 = vpop.f32.mrb[195].mxu1 }
 0x59a   : > { %6157 = vmatmul.mubr.bf16.gmra.mrb[44].mxu1 %v5956_v57  ;;  %v5931_v57 = vld [vmem:[#allocation2 + $0x96] sm:$0xff] }
 0x59b   : > { %6164 = vmatprep.mubr.bf16.mxu1 %v5957_v27  ;;  %v5960_v52 = vpack.c.bf16 %v5932_v18, %v5931_v57  ;;  %v5937_v57 = vld [vmem:[#allocation2 + $0xc6] sm:$0xff] }
 0x59c   : > { %v14638_v18 = vld [vmem:[%s20509_s5 + $0x8] sm:$0xff]  }
 0x59d   : > { %v5392_v59 = vpop.f32.mrb[196].mxu1 }
 0x59e   : > { %v17671_v48 = vadd.f32 %v5392_v59, %v17518_v13  ;;  %v5394_v16 = vpop.f32.mrb[197].mxu1 }
 0x59f   : > { %v5395_v20 = vpop.f32.mrb[198].mxu1 }
 0x5a0   : > { %v17674_v6 = vadd.f32 %v5395_v20, %v17524_v34  ;;  %v5397_v60 = vpop.f32.mrb[199].mxu1 }
 0x5a2   : > { %6165 = vmatmul.mubr.bf16.gmra.mrb[48].mxu1 %v5957_v27  ;;  %v5934_v27 = vld [vmem:[#allocation2 + $0xae] sm:$0xff] }
 0x5a3   : > { %6172 = vmatprep.mubr.bf16.mxu1 %v5958_v8  ;;  %v5961_v37 = vpack.c.bf16 %v5934_v27, %v5933_v23  ;;  %v14640_v23 = vld [vmem:[%s20509_s5 + $0x18] sm:$0xff]  }
 0x5a5   : > { %v5400_v4 = vpop.f32.mrb[200].mxu1 }
 0x5a6   : > { %v17677_v42 = vadd.f32 %v5400_v4, %v17533_v45  ;;  %v5402_v31 = vpop.f32.mrb[201].mxu1  ;;  %v5936_v4 = vld [vmem:[#allocation2 + $0xbe] sm:$0xff] }
 0x5a7   : > { %v5403_v25 = vpop.f32.mrb[202].mxu1 }
 0x5a8   : > { %v17680_v13 = vadd.f32 %v5403_v25, %v17539_v35  ;;  %v5405_v39 = vpop.f32.mrb[203].mxu1 }
 0x5aa   : > { %6173 = vmatmul.mubr.bf16.gmra.mrb[52].mxu1 %v5958_v8  ;;  %v5935_v8 = vld [vmem:[#allocation2 + $0xb6] sm:$0xff] }
 0x5ab   : > { %6180 = vmatprep.mubr.bf16.mxu1 %v5959_v5  ;;  %v5962_v25 = vpack.c.bf16 %v5936_v4, %v5935_v8 }
 0x5ad   : > { %v5408_v34 = vpop.f32.mrb[204].mxu1 }
 0x5ae   : > { %v17683_v9 = vadd.f32 %v5408_v34, %v17548_v21  ;;  %v5410_v61 = vpop.f32.mrb[205].mxu1 }
 0x5af   : > { %v5411_v45 = vpop.f32.mrb[206].mxu1 }
 0x5b0   : > { %v17686_v54 = vadd.f32 %v5411_v45, %v17554_v55  ;;  %v5413_v22 = vpop.f32.mrb[207].mxu1 }
 0x5b2   : > { %6181 = vmatmul.mubr.bf16.gmra.mrb[56].mxu1 %v5959_v5  ;;  %v5938_v5 = vld [vmem:[#allocation2 + $0xce] sm:$0xff] }
 0x5b3   : > { %6188 = vmatprep.mubr.bf16.mxu1 %v5960_v52  ;;  %v5963_v45 = vpack.c.bf16 %v5938_v5, %v5937_v57 }
 0x5b5   : > { %v5416_v35 = vpop.f32.mrb[208].mxu1 }
 0x5b6   : > { %v17689_v58 = vadd.f32 %v5416_v35, %v17563_v3  ;;  %v5418_v14 = vpop.f32.mrb[209].mxu1  ;;  %v5940_v35 = vld [vmem:[#allocation2 + $0xde] sm:$0xff] }
 0x5b7   : > { %v5419_v59 = vpop.f32.mrb[210].mxu1 }
 0x5b8   : > { %v17692_v21 = vadd.f32 %v5419_v59, %v17569_v46  ;;  %v5421_v16 = vpop.f32.mrb[211].mxu1 }
 0x5b9   : > { %v14639_v16 = vld [vmem:[%s20509_s5 + $0x10] sm:$0xff]  }
 0x5ba   : > { %6189 = vmatmul.mubr.bf16.gmra.mrb[60].mxu1 %v5960_v52  ;;  %v5939_v52 = vld [vmem:[#allocation2 + $0xd6] sm:$0xff] }
 0x5bb   : > { %6196 = vmatprep.mubr.bf16.mxu1 %v5961_v37 }
 0x5bd   : > { %v5424_v55 = vpop.f32.mrb[212].mxu1 }
 0x5be   : > { %v17695_v20 = vadd.f32 %v5424_v55, %v17578_v36  ;;  %v5426_v60 = vpop.f32.mrb[213].mxu1 }
 0x5bf   : > { %v5427_v3 = vpop.f32.mrb[214].mxu1  ;;  %v5942_v60 = vld [vmem:[#allocation2 + $0xee] sm:$0xff] }
 0x5c0   : > { %v17698_v31 = vadd.f32 %v5427_v3, %v17581_v15  ;;  %v5429_v51 = vpop.f32.mrb[215].mxu1  ;;  %v14637_v15 = vld [vmem:[%s20509_s5] sm:$0xff]  }
 0x5c1   : > { %13902 = vmatprep.subr.bf16.mxu0 %v14637_v15  ;;  %v5941_v51 = vld [vmem:[#allocation2 + $0xe6] sm:$0xff] }
 0x5c2   : > { %6197 = vmatmul.mubr.bf16.gmra.mrb[64].mxu1 %v5961_v37  ;;  %13903 = vmatpush3.bf16.msra.mxu0 %v14637_v15  ;;  %v5964_v37 = vpack.c.bf16 %v5940_v35, %v5939_v52  ;;  %v14643_v35 = vld [vmem:[%s20509_s5 + $0x30] sm:$0xff]  }
 0x5c3   : > { %6204 = vmatprep.mubr.bf16.mxu1 %v5962_v25  ;;  %13904 = vmatprep.subr.bf16.mxu0 %v14638_v18 }
 0x5c5   : > { %v5738_v46 = vpop.f32.mrb[216].mxu1 }
 0x5c6   : > { %v17701_v39 = vadd.f32 %v5738_v46, %v17585_v11  ;;  %v5740_v53 = vpop.f32.mrb[217].mxu1  ;;  %13905 = vmatpush3.bf16.msra.mxu0 %v14638_v18  ;;  %v14641_v46 = vld [vmem:[%s20509_s5 + $0x20] sm:$0xff]  }
 0x5c7   : > { %v5741_v34 = vpop.f32.mrb[218].mxu1  ;;  %13906 = vmatprep.subr.bf16.mxu0 %v14639_v16 }
 0x5c8   : > { %v17704_v36 = vadd.f32 %v5741_v34, %v17588_v38  ;;  %v5743_v61 = vpop.f32.mrb[219].mxu1  ;;  %v5943_v34 = vld [vmem:[#allocation2 + $0xf6] sm:$0xff] }
 0x5c9   : > { %v5944_v61 = vld [vmem:[#allocation2 + $0xfe] sm:$0xff] }
 0x5ca   : > { %6205 = vmatmul.mubr.bf16.gmra.mrb[68].mxu1 %v5962_v25  ;;  %13907 = vmatpush3.bf16.msra.mxu0 %v14639_v16  ;;  %v5965_v25 = vpack.c.bf16 %v5942_v60, %v5941_v51  ;;  %v5947_v60 = vld [vmem:[#allocation2 + $0x116] sm:$0xff] }
 0x5cb   : > { %6212 = vmatprep.mubr.bf16.mxu1 %v5963_v45  ;;  %13908 = vmatprep.subr.bf16.mxu0 %v14640_v23 }
 0x5cd   : > { %v5746_v11 = vpop.f32.mrb[220].mxu1 }
 0x5ce   : > { %v17713_v38 = vadd.f32 %v5746_v11, %v17592_v30  ;;  %v5748_v22 = vpop.f32.mrb[221].mxu1  ;;  %13909 = vmatpush3.bf16.msra.mxu0 %v14640_v23  ;;  %v5945_v23 = vld [vmem:[#allocation2 + $0x106] sm:$0xff] }
 0x5cf   : > { %v5749_v14 = vpop.f32.mrb[222].mxu1  ;;  %13910 = vmatprep.subr.bf16.mxu0 %v14641_v46 }
 0x5d0   : > { %v17716_v27 = vadd.f32 %v5749_v14, %v17595_v32  ;;  %v5751_v59 = vpop.f32.mrb[223].mxu1 }
 0x5d2   : > { %6213 = vmatmul.mubr.bf16.gmra.mrb[72].mxu1 %v5963_v45  ;;  %13911 = vmatpush3.bf16.msra.mxu0 %v14641_v46  ;;  %v5966_v45 = vpack.c.bf16 %v5944_v61, %v5943_v34 }
 0x5d3   : > { %6220 = vmatprep.mubr.bf16.mxu1 %v5964_v37 }
 0x5d5   : > { %v5754_v30 = vpop.f32.mrb[224].mxu1 }
 0x5d6   : > { %v17725_v55 = vadd.f32 %v5754_v30, %v17599_v49  ;;  %v5756_v32 = vpop.f32.mrb[225].mxu1  ;;  %v14642_v49 = vld [vmem:[%s20509_s5 + $0x28] sm:$0xff]  }
 0x5d7   : > { %v5757_v8 = vpop.f32.mrb[226].mxu1  ;;  %13912 = vmatprep.subr.bf16.mxu0 %v14642_v49 }
 0x5d8   : > { %v17728_v4 = vadd.f32 %v5757_v8, %v17602_v10  ;;  %v5759_v3 = vpop.f32.mrb[227].mxu1  ;;  %13913 = vmatpush3.bf16.msra.mxu0 %v14642_v49  ;;  %v5948_v8 = vld [vmem:[#allocation2 + $0x11e] sm:$0xff] }
 0x5d9   : > { %13914 = vmatprep.subr.bf16.mxu0 %v14643_v35 }
 0x5da   : > { %6221 = vmatmul.mubr.bf16.gmra.mrb[76].mxu1 %v5964_v37 }
 0x5db   : > { %6228 = vmatprep.mubr.bf16.mxu1 %v5965_v25 }
 0x5dc   : > { %13915 = vmatpush3.bf16.msra.mxu0 %v14643_v35 }
 0x5dd   : > { %v5762_v53 = vpop.f32.mrb[228].mxu1 }
 0x5de   : > { %v17737_v5 = vadd.f32 %v5762_v53, %v17606_v44  ;;  %v5764_v10 = vpop.f32.mrb[229].mxu1  ;;  %v5946_v44 = vld [vmem:[#allocation2 + $0x10e] sm:$0xff] }
 0x5df   : > { %v5765_v57 = vpop.f32.mrb[230].mxu1  ;;  %v5967_v37 = vpack.c.bf16 %v5946_v44, %v5945_v23  ;;  %v5950_v10 = vld [vmem:[#allocation2 + $0x12e] sm:$0xff] }
 0x5e0   : > { %v17740_v15 = vadd.f32 %v5765_v57, %v17609_v19  ;;  %v5767_v18 = vpop.f32.mrb[231].mxu1  ;;  %v14644_v19 = vld [vmem:[%s20509_s5 + $0x38] sm:$0xff]  }
 0x5e1   : > { %13916 = vmatprep.subr.bf16.mxu0 %v14644_v19 }
 0x5e2   : > { %6229 = vmatmul.mubr.bf16.gmra.mrb[80].mxu1 %v5965_v25  ;;  %13917 = vmatpush3.bf16.msra.mxu0 %v14644_v19  ;;  %v5968_v25 = vpack.c.bf16 %v5948_v8, %v5947_v60 }
 0x5e3   : > { %6236 = vmatprep.mubr.bf16.mxu1 %v5966_v45  ;;  %7481 = vmatprep.subr.bf16.mxu0 %v20682_v41 }
 0x5e5   : > { %v5770_v11 = vpop.f32.mrb[232].mxu1 }
 0x5e6   : > { %v17743_v22 = vadd.f32 %v5770_v11, %v17613_v62  ;;  %v5772_v52 = vpop.f32.mrb[233].mxu1 }
 0x5e7   : > { %v5773_v14 = vpop.f32.mrb[234].mxu1 }
 0x5e8   : > { %v17752_v59 = vadd.f32 %v5773_v14, %v17616_v12  ;;  %v5775_v16 = vpop.f32.mrb[235].mxu1 }
 0x5ea   : > { %6237 = vmatmul.mubr.bf16.gmra.mrb[84].mxu1 %v5966_v45  ;;  %v5952_v45 = vld [vmem:[#allocation2 + $0x13e] sm:$0xff] }
 0x5eb   : > { %6244 = vmatprep.mubr.bf16.mxu1 %v5967_v37 }
 0x5ed   : > { %v5778_v62 = vpop.f32.mrb[236].mxu1 }
 0x5ee   : > { %v17755_v30 = vadd.f32 %v5778_v62, %v17620_v7  ;;  %v5780_v32 = vpop.f32.mrb[237].mxu1  ;;  %v5949_v7 = vld [vmem:[#allocation2 + $0x126] sm:$0xff] }
 0x5ef   : > { %v5781_v12 = vpop.f32.mrb[238].mxu1  ;;  %v5969_v18 = vpack.c.bf16 %v5950_v10, %v5949_v7 }
 0x5f0   : > { %v17759_v3 = vadd.f32 %v5781_v12, %v17623_v2  ;;  %v5783_v51 = vpop.f32.mrb[239].mxu1  ;;  %v5951_v2 = vld [vmem:[#allocation2 + $0x136] sm:$0xff] }
 0x5f1   : > { %v5970_v35 = vpack.c.bf16 %v5952_v45, %v5951_v2 }
 0x5f2   : > { %6245 = vmatmul.mubr.bf16.gmra.mrb[88].mxu1 %v5967_v37 }
 0x5f3   : > { %6252 = vmatprep.mubr.bf16.mxu1 %v5968_v25 }
 0x5f5   : > { %v5786_v46 = vpop.f32.mrb[240].mxu1 }
 0x5f6   : > { %v17762_v49 = vadd.f32 %v5786_v46, %v17627_v33  ;;  %v5788_v53 = vpop.f32.mrb[241].mxu1 }
 0x5f7   : > { %v5789_v34 = vpop.f32.mrb[242].mxu1 }
 0x5f8   : > { %v17765_v61 = vadd.f32 %v5789_v34, %v17630_v1  ;;  %v5791_v57 = vpop.f32.mrb[243].mxu1 }
 0x5fa   : > { %6253 = vmatmul.mubr.bf16.gmra.mrb[92].mxu1 %v5968_v25 }
 0x5fb   : > { %6260 = vmatprep.mubr.bf16.mxu1 %v5969_v18 }
 0x5fd   : > { %v5794_v11 = vpop.f32.mrb[244].mxu1 }
 0x5fe   : > { %v17768_v52 = vadd.f32 %v5794_v11, %v17634_v56  ;;  %v5796_v44 = vpop.f32.mrb[245].mxu1 }
 0x5ff   : > { %v5797_v33 = vpop.f32.mrb[246].mxu1 }
 0x600   : > { %v17771_v19 = vadd.f32 %v5797_v33, %v17637_v17  ;;  %v5799_v14 = vpop.f32.mrb[247].mxu1 }
 0x602   : > { %6261 = vmatmul.mubr.bf16.gmra.mrb[96].mxu1 %v5969_v18 }
 0x603   : > { %6268 = vmatprep.mubr.bf16.mxu1 %v5970_v35 }
 0x605   : > { %v5802_v1 = vpop.f32.mrb[248].mxu1 }
 0x606   : > { %v17774_v16 = vadd.f32 %v5802_v1, %v17641_v28  ;;  %v5804_v23 = vpop.f32.mrb[249].mxu1 }
 0x607   : > { %v5805_v37 = vpop.f32.mrb[250].mxu1 }
 0x608   : > { %v17777_v62 = vadd.f32 %v5805_v37, %v17644_v0  ;;  %v5807_v56 = vpop.f32.mrb[251].mxu1 }
 0x60a   : > { %6269 = vmatmul.mubr.bf16.gmra.mrb[100].mxu1 %v5970_v35 }
 0x60d   : > { %v5810_v32 = vpop.f32.mrb[252].mxu1 }
 0x60e   : > { %v17780_v60 = vadd.f32 %v5810_v32, %v17647_v26  ;;  %v5812_v17 = vpop.f32.mrb[253].mxu1 }
 0x60f   : > { %v5813_v8 = vpop.f32.mrb[254].mxu1 }
 0x610   : > { %v17783_v12 = vadd.f32 %v5813_v8, %v17650_v50  ;;  %v5815_v51 = vpop.f32.mrb[255].mxu1 }
 0x615   : > { %v5818_v25 = vpop.f32.mrb[0].mxu1 }
 0x616   : > { %v17786_v28 = vadd.f32 %v5818_v25, %v17653_v47  ;;  %v5820_v46 = vpop.f32.mrb[1].mxu1 }
 0x617   : > { %v5821_v53 = vpop.f32.mrb[2].mxu1 }
 0x618   : > { %v17789_v0 = vadd.f32 %v5821_v53, %v17656_v43  ;;  %v5823_v7 = vpop.f32.mrb[3].mxu1 }
 0x61d   : > { %v5826_v10 = vpop.f32.mrb[4].mxu1 }
 0x61e   : > { %v17792_v26 = vadd.f32 %v5826_v10, %v17659_v40  ;;  %v5828_v34 = vpop.f32.mrb[5].mxu1 }
 0x61f   : > { %v5829_v57 = vpop.f32.mrb[6].mxu1 }
 0x620   : > { %v17795_v50 = vadd.f32 %v5829_v57, %v17662_v24  ;;  %v5831_v18 = vpop.f32.mrb[7].mxu1 }
 0x625   : > { %v5834_v2 = vpop.f32.mrb[8].mxu1 }
 0x626   : > { %v17798_v47 = vadd.f32 %v5834_v2, %v17665_v29  ;;  %v5836_v45 = vpop.f32.mrb[9].mxu1 }
 0x627   : > { %v5837_v11 = vpop.f32.mrb[10].mxu1 }
 0x628   : > { %v17801_v43 = vadd.f32 %v5837_v11, %v17668_v63  ;;  %v5839_v44 = vpop.f32.mrb[11].mxu1 }
 0x62d   : > { %v5842_v33 = vpop.f32.mrb[12].mxu1 }
 0x62e   : > { %v17804_v40 = vadd.f32 %v5842_v33, %v17671_v48  ;;  %v5844_v35 = vpop.f32.mrb[13].mxu1 }
 0x62f   : > { %v5845_v14 = vpop.f32.mrb[14].mxu1 }
 0x630   : > { %v17807_v24 = vadd.f32 %v5845_v14, %v17674_v6  ;;  %v5847_v1 = vpop.f32.mrb[15].mxu1 }
 0x635   : > { %v5850_v23 = vpop.f32.mrb[16].mxu1 }
 0x636   : > { %v17810_v29 = vadd.f32 %v5850_v23, %v17677_v42  ;;  %v5852_v37 = vpop.f32.mrb[17].mxu1 }
 0x637   : > { %v5853_v56 = vpop.f32.mrb[18].mxu1 }
 0x638   : > { %v17813_v63 = vadd.f32 %v5853_v56, %v17680_v13  ;;  %v5855_v32 = vpop.f32.mrb[19].mxu1 }
 0x63d   : > { %v5858_v17 = vpop.f32.mrb[20].mxu1 }
 0x63e   : > { %v17816_v48 = vadd.f32 %v5858_v17, %v17683_v9  ;;  %v5860_v8 = vpop.f32.mrb[21].mxu1 }
 0x63f   : > { %v5861_v51 = vpop.f32.mrb[22].mxu1 }
 0x640   : > { %v17819_v6 = vadd.f32 %v5861_v51, %v17686_v54  ;;  %v5863_v25 = vpop.f32.mrb[23].mxu1 }
 0x645   : > { %v5866_v46 = vpop.f32.mrb[24].mxu1 }
 0x646   : > { %v17822_v42 = vadd.f32 %v5866_v46, %v17689_v58  ;;  %v5868_v53 = vpop.f32.mrb[25].mxu1  ;;  %v17836_v58 = vld [vmem:[%s20508_s4] ss:$0 sm:$0xff] }
 0x647   : > { %v5869_v7 = vpop.f32.mrb[26].mxu1 }
 0x648   : > { %v17825_v13 = vadd.f32 %v5869_v7, %v17692_v21  ;;  %v5871_v10 = vpop.f32.mrb[27].mxu1 }
 0x64d   : > { %v5874_v34 = vpop.f32.mrb[28].mxu1 }
 0x64e   : > { %v17828_v9 = vadd.f32 %v5874_v34, %v17695_v20  ;;  %v5876_v57 = vpop.f32.mrb[29].mxu1 }
 0x64f   : > { %v5877_v18 = vpop.f32.mrb[30].mxu1 }
 0x650   : > { %v17831_v54 = vadd.f32 %v5877_v18, %v17698_v31  ;;  %v5879_v2 = vpop.f32.mrb[31].mxu1 }
 0x655   : > { %v6134_v45 = vpop.f32.mrb[32].mxu1 }
 0x656   : > { %v6277_v21 = vadd.f32 %v6134_v45, %v17701_v39  ;;  %v6136_v11 = vpop.f32.mrb[33].mxu1 }
 0x657   : > { %v6137_v44 = vpop.f32.mrb[34].mxu1 }
 0x658   : > { %v6320_v33 = vadd.f32 %v17836_v58, %v6277_v21  ;;  %v6278_v20 = vadd.f32 %v6137_v44, %v17704_v36  ;;  %v6139_v35 = vpop.f32.mrb[35].mxu1 }
 0x65a   : > { %v6321_v14 = vadd.f32 %v17836_v58, %v6278_v20  ;;  %v6356_v31 = vmax.f32 %v6320_v33, 0.0 }
 0x65c   : > { %v6357_v1 = vmax.f32 %v6321_v14, 0.0 }
 0x65d   : > { %v6142_v23 = vpop.f32.mrb[36].mxu1 }
 0x65e   : > { %v6279_v37 = vadd.f32 %v6142_v23, %v17713_v38  ;;  %v6144_v56 = vpop.f32.mrb[37].mxu1  ;;  %v6392_v32 = vpack.c.bf16 %v6357_v1, %v6356_v31 }
 0x65f   : > { %v6145_v17 = vpop.f32.mrb[38].mxu1 }
 0x660   : > { %v6322_v8 = vadd.f32 %v17836_v58, %v6279_v37  ;;  %v6280_v39 = vadd.f32 %v6145_v17, %v17716_v27  ;;  %v6147_v51 = vpop.f32.mrb[39].mxu1  ;;  %13918 = vmatprep.mubr.bf16.mxu0 %v6392_v32 }
 0x662   : > { %v6323_v25 = vadd.f32 %v17836_v58, %v6280_v39  ;;  %v6358_v36 = vmax.f32 %v6322_v8, 0.0 }
 0x664   : > { %v6359_v46 = vmax.f32 %v6323_v25, 0.0 }
 0x665   : > { %v6150_v53 = vpop.f32.mrb[40].mxu1 }
 0x666   : > { %v6393_v7 = vpack.c.bf16 %v6359_v46, %v6358_v36  ;;  %v6281_v10 = vadd.f32 %v6150_v53, %v17725_v55  ;;  %v6152_v34 = vpop.f32.mrb[41].mxu1 }
 0x667   : > { %v6153_v57 = vpop.f32.mrb[42].mxu1 }
 0x668   : > { %v6324_v38 = vadd.f32 %v17836_v58, %v6281_v10  ;;  %v6282_v18 = vadd.f32 %v6153_v57, %v17728_v4  ;;  %v6155_v2 = vpop.f32.mrb[43].mxu1  ;;  %13919 = vmatmul.mubr.bf16.vlgmr.msra.gmra.mrb[36].mxu0 %v6393_v7 }
 0x66a   : > { %v6325_v27 = vadd.f32 %v17836_v58, %v6282_v18  ;;  %v6360_v45 = vmax.f32 %v6324_v38, 0.0 }
 0x66c   : > { %v6361_v21 = vmax.f32 %v6325_v27, 0.0 }
 0x66d   : > { %v6158_v11 = vpop.f32.mrb[44].mxu1 }
 0x66e   : > { %v6283_v44 = vadd.f32 %v6158_v11, %v17737_v5  ;;  %v6160_v33 = vpop.f32.mrb[45].mxu1  ;;  %v6394_v20 = vpack.c.bf16 %v6361_v21, %v6360_v45 }
 0x66f   : > { %v6161_v35 = vpop.f32.mrb[46].mxu1 }
 0x670   : > { %v6326_v55 = vadd.f32 %v17836_v58, %v6283_v44  ;;  %v6284_v14 = vadd.f32 %v6161_v35, %v17740_v15  ;;  %v6163_v31 = vpop.f32.mrb[47].mxu1  ;;  %13922 = vmatprep.mubr.bf16.mxu0 %v6394_v20 }
 0x672   : > { %v6327_v4 = vadd.f32 %v17836_v58, %v6284_v14  ;;  %v6362_v1 = vmax.f32 %v6326_v55, 0.0 }
 0x674   : > { %v6363_v23 = vmax.f32 %v6327_v4, 0.0 }
 0x675   : > { %v6166_v37 = vpop.f32.mrb[48].mxu1 }
 0x676   : > { %v6285_v56 = vadd.f32 %v6166_v37, %v17743_v22  ;;  %v6168_v32 = vpop.f32.mrb[49].mxu1  ;;  %v6395_v17 = vpack.c.bf16 %v6363_v23, %v6362_v1 }
 0x677   : > { %v6169_v8 = vpop.f32.mrb[50].mxu1 }
 0x678   : > { %v6328_v5 = vadd.f32 %v17836_v58, %v6285_v56  ;;  %v6286_v39 = vadd.f32 %v6169_v8, %v17752_v59  ;;  %v6171_v51 = vpop.f32.mrb[51].mxu1  ;;  %13923 = vmatmul.mubr.bf16.gmra.mrb[40].mxu0 %v6395_v17 }
 0x67a   : > { %v6329_v15 = vadd.f32 %v17836_v58, %v6286_v39  ;;  %v6364_v25 = vmax.f32 %v6328_v5, 0.0 }
 0x67c   : > { %v6365_v36 = vmax.f32 %v6329_v15, 0.0 }
 0x67d   : > { %v6174_v46 = vpop.f32.mrb[52].mxu1 }
 0x67e   : > { %v6287_v53 = vadd.f32 %v6174_v46, %v17755_v30  ;;  %v6176_v7 = vpop.f32.mrb[53].mxu1  ;;  %v6396_v10 = vpack.c.bf16 %v6365_v36, %v6364_v25 }
 0x67f   : > { %v6177_v34 = vpop.f32.mrb[54].mxu1 }
 0x680   : > { %v6330_v22 = vadd.f32 %v17836_v58, %v6287_v53  ;;  %v6288_v57 = vadd.f32 %v6177_v34, %v17759_v3  ;;  %v6179_v38 = vpop.f32.mrb[55].mxu1  ;;  %13926 = vmatprep.mubr.bf16.mxu0 %v6396_v10 }
 0x682   : > { %v6331_v59 = vadd.f32 %v17836_v58, %v6288_v57  ;;  %v6366_v18 = vmax.f32 %v6330_v22, 0.0 }
 0x684   : > { %v6367_v2 = vmax.f32 %v6331_v59, 0.0 }
 0x685   : > { %v6182_v27 = vpop.f32.mrb[56].mxu1 }
 0x686   : > { %v6289_v45 = vadd.f32 %v6182_v27, %v17762_v49  ;;  %v6184_v21 = vpop.f32.mrb[57].mxu1  ;;  %v6397_v11 = vpack.c.bf16 %v6367_v2, %v6366_v18 }
 0x687   : > { %v6185_v44 = vpop.f32.mrb[58].mxu1 }
 0x688   : > { %v6332_v30 = vadd.f32 %v17836_v58, %v6289_v45  ;;  %v6290_v33 = vadd.f32 %v6185_v44, %v17765_v61  ;;  %v6187_v20 = vpop.f32.mrb[59].mxu1  ;;  %13927 = vmatmul.mubr.bf16.gmra.mrb[44].mxu0 %v6397_v11 }
 0x68a   : > { %v6333_v3 = vadd.f32 %v17836_v58, %v6290_v33  ;;  %v6368_v35 = vmax.f32 %v6332_v30, 0.0 }
 0x68c   : > { %v6369_v55 = vmax.f32 %v6333_v3, 0.0 }
 0x68d   : > { %v6190_v14 = vpop.f32.mrb[60].mxu1 }
 0x68e   : > { %v6291_v31 = vadd.f32 %v6190_v14, %v17768_v52  ;;  %v6192_v4 = vpop.f32.mrb[61].mxu1  ;;  %v6398_v1 = vpack.c.bf16 %v6369_v55, %v6368_v35 }
 0x68f   : > { %v6193_v23 = vpop.f32.mrb[62].mxu1 }
 0x690   : > { %v6334_v49 = vadd.f32 %v17836_v58, %v6291_v31  ;;  %v6292_v37 = vadd.f32 %v6193_v23, %v17771_v19  ;;  %v6195_v56 = vpop.f32.mrb[63].mxu1  ;;  %13930 = vmatprep.mubr.bf16.mxu0 %v6398_v1 }
 0x692   : > { %v6335_v61 = vadd.f32 %v17836_v58, %v6292_v37  ;;  %v6370_v32 = vmax.f32 %v6334_v49, 0.0 }
 0x694   : > { %v6371_v17 = vmax.f32 %v6335_v61, 0.0 }
 0x695   : > { %v6198_v8 = vpop.f32.mrb[64].mxu1 }
 0x696   : > { %v6293_v5 = vadd.f32 %v6198_v8, %v17774_v16  ;;  %v6200_v39 = vpop.f32.mrb[65].mxu1  ;;  %v6399_v51 = vpack.c.bf16 %v6371_v17, %v6370_v32 }
 0x697   : > { %v6201_v15 = vpop.f32.mrb[66].mxu1 }
 0x698   : > { %v6336_v52 = vadd.f32 %v17836_v58, %v6293_v5  ;;  %v6294_v25 = vadd.f32 %v6201_v15, %v17777_v62  ;;  %v6203_v36 = vpop.f32.mrb[67].mxu1  ;;  %13931 = vmatmul.mubr.bf16.gmra.mrb[48].mxu0 %v6399_v51 }
 0x69a   : > { %v6337_v19 = vadd.f32 %v17836_v58, %v6294_v25  ;;  %v6372_v46 = vmax.f32 %v6336_v52, 0.0 }
 0x69c   : > { %v6373_v53 = vmax.f32 %v6337_v19, 0.0 }
 0x69d   : > { %v6206_v7 = vpop.f32.mrb[68].mxu1 }
 0x69e   : > { %v6295_v10 = vadd.f32 %v6206_v7, %v17780_v60  ;;  %v6208_v34 = vpop.f32.mrb[69].mxu1  ;;  %v6400_v22 = vpack.c.bf16 %v6373_v53, %v6372_v46 }
 0x69f   : > { %v6209_v57 = vpop.f32.mrb[70].mxu1 }
 0x6a0   : > { %v6338_v16 = vadd.f32 %v17836_v58, %v6295_v10  ;;  %v6296_v38 = vadd.f32 %v6209_v57, %v17783_v12  ;;  %v6211_v59 = vpop.f32.mrb[71].mxu1  ;;  %13934 = vmatprep.mubr.bf16.mxu0 %v6400_v22 }
 0x6a2   : > { %v6339_v62 = vadd.f32 %v17836_v58, %v6296_v38  ;;  %v6374_v18 = vmax.f32 %v6338_v16, 0.0 }
 0x6a4   : > { %v6375_v2 = vmax.f32 %v6339_v62, 0.0 }
 0x6a5   : > { %v6214_v27 = vpop.f32.mrb[72].mxu1 }
 0x6a6   : > { %v6297_v45 = vadd.f32 %v6214_v27, %v17786_v28  ;;  %v6216_v21 = vpop.f32.mrb[73].mxu1  ;;  %v6401_v11 = vpack.c.bf16 %v6375_v2, %v6374_v18 }
 0x6a7   : > { %v6217_v44 = vpop.f32.mrb[74].mxu1 }
 0x6a8   : > { %v6340_v60 = vadd.f32 %v17836_v58, %v6297_v45  ;;  %v6298_v30 = vadd.f32 %v6217_v44, %v17789_v0  ;;  %v6219_v33 = vpop.f32.mrb[75].mxu1  ;;  %13935 = vmatmul.mubr.bf16.gmra.mrb[52].mxu0 %v6401_v11 }
 0x6aa   : > { %v6341_v12 = vadd.f32 %v17836_v58, %v6298_v30  ;;  %v6376_v20 = vmax.f32 %v6340_v60, 0.0 }
 0x6ac   : > { %v6377_v3 = vmax.f32 %v6341_v12, 0.0 }
 0x6ad   : > { %v6222_v35 = vpop.f32.mrb[76].mxu1 }
 0x6ae   : > { %v6299_v55 = vadd.f32 %v6222_v35, %v17792_v26  ;;  %v6224_v14 = vpop.f32.mrb[77].mxu1  ;;  %v6402_v31 = vpack.c.bf16 %v6377_v3, %v6376_v20 }
 0x6af   : > { %v6225_v4 = vpop.f32.mrb[78].mxu1 }
 0x6b0   : > { %v6342_v28 = vadd.f32 %v17836_v58, %v6299_v55  ;;  %v6300_v1 = vadd.f32 %v6225_v4, %v17795_v50  ;;  %v6227_v23 = vpop.f32.mrb[79].mxu1  ;;  %13938 = vmatprep.mubr.bf16.mxu0 %v6402_v31 }
 0x6b2   : > { %v6343_v0 = vadd.f32 %v17836_v58, %v6300_v1  ;;  %v6378_v49 = vmax.f32 %v6342_v28, 0.0 }
 0x6b4   : > { %v6379_v37 = vmax.f32 %v6343_v0, 0.0 }
 0x6b5   : > { %v6230_v56 = vpop.f32.mrb[80].mxu1 }
 0x6b6   : > { %v6301_v61 = vadd.f32 %v6230_v56, %v17798_v47  ;;  %v6232_v32 = vpop.f32.mrb[81].mxu1  ;;  %v6403_v17 = vpack.c.bf16 %v6379_v37, %v6378_v49 }
 0x6b7   : > { %v6233_v8 = vpop.f32.mrb[82].mxu1 }
 0x6b8   : > { %v6344_v26 = vadd.f32 %v17836_v58, %v6301_v61  ;;  %v6302_v5 = vadd.f32 %v6233_v8, %v17801_v43  ;;  %v6235_v39 = vpop.f32.mrb[83].mxu1  ;;  %13939 = vmatmul.mubr.bf16.gmra.mrb[56].mxu0 %v6403_v17 }
 0x6b9   : > { %v17917_v39 = vld [vmem:[%s20510_s6] ss:$0 sm:$0xff] }
 0x6ba   : > { %v6345_v50 = vadd.f32 %v17836_v58, %v6302_v5  ;;  %v6380_v51 = vmax.f32 %v6344_v26, 0.0 }
 0x6bc   : > { %v6381_v15 = vmax.f32 %v6345_v50, 0.0 }
 0x6bd   : > { %v6238_v52 = vpop.f32.mrb[84].mxu1 }
 0x6be   : > { %v6303_v25 = vadd.f32 %v6238_v52, %v17804_v40  ;;  %v6240_v36 = vpop.f32.mrb[85].mxu1  ;;  %v6404_v19 = vpack.c.bf16 %v6381_v15, %v6380_v51 }
 0x6bf   : > { %v6241_v46 = vpop.f32.mrb[86].mxu1 }
 0x6c0   : > { %v6346_v47 = vadd.f32 %v17836_v58, %v6303_v25  ;;  %v6304_v53 = vadd.f32 %v6241_v46, %v17807_v24  ;;  %v6243_v7 = vpop.f32.mrb[87].mxu1  ;;  %13942 = vmatprep.mubr.bf16.mxu0 %v6404_v19 }
 0x6c2   : > { %v6347_v43 = vadd.f32 %v17836_v58, %v6304_v53  ;;  %v6382_v10 = vmax.f32 %v6346_v47, 0.0  ;;  %v14654_v47 = vld [vmem:[%s20511_s7 + $0x8] ss:$12 sps:$4 sm:$0xff]  }
 0x6c3   : > { %13958 = vmatprep.mubr.msk.bf16.mxu1 %vm7384_vm6, %v14654_v47 }
 0x6c4   : > { %v6383_v34 = vmax.f32 %v6347_v43, 0.0 }
 0x6c5   : > { %v6246_v22 = vpop.f32.mrb[88].mxu1 }
 0x6c6   : > { %v6305_v57 = vadd.f32 %v6246_v22, %v17810_v29  ;;  %v6248_v16 = vpop.f32.mrb[89].mxu1  ;;  %v6405_v38 = vpack.c.bf16 %v6383_v34, %v6382_v10 }
 0x6c7   : > { %v6249_v59 = vpop.f32.mrb[90].mxu1 }
 0x6c8   : > { %v6348_v40 = vadd.f32 %v17836_v58, %v6305_v57  ;;  %v6306_v62 = vadd.f32 %v6249_v59, %v17813_v63  ;;  %v6251_v18 = vpop.f32.mrb[91].mxu1  ;;  %13943 = vmatmul.mubr.bf16.gmra.mrb[60].mxu0 %v6405_v38 }
 0x6ca   : > { %v6349_v24 = vadd.f32 %v17836_v58, %v6306_v62  ;;  %v6384_v2 = vmax.f32 %v6348_v40, 0.0 }
 0x6cc   : > { %v6385_v27 = vmax.f32 %v6349_v24, 0.0 }
 0x6cd   : > { %v6254_v45 = vpop.f32.mrb[92].mxu1 }
 0x6ce   : > { %v6307_v21 = vadd.f32 %v6254_v45, %v17816_v48  ;;  %v6256_v11 = vpop.f32.mrb[93].mxu1  ;;  %v6406_v44 = vpack.c.bf16 %v6385_v27, %v6384_v2 }
 0x6cf   : > { %v6257_v60 = vpop.f32.mrb[94].mxu1 }
 0x6d0   : > { %v6350_v29 = vadd.f32 %v17836_v58, %v6307_v21  ;;  %v6308_v30 = vadd.f32 %v6257_v60, %v17819_v6  ;;  %v6259_v33 = vpop.f32.mrb[95].mxu1  ;;  %13946 = vmatprep.mubr.bf16.mxu0 %v6406_v44 }
 0x6d2   : > { %v6351_v63 = vadd.f32 %v17836_v58, %v6308_v30  ;;  %v6386_v12 = vmax.f32 %v6350_v29, 0.0 }
 0x6d4   : > { %v6387_v20 = vmax.f32 %v6351_v63, 0.0 }
 0x6d5   : > { %v6262_v3 = vpop.f32.mrb[96].mxu1 }
 0x6d6   : > { %v6309_v35 = vadd.f32 %v6262_v3, %v17822_v42  ;;  %v6264_v55 = vpop.f32.mrb[97].mxu1  ;;  %v6407_v14 = vpack.c.bf16 %v6387_v20, %v6386_v12 }
 0x6d7   : > { %v6265_v31 = vpop.f32.mrb[98].mxu1 }
 0x6d8   : > { %v6352_v48 = vadd.f32 %v17836_v58, %v6309_v35  ;;  %v6310_v4 = vadd.f32 %v6265_v31, %v17825_v13  ;;  %v6267_v28 = vpop.f32.mrb[99].mxu1  ;;  %13947 = vmatmul.mubr.bf16.gmra.mrb[64].mxu0 %v6407_v14 }
 0x6da   : > { %v6353_v6 = vadd.f32 %v17836_v58, %v6310_v4  ;;  %v6388_v1 = vmax.f32 %v6352_v48, 0.0 }
 0x6dc   : > { %v6389_v23 = vmax.f32 %v6353_v6, 0.0 }
 0x6dd   : > { %v6270_v0 = vpop.f32.mrb[100].mxu1 }
 0x6de   : > { %v6311_v49 = vadd.f32 %v6270_v0, %v17828_v9  ;;  %v6272_v37 = vpop.f32.mrb[101].mxu1  ;;  %v6408_v56 = vpack.c.bf16 %v6389_v23, %v6388_v1  ;;  %v14647_v9 = vld [vmem:[%s20511_s7 + $0x4] ss:$12 sps:$4 sm:$0xff]  }
 0x6df   : > { %v6273_v42 = vpop.f32.mrb[102].mxu1 }
 0x6e0   : > { %v6354_v61 = vadd.f32 %v17836_v58, %v6311_v49  ;;  %v6312_v32 = vadd.f32 %v6273_v42, %v17831_v54  ;;  %13950 = vmatprep.mubr.bf16.mxu0 %v6408_v56  ;;  %v6275_v17 = vpop.f32.mrb[103].mxu1 }
 0x6e2   : > { %v6355_v13 = vadd.f32 %v17836_v58, %v6312_v32  ;;  %v6390_v8 = vmax.f32 %v6354_v61, 0.0 }
 0x6e4   : > { %v6391_v26 = vmax.f32 %v6355_v13, 0.0 }
 0x6e6   : > { %v6409_v5 = vpack.c.bf16 %v6391_v26, %v6390_v8 }
 0x6e8   : > { %13951 = vmatmul.mubr.bf16.gmra.mrb[68].mxu0 %v6409_v5 }
 0x6e9   : > { %7513 = vmatprep.mubr.bf16.mxu0 %v14647_v9 }
 0x73b   : > { %v13920_v54 = vpop.f32.mrb[36].mxu0 }
 0x73c   : > { %v6524_v58 = vadd.f32 %v13920_v54, %v17917_v39  ;;  %v6515_v50 = vpop.f32.mrb[37].mxu0 }
 0x73d   : > { %v6516_v51 = vadd.f32 %v17917_v39, %v6515_v50  ;;  %v13921_v15 = vpop.f32.mrb[38].mxu0 }
 0x73e   : > { %6660 = vst [vmem:[%s17922_s26 + $0x10] sm:$0xff] %v6524_v58  ;;  %v6527_v52 = vadd.f32 %v13921_v15, %v17917_v39  ;;  %v6518_v25 = vpop.f32.mrb[39].mxu0 }
 0x73f   : > { %6658 = vst [vmem:[%s17922_s26] sm:$0xff] %v6516_v51  ;;  %v6519_v36 = vadd.f32 %v17917_v39, %v6518_v25 }
 0x740   : > { %6661 = vst [vmem:[%s17922_s26 + $0x18] sm:$0xff] %v6527_v52  ;;  %v17931_v19 = vpack.c.bf16 %v6527_v52, %v6524_v58 }
 0x741   : > { %6659 = vst [vmem:[%s17922_s26 + $0x8] sm:$0xff] %v6519_v36  ;;  %v17934_v46 = vpack.c.bf16 %v6519_v36, %v6516_v51 }
 0x743   : > { %7482 = vmatpush1.bf16.msra.mxu0 %v17934_v46 }
 0x744   : > { %7483 = vmatprep.subr.bf16.mxu0 %v20682_v41 }
 0x747   : > { %7484 = vmatpush1.bf16.msra.mxu0 %v17931_v19 }
 0x748   : > { %7485 = vmatprep.subr.bf16.mxu0 %v20682_v41 }
 0x74b   : > { %v13924_v53 = vpop.f32.mrb[40].mxu0 }
 0x74c   : > { %v6540_v7 = vadd.f32 %v13924_v53, %v17917_v39  ;;  %v6531_v43 = vpop.f32.mrb[41].mxu0 }
 0x74d   : > { %v6532_v10 = vadd.f32 %v17917_v39, %v6531_v43  ;;  %v13925_v34 = vpop.f32.mrb[42].mxu0 }
 0x74e   : > { %6664 = vst [vmem:[%s17922_s26 + $0x30] sm:$0xff] %v6540_v7  ;;  %v6543_v22 = vadd.f32 %v13925_v34, %v17917_v39  ;;  %v6534_v57 = vpop.f32.mrb[43].mxu0 }
 0x74f   : > { %6662 = vst [vmem:[%s17922_s26 + $0x20] sm:$0xff] %v6532_v10  ;;  %v6535_v16 = vadd.f32 %v17917_v39, %v6534_v57 }
 0x750   : > { %6665 = vst [vmem:[%s17922_s26 + $0x38] sm:$0xff] %v6543_v22  ;;  %v17951_v38 = vpack.c.bf16 %v6543_v22, %v6540_v7 }
 0x751   : > { %6663 = vst [vmem:[%s17922_s26 + $0x28] sm:$0xff] %v6535_v16  ;;  %v17954_v59 = vpack.c.bf16 %v6535_v16, %v6532_v10 }
 0x753   : > { %7486 = vmatpush1.bf16.msra.mxu0 %v17954_v59 }
 0x754   : > { %7487 = vmatprep.subr.bf16.mxu0 %v20682_v41 }
 0x757   : > { %7488 = vmatpush1.bf16.msra.mxu0 %v17951_v38 }
 0x758   : > { %7489 = vmatprep.subr.bf16.mxu0 %v20682_v41 }
 0x75b   : > { %v13928_v40 = vpop.f32.mrb[44].mxu0 }
 0x75c   : > { %v6556_v62 = vadd.f32 %v13928_v40, %v17917_v39  ;;  %v6547_v18 = vpop.f32.mrb[45].mxu0 }
 0x75d   : > { %v6548_v24 = vadd.f32 %v17917_v39, %v6547_v18  ;;  %v13929_v2 = vpop.f32.mrb[46].mxu0  ;;  %v14645_v18 = vld [vmem:[%s20511_s7] ss:$12 sps:$4 sm:$0xff]  }
 0x75e   : > { %6668 = vst [vmem:[%s17922_s26 + $0x50] sm:$0xff] %v6556_v62  ;;  %v6559_v27 = vadd.f32 %v13929_v2, %v17917_v39  ;;  %v6550_v45 = vpop.f32.mrb[47].mxu0 }
 0x75f   : > { %6666 = vst [vmem:[%s17922_s26 + $0x40] sm:$0xff] %v6548_v24  ;;  %v6551_v21 = vadd.f32 %v17917_v39, %v6550_v45 }
 0x760   : > { %6669 = vst [vmem:[%s17922_s26 + $0x58] sm:$0xff] %v6559_v27  ;;  %v17967_v11 = vpack.c.bf16 %v6559_v27, %v6556_v62 }
 0x761   : > { %6667 = vst [vmem:[%s17922_s26 + $0x48] sm:$0xff] %v6551_v21  ;;  %v17970_v44 = vpack.c.bf16 %v6551_v21, %v6548_v24  ;;  %v14648_v24 = vld [vmem:[%s20511_s7 + $0x1c] ss:$12 sps:$4 sm:$0xff]  }
 0x763   : > { %7490 = vmatpush1.bf16.msra.mxu0 %v17970_v44 }
 0x764   : > { %7491 = vmatprep.subr.bf16.mxu0 %v20682_v41 }
 0x767   : > { %7492 = vmatpush1.bf16.msra.mxu0 %v17967_v11 }
 0x768   : > { %7493 = vmatprep.subr.bf16.mxu0 %v20682_v41 }
 0x76b   : > { %v13932_v60 = vpop.f32.mrb[48].mxu0 }
 0x76c   : > { %v6572_v29 = vadd.f32 %v13932_v60, %v17917_v39  ;;  %v6563_v30 = vpop.f32.mrb[49].mxu0 }
 0x76d   : > { %v6564_v33 = vadd.f32 %v17917_v39, %v6563_v30  ;;  %v13933_v63 = vpop.f32.mrb[50].mxu0 }
 0x76e   : > { %6672 = vst [vmem:[%s17922_s26 + $0x70] sm:$0xff] %v6572_v29  ;;  %v6575_v12 = vadd.f32 %v13933_v63, %v17917_v39  ;;  %v6566_v20 = vpop.f32.mrb[51].mxu0 }
 0x76f   : > { %6670 = vst [vmem:[%s17922_s26 + $0x60] sm:$0xff] %v6564_v33  ;;  %v6567_v3 = vadd.f32 %v17917_v39, %v6566_v20 }
 0x770   : > { %6673 = vst [vmem:[%s17922_s26 + $0x78] sm:$0xff] %v6575_v12  ;;  %v17983_v35 = vpack.c.bf16 %v6575_v12, %v6572_v29 }
 0x771   : > { %6671 = vst [vmem:[%s17922_s26 + $0x68] sm:$0xff] %v6567_v3  ;;  %v17986_v55 = vpack.c.bf16 %v6567_v3, %v6564_v33  ;;  %v14650_v33 = vld [vmem:[%s20511_s7 + $0x18] ss:$12 sps:$4 sm:$0xff]   ;;  %v14651_v3 = vld [vmem:[%s20511_s7 + $0x34] ss:$12 sps:$4 sm:$0xff]  }
 0x773   : > { %7494 = vmatpush1.bf16.msra.mxu0 %v17986_v55 }
 0x774   : > { %7495 = vmatprep.subr.bf16.mxu0 %v20682_v41 }
 0x777   : > { %7496 = vmatpush1.bf16.msra.mxu0 %v17983_v35 }
 0x778   : > { %7497 = vmatprep.subr.bf16.mxu0 %v20682_v41 }
 0x77b   : > { %v13936_v14 = vpop.f32.mrb[52].mxu0 }
 0x77c   : > { %v6588_v31 = vadd.f32 %v13936_v14, %v17917_v39  ;;  %v6579_v48 = vpop.f32.mrb[53].mxu0  ;;  %v14655_v14 = vld [vmem:[%s20511_s7 + $0x20] ss:$12 sps:$4 sm:$0xff]  }
 0x77d   : > { %v6580_v4 = vadd.f32 %v17917_v39, %v6579_v48  ;;  %v13937_v28 = vpop.f32.mrb[54].mxu0  ;;  %v14659_v48 = vld [vmem:[%s20511_s7 + $0x38] ss:$12 sps:$4 sm:$0xff]  }
 0x77e   : > { %6676 = vst [vmem:[%s17922_s26 + $0x90] sm:$0xff] %v6588_v31  ;;  %v6591_v6 = vadd.f32 %v13937_v28, %v17917_v39  ;;  %v6582_v1 = vpop.f32.mrb[55].mxu0  ;;  %v14660_v28 = vld [vmem:[%s20511_s7 + $0x50] ss:$12 sps:$4 sm:$0xff]  }
 0x77f   : > { %6674 = vst [vmem:[%s17922_s26 + $0x80] sm:$0xff] %v6580_v4  ;;  %v6583_v23 = vadd.f32 %v17917_v39, %v6582_v1  ;;  %v14664_v1 = vld [vmem:[%s20511_s7 + $0x68] ss:$12 sps:$4 sm:$0xff]  }
 0x780   : > { %6677 = vst [vmem:[%s17922_s26 + $0x98] sm:$0xff] %v6591_v6  ;;  %v17999_v0 = vpack.c.bf16 %v6591_v6, %v6588_v31  ;;  %v14656_v31 = vld [vmem:[%s20511_s7 + $0x4c] ss:$12 sps:$4 sm:$0xff]   ;;  %v14661_v6 = vld [vmem:[%s20511_s7 + $0x64] ss:$12 sps:$4 sm:$0xff]  }
 0x781   : > { %6675 = vst [vmem:[%s17922_s26 + $0x88] sm:$0xff] %v6583_v23  ;;  %v18002_v49 = vpack.c.bf16 %v6583_v23, %v6580_v4  ;;  %v14658_v4 = vld [vmem:[%s20511_s7 + $0x48] ss:$12 sps:$4 sm:$0xff]   ;;  %v14663_v23 = vld [vmem:[%s20511_s7 + $0x60] ss:$12 sps:$4 sm:$0xff]  }
 0x783   : > { %7498 = vmatpush1.bf16.msra.mxu0 %v18002_v49 }
 0x784   : > { %7499 = vmatprep.subr.bf16.mxu0 %v20682_v41 }
 0x787   : > { %7500 = vmatpush1.bf16.msra.mxu0 %v17999_v0 }
 0x788   : > { %7501 = vmatprep.subr.bf16.mxu0 %v20682_v41 }
 0x78b   : > { %v13940_v37 = vpop.f32.mrb[56].mxu0 }
 0x78c   : > { %v6604_v56 = vadd.f32 %v13940_v37, %v17917_v39  ;;  %v6595_v42 = vpop.f32.mrb[57].mxu0  ;;  %v14665_v37 = vld [vmem:[%s20511_s7 + $0x80] ss:$12 sps:$4 sm:$0xff]  }
 0x78d   : > { %v6596_v61 = vadd.f32 %v17917_v39, %v6595_v42  ;;  %v13941_v32 = vpop.f32.mrb[58].mxu0  ;;  %v14669_v42 = vld [vmem:[%s20511_s7 + $0x98] ss:$12 sps:$4 sm:$0xff]  }
 0x78e   : > { %6680 = vst [vmem:[%s17922_s26 + $0xb0] sm:$0xff] %v6604_v56  ;;  %v6607_v17 = vadd.f32 %v13941_v32, %v17917_v39  ;;  %v6598_v13 = vpop.f32.mrb[59].mxu0  ;;  %v14670_v32 = vld [vmem:[%s20511_s7 + $0xb0] ss:$12 sps:$4 sm:$0xff]  }
 0x78f   : > { %6678 = vst [vmem:[%s17922_s26 + $0xa0] sm:$0xff] %v6596_v61  ;;  %v6599_v8 = vadd.f32 %v17917_v39, %v6598_v13  ;;  %v14674_v13 = vld [vmem:[%s20511_s7 + $0xc8] ss:$12 sps:$4 sm:$0xff]  }
 0x790   : > { %6681 = vst [vmem:[%s17922_s26 + $0xb8] sm:$0xff] %v6607_v17  ;;  %v18015_v26 = vpack.c.bf16 %v6607_v17, %v6604_v56  ;;  %v14666_v56 = vld [vmem:[%s20511_s7 + $0x7c] ss:$12 sps:$4 sm:$0xff]   ;;  %v14671_v17 = vld [vmem:[%s20511_s7 + $0x94] ss:$12 sps:$4 sm:$0xff]  }
 0x791   : > { %6679 = vst [vmem:[%s17922_s26 + $0xa8] sm:$0xff] %v6599_v8  ;;  %v18018_v5 = vpack.c.bf16 %v6599_v8, %v6596_v61  ;;  %v14668_v61 = vld [vmem:[%s20511_s7 + $0x78] ss:$12 sps:$4 sm:$0xff]   ;;  %v14673_v8 = vld [vmem:[%s20511_s7 + $0x90] ss:$12 sps:$4 sm:$0xff]  }
 0x793   : > { %7502 = vmatpush1.bf16.msra.mxu0 %v18018_v5 }
 0x794   : > { %7503 = vmatprep.subr.bf16.mxu0 %v20682_v41 }
 0x797   : > { %7504 = vmatpush1.bf16.msra.mxu0 %v18015_v26 }
 0x798   : > { %7505 = vmatprep.subr.bf16.mxu0 %v20682_v41 }
 0x79b   : > { %v13944_v9 = vpop.f32.mrb[60].mxu0 }
 0x79c   : > { %v6620_v54 = vadd.f32 %v13944_v9, %v17917_v39  ;;  %v6611_v58 = vpop.f32.mrb[61].mxu0  ;;  %v14675_v9 = vld [vmem:[%s20511_s7 + $0xe0] ss:$12 sps:$4 sm:$0xff]  }
 0x79d   : > { %v6612_v50 = vadd.f32 %v17917_v39, %v6611_v58  ;;  %v13945_v51 = vpop.f32.mrb[62].mxu0  ;;  %v14679_v58 = vld [vmem:[%s20511_s7 + $0xf8] ss:$12 sps:$4 sm:$0xff]  }
 0x79e   : > { %6684 = vst [vmem:[%s17922_s26 + $0xd0] sm:$0xff] %v6620_v54  ;;  %v6623_v15 = vadd.f32 %v13945_v51, %v17917_v39  ;;  %v6614_v52 = vpop.f32.mrb[63].mxu0  ;;  %v14680_v51 = vld [vmem:[%s20511_s7 + $0x110] ss:$12 sps:$4 sm:$0xff]  }
 0x79f   : > { %6682 = vst [vmem:[%s17922_s26 + $0xc0] sm:$0xff] %v6612_v50  ;;  %v6615_v25 = vadd.f32 %v17917_v39, %v6614_v52  ;;  %v14684_v52 = vld [vmem:[%s20511_s7 + $0x128] ss:$12 sps:$4 sm:$0xff]  }
 0x7a0   : > { %6685 = vst [vmem:[%s17922_s26 + $0xd8] sm:$0xff] %v6623_v15  ;;  %v18031_v36 = vpack.c.bf16 %v6623_v15, %v6620_v54  ;;  %v14676_v54 = vld [vmem:[%s20511_s7 + $0xac] ss:$12 sps:$4 sm:$0xff]   ;;  %v14681_v15 = vld [vmem:[%s20511_s7 + $0xc4] ss:$12 sps:$4 sm:$0xff]  }
 0x7a1   : > { %6683 = vst [vmem:[%s17922_s26 + $0xc8] sm:$0xff] %v6615_v25  ;;  %v18034_v47 = vpack.c.bf16 %v6615_v25, %v6612_v50  ;;  %v14678_v50 = vld [vmem:[%s20511_s7 + $0xa8] ss:$12 sps:$4 sm:$0xff]   ;;  %v14683_v25 = vld [vmem:[%s20511_s7 + $0xc0] ss:$12 sps:$4 sm:$0xff]  }
 0x7a3   : > { %7506 = vmatpush1.bf16.msra.mxu0 %v18034_v47 }
 0x7a4   : > { %7507 = vmatprep.subr.bf16.mxu0 %v20682_v41 }
 0x7a7   : > { %7508 = vmatpush1.bf16.msra.mxu0 %v18031_v36 }
 0x7a8   : > { %7509 = vmatprep.subr.bf16.mxu0 %v20682_v41 }
 0x7ab   : > { %v13948_v53 = vpop.f32.mrb[64].mxu0 }
 0x7ac   : > { %v6636_v7 = vadd.f32 %v13948_v53, %v17917_v39  ;;  %v6627_v43 = vpop.f32.mrb[65].mxu0  ;;  %v14685_v53 = vld [vmem:[%s20511_s7 + $0x140] ss:$12 sps:$4 sm:$0xff]  }
 0x7ad   : > { %v6628_v10 = vadd.f32 %v17917_v39, %v6627_v43  ;;  %v13949_v34 = vpop.f32.mrb[66].mxu0  ;;  %v14689_v43 = vld [vmem:[%s20511_s7 + $0x158] ss:$12 sps:$4 sm:$0xff]  }
 0x7ae   : > { %6688 = vst [vmem:[%s17922_s26 + $0xf0] sm:$0xff] %v6636_v7  ;;  %v6639_v22 = vadd.f32 %v13949_v34, %v17917_v39  ;;  %v6630_v57 = vpop.f32.mrb[67].mxu0  ;;  %v14690_v34 = vld [vmem:[%s20511_s7 + $0x170] ss:$12 sps:$4 sm:$0xff]  }
 0x7af   : > { %6686 = vst [vmem:[%s17922_s26 + $0xe0] sm:$0xff] %v6628_v10  ;;  %v6631_v16 = vadd.f32 %v17917_v39, %v6630_v57  ;;  %v14694_v57 = vld [vmem:[%s20511_s7 + $0x188] ss:$12 sps:$4 sm:$0xff]  }
 0x7b0   : > { %6689 = vst [vmem:[%s17922_s26 + $0xf8] sm:$0xff] %v6639_v22  ;;  %v18047_v40 = vpack.c.bf16 %v6639_v22, %v6636_v7  ;;  %v14686_v7 = vld [vmem:[%s20511_s7 + $0xdc] ss:$12 sps:$4 sm:$0xff]   ;;  %v14691_v22 = vld [vmem:[%s20511_s7 + $0xf4] ss:$12 sps:$4 sm:$0xff]  }
 0x7b1   : > { %6687 = vst [vmem:[%s17922_s26 + $0xe8] sm:$0xff] %v6631_v16  ;;  %v18050_v62 = vpack.c.bf16 %v6631_v16, %v6628_v10  ;;  %v14688_v10 = vld [vmem:[%s20511_s7 + $0xd8] ss:$12 sps:$4 sm:$0xff]   ;;  %v14693_v16 = vld [vmem:[%s20511_s7 + $0xf0] ss:$12 sps:$4 sm:$0xff]  }
 0x7b3   : > { %7510 = vmatpush1.bf16.msra.mxu0 %v18050_v62 }
 0x7b4   : > { %7511 = vmatprep.subr.bf16.mxu0 %v20682_v41 }
 0x7b7   : > { %7512 = vmatpush1.bf16.msra.mxu0 %v18047_v40 }
 0x7ba   : > { %7514 = vmatmul.mubr.bf16.vlgmr.msra.gmra.mrb[72].mxu0 %v14645_v18  ;;  %v14695_v18 = vld [vmem:[%s20511_s7 + $0x1a0] ss:$12 sps:$4 sm:$0xff]  }
 0x7bb   : > { %v13952_v2 = vpop.f32.mrb[68].mxu0  ;;  %7521 = vmatprep.mubr.bf16.mxu0 %v14648_v24  ;;  %v14696_v24 = vld [vmem:[%s20511_s7 + $0x10c] ss:$12 sps:$4 sm:$0xff]  }
 0x7bc   : > { %v6652_v27 = vadd.f32 %v13952_v2, %v17917_v39  ;;  %v6643_v45 = vpop.f32.mrb[69].mxu0  ;;  %v14699_v2 = vld [vmem:[%s20511_s7 + $0x1b8] ss:$12 sps:$4 sm:$0xff]  }
 0x7bd   : > { %v6644_v21 = vadd.f32 %v17917_v39, %v6643_v45  ;;  %v13953_v60 = vpop.f32.mrb[70].mxu0  ;;  %v14700_v45 = vld [vmem:[%s20511_s7 + $0x1d0] ss:$12 sps:$4 sm:$0xff]  }
 0x7be   : > { %6692 = vst [vmem:[%s17922_s26 + $0x110] sm:$0xff] %v6652_v27  ;;  %v6655_v29 = vadd.f32 %v13953_v60, %v17917_v39  ;;  %v6646_v30 = vpop.f32.mrb[71].mxu0  ;;  %v14704_v60 = vld [vmem:[%s20511_s7 + $0x1e8] ss:$12 sps:$4 sm:$0xff]  }
 0x7bf   : > { %6690 = vst [vmem:[%s17922_s26 + $0x100] sm:$0xff] %v6644_v21  ;;  %v6647_v63 = vadd.f32 %v17917_v39, %v6646_v30  ;;  %v14653_v39 = vld [vmem:[%s20511_s7 + $0x30] ss:$12 sps:$4 sm:$0xff]   ;;  %v14705_v30 = vld [vmem:[%s20511_s7 + $0x200] ss:$12 sps:$4 sm:$0xff]  }
 0x7c0   : > { %6693 = vst [vmem:[%s17922_s26 + $0x118] sm:$0xff] %v6655_v29  ;;  %v18071_v12 = vpack.c.bf16 %v6655_v29, %v6652_v27  ;;  %v14698_v27 = vld [vmem:[%s20511_s7 + $0x108] ss:$12 sps:$4 sm:$0xff]   ;;  %v14703_v29 = vld [vmem:[%s20511_s7 + $0x120] ss:$12 sps:$4 sm:$0xff]  }
 0x7c1   : > { %6691 = vst [vmem:[%s17922_s26 + $0x108] sm:$0xff] %v6647_v63  ;;  %v18074_v20 = vpack.c.bf16 %v6647_v63, %v6644_v21  ;;  %v14701_v21 = vld [vmem:[%s20511_s7 + $0x124] ss:$12 sps:$4 sm:$0xff]  }
 0x7c2   : > { %7522 = vmatmul.mubr.bf16.gmra.mrb[76].mxu0 %v14650_v33  ;;  %v14706_v33 = vld [vmem:[%s20511_s7 + $0x13c] ss:$12 sps:$4 sm:$0xff]   ;;  %v14709_v63 = vld [vmem:[%s20511_s7 + $0x218] ss:$12 sps:$4 sm:$0xff]  }
 0x7c3   : > { %13954 = vmatprep.subr.bf16.mxu1 %v18074_v20  ;;  %14022 = vmatprep.subr.bf16.mxu0 %v18074_v20 }
 0x7c4   : > { %13955 = vmatpush3.bf16.msra.mxu1 %v18074_v20  ;;  %14023 = vmatpush3.bf16.msra.mxu0 %v18074_v20 }
 0x7c5   : > { %13956 = vmatprep.subr.bf16.mxu1 %v18071_v12  ;;  %14024 = vmatprep.subr.bf16.mxu0 %v18071_v12 }
 0x7c6   : > { %7529 = vmatprep.mubr.bf16.mxu0 %v14651_v3  ;;  %v14708_v3 = vld [vmem:[%s20511_s7 + $0x138] ss:$12 sps:$4 sm:$0xff]  }
 0x7c8   : > { %13957 = vmatpush3.bf16.msra.mxu1 %v18071_v12  ;;  %14025 = vmatpush3.bf16.msra.mxu0 %v18071_v12 }
 0x7c9   : > { %8828 = vmatprep.subr.bf16.mxu1 %v20682_v41  ;;  %10431 = vmatprep.subr.bf16.mxu0 %v20682_v41 }
 0x7ca   : > { %7530 = vmatmul.mubr.bf16.gmra.mrb[80].mxu0 %v14653_v39  ;;  %v14710_v39 = vld [vmem:[%s20511_s7 + $0x230] ss:$12 sps:$4 sm:$0xff]  }
 0x7cb   : > { %13959 = vmatmul.mubr.msk.bf16.vlgmr.msra.gmra.mrb[104].mxu1 %vm7384_vm6, %v14655_v14  ;;  %7537 = vmatprep.mubr.bf16.mxu0 %v14656_v31  ;;  %v14711_v14 = vld [vmem:[%s20511_s7 + $0x154] ss:$12 sps:$4 sm:$0xff]  }
 0x7cc   : > { %8829 = vmatpush1.bf16.msra.mxu1 %v17934_v46  ;;  %13962 = vmatprep.mubr.msk.bf16.mxu1 %vm7384_vm6, %v14659_v48  ;;  %v14714_v31 = vld [vmem:[%s20511_s7 + $0x248] ss:$12 sps:$4 sm:$0xff]   ;;  %v14713_v48 = vld [vmem:[%s20511_s7 + $0x150] ss:$12 sps:$4 sm:$0xff]  }
 0x7cd   : > { %8830 = vmatprep.subr.bf16.mxu1 %v20682_v41 }
 0x7d0   : > { %8831 = vmatpush1.bf16.msra.mxu1 %v17931_v19 }
 0x7d1   : > { %8832 = vmatprep.subr.bf16.mxu1 %v20682_v41 }
 0x7d2   : > { %7538 = vmatmul.mubr.bf16.gmra.mrb[84].mxu0 %v14658_v4  ;;  %v14715_v4 = vld [vmem:[%s20511_s7 + $0x260] ss:$12 sps:$4 sm:$0xff]  }
 0x7d3   : > { %13963 = vmatmul.mubr.msk.bf16.gmra.mrb[108].mxu1 %vm7384_vm6, %v14660_v28  ;;  %7545 = vmatprep.mubr.bf16.mxu0 %v14661_v6  ;;  %v14716_v28 = vld [vmem:[%s20511_s7 + $0x16c] ss:$12 sps:$4 sm:$0xff]  }
 0x7d4   : > { %8833 = vmatpush1.bf16.msra.mxu1 %v17954_v59  ;;  %13966 = vmatprep.mubr.msk.bf16.mxu1 %vm7384_vm6, %v14664_v1  ;;  %v14719_v6 = vld [vmem:[%s20511_s7 + $0x278] ss:$12 sps:$4 sm:$0xff]   ;;  %v14718_v1 = vld [vmem:[%s20511_s7 + $0x168] ss:$12 sps:$4 sm:$0xff]  }
 0x7d5   : > { %8834 = vmatprep.subr.bf16.mxu1 %v20682_v41 }
 0x7d8   : > { %8835 = vmatpush1.bf16.msra.mxu1 %v17951_v38 }
 0x7d9   : > { %8836 = vmatprep.subr.bf16.mxu1 %v20682_v41 }
 0x7da   : > { %7546 = vmatmul.mubr.bf16.gmra.mrb[88].mxu0 %v14663_v23  ;;  %v14720_v23 = vld [vmem:[%s20511_s7 + $0x290] ss:$12 sps:$4 sm:$0xff]  }
 0x7db   : > { %13967 = vmatmul.mubr.msk.bf16.gmra.mrb[112].mxu1 %vm7384_vm6, %v14665_v37  ;;  %7553 = vmatprep.mubr.bf16.mxu0 %v14666_v56  ;;  %v14721_v37 = vld [vmem:[%s20511_s7 + $0x184] ss:$12 sps:$4 sm:$0xff]   ;;  %v14724_v56 = vld [vmem:[%s20511_s7 + $0x2a8] ss:$12 sps:$4 sm:$0xff]  }
 0x7dc   : > { %8837 = vmatpush1.bf16.msra.mxu1 %v17970_v44  ;;  %13970 = vmatprep.mubr.msk.bf16.mxu1 %vm7384_vm6, %v14669_v42  ;;  %v14723_v42 = vld [vmem:[%s20511_s7 + $0x180] ss:$12 sps:$4 sm:$0xff]  }
 0x7dd   : > { %8838 = vmatprep.subr.bf16.mxu1 %v20682_v41 }
 0x7e0   : > { %8839 = vmatpush1.bf16.msra.mxu1 %v17967_v11 }
 0x7e1   : > { %8840 = vmatprep.subr.bf16.mxu1 %v20682_v41 }
 0x7e2   : > { %7554 = vmatmul.mubr.bf16.gmra.mrb[92].mxu0 %v14668_v61  ;;  %v14725_v61 = vld [vmem:[%s20511_s7 + $0x2c0] ss:$12 sps:$4 sm:$0xff]  }
 0x7e3   : > { %13971 = vmatmul.mubr.msk.bf16.gmra.mrb[116].mxu1 %vm7384_vm6, %v14670_v32  ;;  %7561 = vmatprep.mubr.bf16.mxu0 %v14671_v17  ;;  %v14726_v32 = vld [vmem:[%s20511_s7 + $0x19c] ss:$12 sps:$4 sm:$0xff]   ;;  %v14729_v17 = vld [vmem:[%s20511_s7 + $0x2d8] ss:$12 sps:$4 sm:$0xff]  }
 0x7e4   : > { %8841 = vmatpush1.bf16.msra.mxu1 %v17986_v55  ;;  %13974 = vmatprep.mubr.msk.bf16.mxu1 %vm7384_vm6, %v14674_v13  ;;  %v14728_v13 = vld [vmem:[%s20511_s7 + $0x198] ss:$12 sps:$4 sm:$0xff]  }
 0x7e5   : > { %8842 = vmatprep.subr.bf16.mxu1 %v20682_v41 }
 0x7e8   : > { %8843 = vmatpush1.bf16.msra.mxu1 %v17983_v35 }
 0x7e9   : > { %8844 = vmatprep.subr.bf16.mxu1 %v20682_v41 }
 0x7ea   : > { %7562 = vmatmul.mubr.bf16.gmra.mrb[96].mxu0 %v14673_v8  ;;  %v14730_v8 = vld [vmem:[%s20511_s7 + $0x2f0] ss:$12 sps:$4 sm:$0xff]  }
 0x7eb   : > { %13975 = vmatmul.mubr.msk.bf16.gmra.mrb[120].mxu1 %vm7384_vm6, %v14675_v9  ;;  %7569 = vmatprep.mubr.bf16.mxu0 %v14676_v54  ;;  %v14731_v9 = vld [vmem:[%s20511_s7 + $0x1b4] ss:$12 sps:$4 sm:$0xff]   ;;  %v14736_v54 = vld [vmem:[%s20511_s7 + $0x304] ss:$12 sps:$4 sm:$0xff]  }
 0x7ec   : > { %8845 = vmatpush1.bf16.msra.mxu1 %v18002_v49  ;;  %13978 = vmatprep.mubr.msk.bf16.mxu1 %vm7384_vm6, %v14679_v58  ;;  %v14733_v58 = vld [vmem:[%s20511_s7 + $0x1b0] ss:$12 sps:$4 sm:$0xff]  }
 0x7ed   : > { %8846 = vmatprep.subr.bf16.mxu1 %v20682_v41 }
 0x7f0   : > { %8847 = vmatpush1.bf16.msra.mxu1 %v17999_v0 }
 0x7f1   : > { %8848 = vmatprep.subr.bf16.mxu1 %v20682_v41 }
 0x7f2   : > { %7570 = vmatmul.mubr.bf16.gmra.mrb[100].mxu0 %v14678_v50  ;;  %v14734_v50 = vld [vmem:[%s20511_s7 + $0x300] ss:$12 sps:$4 sm:$0xff]  }
 0x7f3   : > { %13979 = vmatmul.mubr.msk.bf16.gmra.mrb[124].mxu1 %vm7384_vm6, %v14680_v51  ;;  %7577 = vmatprep.mubr.bf16.mxu0 %v14681_v15  ;;  %v14737_v51 = vld [vmem:[%s20511_s7 + $0x1cc] ss:$12 sps:$4 sm:$0xff]   ;;  %v14742_v15 = vld [vmem:[%s20511_s7 + $0x31c] ss:$12 sps:$4 sm:$0xff]  }
 0x7f4   : > { %8849 = vmatpush1.bf16.msra.mxu1 %v18018_v5  ;;  %13982 = vmatprep.mubr.msk.bf16.mxu1 %vm7384_vm6, %v14684_v52  ;;  %v14739_v52 = vld [vmem:[%s20511_s7 + $0x1c8] ss:$12 sps:$4 sm:$0xff]  }
 0x7f5   : > { %8850 = vmatprep.subr.bf16.mxu1 %v20682_v41 }
 0x7f8   : > { %8851 = vmatpush1.bf16.msra.mxu1 %v18015_v26 }
 0x7f9   : > { %8852 = vmatprep.subr.bf16.mxu1 %v20682_v41 }
 0x7fa   : > { %7578 = vmatmul.mubr.bf16.gmra.mrb[104].mxu0 %v14683_v25  ;;  %v14740_v25 = vld [vmem:[%s20511_s7 + $0x318] ss:$12 sps:$4 sm:$0xff]  }
 0x7fb   : > { %13983 = vmatmul.mubr.msk.bf16.gmra.mrb[128].mxu1 %vm7384_vm6, %v14685_v53  ;;  %7585 = vmatprep.mubr.bf16.mxu0 %v14686_v7  ;;  %v14743_v53 = vld [vmem:[%s20511_s7 + $0x1e4] ss:$12 sps:$4 sm:$0xff]   ;;  %v14745_v7 = vld [vmem:[%s20511_s7 + $0x1e0] ss:$12 sps:$4 sm:$0xff]  }
 0x7fc   : > { %8853 = vmatpush1.bf16.msra.mxu1 %v18034_v47  ;;  %13986 = vmatprep.mubr.msk.bf16.mxu1 %vm7384_vm6, %v14689_v43  ;;  %v14746_v43 = vld [vmem:[%s20511_s7 + $0x330] ss:$12 sps:$4 sm:$0xff]  }
 0x7fd   : > { %8854 = vmatprep.subr.bf16.mxu1 %v20682_v41 }
 0x800   : > { %8855 = vmatpush1.bf16.msra.mxu1 %v18031_v36 }
 0x801   : > { %8856 = vmatprep.subr.bf16.mxu1 %v20682_v41 }
 0x802   : > { %7586 = vmatmul.mubr.bf16.gmra.mrb[108].mxu0 %v14688_v10  ;;  %v14754_v10 = vld [vmem:[%s20511_s7 + $0x34c] ss:$12 sps:$4 sm:$0xff]  }
 0x803   : > { %13987 = vmatmul.mubr.msk.bf16.gmra.mrb[132].mxu1 %vm7384_vm6, %v14690_v34  ;;  %7593 = vmatprep.mubr.bf16.mxu0 %v14691_v22  ;;  %v14751_v34 = vld [vmem:[%s20511_s7 + $0x1f8] ss:$12 sps:$4 sm:$0xff]   ;;  %v14752_v22 = vld [vmem:[%s20511_s7 + $0x348] ss:$12 sps:$4 sm:$0xff]  }
 0x804   : > { %8857 = vmatpush1.bf16.msra.mxu1 %v18050_v62  ;;  %13990 = vmatprep.mubr.msk.bf16.mxu1 %vm7384_vm6, %v14694_v57  ;;  %v14755_v57 = vld [vmem:[%s20511_s7 + $0x214] ss:$12 sps:$4 sm:$0xff]  }
 0x805   : > { %8858 = vmatprep.subr.bf16.mxu1 %v20682_v41 }
 0x808   : > { %8859 = vmatpush1.bf16.msra.mxu1 %v18047_v40 }
 0x809   : > { %14090 = vmatprep.subr.bf16.mxu1 %v18074_v20 }
 0x80a   : > { %7594 = vmatmul.mubr.bf16.gmra.mrb[112].mxu0 %v14693_v16  ;;  %v14760_v16 = vld [vmem:[%s20511_s7 + $0x364] ss:$12 sps:$4 sm:$0xff]  }
 0x80b   : > { %13991 = vmatmul.mubr.msk.bf16.gmra.mrb[136].mxu1 %vm7384_vm6, %v14695_v18  ;;  %7601 = vmatprep.mubr.bf16.mxu0 %v14696_v24  ;;  %v14757_v18 = vld [vmem:[%s20511_s7 + $0x210] ss:$12 sps:$4 sm:$0xff]   ;;  %v14758_v24 = vld [vmem:[%s20511_s7 + $0x360] ss:$12 sps:$4 sm:$0xff]  }
 0x80c   : > { %13994 = vmatprep.mubr.msk.bf16.mxu1 %vm7384_vm6, %v14699_v2  ;;  %v14761_v2 = vld [vmem:[%s20511_s7 + $0x22c] ss:$12 sps:$4 sm:$0xff]  }
 0x812   : > { %7602 = vmatmul.mubr.bf16.gmra.mrb[116].mxu0 %v14698_v27  ;;  %v14766_v27 = vld [vmem:[%s20511_s7 + $0x37c] ss:$12 sps:$4 sm:$0xff]  }
 0x813   : > { %13995 = vmatmul.mubr.msk.bf16.gmra.mrb[140].mxu1 %vm7384_vm6, %v14700_v45  ;;  %7609 = vmatprep.mubr.bf16.mxu0 %v14701_v21  ;;  %v14763_v45 = vld [vmem:[%s20511_s7 + $0x228] ss:$12 sps:$4 sm:$0xff]   ;;  %v14764_v21 = vld [vmem:[%s20511_s7 + $0x378] ss:$12 sps:$4 sm:$0xff]  }
 0x814   : > { %13998 = vmatprep.mubr.msk.bf16.mxu1 %vm7384_vm6, %v14704_v60  ;;  %v14767_v60 = vld [vmem:[%s20511_s7 + $0x244] ss:$12 sps:$4 sm:$0xff]  }
 0x81a   : > { %7610 = vmatmul.mubr.bf16.gmra.mrb[120].mxu0 %v14703_v29  ;;  %v14772_v29 = vld [vmem:[%s20511_s7 + $0x394] ss:$12 sps:$4 sm:$0xff]  }
 0x81b   : > { %13999 = vmatmul.mubr.msk.bf16.gmra.mrb[144].mxu1 %vm7384_vm6, %v14705_v30  ;;  %7617 = vmatprep.mubr.bf16.mxu0 %v14706_v33  ;;  %v14769_v30 = vld [vmem:[%s20511_s7 + $0x240] ss:$12 sps:$4 sm:$0xff]   ;;  %v14770_v33 = vld [vmem:[%s20511_s7 + $0x390] ss:$12 sps:$4 sm:$0xff]  }
 0x81c   : > { %14002 = vmatprep.mubr.msk.bf16.mxu1 %vm7384_vm6, %v14709_v63  ;;  %v14773_v63 = vld [vmem:[%s20511_s7 + $0x25c] ss:$12 sps:$4 sm:$0xff]  }
 0x822   : > { %7618 = vmatmul.mubr.bf16.gmra.mrb[124].mxu0 %v14708_v3  ;;  %v14778_v3 = vld [vmem:[%s20511_s7 + $0x3ac] ss:$12 sps:$4 sm:$0xff]  }
 0x823   : > { %14003 = vmatmul.mubr.msk.bf16.gmra.mrb[148].mxu1 %vm7384_vm6, %v14710_v39  ;;  %7625 = vmatprep.mubr.bf16.mxu0 %v14711_v14  ;;  %v14775_v39 = vld [vmem:[%s20511_s7 + $0x258] ss:$12 sps:$4 sm:$0xff]   ;;  %v14776_v14 = vld [vmem:[%s20511_s7 + $0x3a8] ss:$12 sps:$4 sm:$0xff]  }
 0x824   : > { %14006 = vmatprep.mubr.msk.bf16.mxu1 %vm7384_vm6, %v14714_v31  ;;  %v14779_v31 = vld [vmem:[%s20511_s7 + $0x274] ss:$12 sps:$4 sm:$0xff]  }
 0x82a   : > { %7626 = vmatmul.mubr.bf16.gmra.mrb[128].mxu0 %v14713_v48  ;;  %v14784_v48 = vld [vmem:[%s20511_s7 + $0x3c4] ss:$12 sps:$4 sm:$0xff]  }
 0x82b   : > { %14007 = vmatmul.mubr.msk.bf16.gmra.mrb[152].mxu1 %vm7384_vm6, %v14715_v4  ;;  %7633 = vmatprep.mubr.bf16.mxu0 %v14716_v28  ;;  %v14781_v4 = vld [vmem:[%s20511_s7 + $0x270] ss:$12 sps:$4 sm:$0xff]   ;;  %v14782_v28 = vld [vmem:[%s20511_s7 + $0x3c0] ss:$12 sps:$4 sm:$0xff]  }
 0x82c   : > { %14010 = vmatprep.mubr.msk.bf16.mxu1 %vm7384_vm6, %v14719_v6  ;;  %v14785_v6 = vld [vmem:[%s20511_s7 + $0x28c] ss:$12 sps:$4 sm:$0xff]  }
 0x832   : > { %7634 = vmatmul.mubr.bf16.gmra.mrb[132].mxu0 %v14718_v1  ;;  %v14790_v1 = vld [vmem:[%s20511_s7 + $0x3dc] ss:$12 sps:$4 sm:$0xff]  }
 0x833   : > { %14011 = vmatmul.mubr.msk.bf16.gmra.mrb[156].mxu1 %vm7384_vm6, %v14720_v23  ;;  %7641 = vmatprep.mubr.bf16.mxu0 %v14721_v37 }
 0x834   : > { %14014 = vmatprep.mubr.msk.bf16.mxu1 %vm7384_vm6, %v14724_v56  ;;  %v14787_v56 = vld [vmem:[%s20511_s7 + $0x288] ss:$12 sps:$4 sm:$0xff]  }
 0x83a   : > { %7642 = vmatmul.mubr.bf16.gmra.mrb[136].mxu0 %v14723_v42 }
 0x83b   : > { %14015 = vmatmul.mubr.msk.bf16.gmra.mrb[160].mxu1 %vm7384_vm6, %v14725_v61  ;;  %7649 = vmatprep.mubr.bf16.mxu0 %v14726_v32  ;;  %v14788_v61 = vld [vmem:[%s20511_s7 + $0x3d8] ss:$12 sps:$4 sm:$0xff]  }
 0x83c   : > { %14018 = vmatprep.mubr.msk.bf16.mxu1 %vm7384_vm6, %v14729_v17  ;;  %v14791_v32 = vld [vmem:[%s20511_s7 + $0x2a4] ss:$12 sps:$4 sm:$0xff]  }
 0x842   : > { %7650 = vmatmul.mubr.bf16.gmra.mrb[140].mxu0 %v14728_v13  ;;  %v14796_v13 = vld [vmem:[%s20511_s7 + $0x3f4] ss:$12 sps:$4 sm:$0xff]  }
 0x843   : > { %14019 = vmatmul.mubr.msk.bf16.gmra.mrb[164].mxu1 %vm7384_vm6, %v14730_v8  ;;  %7657 = vmatprep.mubr.bf16.mxu0 %v14731_v9 }
 0x844   : > { %8860 = vmatprep.mubr.bf16.mxu1 %v14736_v54  ;;  %v14793_v54 = vld [vmem:[%s20511_s7 + $0x2a0] ss:$12 sps:$4 sm:$0xff]  }
 0x84a   : > { %7658 = vmatmul.mubr.bf16.gmra.mrb[144].mxu0 %v14733_v58 }
 0x84b   : > { %8861 = vmatmul.mubr.bf16.vlgmr.msra.gmra.mrb[168].mxu1 %v14734_v50  ;;  %7665 = vmatprep.mubr.bf16.mxu0 %v14737_v51  ;;  %v14794_v50 = vld [vmem:[%s20511_s7 + $0x3f0] ss:$12 sps:$4 sm:$0xff]  }
 0x84c   : > { %14091 = vmatpush3.bf16.msra.mxu1 %v18074_v20  ;;  %8868 = vmatprep.mubr.bf16.mxu1 %v14742_v15  ;;  %v14748_v20 = vld [vmem:[%s20511_s7 + $0x334] ss:$12 sps:$4 sm:$0xff]   ;;  %v14797_v51 = vld [vmem:[%s20511_s7 + $0x2bc] ss:$12 sps:$4 sm:$0xff]  }
 0x84d   : > { %14092 = vmatprep.subr.bf16.mxu1 %v18071_v12 }
 0x850   : > { %14093 = vmatpush3.bf16.msra.mxu1 %v18071_v12  ;;  %v14749_v12 = vld [vmem:[%s20511_s7 + $0x1fc] ss:$12 sps:$4 sm:$0xff]  }
 0x852   : > { %7666 = vmatmul.mubr.bf16.gmra.mrb[148].mxu0 %v14739_v52  ;;  %v14802_v52 = vld [vmem:[%s20511_s7 + $0x40c] ss:$12 sps:$4 sm:$0xff]  }
 0x853   : > { %8869 = vmatmul.mubr.bf16.gmra.mrb[172].mxu1 %v14740_v25  ;;  %7673 = vmatprep.mubr.bf16.mxu0 %v14743_v53 }
 0x854   : > { %8876 = vmatprep.mubr.bf16.mxu1 %v14748_v20 }
 0x85a   : > { %7674 = vmatmul.mubr.bf16.gmra.mrb[152].mxu0 %v14745_v7  ;;  %v14799_v7 = vld [vmem:[%s20511_s7 + $0x2b8] ss:$12 sps:$4 sm:$0xff]  }
 0x85b   : > { %8877 = vmatmul.mubr.bf16.gmra.mrb[176].mxu1 %v14746_v43  ;;  %7681 = vmatprep.mubr.bf16.mxu0 %v14749_v12 }
 0x85c   : > { %8884 = vmatprep.mubr.bf16.mxu1 %v14754_v10 }
 0x862   : > { %7682 = vmatmul.mubr.bf16.gmra.mrb[156].mxu0 %v14751_v34  ;;  %v14800_v34 = vld [vmem:[%s20511_s7 + $0x408] ss:$12 sps:$4 sm:$0xff]  }
 0x863   : > { %8885 = vmatmul.mubr.bf16.gmra.mrb[180].mxu1 %v14752_v22  ;;  %7689 = vmatprep.mubr.bf16.mxu0 %v14755_v57  ;;  %v14803_v22 = vld [vmem:[%s20511_s7 + $0x2d4] ss:$12 sps:$4 sm:$0xff]  }
 0x864   : > { %8892 = vmatprep.mubr.bf16.mxu1 %v14760_v16 }
 0x86a   : > { %7690 = vmatmul.mubr.bf16.gmra.mrb[160].mxu0 %v14757_v18 }
 0x86b   : > { %8893 = vmatmul.mubr.bf16.gmra.mrb[184].mxu1 %v14758_v24  ;;  %7697 = vmatprep.mubr.bf16.mxu0 %v14761_v2  ;;  %v14808_v24 = vld [vmem:[%s20511_s7 + $0x424] ss:$12 sps:$4 sm:$0xff]  }
 0x86c   : > { %8900 = vmatprep.mubr.bf16.mxu1 %v14766_v27 }
 0x872   : > { %7698 = vmatmul.mubr.bf16.gmra.mrb[164].mxu0 %v14763_v45 }
 0x873   : > { %8901 = vmatmul.mubr.bf16.gmra.mrb[188].mxu1 %v14764_v21  ;;  %7705 = vmatprep.mubr.bf16.mxu0 %v14767_v60 }
 0x874   : > { %8908 = vmatprep.mubr.bf16.mxu1 %v14772_v29 }
 0x87a   : > { %7706 = vmatmul.mubr.bf16.gmra.mrb[168].mxu0 %v14769_v30  ;;  %v14805_v30 = vld [vmem:[%s20511_s7 + $0x2d0] ss:$12 sps:$4 sm:$0xff]  }
 0x87b   : > { %8909 = vmatmul.mubr.bf16.gmra.mrb[192].mxu1 %v14770_v33  ;;  %7713 = vmatprep.mubr.bf16.mxu0 %v14773_v63 }
 0x87c   : > { %8916 = vmatprep.mubr.bf16.mxu1 %v14778_v3 }
 0x882   : > { %7714 = vmatmul.mubr.bf16.gmra.mrb[172].mxu0 %v14775_v39  ;;  %v14806_v39 = vld [vmem:[%s20511_s7 + $0x420] ss:$12 sps:$4 sm:$0xff]  }
 0x883   : > { %8917 = vmatmul.mubr.bf16.gmra.mrb[196].mxu1 %v14776_v14  ;;  %7721 = vmatprep.mubr.bf16.mxu0 %v14779_v31  ;;  %v14809_v14 = vld [vmem:[%s20511_s7 + $0x2ec] ss:$12 sps:$4 sm:$0xff]  }
 0x884   : > { %8924 = vmatprep.mubr.bf16.mxu1 %v14784_v48 }
 0x88a   : > { %7722 = vmatmul.mubr.bf16.gmra.mrb[176].mxu0 %v14781_v4 }
 0x88b   : > { %8925 = vmatmul.mubr.bf16.gmra.mrb[200].mxu1 %v14782_v28  ;;  %7729 = vmatprep.mubr.bf16.mxu0 %v14785_v6  ;;  %v14814_v28 = vld [vmem:[%s20511_s7 + $0x43c] ss:$12 sps:$4 sm:$0xff]  }
 0x88c   : > { %8932 = vmatprep.mubr.bf16.mxu1 %v14790_v1 }
 0x88d   : > { %v7515_v23 = vpop.f32.mrb[72].mxu0 }
 0x88e   : > { %v7517_v37 = vpop.f32.mrb[73].mxu0 }
 0x88f   : > { %v7518_v42 = vpop.f32.mrb[74].mxu0 }
 0x890   : > { %v7520_v17 = vpop.f32.mrb[75].mxu0 }
 0x892   : > { %7730 = vmatmul.mubr.bf16.gmra.mrb[180].mxu0 %v14787_v56 }
 0x893   : > { %8933 = vmatmul.mubr.bf16.gmra.mrb[204].mxu1 %v14788_v61  ;;  %7737 = vmatprep.mubr.bf16.mxu0 %v14791_v32  ;;  %v14811_v61 = vld [vmem:[%s20511_s7 + $0x2e8] ss:$12 sps:$4 sm:$0xff]  }
 0x894   : > { %8940 = vmatprep.mubr.bf16.mxu1 %v14796_v13  ;;  %v14812_v13 = vld [vmem:[%s20511_s7 + $0x438] ss:$12 sps:$4 sm:$0xff]  }
 0x895   : > { %v7523_v8 = vpop.f32.mrb[76].mxu0 }
 0x896   : > { %v7525_v9 = vpop.f32.mrb[77].mxu0 }
 0x897   : > { %v7526_v58 = vpop.f32.mrb[78].mxu0 }
 0x898   : > { %v7528_v15 = vpop.f32.mrb[79].mxu0 }
 0x89a   : > { %7738 = vmatmul.mubr.bf16.gmra.mrb[184].mxu0 %v14793_v54 }
 0x89b   : > { %8941 = vmatmul.mubr.bf16.gmra.mrb[208].mxu1 %v14794_v50  ;;  %7745 = vmatprep.mubr.bf16.mxu0 %v14797_v51  ;;  %v14818_v50 = vld [vmem:[%s20511_s7 + $0x454] ss:$12 sps:$4 sm:$0xff]  }
 0x89c   : > { %8948 = vmatprep.mubr.bf16.mxu1 %v14802_v52 }
 0x89d   : > { %v7531_v25 = vpop.f32.mrb[80].mxu0 }
 0x89e   : > { %v7533_v53 = vpop.f32.mrb[81].mxu0  ;;  %v13960_v20 = vpop.f32.mrb[104].mxu1 }
 0x89f   : > { %v18482_v43 = vadd.f32 %v13960_v20, %v7523_v8  ;;  %v7534_v12 = vpop.f32.mrb[82].mxu0  ;;  %v7804_v10 = vpop.f32.mrb[105].mxu1  ;;  %v14815_v8 = vld [vmem:[%s20511_s7 + $0x308] ss:$12 sps:$4 sm:$0xff]   ;;  %v14819_v20 = vld [vmem:[%s20511_s7 + $0x320] ss:$12 sps:$4 sm:$0xff]  }
 0x8a0   : > { %v18490_v57 = vadd.f32 %v7804_v10, %v7515_v23  ;;  %v7536_v16 = vpop.f32.mrb[83].mxu0  ;;  %v13961_v18 = vpop.f32.mrb[106].mxu1  ;;  %v14816_v10 = vld [vmem:[%s20511_s7 + $0x450] ss:$12 sps:$4 sm:$0xff]  }
 0x8a1   : > { %20766 = vst [vmem:[#allocation7_spill] sm:$0xff] %v18482_v43  ;;  %v18495_v2 = vadd.f32 %v13961_v18, %v7526_v58  ;;  %v7807_v27 = vpop.f32.mrb[107].mxu1 }
 0x8a2   : > { %20767 = vst [vmem:[#allocation8_spill] sm:$0xff] %v18490_v57  ;;  %v18497_v45 = vadd.f32 %v7807_v27, %v7518_v42  ;;  %7746 = vmatmul.mubr.bf16.gmra.mrb[188].mxu0 %v14799_v7 }
 0x8a3   : > { %20768 = vst [vmem:[#allocation12_spill] sm:$0xff] %v18495_v2  ;;  %8949 = vmatmul.mubr.bf16.gmra.mrb[212].mxu1 %v14800_v34  ;;  %7753 = vmatprep.mubr.bf16.mxu0 %v14803_v22 }
 0x8a4   : > { %20769 = vst [vmem:[#allocation10_spill] sm:$0xff] %v18497_v45  ;;  %8956 = vmatprep.mubr.bf16.mxu1 %v14808_v24  ;;  %v14820_v24 = vld [vmem:[%s20511_s7 + $0x338] ss:$12 sps:$4 sm:$0xff]  }
 0x8a5   : > { %v7539_v21 = vpop.f32.mrb[84].mxu0 }
 0x8a6   : > { %v7541_v60 = vpop.f32.mrb[85].mxu0  ;;  %v13964_v29 = vpop.f32.mrb[108].mxu1 }
 0x8a7   : > { %v18502_v33 = vadd.f32 %v13964_v29, %v7539_v21  ;;  %v7542_v63 = vpop.f32.mrb[86].mxu0  ;;  %v7820_v3 = vpop.f32.mrb[109].mxu1  ;;  %v14823_v21 = vld [vmem:[%s20511_s7 + $0x46c] ss:$12 sps:$4 sm:$0xff]  }
 0x8a8   : > { %v18510_v31 = vadd.f32 %v7820_v3, %v7531_v25  ;;  %v7544_v48 = vpop.f32.mrb[87].mxu0  ;;  %v13965_v4 = vpop.f32.mrb[110].mxu1 }
 0x8a9   : > { %20770 = vst [vmem:[#allocation3_spill] sm:$0xff] %v18502_v33  ;;  %v18515_v6 = vadd.f32 %v13965_v4, %v7542_v63  ;;  %v7823_v1 = vpop.f32.mrb[111].mxu1  ;;  %v14824_v63 = vld [vmem:[%s20511_s7 + $0x350] ss:$12 sps:$4 sm:$0xff]  }
 0x8aa   : > { %20771 = vst [vmem:[#allocation9_spill] sm:$0xff] %v18510_v31  ;;  %v18517_v23 = vadd.f32 %v7823_v1, %v7534_v12  ;;  %7754 = vmatmul.mubr.bf16.gmra.mrb[192].mxu0 %v14805_v30 }
 0x8ab   : > { %20772 = vst [vmem:[#allocation6_spill] sm:$0xff] %v18515_v6  ;;  %8957 = vmatmul.mubr.bf16.gmra.mrb[216].mxu1 %v14806_v39  ;;  %7761 = vmatprep.mubr.bf16.mxu0 %v14809_v14 }
 0x8ac   : > { %20773 = vst [vmem:[#allocation11_spill] sm:$0xff] %v18517_v23  ;;  %8964 = vmatprep.mubr.bf16.mxu1 %v14814_v28  ;;  %v14825_v28 = vld [vmem:[%s20511_s7 + $0x368] ss:$12 sps:$4 sm:$0xff]  }
 0x8ad   : > { %v7547_v37 = vpop.f32.mrb[88].mxu0 }
 0x8ae   : > { %v7549_v56 = vpop.f32.mrb[89].mxu0  ;;  %v13968_v42 = vpop.f32.mrb[112].mxu1 }
 0x8af   : > { %v7550_v32 = vpop.f32.mrb[90].mxu0  ;;  %v7836_v17 = vpop.f32.mrb[113].mxu1 }
 0x8b0   : > { %v18528_v9 = vadd.f32 %v7836_v17, %v7547_v37  ;;  %v7552_v54 = vpop.f32.mrb[91].mxu0  ;;  %v13969_v58 = vpop.f32.mrb[114].mxu1 }
 0x8b1   : > { %v7839_v51 = vpop.f32.mrb[115].mxu1 }
 0x8b2   : > { %20774 = vst [vmem:[#allocation5_spill] sm:$0xff] %v18528_v9  ;;  %v18533_v15 = vadd.f32 %v7839_v51, %v7550_v32  ;;  %7762 = vmatmul.mubr.bf16.gmra.mrb[196].mxu0 %v14811_v61  ;;  %v14829_v32 = vld [vmem:[%s20511_s7 + $0x380] ss:$12 sps:$4 sm:$0xff]  }
 0x8b3   : > { %8965 = vmatmul.mubr.bf16.gmra.mrb[220].mxu1 %v14812_v13  ;;  %14026 = vmatprep.mubr.msk.bf16.mxu0 %vm7384_vm6, %v14815_v8 }
 0x8b4   : > { %20775 = vst [vmem:[#allocation4_spill] sm:$0xff] %v18533_v15  ;;  %8972 = vmatprep.mubr.bf16.mxu1 %v14818_v50  ;;  %v14830_v50 = vld [vmem:[%s20511_s7 + $0x398] ss:$12 sps:$4 sm:$0xff]  }
 0x8b5   : > { %v7555_v52 = vpop.f32.mrb[92].mxu0 }
 0x8b6   : > { %v18536_v25 = vadd.f32 %v13968_v42, %v7555_v52  ;;  %v7557_v53 = vpop.f32.mrb[93].mxu0  ;;  %v13972_v7 = vpop.f32.mrb[116].mxu1 }
 0x8b7   : > { %v7558_v12 = vpop.f32.mrb[94].mxu0  ;;  %v7852_v34 = vpop.f32.mrb[117].mxu1 }
 0x8b8   : > { %20776 = vst [vmem:[#allocation13_spill] sm:$0xff] %v18536_v25  ;;  %v18544_v22 = vadd.f32 %v13969_v58, %v7558_v12  ;;  %v7560_v16 = vpop.f32.mrb[95].mxu0  ;;  %v13973_v18 = vpop.f32.mrb[118].mxu1  ;;  %v14834_v12 = vld [vmem:[%s20511_s7 + $0x3b0] ss:$12 sps:$4 sm:$0xff]  }
 0x8b9   : > { %v7855_v27 = vpop.f32.mrb[119].mxu1 }
 0x8ba   : > { %20777 = vst [vmem:[#allocation14_spill] sm:$0xff] %v18544_v22  ;;  %14027 = vmatmul.mubr.msk.bf16.vlgmr.msra.gmra.mrb[200].mxu0 %vm7384_vm6, %v14819_v20 }
 0x8bb   : > { %10432 = vmatpush1.bf16.msra.mxu0 %v17934_v46  ;;  %8973 = vmatmul.mubr.bf16.gmra.mrb[224].mxu1 %v14816_v10  ;;  %v14821_v46 = vld [vmem:[%s20511_s7 + $0x468] ss:$12 sps:$4 sm:$0xff]  }
 0x8bc   : > { %10433 = vmatprep.subr.bf16.mxu0 %v20682_v41  ;;  %14030 = vmatprep.mubr.msk.bf16.mxu0 %vm7384_vm6, %v14820_v24 }
 0x8bd   : > { %v7563_v60 = vpop.f32.mrb[96].mxu0  ;;  %8980 = vmatprep.mubr.bf16.mxu1 %v14823_v21 }
 0x8be   : > { %v18556_v29 = vadd.f32 %v7852_v34, %v7563_v60  ;;  %v7565_v30 = vpop.f32.mrb[97].mxu0  ;;  %v18561_v3 = vpop.f32.mrb[120].mxu1 }
 0x8bf   : > { %10434 = vmatpush1.bf16.msra.mxu0 %v17931_v19  ;;  %v7566_v39 = vpop.f32.mrb[98].mxu0  ;;  %v7868_v14 = vpop.f32.mrb[121].mxu1  ;;  %v14828_v19 = vld [vmem:[%s20511_s7 + $0x484] ss:$12 sps:$4 sm:$0xff]  }
 0x8c0   : > { %20778 = vst [vmem:[#allocation15_spill] sm:$0xff] %v18556_v29  ;;  %v18567_v48 = vadd.f32 %v7855_v27, %v7566_v39  ;;  %v7568_v4 = vpop.f32.mrb[99].mxu0  ;;  %10435 = vmatprep.subr.bf16.mxu0 %v20682_v41  ;;  %v13977_v1 = vpop.f32.mrb[122].mxu1  ;;  %v14835_v27 = vld [vmem:[%s20511_s7 + $0x3c8] ss:$12 sps:$4 sm:$0xff]  }
 0x8c1   : > { %v7871_v37 = vpop.f32.mrb[123].mxu1  ;;  %v14836_v4 = vld [vmem:[%s20511_s7 + $0x4b0] ss:$12 sps:$4 sm:$0xff]  }
 0x8c2   : > { %20779 = vst [vmem:[#allocation16_spill] sm:$0xff] %v18567_v48  ;;  %14031 = vmatmul.mubr.msk.bf16.gmra.mrb[204].mxu0 %vm7384_vm6, %v14824_v63 }
 0x8c3   : > { %10436 = vmatpush1.bf16.msra.mxu0 %v17954_v59  ;;  %8981 = vmatmul.mubr.bf16.gmra.mrb[228].mxu1 %v14821_v46  ;;  %v14826_v59 = vld [vmem:[%s20511_s7 + $0x480] ss:$12 sps:$4 sm:$0xff]  }
 0x8c4   : > { %10437 = vmatprep.subr.bf16.mxu0 %v20682_v41  ;;  %14034 = vmatprep.mubr.msk.bf16.mxu0 %vm7384_vm6, %v14825_v28  ;;  %v14839_v46 = vld [vmem:[%s20511_s7 + $0x3e0] ss:$12 sps:$4 sm:$0xff]  }
 0x8c5   : > { %v7571_v56 = vpop.f32.mrb[100].mxu0  ;;  %8988 = vmatprep.mubr.bf16.mxu1 %v14828_v19 }
 0x8c6   : > { %v18580_v42 = vadd.f32 %v13972_v7, %v7571_v56  ;;  %v7573_v61 = vpop.f32.mrb[101].mxu0  ;;  %v18585_v17 = vpop.f32.mrb[124].mxu1 }
 0x8c7   : > { %10438 = vmatpush1.bf16.msra.mxu0 %v17951_v38  ;;  %v7574_v13 = vpop.f32.mrb[102].mxu0  ;;  %v7884_v8 = vpop.f32.mrb[125].mxu1  ;;  %v14833_v38 = vld [vmem:[%s20511_s7 + $0x49c] ss:$12 sps:$4 sm:$0xff]  }
 0x8c8   : > { %20780 = vst [vmem:[#allocation17_spill] sm:$0xff] %v18580_v42  ;;  %v18591_v54 = vadd.f32 %v13973_v18, %v7574_v13  ;;  %v7576_v58 = vpop.f32.mrb[103].mxu0  ;;  %10439 = vmatprep.subr.bf16.mxu0 %v20682_v41  ;;  %v18597_v51 = vpop.f32.mrb[126].mxu1 }
 0x8c9   : > { %v7887_v52 = vpop.f32.mrb[127].mxu1 }
 0x8ca   : > { %20781 = vst [vmem:[#allocation18_spill] sm:$0xff] %v18591_v54  ;;  %14035 = vmatmul.mubr.msk.bf16.gmra.mrb[208].mxu0 %vm7384_vm6, %v14829_v32 }
 0x8cb   : > { %10440 = vmatpush1.bf16.msra.mxu0 %v17970_v44  ;;  %8989 = vmatmul.mubr.bf16.gmra.mrb[232].mxu1 %v14826_v59  ;;  %v14831_v44 = vld [vmem:[%s20511_s7 + $0x498] ss:$12 sps:$4 sm:$0xff]   ;;  %v14844_v59 = vld [vmem:[%s20511_s7 + $0x410] ss:$12 sps:$4 sm:$0xff]  }
 0x8cc   : > { %10441 = vmatprep.subr.bf16.mxu0 %v20682_v41  ;;  %14038 = vmatprep.mubr.msk.bf16.mxu0 %vm7384_vm6, %v14830_v50 }
 0x8cd   : > { %v7579_v53 = vpop.f32.mrb[104].mxu0  ;;  %8996 = vmatprep.mubr.bf16.mxu1 %v14833_v38 }
 0x8ce   : > { %v18606_v20 = vadd.f32 %v7868_v14, %v7579_v53  ;;  %v7581_v7 = vpop.f32.mrb[105].mxu0  ;;  %v18611_v10 = vpop.f32.mrb[128].mxu1 }
 0x8cf   : > { %10442 = vmatpush1.bf16.msra.mxu0 %v17967_v11  ;;  %v7582_v34 = vpop.f32.mrb[106].mxu0  ;;  %v18617_v16 = vpop.f32.mrb[129].mxu1  ;;  %v14838_v11 = vld [vmem:[%s20511_s7 + $0x4b4] ss:$12 sps:$4 sm:$0xff]  }
 0x8d0   : > { %20782 = vst [vmem:[#allocation19_spill] sm:$0xff] %v18606_v20  ;;  %v18619_v18 = vadd.f32 %v7871_v37, %v7582_v34  ;;  %v7584_v24 = vpop.f32.mrb[107].mxu0  ;;  %10443 = vmatprep.subr.bf16.mxu0 %v20682_v41  ;;  %v18625_v21 = vpop.f32.mrb[130].mxu1  ;;  %v14840_v37 = vld [vmem:[%s20511_s7 + $0x3f8] ss:$12 sps:$4 sm:$0xff]  }
 0x8d1   : > { %v18630_v60 = vpop.f32.mrb[131].mxu1  ;;  %v14845_v7 = vld [vmem:[%s20511_s7 + $0x428] ss:$12 sps:$4 sm:$0xff]  }
 0x8d2   : > { %20783 = vst [vmem:[#allocation20_spill] sm:$0xff] %v18619_v18  ;;  %14039 = vmatmul.mubr.msk.bf16.gmra.mrb[212].mxu0 %vm7384_vm6, %v14834_v12 }
 0x8d3   : > { %10444 = vmatpush1.bf16.msra.mxu0 %v17986_v55  ;;  %8997 = vmatmul.mubr.bf16.gmra.mrb[236].mxu1 %v14831_v44 }
 0x8d4   : > { %10445 = vmatprep.subr.bf16.mxu0 %v20682_v41  ;;  %14042 = vmatprep.mubr.msk.bf16.mxu0 %vm7384_vm6, %v14835_v27  ;;  %v14849_v27 = vld [vmem:[%s20511_s7 + $0x440] ss:$12 sps:$4 sm:$0xff]  }
 0x8d5   : > { %v7587_v30 = vpop.f32.mrb[108].mxu0  ;;  %9004 = vmatprep.mubr.bf16.mxu1 %v14838_v11 }
 0x8d6   : > { %v18637_v63 = vadd.f32 %v18561_v3, %v7587_v30  ;;  %v7589_v39 = vpop.f32.mrb[109].mxu0  ;;  %v18642_v14 = vpop.f32.mrb[132].mxu1  ;;  %v14846_v30 = vld [vmem:[%s20511_s7 + $0x4e0] ss:$12 sps:$4 sm:$0xff]  }
 0x8d7   : > { %10446 = vmatpush1.bf16.msra.mxu0 %v17983_v35  ;;  %v7590_v55 = vpop.f32.mrb[110].mxu0  ;;  %v18648_v28 = vpop.f32.mrb[133].mxu1  ;;  %v14843_v35 = vld [vmem:[%s20511_s7 + $0x4cc] ss:$12 sps:$4 sm:$0xff]  }
 0x8d8   : > { %20784 = vst [vmem:[#allocation21_spill] sm:$0xff] %v18637_v63  ;;  %v18650_v19 = vadd.f32 %v13977_v1, %v7590_v55  ;;  %v7592_v3 = vpop.f32.mrb[111].mxu0  ;;  %10447 = vmatprep.subr.bf16.mxu0 %v20682_v41  ;;  %v18656_v56 = vpop.f32.mrb[134].mxu1  ;;  %v14850_v55 = vld [vmem:[%s20511_s7 + $0x458] ss:$12 sps:$4 sm:$0xff]  }
 0x8d9   : > { %v18661_v61 = vpop.f32.mrb[135].mxu1 }
 0x8da   : > { %20785 = vst [vmem:[#allocation22_spill] sm:$0xff] %v18650_v19  ;;  %14043 = vmatmul.mubr.msk.bf16.gmra.mrb[216].mxu0 %vm7384_vm6, %v14839_v46 }
 0x8db   : > { %10448 = vmatpush1.bf16.msra.mxu0 %v18002_v49  ;;  %9005 = vmatmul.mubr.bf16.gmra.mrb[240].mxu1 %v14836_v4  ;;  %v14841_v49 = vld [vmem:[%s20511_s7 + $0x4c8] ss:$12 sps:$4 sm:$0xff]  }
 0x8dc   : > { %10449 = vmatprep.subr.bf16.mxu0 %v20682_v41  ;;  %14046 = vmatprep.mubr.msk.bf16.mxu0 %vm7384_vm6, %v14840_v37 }
 0x8dd   : > { %v7595_v1 = vpop.f32.mrb[112].mxu0  ;;  %9012 = vmatprep.mubr.bf16.mxu1 %v14843_v35 }
 0x8de   : > { %v18667_v32 = vadd.f32 %v7884_v8, %v7595_v1  ;;  %v7597_v13 = vpop.f32.mrb[113].mxu0  ;;  %v18672_v58 = vpop.f32.mrb[136].mxu1  ;;  %v14854_v1 = vld [vmem:[%s20511_s7 + $0x470] ss:$12 sps:$4 sm:$0xff]  }
 0x8df   : > { %10450 = vmatpush1.bf16.msra.mxu0 %v17999_v0  ;;  %v7598_v50 = vpop.f32.mrb[114].mxu0  ;;  %v18678_v38 = vpop.f32.mrb[137].mxu1  ;;  %v14848_v0 = vld [vmem:[%s20511_s7 + $0x4e4] ss:$12 sps:$4 sm:$0xff]  }
 0x8e0   : > { %20786 = vst [vmem:[#allocation23_spill] sm:$0xff] %v18667_v32  ;;  %v18680_v53 = vadd.f32 %v7887_v52, %v7598_v50  ;;  %v7600_v8 = vpop.f32.mrb[115].mxu0  ;;  %10451 = vmatprep.subr.bf16.mxu0 %v20682_v41  ;;  %v18686_v12 = vpop.f32.mrb[138].mxu1 }
 0x8e1   : > { %v18691_v34 = vpop.f32.mrb[139].mxu1  ;;  %v14855_v8 = vld [vmem:[%s20511_s7 + $0x488] ss:$12 sps:$4 sm:$0xff]  }
 0x8e2   : > { %20787 = vst [vmem:[#allocation24_spill] sm:$0xff] %v18680_v53  ;;  %14047 = vmatmul.mubr.msk.bf16.gmra.mrb[220].mxu0 %vm7384_vm6, %v14844_v59  ;;  %v14851_v59 = vld [vmem:[%s20511_s7 + $0x4f8] ss:$12 sps:$4 sm:$0xff]  }
 0x8e3   : > { %10452 = vmatpush1.bf16.msra.mxu0 %v18018_v5  ;;  %9013 = vmatmul.mubr.bf16.gmra.mrb[244].mxu1 %v14841_v49 }
 0x8e4   : > { %10453 = vmatprep.subr.bf16.mxu0 %v20682_v41  ;;  %14050 = vmatprep.mubr.msk.bf16.mxu0 %vm7384_vm6, %v14845_v7 }
 0x8e5   : > { %v7603_v52 = vpop.f32.mrb[116].mxu0  ;;  %9020 = vmatprep.mubr.bf16.mxu1 %v14848_v0 }
 0x8e6   : > { %v18698_v44 = vadd.f32 %v18585_v17, %v7603_v52  ;;  %v7605_v24 = vpop.f32.mrb[117].mxu0  ;;  %v18703_v11 = vpop.f32.mrb[140].mxu1 }
 0x8e7   : > { %10454 = vmatpush1.bf16.msra.mxu0 %v18015_v26  ;;  %v7606_v5 = vpop.f32.mrb[118].mxu0  ;;  %v18709_v39 = vpop.f32.mrb[141].mxu1  ;;  %v14853_v26 = vld [vmem:[%s20511_s7 + $0x4fc] ss:$12 sps:$4 sm:$0xff]  }
 0x8e8   : > { %20788 = vst [vmem:[#allocation25_spill] sm:$0xff] %v18698_v44  ;;  %v18712_v46 = vadd.f32 %v18597_v51, %v7606_v5  ;;  %v7608_v17 = vpop.f32.mrb[119].mxu0  ;;  %10455 = vmatprep.subr.bf16.mxu0 %v20682_v41  ;;  %v18718_v4 = vpop.f32.mrb[142].mxu1 }
 0x8e9   : > { %v18723_v3 = vpop.f32.mrb[143].mxu1 }
 0x8ea   : > { %20789 = vst [vmem:[#allocation26_spill] sm:$0xff] %v18712_v46  ;;  %14051 = vmatmul.mubr.msk.bf16.gmra.mrb[224].mxu0 %vm7384_vm6, %v14849_v27  ;;  %v14859_v27 = vld [vmem:[%s20511_s7 + $0x4a0] ss:$12 sps:$4 sm:$0xff]  }
 0x8eb   : > { %10456 = vmatpush1.bf16.msra.mxu0 %v18034_v47  ;;  %9021 = vmatmul.mubr.bf16.gmra.mrb[248].mxu1 %v14846_v30  ;;  %v14860_v30 = vld [vmem:[%s20511_s7 + $0x4b8] ss:$12 sps:$4 sm:$0xff]  }
 0x8ec   : > { %10457 = vmatprep.subr.bf16.mxu0 %v20682_v41  ;;  %14054 = vmatprep.mubr.msk.bf16.mxu0 %vm7384_vm6, %v14850_v55 }
 0x8ed   : > { %v7611_v51 = vpop.f32.mrb[120].mxu0  ;;  %9028 = vmatprep.mubr.bf16.mxu1 %v14853_v26  ;;  %v14863_v26 = vld [vmem:[%s20511_s7 + $0x52c] ss:$12 sps:$4 sm:$0xff]  }
 0x8ee   : > { %v18730_v37 = vadd.f32 %v18617_v16, %v7611_v51  ;;  %v7613_v35 = vpop.f32.mrb[121].mxu0  ;;  %v18735_v13 = vpop.f32.mrb[144].mxu1 }
 0x8ef   : > { %10458 = vmatpush1.bf16.msra.mxu0 %v18031_v36  ;;  %v7614_v47 = vpop.f32.mrb[122].mxu0  ;;  %v18741_v50 = vpop.f32.mrb[145].mxu1  ;;  %v14858_v36 = vld [vmem:[%s20511_s7 + $0x514] ss:$12 sps:$4 sm:$0xff]  }
 0x8f0   : > { %20790 = vst [vmem:[#allocation27_spill] sm:$0xff] %v18730_v37  ;;  %v18744_v49 = vadd.f32 %v18630_v60, %v7614_v47  ;;  %v7616_v16 = vpop.f32.mrb[123].mxu0  ;;  %10459 = vmatprep.subr.bf16.mxu0 %v20682_v41  ;;  %v18750_v7 = vpop.f32.mrb[146].mxu1  ;;  %v14864_v47 = vld [vmem:[%s20511_s7 + $0x4d0] ss:$12 sps:$4 sm:$0xff]  }
 0x8f1   : > { %v18755_v0 = vpop.f32.mrb[147].mxu1 }
 0x8f2   : > { %20791 = vst [vmem:[#allocation28_spill] sm:$0xff] %v18744_v49  ;;  %14055 = vmatmul.mubr.msk.bf16.gmra.mrb[228].mxu0 %vm7384_vm6, %v14854_v1 }
 0x8f3   : > { %10460 = vmatpush1.bf16.msra.mxu0 %v18050_v62  ;;  %9029 = vmatmul.mubr.bf16.gmra.mrb[252].mxu1 %v14851_v59 }
 0x8f4   : > { %10461 = vmatprep.subr.bf16.mxu0 %v20682_v41  ;;  %14058 = vmatprep.mubr.msk.bf16.mxu0 %vm7384_vm6, %v14855_v8  ;;  %v14856_v41 = vld [vmem:[%s20511_s7 + $0x510] ss:$12 sps:$4 sm:$0xff]   ;;  %v14861_v8 = vld [vmem:[%s20511_s7 + $0x528] ss:$12 sps:$4 sm:$0xff]  }
 0x8f5   : > { %v7619_v60 = vpop.f32.mrb[124].mxu0  ;;  %9036 = vmatprep.mubr.bf16.mxu1 %v14858_v36  ;;  %v14865_v36 = vld [vmem:[%s20511_s7 + $0x4e8] ss:$12 sps:$4 sm:$0xff]  }
 0x8f6   : > { %v18762_v52 = vadd.f32 %v18611_v10, %v7619_v60  ;;  %v7621_v24 = vpop.f32.mrb[125].mxu0  ;;  %v18767_v5 = vpop.f32.mrb[148].mxu1 }
 0x8f7   : > { %10462 = vmatpush1.bf16.msra.mxu0 %v18047_v40  ;;  %v7622_v62 = vpop.f32.mrb[126].mxu0  ;;  %v18776_v10 = vpop.f32.mrb[149].mxu1 }
 0x8f8   : > { %20792 = vst [vmem:[#allocation29_spill] sm:$0xff] %v18762_v52  ;;  %v18779_v17 = vadd.f32 %v18625_v21, %v7622_v62  ;;  %v7624_v55 = vpop.f32.mrb[127].mxu0  ;;  %v18784_v40 = vpop.f32.mrb[150].mxu1 }
 0x8f9   : > { %v18786_v51 = vpop.f32.mrb[151].mxu1 }
 0x8fa   : > { %20793 = vst [vmem:[#allocation30_spill] sm:$0xff] %v18779_v17  ;;  %14059 = vmatmul.mubr.msk.bf16.gmra.mrb[232].mxu0 %vm7384_vm6, %v14859_v27  ;;  %v14868_v27 = vld [vmem:[%s20511_s7 + $0x544] ss:$12 sps:$4 sm:$0xff]  }
 0x8fb   : > { %9037 = vmatmul.mubr.bf16.gmra.mrb[0].mxu1 %v14856_v41  ;;  %14062 = vmatprep.mubr.msk.bf16.mxu0 %vm7384_vm6, %v14860_v30 }
 0x8fc   : > { %9044 = vmatprep.mubr.bf16.mxu1 %v14863_v26  ;;  %v14869_v26 = vld [vmem:[%s20511_s7 + $0x500] ss:$12 sps:$4 sm:$0xff]  }
 0x8fd   : > { %v7627_v35 = vpop.f32.mrb[128].mxu0 }
 0x8fe   : > { %v18791_v1 = vadd.f32 %v18648_v28, %v7627_v35  ;;  %v7629_v21 = vpop.f32.mrb[129].mxu0  ;;  %v18796_v59 = vpop.f32.mrb[152].mxu1 }
 0x8ff   : > { %v7630_v16 = vpop.f32.mrb[130].mxu0  ;;  %v18804_v60 = vpop.f32.mrb[153].mxu1 }
 0x900   : > { %v18807_v28 = vadd.f32 %v18661_v61, %v7630_v16  ;;  %v7632_v24 = vpop.f32.mrb[131].mxu0  ;;  %v18812_v62 = vpop.f32.mrb[154].mxu1  ;;  %v14870_v16 = vld [vmem:[%s20511_s7 + $0x518] ss:$12 sps:$4 sm:$0xff]  }
 0x901   : > { %v18814_v41 = vpop.f32.mrb[155].mxu1  ;;  %v14873_v24 = vld [vmem:[%s20511_s7 + $0x55c] ss:$12 sps:$4 sm:$0xff]  }
 0x902   : > { %14063 = vmatmul.mubr.msk.bf16.gmra.mrb[236].mxu0 %vm7384_vm6, %v14864_v47  ;;  %v14866_v47 = vld [vmem:[%s20511_s7 + $0x540] ss:$12 sps:$4 sm:$0xff]  }
 0x903   : > { %9045 = vmatmul.mubr.bf16.gmra.mrb[4].mxu1 %v14861_v8  ;;  %14066 = vmatprep.mubr.msk.bf16.mxu0 %vm7384_vm6, %v14865_v36 }
 0x904   : > { %9052 = vmatprep.mubr.bf16.mxu1 %v14868_v27 }
 0x905   : > { %v7635_v30 = vpop.f32.mrb[132].mxu0 }
 0x906   : > { %v18819_v55 = vadd.f32 %v18642_v14, %v7635_v30  ;;  %v7637_v61 = vpop.f32.mrb[133].mxu0  ;;  %v18824_v35 = vpop.f32.mrb[156].mxu1 }
 0x907   : > { %v7638_v21 = vpop.f32.mrb[134].mxu0  ;;  %v18832_v8 = vpop.f32.mrb[157].mxu1 }
 0x908   : > { %20794 = vst [vmem:[#allocation31_spill] sm:$0xff] %v18819_v55  ;;  %v18835_v14 = vadd.f32 %v18656_v56, %v7638_v21  ;;  %v7640_v36 = vpop.f32.mrb[135].mxu0  ;;  %v18840_v27 = vpop.f32.mrb[158].mxu1  ;;  %v14874_v21 = vld [vmem:[%s20511_s7 + $0x530] ss:$12 sps:$4 sm:$0xff]  }
 0x909   : > { %v18842_v30 = vpop.f32.mrb[159].mxu1 }
 0x90a   : > { %20795 = vst [vmem:[#allocation32_spill] sm:$0xff] %v18835_v14  ;;  %14067 = vmatmul.mubr.msk.bf16.gmra.mrb[240].mxu0 %vm7384_vm6, %v14869_v26  ;;  %v14871_v26 = vld [vmem:[%s20511_s7 + $0x558] ss:$12 sps:$4 sm:$0xff]  }
 0x90b   : > { %9053 = vmatmul.mubr.bf16.gmra.mrb[8].mxu1 %v14866_v47  ;;  %14070 = vmatprep.mubr.msk.bf16.mxu0 %vm7384_vm6, %v14870_v16  ;;  %v14875_v47 = vld [vmem:[%s20511_s7 + $0x548] ss:$12 sps:$4 sm:$0xff]  }
 0x90c   : > { %9060 = vmatprep.mubr.bf16.mxu1 %v14873_v24 }
 0x90d   : > { %v7643_v61 = vpop.f32.mrb[136].mxu0 }
 0x90e   : > { %v18847_v55 = vadd.f32 %v18678_v38, %v7643_v61  ;;  %v7645_v56 = vpop.f32.mrb[137].mxu0  ;;  %v18852_v36 = vpop.f32.mrb[160].mxu1  ;;  %v14878_v61 = vld [vmem:[%s20511_s7 + $0x574] ss:$12 sps:$4 sm:$0xff]  }
 0x90f   : > { %v7646_v14 = vpop.f32.mrb[138].mxu0  ;;  %v18860_v16 = vpop.f32.mrb[161].mxu1 }
 0x910   : > { %v18863_v38 = vadd.f32 %v18691_v34, %v7646_v14  ;;  %v7648_v24 = vpop.f32.mrb[139].mxu0  ;;  %v18868_v56 = vpop.f32.mrb[162].mxu1  ;;  %v14879_v14 = vld [vmem:[%s20511_s7 + $0x560] ss:$12 sps:$4 sm:$0xff]  }
 0x911   : > { %v18870_v17 = vpop.f32.mrb[163].mxu1 }
 0x912   : > { %14071 = vmatmul.mubr.msk.bf16.gmra.mrb[244].mxu0 %vm7384_vm6, %v14874_v21  ;;  %v14876_v21 = vld [vmem:[%s20511_s7 + $0x570] ss:$12 sps:$4 sm:$0xff]  }
 0x913   : > { %9061 = vmatmul.mubr.bf16.gmra.mrb[12].mxu1 %v14871_v26  ;;  %14074 = vmatprep.mubr.msk.bf16.mxu0 %vm7384_vm6, %v14875_v47  ;;  %v14880_v26 = vld [vmem:[%s20511_s7 + $0x578] ss:$12 sps:$4 sm:$0xff]  }
 0x914   : > { %9068 = vmatprep.mubr.bf16.mxu1 %v14878_v61  ;;  %v14883_v61 = vld [vmem:[%s20511_s7 + $0x58c] ss:$12 sps:$4 sm:$0xff]  }
 0x915   : > { %v7651_v52 = vpop.f32.mrb[140].mxu0 }
 0x916   : > { %v18875_v49 = vadd.f32 %v18672_v58, %v7651_v52  ;;  %v7653_v34 = vpop.f32.mrb[141].mxu0  ;;  %v18880_v24 = vpop.f32.mrb[164].mxu1 }
 0x917   : > { %v7654_v37 = vpop.f32.mrb[142].mxu0  ;;  %v18888_v47 = vpop.f32.mrb[165].mxu1 }
 0x918   : > { %v18891_v58 = vadd.f32 %v18686_v12, %v7654_v37  ;;  %v7656_v52 = vpop.f32.mrb[143].mxu0  ;;  %v18896_v34 = vpop.f32.mrb[166].mxu1  ;;  %v14884_v37 = vld [vmem:[%s20511_s7 + $0x590] ss:$12 sps:$4 sm:$0xff]  }
 0x919   : > { %v18898_v46 = vpop.f32.mrb[167].mxu1 }
 0x91a   : > { %14075 = vmatmul.mubr.msk.bf16.gmra.mrb[248].mxu0 %vm7384_vm6, %v14879_v14  ;;  %v14881_v14 = vld [vmem:[%s20511_s7 + $0x588] ss:$12 sps:$4 sm:$0xff]  }
 0x91b   : > { %9069 = vmatmul.mubr.bf16.gmra.mrb[16].mxu1 %v14876_v21  ;;  %14078 = vmatprep.mubr.msk.bf16.mxu0 %vm7384_vm6, %v14880_v26  ;;  %v14885_v21 = vld [vmem:[%s20511_s7 + $0x5a8] ss:$12 sps:$4 sm:$0xff]  }
 0x91c   : > { %9076 = vmatprep.mubr.bf16.mxu1 %v14883_v61  ;;  %v14888_v61 = vld [vmem:[%s20511_s7 + $0x5a4] ss:$12 sps:$4 sm:$0xff]  }
 0x91d   : > { %v7659_v44 = vpop.f32.mrb[144].mxu0 }
 0x91e   : > { %v18903_v53 = vadd.f32 %v18709_v39, %v7659_v44  ;;  %v7661_v12 = vpop.f32.mrb[145].mxu0  ;;  %v18908_v52 = vpop.f32.mrb[168].mxu1 }
 0x91f   : > { %v7662_v32 = vpop.f32.mrb[146].mxu0  ;;  %v8864_v26 = vpop.f32.mrb[169].mxu1 }
 0x920   : > { %v18917_v44 = vadd.f32 %v18723_v3, %v7662_v32  ;;  %v7664_v39 = vpop.f32.mrb[147].mxu0  ;;  %v18922_v12 = vpop.f32.mrb[170].mxu1  ;;  %v14889_v3 = vld [vmem:[%s20511_s7 + $0x5c0] ss:$12 sps:$4 sm:$0xff]  }
 0x921   : > { %v8867_v19 = vpop.f32.mrb[171].mxu1 }
 0x922   : > { %14079 = vmatmul.mubr.msk.bf16.gmra.mrb[252].mxu0 %vm7384_vm6, %v14884_v37  ;;  %v14886_v19 = vld [vmem:[%s20511_s7 + $0x5a0] ss:$12 sps:$4 sm:$0xff]   ;;  %v14890_v37 = vld [vmem:[%s20511_s7 + $0x5d8] ss:$12 sps:$4 sm:$0xff]  }
 0x923   : > { %9077 = vmatmul.mubr.bf16.gmra.mrb[20].mxu1 %v14881_v14  ;;  %14082 = vmatprep.mubr.msk.bf16.mxu0 %vm7384_vm6, %v14885_v21  ;;  %v14893_v21 = vld [vmem:[%s20511_s7 + $0x5bc] ss:$12 sps:$4 sm:$0xff]  }
 0x924   : > { %9084 = vmatprep.mubr.bf16.mxu1 %v14888_v61 }
 0x925   : > { %v7667_v63 = vpop.f32.mrb[148].mxu0 }
 0x926   : > { %v18927_v26 = vadd.f32 %v18703_v11, %v7667_v63  ;;  %v7669_v32 = vpop.f32.mrb[149].mxu0  ;;  %v18932_v39 = vpop.f32.mrb[172].mxu1 }
 0x927   : > { %v7670_v18 = vpop.f32.mrb[150].mxu0  ;;  %v8872_v14 = vpop.f32.mrb[173].mxu1 }
 0x928   : > { %v18941_v63 = vadd.f32 %v18718_v4, %v7670_v18  ;;  %v7672_v11 = vpop.f32.mrb[151].mxu0  ;;  %v18946_v61 = vpop.f32.mrb[174].mxu1  ;;  %v14894_v4 = vld [vmem:[%s20511_s7 + $0x5f0] ss:$12 sps:$4 sm:$0xff]  }
 0x929   : > { %v8875_v32 = vpop.f32.mrb[175].mxu1 }
 0x92a   : > { %14083 = vmatmul.mubr.msk.bf16.gmra.mrb[0].mxu0 %vm7384_vm6, %v14889_v3  ;;  %v14891_v3 = vld [vmem:[%s20511_s7 + $0x5b8] ss:$12 sps:$4 sm:$0xff]  }
 0x92b   : > { %9085 = vmatmul.mubr.bf16.gmra.mrb[24].mxu1 %v14886_v19  ;;  %14086 = vmatprep.mubr.msk.bf16.mxu0 %vm7384_vm6, %v14890_v37  ;;  %v14897_v19 = vld [vmem:[%s20511_s7 + $0x604] ss:$12 sps:$4 sm:$0xff]  }
 0x92c   : > { %9092 = vmatprep.mubr.bf16.mxu1 %v14893_v21  ;;  %v14900_v21 = vld [vmem:[%s20511_s7 + $0x5d4] ss:$12 sps:$4 sm:$0xff]  }
 0x92d   : > { %v7675_v20 = vpop.f32.mrb[152].mxu0 }
 0x92e   : > { %v18951_v14 = vadd.f32 %v18741_v50, %v7675_v20  ;;  %v7677_v18 = vpop.f32.mrb[153].mxu0  ;;  %v18956_v11 = vpop.f32.mrb[176].mxu1 }
 0x92f   : > { %v7678_v54 = vpop.f32.mrb[154].mxu0  ;;  %v8880_v37 = vpop.f32.mrb[177].mxu1 }
 0x930   : > { %v18965_v20 = vadd.f32 %v18755_v0, %v7678_v54  ;;  %v7680_v50 = vpop.f32.mrb[155].mxu0  ;;  %v18970_v32 = vpop.f32.mrb[178].mxu1  ;;  %v14895_v54 = vld [vmem:[%s20511_s7 + $0x600] ss:$12 sps:$4 sm:$0xff]  }
 0x931   : > { %v8883_v18 = vpop.f32.mrb[179].mxu1 }
 0x932   : > { %14087 = vmatmul.mubr.msk.bf16.gmra.mrb[4].mxu0 %vm7384_vm6, %v14894_v4  ;;  %v14898_v18 = vld [vmem:[%s20511_s7 + $0x5d0] ss:$12 sps:$4 sm:$0xff]  }
 0x933   : > { %9093 = vmatmul.mubr.bf16.gmra.mrb[28].mxu1 %v14891_v3  ;;  %10463 = vmatprep.mubr.bf16.mxu0 %v14897_v19  ;;  %v14903_v4 = vld [vmem:[%s20511_s7 + $0x61c] ss:$12 sps:$4 sm:$0xff]   ;;  %v14906_v19 = vld [vmem:[%s20511_s7 + $0x5ec] ss:$12 sps:$4 sm:$0xff]  }
 0x934   : > { %9100 = vmatprep.mubr.bf16.mxu1 %v14900_v21 }
 0x935   : > { %v7683_v42 = vpop.f32.mrb[156].mxu0 }
 0x936   : > { %v18974_v48 = vadd.f32 %v18735_v13, %v7683_v42  ;;  %v7685_v37 = vpop.f32.mrb[157].mxu0  ;;  %v18979_v0 = vpop.f32.mrb[180].mxu1 }
 0x937   : > { %v7686_v50 = vpop.f32.mrb[158].mxu0  ;;  %v8888_v3 = vpop.f32.mrb[181].mxu1 }
 0x938   : > { %v18988_v42 = vadd.f32 %v18750_v7, %v7686_v50  ;;  %v7688_v13 = vpop.f32.mrb[159].mxu0  ;;  %v18993_v21 = vpop.f32.mrb[182].mxu1  ;;  %v14901_v7 = vld [vmem:[%s20511_s7 + $0x618] ss:$12 sps:$4 sm:$0xff]  }
 0x939   : > { %v8891_v37 = vpop.f32.mrb[183].mxu1 }
 0x93a   : > { %10464 = vmatmul.mubr.bf16.vlgmr.msra.gmra.mrb[8].mxu0 %v14895_v54  ;;  %v14904_v37 = vld [vmem:[%s20511_s7 + $0x5e8] ss:$12 sps:$4 sm:$0xff]  }
 0x93b   : > { %9101 = vmatmul.mubr.bf16.gmra.mrb[32].mxu1 %v14898_v18  ;;  %10471 = vmatprep.mubr.bf16.mxu0 %v14903_v4  ;;  %v14909_v54 = vld [vmem:[%s20511_s7 + $0x634] ss:$12 sps:$4 sm:$0xff]  }
 0x93c   : > { %9108 = vmatprep.mubr.bf16.mxu1 %v14906_v19  ;;  %v14910_v4 = vld [vmem:[%s20511_s7 + $0x608] ss:$12 sps:$4 sm:$0xff]  }
 0x93d   : > { %v7691_v29 = vpop.f32.mrb[160].mxu0 }
 0x93e   : > { %v18996_v22 = vadd.f32 %v18776_v10, %v7691_v29  ;;  %v7693_v3 = vpop.f32.mrb[161].mxu0  ;;  %v19001_v50 = vpop.f32.mrb[184].mxu1 }
 0x93f   : > { %v7694_v13 = vpop.f32.mrb[162].mxu0  ;;  %v8896_v18 = vpop.f32.mrb[185].mxu1 }
 0x940   : > { %v19010_v29 = vadd.f32 %v18786_v51, %v7694_v13  ;;  %v7696_v10 = vpop.f32.mrb[163].mxu0  ;;  %v19015_v19 = vpop.f32.mrb[186].mxu1  ;;  %v14907_v51 = vld [vmem:[%s20511_s7 + $0x630] ss:$12 sps:$4 sm:$0xff]  }
 0x941   : > { %v8899_v3 = vpop.f32.mrb[187].mxu1 }
 0x942   : > { %10472 = vmatmul.mubr.bf16.gmra.mrb[12].mxu0 %v14901_v7  ;;  %v14911_v7 = vld [vmem:[%s20511_s7 + $0x620] ss:$12 sps:$4 sm:$0xff]  }
 0x943   : > { %9109 = vmatmul.mubr.bf16.gmra.mrb[36].mxu1 %v14904_v37  ;;  %10479 = vmatprep.mubr.bf16.mxu0 %v14909_v54  ;;  %v14914_v37 = vld [vmem:[%s20511_s7 + $0x64c] ss:$12 sps:$4 sm:$0xff]  }
 0x944   : > { %14094 = vmatprep.mubr.msk.bf16.mxu1 %vm7384_vm6, %v14910_v4  ;;  %v14915_v4 = vld [vmem:[%s20511_s7 + $0x638] ss:$12 sps:$4 sm:$0xff]  }
 0x945   : > { %v7699_v25 = vpop.f32.mrb[164].mxu0 }
 0x946   : > { %v19019_v15 = vadd.f32 %v18767_v5, %v7699_v25  ;;  %v7701_v18 = vpop.f32.mrb[165].mxu0  ;;  %v19024_v13 = vpop.f32.mrb[188].mxu1 }
 0x947   : > { %v7702_v10 = vpop.f32.mrb[166].mxu0  ;;  %v8904_v54 = vpop.f32.mrb[189].mxu1 }
 0x948   : > { %v19033_v25 = vadd.f32 %v18784_v40, %v7702_v10  ;;  %v7704_v5 = vpop.f32.mrb[167].mxu0  ;;  %v19038_v3 = vpop.f32.mrb[190].mxu1  ;;  %v14912_v10 = vld [vmem:[%s20511_s7 + $0x648] ss:$12 sps:$4 sm:$0xff]  }
 0x949   : > { %v8907_v18 = vpop.f32.mrb[191].mxu1 }
 0x94a   : > { %10480 = vmatmul.mubr.bf16.gmra.mrb[16].mxu0 %v14907_v51  ;;  %v14916_v51 = vld [vmem:[%s20511_s7 + $0x650] ss:$12 sps:$4 sm:$0xff]  }
 0x94b   : > { %14095 = vmatmul.mubr.msk.bf16.vlgmr.msra.gmra.mrb[40].mxu1 %vm7384_vm6, %v14911_v7  ;;  %10487 = vmatprep.mubr.bf16.mxu0 %v14914_v37  ;;  %v14919_v7 = vld [vmem:[%s20511_s7 + $0x664] ss:$12 sps:$4 sm:$0xff]  }
 0x94c   : > { %14098 = vmatprep.mubr.msk.bf16.mxu1 %vm7384_vm6, %v14915_v4  ;;  %v14920_v4 = vld [vmem:[%s20511_s7 + $0x668] ss:$12 sps:$4 sm:$0xff]  }
 0x94d   : > { %v7707_v9 = vpop.f32.mrb[168].mxu0 }
 0x94e   : > { %v19043_v54 = vadd.f32 %v18804_v60, %v7707_v9  ;;  %v7709_v40 = vpop.f32.mrb[169].mxu0  ;;  %v19048_v5 = vpop.f32.mrb[192].mxu1 }
 0x94f   : > { %v7710_v23 = vpop.f32.mrb[170].mxu0  ;;  %v8912_v37 = vpop.f32.mrb[193].mxu1 }
 0x950   : > { %v19057_v9 = vadd.f32 %v18814_v41, %v7710_v23  ;;  %v7712_v60 = vpop.f32.mrb[171].mxu0  ;;  %v19062_v18 = vpop.f32.mrb[194].mxu1  ;;  %v14917_v41 = vld [vmem:[%s20511_s7 + $0x660] ss:$12 sps:$4 sm:$0xff]  }
 0x951   : > { %v8915_v40 = vpop.f32.mrb[195].mxu1 }
 0x952   : > { %10488 = vmatmul.mubr.bf16.gmra.mrb[20].mxu0 %v14912_v10  ;;  %v14921_v10 = vld [vmem:[%s20511_s7 + $0x680] ss:$12 sps:$4 sm:$0xff]   ;;  %v14925_v40 = vld [vmem:[%s20511_s7 + $0x698] ss:$12 sps:$4 sm:$0xff]  }
 0x953   : > { %14099 = vmatmul.mubr.msk.bf16.gmra.mrb[44].mxu1 %vm7384_vm6, %v14916_v51  ;;  %10495 = vmatprep.mubr.bf16.mxu0 %v14919_v7  ;;  %v14924_v51 = vld [vmem:[%s20511_s7 + $0x67c] ss:$12 sps:$4 sm:$0xff]  }
 0x954   : > { %14102 = vmatprep.mubr.msk.bf16.mxu1 %vm7384_vm6, %v14920_v4 }
 0x955   : > { %v7715_v31 = vpop.f32.mrb[172].mxu0 }
 0x956   : > { %v19067_v37 = vadd.f32 %v18796_v59, %v7715_v31  ;;  %v7717_v23 = vpop.f32.mrb[173].mxu0  ;;  %v19072_v60 = vpop.f32.mrb[196].mxu1 }
 0x957   : > { %v7718_v6 = vpop.f32.mrb[174].mxu0  ;;  %v8920_v7 = vpop.f32.mrb[197].mxu1 }
 0x958   : > { %v19081_v31 = vadd.f32 %v18812_v62, %v7718_v6  ;;  %v7720_v59 = vpop.f32.mrb[175].mxu0  ;;  %v19083_v4 = vpop.f32.mrb[198].mxu1  ;;  %v14922_v62 = vld [vmem:[%s20511_s7 + $0x678] ss:$12 sps:$4 sm:$0xff]  }
 0x959   : > { %v8923_v23 = vpop.f32.mrb[199].mxu1 }
 0x95a   : > { %10496 = vmatmul.mubr.bf16.gmra.mrb[24].mxu0 %v14917_v41  ;;  %v14928_v41 = vld [vmem:[%s20511_s7 + $0x694] ss:$12 sps:$4 sm:$0xff]  }
 0x95b   : > { %14103 = vmatmul.mubr.msk.bf16.gmra.mrb[48].mxu1 %vm7384_vm6, %v14921_v10  ;;  %10503 = vmatprep.mubr.bf16.mxu0 %v14924_v51  ;;  %v14929_v10 = vld [vmem:[%s20511_s7 + $0x6b0] ss:$12 sps:$4 sm:$0xff]   ;;  %v14933_v23 = vld [vmem:[%s20511_s7 + $0x6c8] ss:$12 sps:$4 sm:$0xff]  }
 0x95c   : > { %14106 = vmatprep.mubr.msk.bf16.mxu1 %vm7384_vm6, %v14925_v40 }
 0x95d   : > { %v7723_v33 = vpop.f32.mrb[176].mxu0 }
 0x95e   : > { %v19091_v7 = vadd.f32 %v18832_v8, %v7723_v33  ;;  %v7725_v6 = vpop.f32.mrb[177].mxu0  ;;  %v19096_v59 = vpop.f32.mrb[200].mxu1 }
 0x95f   : > { %v7726_v45 = vpop.f32.mrb[178].mxu0  ;;  %v8928_v51 = vpop.f32.mrb[201].mxu1 }
 0x960   : > { %v19105_v33 = vadd.f32 %v18842_v30, %v7726_v45  ;;  %v7728_v8 = vpop.f32.mrb[179].mxu0  ;;  %v19107_v40 = vpop.f32.mrb[202].mxu1  ;;  %v14926_v30 = vld [vmem:[%s20511_s7 + $0x690] ss:$12 sps:$4 sm:$0xff]  }
 0x961   : > { %v8931_v6 = vpop.f32.mrb[203].mxu1 }
 0x962   : > { %10504 = vmatmul.mubr.bf16.gmra.mrb[28].mxu0 %v14922_v62  ;;  %v14932_v62 = vld [vmem:[%s20511_s7 + $0x6ac] ss:$12 sps:$4 sm:$0xff]  }
 0x963   : > { %10511 = vmatprep.mubr.bf16.mxu0 %v14928_v41  ;;  %14107 = vmatmul.mubr.msk.bf16.gmra.mrb[52].mxu1 %vm7384_vm6, %v14929_v10  ;;  %v14934_v10 = vld [vmem:[%s20511_s7 + $0x6e0] ss:$12 sps:$4 sm:$0xff]   ;;  %v14941_v6 = vld [vmem:[%s20511_s7 + $0x6f8] ss:$12 sps:$4 sm:$0xff]  }
 0x964   : > { %14110 = vmatprep.mubr.msk.bf16.mxu1 %vm7384_vm6, %v14933_v23 }
 0x965   : > { %v7731_v57 = vpop.f32.mrb[180].mxu0 }
 0x966   : > { %v19115_v51 = vadd.f32 %v18824_v35, %v7731_v57  ;;  %v7733_v45 = vpop.f32.mrb[181].mxu0  ;;  %v19120_v8 = vpop.f32.mrb[204].mxu1 }
 0x967   : > { %v7734_v2 = vpop.f32.mrb[182].mxu0  ;;  %v8936_v41 = vpop.f32.mrb[205].mxu1 }
 0x968   : > { %20796 = vst [vmem:[#allocation33_spill] sm:$0xff] %v19115_v51  ;;  %v19129_v57 = vadd.f32 %v18840_v27, %v7734_v2  ;;  %v7736_v35 = vpop.f32.mrb[183].mxu0  ;;  %v19131_v23 = vpop.f32.mrb[206].mxu1  ;;  %v14930_v27 = vld [vmem:[%s20511_s7 + $0x6a8] ss:$12 sps:$4 sm:$0xff]  }
 0x969   : > { %v8939_v45 = vpop.f32.mrb[207].mxu1 }
 0x96a   : > { %20797 = vst [vmem:[#allocation34_spill] sm:$0xff] %v19129_v57  ;;  %10512 = vmatmul.mubr.bf16.gmra.mrb[32].mxu0 %v14926_v30  ;;  %v14937_v30 = vld [vmem:[%s20511_s7 + $0x6c4] ss:$12 sps:$4 sm:$0xff]  }
 0x96b   : > { %10519 = vmatprep.mubr.bf16.mxu0 %v14932_v62  ;;  %14111 = vmatmul.mubr.msk.bf16.gmra.mrb[56].mxu1 %vm7384_vm6, %v14934_v10  ;;  %v14945_v10 = vld [vmem:[%s20511_s7 + $0x710] ss:$12 sps:$4 sm:$0xff]  }
 0x96c   : > { %14114 = vmatprep.mubr.msk.bf16.mxu1 %vm7384_vm6, %v14941_v6 }
 0x96d   : > { %v7739_v41 = vpop.f32.mrb[184].mxu0 }
 0x96e   : > { %v19139_v43 = vadd.f32 %v18860_v16, %v7739_v41  ;;  %v7741_v2 = vpop.f32.mrb[185].mxu0  ;;  %v19144_v35 = vpop.f32.mrb[208].mxu1  ;;  %v14949_v41 = vld [vmem:[%s20511_s7 + $0x728] ss:$12 sps:$4 sm:$0xff]  }
 0x96f   : > { %v7742_v51 = vpop.f32.mrb[186].mxu0  ;;  %v8944_v62 = vpop.f32.mrb[209].mxu1 }
 0x970   : > { %20798 = vst [vmem:[#allocation35_spill] sm:$0xff] %v19139_v43  ;;  %v19153_v16 = vadd.f32 %v18870_v17, %v7742_v51  ;;  %v7744_v6 = vpop.f32.mrb[187].mxu0  ;;  %v19155_v45 = vpop.f32.mrb[210].mxu1  ;;  %v14935_v51 = vld [vmem:[%s20511_s7 + $0x6c0] ss:$12 sps:$4 sm:$0xff]  }
 0x971   : > { %v8947_v2 = vpop.f32.mrb[211].mxu1 }
 0x972   : > { %20799 = vst [vmem:[#allocation36_spill] sm:$0xff] %v19153_v16  ;;  %10520 = vmatmul.mubr.bf16.gmra.mrb[36].mxu0 %v14930_v27  ;;  %v14940_v27 = vld [vmem:[%s20511_s7 + $0x6dc] ss:$12 sps:$4 sm:$0xff]  }
 0x973   : > { %10527 = vmatprep.mubr.bf16.mxu0 %v14937_v30  ;;  %14115 = vmatmul.mubr.msk.bf16.gmra.mrb[60].mxu1 %vm7384_vm6, %v14945_v10  ;;  %v14953_v10 = vld [vmem:[%s20511_s7 + $0x740] ss:$12 sps:$4 sm:$0xff]  }
 0x974   : > { %14118 = vmatprep.mubr.msk.bf16.mxu1 %vm7384_vm6, %v14949_v41 }
 0x975   : > { %v7747_v62 = vpop.f32.mrb[188].mxu0 }
 0x976   : > { %v19163_v43 = vadd.f32 %v18852_v36, %v7747_v62  ;;  %v7749_v17 = vpop.f32.mrb[189].mxu0  ;;  %v19168_v6 = vpop.f32.mrb[212].mxu1  ;;  %v14957_v62 = vld [vmem:[%s20511_s7 + $0x758] ss:$12 sps:$4 sm:$0xff]  }
 0x977   : > { %v7750_v16 = vpop.f32.mrb[190].mxu0  ;;  %v8952_v30 = vpop.f32.mrb[213].mxu1 }
 0x978   : > { %20800 = vst [vmem:[#allocation37_spill] sm:$0xff] %v19163_v43  ;;  %v19177_v36 = vadd.f32 %v18868_v56, %v7750_v16  ;;  %v7752_v41 = vpop.f32.mrb[191].mxu0  ;;  %v19179_v2 = vpop.f32.mrb[214].mxu1  ;;  %v14938_v16 = vld [vmem:[%s20511_s7 + $0x6d8] ss:$12 sps:$4 sm:$0xff]  }
 0x979   : > { %v8955_v17 = vpop.f32.mrb[215].mxu1 }
 0x97a   : > { %20801 = vst [vmem:[#allocation38_spill] sm:$0xff] %v19177_v36  ;;  %10528 = vmatmul.mubr.bf16.gmra.mrb[40].mxu0 %v14935_v51  ;;  %v14944_v51 = vld [vmem:[%s20511_s7 + $0x6f4] ss:$12 sps:$4 sm:$0xff]  }
 0x97b   : > { %10535 = vmatprep.mubr.bf16.mxu0 %v14940_v27  ;;  %14119 = vmatmul.mubr.msk.bf16.gmra.mrb[64].mxu1 %vm7384_vm6, %v14953_v10  ;;  %v14961_v10 = vld [vmem:[%s20511_s7 + $0x770] ss:$12 sps:$4 sm:$0xff]  }
 0x97c   : > { %14122 = vmatprep.mubr.msk.bf16.mxu1 %vm7384_vm6, %v14957_v62 }
 0x97d   : > { %v7755_v30 = vpop.f32.mrb[192].mxu0 }
 0x97e   : > { %v19187_v43 = vadd.f32 %v18888_v47, %v7755_v30  ;;  %v7757_v56 = vpop.f32.mrb[193].mxu0  ;;  %v19192_v41 = vpop.f32.mrb[216].mxu1  ;;  %v14965_v30 = vld [vmem:[%s20511_s7 + $0x788] ss:$12 sps:$4 sm:$0xff]  }
 0x97f   : > { %v7758_v36 = vpop.f32.mrb[194].mxu0  ;;  %v8960_v27 = vpop.f32.mrb[217].mxu1 }
 0x980   : > { %20802 = vst [vmem:[#allocation39_spill] sm:$0xff] %v19187_v43  ;;  %v19201_v47 = vadd.f32 %v18898_v46, %v7758_v36  ;;  %v7760_v62 = vpop.f32.mrb[195].mxu0  ;;  %v19203_v17 = vpop.f32.mrb[218].mxu1  ;;  %v14942_v36 = vld [vmem:[%s20511_s7 + $0x6f0] ss:$12 sps:$4 sm:$0xff]  }
 0x981   : > { %v8963_v56 = vpop.f32.mrb[219].mxu1 }
 0x982   : > { %20803 = vst [vmem:[#allocation40_spill] sm:$0xff] %v19201_v47  ;;  %10536 = vmatmul.mubr.bf16.gmra.mrb[44].mxu0 %v14938_v16  ;;  %v14948_v16 = vld [vmem:[%s20511_s7 + $0x70c] ss:$12 sps:$4 sm:$0xff]  }
 0x983   : > { %10543 = vmatprep.mubr.bf16.mxu0 %v14944_v51  ;;  %14123 = vmatmul.mubr.msk.bf16.gmra.mrb[68].mxu1 %vm7384_vm6, %v14961_v10  ;;  %v14969_v10 = vld [vmem:[%s20511_s7 + $0x7a0] ss:$12 sps:$4 sm:$0xff]  }
 0x984   : > { %14126 = vmatprep.mubr.msk.bf16.mxu1 %vm7384_vm6, %v14965_v30 }
 0x985   : > { %v7763_v27 = vpop.f32.mrb[196].mxu0 }
 0x986   : > { %v19211_v43 = vadd.f32 %v18880_v24, %v7763_v27  ;;  %v7765_v46 = vpop.f32.mrb[197].mxu0  ;;  %v19216_v62 = vpop.f32.mrb[220].mxu1  ;;  %v14973_v27 = vld [vmem:[%s20511_s7 + $0x7b8] ss:$12 sps:$4 sm:$0xff]  }
 0x987   : > { %v7766_v47 = vpop.f32.mrb[198].mxu0  ;;  %v8968_v51 = vpop.f32.mrb[221].mxu1 }
 0x988   : > { %20804 = vst [vmem:[#allocation41_spill] sm:$0xff] %v19211_v43  ;;  %v19225_v24 = vadd.f32 %v18896_v34, %v7766_v47  ;;  %v7768_v30 = vpop.f32.mrb[199].mxu0  ;;  %v19227_v56 = vpop.f32.mrb[222].mxu1  ;;  %v14946_v34 = vld [vmem:[%s20511_s7 + $0x708] ss:$12 sps:$4 sm:$0xff]  }
 0x989   : > { %v8971_v46 = vpop.f32.mrb[223].mxu1 }
 0x98a   : > { %20805 = vst [vmem:[#allocation42_spill] sm:$0xff] %v19225_v24  ;;  %10544 = vmatmul.mubr.bf16.gmra.mrb[48].mxu0 %v14942_v36  ;;  %v14952_v36 = vld [vmem:[%s20511_s7 + $0x724] ss:$12 sps:$4 sm:$0xff]  }
 0x98b   : > { %10551 = vmatprep.mubr.bf16.mxu0 %v14948_v16  ;;  %14127 = vmatmul.mubr.msk.bf16.gmra.mrb[72].mxu1 %vm7384_vm6, %v14969_v10  ;;  %v14977_v10 = vld [vmem:[%s20511_s7 + $0x7d0] ss:$12 sps:$4 sm:$0xff]  }
 0x98c   : > { %14130 = vmatprep.mubr.msk.bf16.mxu1 %vm7384_vm6, %v14973_v27 }
 0x98d   : > { %v14028_v51 = vpop.f32.mrb[200].mxu0 }
 0x98e   : > { %v9160_v43 = vadd.f32 %v14028_v51, %v18932_v39  ;;  %v9151_v57 = vpop.f32.mrb[201].mxu0  ;;  %v19238_v47 = vpop.f32.mrb[224].mxu1 }
 0x98f   : > { %v9152_v30 = vadd.f32 %v9151_v57, %v18908_v52  ;;  %v14029_v24 = vpop.f32.mrb[202].mxu0  ;;  %v8976_v16 = vpop.f32.mrb[225].mxu1  ;;  %v14981_v52 = vld [vmem:[%s20511_s7 + $0x7e8] ss:$12 sps:$4 sm:$0xff]  }
 0x990   : > { %v9163_v39 = vadd.f32 %v14029_v24, %v18946_v61  ;;  %v9154_v27 = vpop.f32.mrb[203].mxu0  ;;  %9474 = vrot.lane.b32.xlu0 %v9160_v43, %s15088_s17  ;;  %v19249_v46 = vpop.f32.mrb[226].mxu1  ;;  %v14950_v16 = vld [vmem:[%s20511_s7 + $0x720] ss:$12 sps:$4 sm:$0xff]  }
 0x991   : > { %v9155_v57 = vadd.f32 %v9154_v27, %v18922_v12  ;;  %9470 = vrot.lane.b32.xlu1 %v9152_v30, %s15088_s17  ;;  %v8979_v51 = vpop.f32.mrb[227].mxu1 }
 0x992   : > { %10552 = vmatmul.mubr.bf16.gmra.mrb[52].mxu0 %v14946_v34 }
 0x993   : > { %10559 = vmatprep.mubr.bf16.mxu0 %v14952_v36  ;;  %14131 = vmatmul.mubr.msk.bf16.gmra.mrb[76].mxu1 %vm7384_vm6, %v14977_v10  ;;  %v14956_v36 = vld [vmem:[%s20511_s7 + $0x73c] ss:$12 sps:$4 sm:$0xff]  }
 0x994   : > { %14134 = vmatprep.mubr.msk.bf16.mxu1 %vm7384_vm6, %v14981_v52 }
 0x995   : > { %v14032_v61 = vpop.f32.mrb[204].mxu0  ;;  %9476 = vrot.lane.b32.xlu1 %v9163_v39, %s15088_s17  ;;  %v14985_v39 = vld [vmem:[%s20511_s7 + $0x800] ss:$12 sps:$4 sm:$0xff]  }
 0x996   : > { %v9176_v43 = vadd.f32 %v14032_v61, %v18979_v0  ;;  %v9167_v24 = vpop.f32.mrb[205].mxu0  ;;  %v19263_v12 = vpop.f32.mrb[228].mxu1 }
 0x997   : > { %v9168_v30 = vadd.f32 %v9167_v24, %v18956_v11  ;;  %v14033_v34 = vpop.f32.mrb[206].mxu0  ;;  %v8984_v10 = vpop.f32.mrb[229].mxu1  ;;  %v14989_v11 = vld [vmem:[%s20511_s7 + $0x818] ss:$12 sps:$4 sm:$0xff]  }
 0x998   : > { %v9179_v0 = vadd.f32 %v14033_v34, %v18993_v21  ;;  %v9170_v27 = vpop.f32.mrb[207].mxu0  ;;  %9482 = vrot.lane.b32.xlu0 %v9176_v43, %s15088_s17  ;;  %v19274_v52 = vpop.f32.mrb[230].mxu1  ;;  %v14993_v10 = vld [vmem:[%s20511_s7 + $0x830] ss:$12 sps:$4 sm:$0xff]  }
 0x999   : > { %v9171_v51 = vadd.f32 %v9170_v27, %v18970_v32  ;;  %9472 = vrot.lane.b32.xlu1 %v9155_v57, %s15088_s17  ;;  %v8987_v61 = vpop.f32.mrb[231].mxu1  ;;  %v14954_v32 = vld [vmem:[%s20511_s7 + $0x738] ss:$12 sps:$4 sm:$0xff]  }
 0x99a   : > { %10560 = vmatmul.mubr.bf16.gmra.mrb[56].mxu0 %v14950_v16 }
 0x99b   : > { %10567 = vmatprep.mubr.bf16.mxu0 %v14956_v36  ;;  %14135 = vmatmul.mubr.msk.bf16.gmra.mrb[80].mxu1 %vm7384_vm6, %v14985_v39 }
 0x99c   : > { %9478 = vrot.lane.b32.xlu0 %v9168_v30, %s15088_s17  ;;  %14138 = vmatprep.mubr.msk.bf16.mxu1 %vm7384_vm6, %v14989_v11  ;;  %v14960_v30 = vld [vmem:[%s20511_s7 + $0x754] ss:$12 sps:$4 sm:$0xff]  }
 0x99d   : > { %v14036_v21 = vpop.f32.mrb[208].mxu0  ;;  %9484 = vrot.lane.b32.xlu1 %v9179_v0, %s15088_s17 }
 0x99e   : > { %v9192_v43 = vadd.f32 %v14036_v21, %v19024_v13  ;;  %v9183_v24 = vpop.f32.mrb[209].mxu0  ;;  %v19289_v57 = vpop.f32.mrb[232].mxu1 }
 0x99f   : > { %v9184_v16 = vadd.f32 %v9183_v24, %v19001_v50  ;;  %v14037_v34 = vpop.f32.mrb[210].mxu0  ;;  %v8992_v36 = vpop.f32.mrb[233].mxu1  ;;  %v14997_v50 = vld [vmem:[%s20511_s7 + $0x848] ss:$12 sps:$4 sm:$0xff]  }
 0x9a0   : > { %v9195_v13 = vadd.f32 %v14037_v34, %v19038_v3  ;;  %v9186_v39 = vpop.f32.mrb[211].mxu0  ;;  %9490 = vrot.lane.b32.xlu0 %v9192_v43, %s15088_s17  ;;  %v19300_v0 = vpop.f32.mrb[234].mxu1  ;;  %v15001_v34 = vld [vmem:[%s20511_s7 + $0x860] ss:$12 sps:$4 sm:$0xff]  }
 0x9a1   : > { %v9187_v27 = vadd.f32 %v9186_v39, %v19015_v19  ;;  %9480 = vrot.lane.b32.xlu1 %v9171_v51, %s15088_s17  ;;  %v8995_v11 = vpop.f32.mrb[235].mxu1  ;;  %v14958_v19 = vld [vmem:[%s20511_s7 + $0x750] ss:$12 sps:$4 sm:$0xff]  }
 0x9a2   : > { %10568 = vmatmul.mubr.bf16.gmra.mrb[60].mxu0 %v14954_v32  ;;  %v14964_v32 = vld [vmem:[%s20511_s7 + $0x76c] ss:$12 sps:$4 sm:$0xff]  }
 0x9a3   : > { %10575 = vmatprep.mubr.bf16.mxu0 %v14960_v30  ;;  %14139 = vmatmul.mubr.msk.bf16.gmra.mrb[84].mxu1 %vm7384_vm6, %v14993_v10 }
 0x9a4   : > { %9486 = vrot.lane.b32.xlu0 %v9184_v16, %s15088_s17  ;;  %14142 = vmatprep.mubr.msk.bf16.mxu1 %vm7384_vm6, %v14997_v50 }
 0x9a5   : > { %v14040_v3 = vpop.f32.mrb[212].mxu0  ;;  %9492 = vrot.lane.b32.xlu1 %v9195_v13, %s15088_s17 }
 0x9a6   : > { %v9208_v61 = vadd.f32 %v14040_v3, %v19072_v60  ;;  %v9199_v21 = vpop.f32.mrb[213].mxu0  ;;  %v19315_v51 = vpop.f32.mrb[236].mxu1 }
 0x9a7   : > { %v9200_v43 = vadd.f32 %v9199_v21, %v19048_v5  ;;  %v14041_v24 = vpop.f32.mrb[214].mxu0  ;;  %v9000_v16 = vpop.f32.mrb[237].mxu1  ;;  %v15005_v5 = vld [vmem:[%s20511_s7 + $0x878] ss:$12 sps:$4 sm:$0xff]  }
 0x9a8   : > { %v9211_v60 = vadd.f32 %v14041_v24, %v19083_v4  ;;  %v9202_v30 = vpop.f32.mrb[215].mxu0  ;;  %9498 = vrot.lane.b32.xlu0 %v9208_v61, %s15088_s17  ;;  %v19326_v36 = vpop.f32.mrb[238].mxu1  ;;  %v14968_v61 = vld [vmem:[%s20511_s7 + $0x784] ss:$12 sps:$4 sm:$0xff]  }
 0x9a9   : > { %v9203_v10 = vadd.f32 %v9202_v30, %v19062_v18  ;;  %9488 = vrot.lane.b32.xlu1 %v9187_v27, %s15088_s17  ;;  %v9003_v13 = vpop.f32.mrb[239].mxu1  ;;  %v14962_v18 = vld [vmem:[%s20511_s7 + $0x768] ss:$12 sps:$4 sm:$0xff]  }
 0x9aa   : > { %10576 = vmatmul.mubr.bf16.gmra.mrb[64].mxu0 %v14958_v19  ;;  %v15009_v19 = vld [vmem:[%s20511_s7 + $0x890] ss:$12 sps:$4 sm:$0xff]  }
 0x9ab   : > { %10583 = vmatprep.mubr.bf16.mxu0 %v14964_v32  ;;  %14143 = vmatmul.mubr.msk.bf16.gmra.mrb[88].mxu1 %vm7384_vm6, %v15001_v34  ;;  %v14972_v13 = vld [vmem:[%s20511_s7 + $0x79c] ss:$12 sps:$4 sm:$0xff]  }
 0x9ac   : > { %9494 = vrot.lane.b32.xlu0 %v9200_v43, %s15088_s17  ;;  %14146 = vmatprep.mubr.msk.bf16.mxu1 %vm7384_vm6, %v15005_v5 }
 0x9ad   : > { %v14044_v4 = vpop.f32.mrb[216].mxu0  ;;  %9500 = vrot.lane.b32.xlu1 %v9211_v60, %s15088_s17 }
 0x9ae   : > { %v9224_v39 = vadd.f32 %v14044_v4, %v19120_v8  ;;  %v9215_v50 = vpop.f32.mrb[217].mxu0  ;;  %v19341_v27 = vpop.f32.mrb[240].mxu1 }
 0x9af   : > { %v9216_v11 = vadd.f32 %v9215_v50, %v19096_v59  ;;  %v14045_v3 = vpop.f32.mrb[218].mxu0  ;;  %v9008_v21 = vpop.f32.mrb[241].mxu1  ;;  %v15013_v59 = vld [vmem:[%s20511_s7 + $0x8a8] ss:$12 sps:$4 sm:$0xff]  }
 0x9b0   : > { %v9227_v8 = vadd.f32 %v14045_v3, %v19131_v23  ;;  %v9218_v43 = vpop.f32.mrb[219].mxu0  ;;  %9506 = vrot.lane.b32.xlu0 %v9224_v39, %s15088_s17  ;;  %v19352_v24 = vpop.f32.mrb[242].mxu1  ;;  %v15017_v39 = vld [vmem:[%s20511_s7 + $0x8c0] ss:$12 sps:$4 sm:$0xff]  }
 0x9b1   : > { %v9219_v32 = vadd.f32 %v9218_v43, %v19107_v40  ;;  %9496 = vrot.lane.b32.xlu1 %v9203_v10, %s15088_s17  ;;  %v9011_v16 = vpop.f32.mrb[243].mxu1  ;;  %v14966_v40 = vld [vmem:[%s20511_s7 + $0x780] ss:$12 sps:$4 sm:$0xff]  }
 0x9b2   : > { %10584 = vmatmul.mubr.bf16.gmra.mrb[68].mxu0 %v14962_v18 }
 0x9b3   : > { %10591 = vmatprep.mubr.bf16.mxu0 %v14968_v61  ;;  %14147 = vmatmul.mubr.msk.bf16.gmra.mrb[92].mxu1 %vm7384_vm6, %v15009_v19 }
 0x9b4   : > { %9502 = vrot.lane.b32.xlu0 %v9216_v11, %s15088_s17  ;;  %14150 = vmatprep.mubr.msk.bf16.mxu1 %vm7384_vm6, %v15013_v59  ;;  %v14976_v59 = vld [vmem:[%s20511_s7 + $0x7b4] ss:$12 sps:$4 sm:$0xff]  }
 0x9b5   : > { %v14048_v23 = vpop.f32.mrb[220].mxu0  ;;  %9508 = vrot.lane.b32.xlu1 %v9227_v8, %s15088_s17 }
 0x9b6   : > { %v9240_v34 = vadd.f32 %v14048_v23, %v19168_v6  ;;  %v9231_v60 = vpop.f32.mrb[221].mxu0  ;;  %v19367_v30 = vpop.f32.mrb[244].mxu1 }
 0x9b7   : > { %v9232_v5 = vadd.f32 %v9231_v60, %v19144_v35  ;;  %v14049_v10 = vpop.f32.mrb[222].mxu0  ;;  %v9016_v4 = vpop.f32.mrb[245].mxu1  ;;  %v15021_v35 = vld [vmem:[%s20511_s7 + $0x8d8] ss:$12 sps:$4 sm:$0xff]  }
 0x9b8   : > { %v9243_v6 = vadd.f32 %v14049_v10, %v19179_v2  ;;  %v9234_v50 = vpop.f32.mrb[223].mxu0  ;;  %9504 = vrot.lane.b32.xlu0 %v9219_v32, %s15088_s17  ;;  %v19378_v18 = vpop.f32.mrb[246].mxu1 }
 0x9b9   : > { %v9235_v11 = vadd.f32 %v9234_v50, %v19155_v45  ;;  %v9019_v3 = vpop.f32.mrb[247].mxu1  ;;  %v14970_v45 = vld [vmem:[%s20511_s7 + $0x798] ss:$12 sps:$4 sm:$0xff]  }
 0x9ba   : > { %10592 = vmatmul.mubr.bf16.gmra.mrb[72].mxu0 %v14966_v40  ;;  %9516 = vrot.lane.b32.xlu1 %v9243_v6, %s15088_s17 }
 0x9bb   : > { %10599 = vmatprep.mubr.bf16.mxu0 %v14972_v13  ;;  %14151 = vmatmul.mubr.msk.bf16.gmra.mrb[96].mxu1 %vm7384_vm6, %v15017_v39  ;;  %v14980_v39 = vld [vmem:[%s20511_s7 + $0x7cc] ss:$12 sps:$4 sm:$0xff]  }
 0x9bc   : > { %9514 = vrot.lane.b32.xlu0 %v9240_v34, %s15088_s17  ;;  %14154 = vmatprep.mubr.msk.bf16.mxu1 %vm7384_vm6, %v15021_v35 }
 0x9bd   : > { %v14052_v2 = vpop.f32.mrb[224].mxu0 }
 0x9be   : > { %v9256_v61 = vadd.f32 %v14052_v2, %v19216_v62  ;;  %v9247_v21 = vpop.f32.mrb[225].mxu0  ;;  %9512 = vrot.lane.b32.xlu1 %v9235_v11, %s15088_s17  ;;  %v19393_v19 = vpop.f32.mrb[248].mxu1  ;;  %v15025_v62 = vld [vmem:[%s20511_s7 + $0x8f0] ss:$12 sps:$4 sm:$0xff]  }
 0x9bf   : > { %v9248_v8 = vadd.f32 %v9247_v21, %v19192_v41  ;;  %v14053_v43 = vpop.f32.mrb[226].mxu0  ;;  %v9024_v32 = vpop.f32.mrb[249].mxu1 }
 0x9c0   : > { %v9259_v16 = vadd.f32 %v14053_v43, %v19227_v56  ;;  %v9250_v23 = vpop.f32.mrb[227].mxu0  ;;  %9510 = vrot.lane.b32.xlu0 %v9232_v5, %s15088_s17  ;;  %v19404_v34 = vpop.f32.mrb[250].mxu1  ;;  %v14974_v5 = vld [vmem:[%s20511_s7 + $0x7b0] ss:$12 sps:$4 sm:$0xff]  }
 0x9c1   : > { %v9251_v60 = vadd.f32 %v9250_v23, %v19203_v17  ;;  %v9027_v41 = vpop.f32.mrb[251].mxu1 }
 0x9c2   : > { %10600 = vmatmul.mubr.bf16.gmra.mrb[76].mxu0 %v14970_v45  ;;  %9524 = vrot.lane.b32.xlu1 %v9259_v16, %s15088_s17 }
 0x9c3   : > { %10607 = vmatprep.mubr.bf16.mxu0 %v14976_v59  ;;  %14155 = vmatmul.mubr.msk.bf16.gmra.mrb[100].mxu1 %vm7384_vm6, %v15025_v62 }
 0x9c4   : > { %9522 = vrot.lane.b32.xlu0 %v9256_v61, %s15088_s17 }
 0x9c5   : > { %v14056_v40 = vpop.f32.mrb[228].mxu0 }
 0x9c6   : > { %v9272_v10 = vadd.f32 %v14056_v40, %v19263_v12  ;;  %v9263_v56 = vpop.f32.mrb[229].mxu0  ;;  %9520 = vrot.lane.b32.xlu1 %v9251_v60, %s15088_s17  ;;  %v9030_v17 = vpop.f32.mrb[252].mxu1 }
 0x9c7   : > { %v9264_v13 = vadd.f32 %v9263_v56, %v19238_v47  ;;  %v14057_v4 = vpop.f32.mrb[230].mxu0  ;;  %v9032_v6 = vpop.f32.mrb[253].mxu1 }
 0x9c8   : > { %v9275_v50 = vadd.f32 %v14057_v4, %v19274_v52  ;;  %v9266_v35 = vpop.f32.mrb[231].mxu0  ;;  %9518 = vrot.lane.b32.xlu0 %v9248_v8, %s15088_s17  ;;  %v9033_v12 = vpop.f32.mrb[254].mxu1  ;;  %v14978_v52 = vld [vmem:[%s20511_s7 + $0x7c8] ss:$12 sps:$4 sm:$0xff]   ;;  %v14984_v8 = vld [vmem:[%s20511_s7 + $0x7e4] ss:$12 sps:$4 sm:$0xff]  }
 0x9c9   : > { %v9267_v11 = vadd.f32 %v9266_v35, %v19249_v46  ;;  %v9035_v3 = vpop.f32.mrb[255].mxu1 }
 0x9ca   : > { %10608 = vmatmul.mubr.bf16.gmra.mrb[80].mxu0 %v14974_v5  ;;  %9532 = vrot.lane.b32.xlu1 %v9275_v50, %s15088_s17  ;;  %v14992_v3 = vld [vmem:[%s20511_s7 + $0x814] ss:$12 sps:$4 sm:$0xff]  }
 0x9cb   : > { %10615 = vmatprep.mubr.bf16.mxu0 %v14980_v39 }
 0x9cc   : > { %9530 = vrot.lane.b32.xlu0 %v9272_v10, %s15088_s17  ;;  %v14988_v10 = vld [vmem:[%s20511_s7 + $0x7fc] ss:$12 sps:$4 sm:$0xff]  }
 0x9cd   : > { %v14060_v47 = vpop.f32.mrb[232].mxu0 }
 0x9ce   : > { %v9288_v2 = vadd.f32 %v14060_v47, %v19315_v51  ;;  %v9279_v61 = vpop.f32.mrb[233].mxu0  ;;  %9528 = vrot.lane.b32.xlu1 %v9267_v11, %s15088_s17  ;;  %v9038_v21 = vpop.f32.mrb[0].mxu1 }
 0x9cf   : > { %v9280_v46 = vadd.f32 %v9279_v61, %v19289_v57  ;;  %v14061_v45 = vpop.f32.mrb[234].mxu0  ;;  %v9040_v43 = vpop.f32.mrb[1].mxu1 }
 0x9d0   : > { %v9291_v59 = vadd.f32 %v14061_v45, %v19326_v36  ;;  %v9282_v32 = vpop.f32.mrb[235].mxu0  ;;  %9526 = vrot.lane.b32.xlu0 %v9264_v13, %s15088_s17  ;;  %v9041_v51 = vpop.f32.mrb[2].mxu1  ;;  %v14982_v36 = vld [vmem:[%s20511_s7 + $0x7e0] ss:$12 sps:$4 sm:$0xff]  }
 0x9d1   : > { %v9283_v62 = vadd.f32 %v9282_v32, %v19300_v0  ;;  %v9043_v16 = vpop.f32.mrb[3].mxu1 }
 0x9d2   : > { %10616 = vmatmul.mubr.bf16.gmra.mrb[84].mxu0 %v14978_v52  ;;  %9540 = vrot.lane.b32.xlu1 %v9291_v59, %s15088_s17 }
 0x9d3   : > { %10623 = vmatprep.mubr.bf16.mxu0 %v14984_v8 }
 0x9d4   : > { %9538 = vrot.lane.b32.xlu0 %v9288_v2, %s15088_s17 }
 0x9d5   : > { %v14064_v57 = vpop.f32.mrb[236].mxu0 }
 0x9d6   : > { %v9304_v23 = vadd.f32 %v14064_v57, %v19367_v30  ;;  %v9295_v60 = vpop.f32.mrb[237].mxu0  ;;  %9536 = vrot.lane.b32.xlu1 %v9283_v62, %s15088_s17  ;;  %v9046_v41 = vpop.f32.mrb[4].mxu1  ;;  %v14996_v62 = vld [vmem:[%s20511_s7 + $0x82c] ss:$12 sps:$4 sm:$0xff]  }
 0x9d7   : > { %v9296_v0 = vadd.f32 %v9295_v60, %v19341_v27  ;;  %v14065_v40 = vpop.f32.mrb[238].mxu0  ;;  %v9048_v56 = vpop.f32.mrb[5].mxu1 }
 0x9d8   : > { %v9307_v5 = vadd.f32 %v14065_v40, %v19378_v18  ;;  %v9298_v13 = vpop.f32.mrb[239].mxu0  ;;  %9534 = vrot.lane.b32.xlu0 %v9280_v46, %s15088_s17  ;;  %v9049_v30 = vpop.f32.mrb[6].mxu1  ;;  %v14986_v18 = vld [vmem:[%s20511_s7 + $0x7f8] ss:$12 sps:$4 sm:$0xff]   ;;  %v14994_v40 = vld [vmem:[%s20511_s7 + $0x828] ss:$12 sps:$4 sm:$0xff]  }
 0x9d9   : > { %v9299_v4 = vadd.f32 %v9298_v13, %v19352_v24  ;;  %v9051_v39 = vpop.f32.mrb[7].mxu1  ;;  %v15000_v13 = vld [vmem:[%s20511_s7 + $0x844] ss:$12 sps:$4 sm:$0xff]  }
 0x9da   : > { %10624 = vmatmul.mubr.bf16.gmra.mrb[88].mxu0 %v14982_v36  ;;  %9548 = vrot.lane.b32.xlu1 %v9307_v5, %s15088_s17 }
 0x9db   : > { %10631 = vmatprep.mubr.bf16.mxu0 %v14988_v10 }
 0x9dc   : > { %9546 = vrot.lane.b32.xlu0 %v9304_v23, %s15088_s17 }
 0x9dd   : > { %v14068_v27 = vpop.f32.mrb[240].mxu0 }
 0x9de   : > { %v9320_v6 = vadd.f32 %v14068_v27, %v9030_v17  ;;  %v9311_v50 = vpop.f32.mrb[241].mxu0  ;;  %9544 = vrot.lane.b32.xlu1 %v9299_v4, %s15088_s17  ;;  %v9054_v35 = vpop.f32.mrb[8].mxu1 }
 0x9df   : > { %v9312_v11 = vadd.f32 %v9311_v50, %v19393_v19  ;;  %v14069_v24 = vpop.f32.mrb[242].mxu0  ;;  %v9056_v47 = vpop.f32.mrb[9].mxu1 }
 0x9e0   : > { %v9323_v2 = vadd.f32 %v14069_v24, %v9033_v12  ;;  %v9314_v61 = vpop.f32.mrb[243].mxu0  ;;  %9542 = vrot.lane.b32.xlu0 %v9296_v0, %s15088_s17  ;;  %v9057_v17 = vpop.f32.mrb[10].mxu1  ;;  %v14990_v12 = vld [vmem:[%s20511_s7 + $0x810] ss:$12 sps:$4 sm:$0xff]  }
 0x9e1   : > { %v9315_v52 = vadd.f32 %v9314_v61, %v19404_v34  ;;  %v9059_v46 = vpop.f32.mrb[11].mxu1  ;;  %v15004_v61 = vld [vmem:[%s20511_s7 + $0x85c] ss:$12 sps:$4 sm:$0xff]  }
 0x9e2   : > { %10632 = vmatmul.mubr.bf16.gmra.mrb[92].mxu0 %v14986_v18  ;;  %9556 = vrot.lane.b32.xlu1 %v9323_v2, %s15088_s17 }
 0x9e3   : > { %10639 = vmatprep.mubr.bf16.mxu0 %v14992_v3 }
 0x9e4   : > { %9554 = vrot.lane.b32.xlu0 %v9320_v6, %s15088_s17 }
 0x9e5   : > { %v14072_v19 = vpop.f32.mrb[244].mxu0 }
 0x9e6   : > { %v9336_v45 = vadd.f32 %v14072_v19, %v9046_v41  ;;  %v9327_v8 = vpop.f32.mrb[245].mxu0  ;;  %9552 = vrot.lane.b32.xlu1 %v9315_v52, %s15088_s17  ;;  %v9062_v43 = vpop.f32.mrb[12].mxu1 }
 0x9e7   : > { %v9328_v59 = vadd.f32 %v9327_v8, %v9038_v21  ;;  %v14073_v32 = vpop.f32.mrb[246].mxu0  ;;  %v9064_v34 = vpop.f32.mrb[13].mxu1 }
 0x9e8   : > { %v9339_v16 = vadd.f32 %v14073_v32, %v9049_v30  ;;  %v9330_v57 = vpop.f32.mrb[247].mxu0  ;;  %9550 = vrot.lane.b32.xlu0 %v9312_v11, %s15088_s17  ;;  %v9065_v23 = vpop.f32.mrb[14].mxu1  ;;  %v14998_v11 = vld [vmem:[%s20511_s7 + $0x840] ss:$12 sps:$4 sm:$0xff]  }
 0x9e9   : > { %v9331_v60 = vadd.f32 %v9330_v57, %v9041_v51  ;;  %v9067_v36 = vpop.f32.mrb[15].mxu1 }
 0x9ea   : > { %10640 = vmatmul.mubr.bf16.gmra.mrb[96].mxu0 %v14990_v12  ;;  %9564 = vrot.lane.b32.xlu1 %v9339_v16, %s15088_s17  ;;  %v15008_v16 = vld [vmem:[%s20511_s7 + $0x874] ss:$12 sps:$4 sm:$0xff]  }
 0x9eb   : > { %10647 = vmatprep.mubr.bf16.mxu0 %v14996_v62 }
 0x9ec   : > { %9562 = vrot.lane.b32.xlu0 %v9336_v45, %s15088_s17 }
 0x9ed   : > { %v14076_v21 = vpop.f32.mrb[248].mxu0 }
 0x9ee   : > { %v9352_v41 = vadd.f32 %v14076_v21, %v9062_v43  ;;  %v9343_v0 = vpop.f32.mrb[249].mxu0  ;;  %9560 = vrot.lane.b32.xlu1 %v9331_v60, %s15088_s17  ;;  %v9070_v10 = vpop.f32.mrb[16].mxu1 }
 0x9ef   : > { %v9344_v56 = vadd.f32 %v9343_v0, %v9054_v35  ;;  %v14077_v5 = vpop.f32.mrb[250].mxu0  ;;  %v9072_v51 = vpop.f32.mrb[17].mxu1 }
 0x9f0   : > { %v9355_v30 = vadd.f32 %v14077_v5, %v9065_v23  ;;  %v9346_v4 = vpop.f32.mrb[251].mxu0  ;;  %9558 = vrot.lane.b32.xlu0 %v9328_v59, %s15088_s17  ;;  %v9073_v39 = vpop.f32.mrb[18].mxu1  ;;  %v15002_v59 = vld [vmem:[%s20511_s7 + $0x858] ss:$12 sps:$4 sm:$0xff]  }
 0x9f1   : > { %v9347_v27 = vadd.f32 %v9346_v4, %v9057_v17  ;;  %v9075_v6 = vpop.f32.mrb[19].mxu1 }
 0x9f2   : > { %10648 = vmatmul.mubr.bf16.gmra.mrb[100].mxu0 %v14994_v40  ;;  %9572 = vrot.lane.b32.xlu1 %v9355_v30, %s15088_s17  ;;  %v15012_v30 = vld [vmem:[%s20511_s7 + $0x88c] ss:$12 sps:$4 sm:$0xff]  }
 0x9f3   : > { %10655 = vmatprep.mubr.bf16.mxu0 %v15000_v13 }
 0x9f4   : > { %9570 = vrot.lane.b32.xlu0 %v9352_v41, %s15088_s17 }
 0x9f5   : > { %v14080_v50 = vpop.f32.mrb[252].mxu0 }
 0x9f6   : > { %v9359_v18 = vpop.f32.mrb[253].mxu0  ;;  %9568 = vrot.lane.b32.xlu1 %v9347_v27, %s15088_s17  ;;  %v9078_v35 = vpop.f32.mrb[20].mxu1 }
 0x9f7   : > { %v9360_v24 = vadd.f32 %v9359_v18, %v9070_v10  ;;  %v9368_v3 = vadd.f32 %v14080_v50, %v9078_v35  ;;  %v9080_v47 = vpop.f32.mrb[21].mxu1  ;;  %v14081_v2 = vpop.f32.mrb[254].mxu0 }
 0x9f8   : > { %v9362_v17 = vpop.f32.mrb[255].mxu0  ;;  %9566 = vrot.lane.b32.xlu0 %v9344_v56, %s15088_s17  ;;  %v9081_v52 = vpop.f32.mrb[22].mxu1  ;;  %v15006_v56 = vld [vmem:[%s20511_s7 + $0x870] ss:$12 sps:$4 sm:$0xff]   ;;  %v15010_v47 = vld [vmem:[%s20511_s7 + $0x888] ss:$12 sps:$4 sm:$0xff]  }
 0x9f9   : > { %v9363_v46 = vadd.f32 %v9362_v17, %v9073_v39  ;;  %v9371_v19 = vadd.f32 %v14081_v2, %v9081_v52  ;;  %v9083_v45 = vpop.f32.mrb[23].mxu1  ;;  %v15016_v17 = vld [vmem:[%s20511_s7 + $0x8a4] ss:$12 sps:$4 sm:$0xff]  }
 0x9fa   : > { %10656 = vmatmul.mubr.bf16.gmra.mrb[104].mxu0 %v14998_v11 }
 0x9fb   : > { %9576 = vrot.lane.b32.xlu1 %v9363_v46, %s15088_s17  ;;  %10663 = vmatprep.mubr.bf16.mxu0 %v15004_v61 }
 0x9fc   : > { %9574 = vrot.lane.b32.xlu0 %v9360_v24, %s15088_s17 }
 0x9fd   : > { %v14084_v8 = vpop.f32.mrb[0].mxu0 }
 0x9fe   : > { %v9086_v12 = vpop.f32.mrb[24].mxu1  ;;  %v9375_v43 = vpop.f32.mrb[1].mxu0 }
 0x9ff   : > { %v9376_v32 = vadd.f32 %v9375_v43, %v9086_v12  ;;  %v14085_v34 = vpop.f32.mrb[2].mxu0  ;;  %9580 = vrot.lane.b32.xlu1 %v9371_v19, %s15088_s17  ;;  %v9088_v62 = vpop.f32.mrb[25].mxu1 }
 0xa00   : > { %v9378_v57 = vpop.f32.mrb[3].mxu0  ;;  %9578 = vrot.lane.b32.xlu0 %v9368_v3, %s15088_s17  ;;  %v9089_v23 = vpop.f32.mrb[26].mxu1 }
 0xa01   : > { %v9379_v60 = vadd.f32 %v9378_v57, %v9089_v23  ;;  %v9091_v36 = vpop.f32.mrb[27].mxu1  ;;  %v15014_v57 = vld [vmem:[%s20511_s7 + $0x8a0] ss:$12 sps:$4 sm:$0xff]  }
 0xa02   : > { %10664 = vmatmul.mubr.bf16.gmra.mrb[108].mxu0 %v15002_v59  ;;  %v19506_v41 = vpop.permute.xlu0 %9474  ;;  %v15020_v36 = vld [vmem:[%s20511_s7 + $0x8bc] ss:$12 sps:$4 sm:$0xff]  }
 0xa03   : > { %v19502_v21 = vpop.permute.xlu1 %9470  ;;  %9584 = vrot.lane.b32.xlu1 %v9379_v60, %s15088_s17  ;;  %10671 = vmatprep.mubr.bf16.mxu0 %v15008_v16 }
 0xa04   : > { %9582 = vrot.lane.b32.xlu0 %v9376_v32, %s15088_s17 }
 0xa05   : > { %v14088_v0 = vpop.f32.mrb[4].mxu0 }
 0xa06   : > { %v9094_v40 = vpop.f32.mrb[28].mxu1  ;;  %v9391_v10 = vpop.f32.mrb[5].mxu0 }
 0xa07   : > { %v9384_v5 = vadd.f32 %v14084_v8, %v9094_v40  ;;  %v14089_v51 = vpop.f32.mrb[6].mxu0  ;;  %v19511_v13 = vpop.permute.xlu1 %9476 }
 0xa08   : > { %v9096_v4 = vpop.f32.mrb[29].mxu1  ;;  %v9394_v39 = vpop.f32.mrb[7].mxu0 }
 0xa09   : > { %v9097_v27 = vpop.f32.mrb[30].mxu1  ;;  %9586 = vrot.lane.b32.xlu0 %v9384_v5, %s15088_s17 }
 0xa0a   : > { %v9387_v6 = vadd.f32 %v14085_v34, %v9097_v27  ;;  %10672 = vmatmul.mubr.bf16.gmra.mrb[112].mxu0 %v15006_v56  ;;  %v19517_v50 = vpop.permute.xlu0 %9482  ;;  %v9099_v18 = vpop.f32.mrb[31].mxu1 }
 0xa0b   : > { %v19519_v35 = vpop.permute.xlu1 %9472  ;;  %10679 = vmatprep.mubr.bf16.mxu0 %v15012_v30 }
 0xa0c   : > { %9588 = vrot.lane.b32.xlu1 %v9387_v6, %s15088_s17 }
 0xa0d   : > { %v10465_v11 = vpop.f32.mrb[8].mxu0 }
 0xa0e   : > { %v10467_v24 = vpop.f32.mrb[9].mxu0  ;;  %v19522_v3 = vpop.permute.xlu0 %9478 }
 0xa0f   : > { %v9102_v2 = vpop.f32.mrb[32].mxu1  ;;  %v10468_v61 = vpop.f32.mrb[10].mxu0 }
 0xa10   : > { %v9392_v52 = vadd.f32 %v9391_v10, %v9102_v2  ;;  %v19530_v46 = vpop.permute.xlu1 %9484  ;;  %v9104_v19 = vpop.f32.mrb[33].mxu1 }
 0xa11   : > { %v9105_v45 = vpop.f32.mrb[34].mxu1  ;;  %v10470_v8 = vpop.f32.mrb[11].mxu0 }
 0xa12   : > { %v9395_v12 = vadd.f32 %v9394_v39, %v9105_v45  ;;  %9590 = vrot.lane.b32.xlu0 %v9392_v52, %s15088_s17  ;;  %10680 = vmatmul.mubr.bf16.gmra.mrb[116].mxu0 %v15010_v47  ;;  %v19533_v43 = vpop.permute.xlu0 %9490  ;;  %v9107_v59 = vpop.f32.mrb[35].mxu1  ;;  %v15018_v47 = vld [vmem:[%s20511_s7 + $0x8b8] ss:$12 sps:$4 sm:$0xff]  }
 0xa13   : > { %10687 = vmatprep.mubr.bf16.mxu0 %v15016_v17  ;;  %v15024_v17 = vld [vmem:[%s20511_s7 + $0x8d4] ss:$12 sps:$4 sm:$0xff]  }
 0xa14   : > { %v19535_v32 = vpop.permute.xlu1 %9480  ;;  %9592 = vrot.lane.b32.xlu1 %v9395_v12, %s15088_s17 }
 0xa15   : > { %v10473_v34 = vpop.f32.mrb[12].mxu0 }
 0xa16   : > { %v10475_v62 = vpop.f32.mrb[13].mxu0  ;;  %v19538_v16 = vpop.permute.xlu0 %9486 }
 0xa17   : > { %v9110_v23 = vpop.f32.mrb[36].mxu1  ;;  %v10476_v60 = vpop.f32.mrb[14].mxu0 }
 0xa18   : > { %v9400_v40 = vadd.f32 %v14088_v0, %v9110_v23  ;;  %v19546_v10 = vpop.permute.xlu1 %9492  ;;  %v9112_v56 = vpop.f32.mrb[37].mxu1 }
 0xa19   : > { %v9113_v5 = vpop.f32.mrb[38].mxu1  ;;  %v10478_v30 = vpop.f32.mrb[15].mxu0 }
 0xa1a   : > { %v9403_v4 = vadd.f32 %v14089_v51, %v9113_v5  ;;  %9594 = vrot.lane.b32.xlu0 %v9400_v40, %s15088_s17  ;;  %10688 = vmatmul.mubr.bf16.gmra.mrb[120].mxu0 %v15014_v57  ;;  %v19549_v39 = vpop.permute.xlu0 %9498  ;;  %v9115_v27 = vpop.f32.mrb[39].mxu1 }
 0xa1b   : > { %10695 = vmatprep.mubr.bf16.mxu0 %v15020_v36 }
 0xa1c   : > { %v19551_v6 = vpop.permute.xlu1 %9488  ;;  %9596 = vrot.lane.b32.xlu1 %v9403_v4, %s15088_s17  ;;  %s15089_s17 = smov 126  }
 0xa1d   : > { %v10481_v18 = vpop.f32.mrb[16].mxu0 }
 0xa1e   : > { %v10483_v24 = vpop.f32.mrb[17].mxu0  ;;  %v19554_v0 = vpop.permute.xlu0 %9494 }
 0xa1f   : > { %v14096_v51 = vpop.f32.mrb[40].mxu1  ;;  %v10484_v2 = vpop.f32.mrb[18].mxu0 }
 0xa20   : > { %v10763_v52 = vadd.f32 %v14096_v51, %v10473_v34  ;;  %v19562_v19 = vpop.permute.xlu1 %9500  ;;  %v10754_v45 = vpop.f32.mrb[41].mxu1 }
 0xa21   : > { %v10755_v8 = vadd.f32 %v10754_v45, %v10465_v11  ;;  %v10486_v12 = vpop.f32.mrb[19].mxu0  ;;  %v14097_v59 = vpop.f32.mrb[42].mxu1 }
 0xa22   : > { %v10766_v62 = vadd.f32 %v14097_v59, %v10476_v60  ;;  %11077 = vrot.lane.b32.xlu0 %v10763_v52, %s15089_s17  ;;  %v10757_v57 = vpop.f32.mrb[43].mxu1  ;;  %10696 = vmatmul.mubr.bf16.gmra.mrb[124].mxu0 %v15018_v47  ;;  %v19565_v23 = vpop.permute.xlu0 %9506  ;;  %v15022_v60 = vld [vmem:[%s20511_s7 + $0x8d0] ss:$12 sps:$4 sm:$0xff]  }
 0xa23   : > { %v10758_v36 = vadd.f32 %v10757_v57, %v10468_v61  ;;  %10703 = vmatprep.mubr.bf16.mxu0 %v15024_v17  ;;  %v15028_v61 = vld [vmem:[%s20511_s7 + $0x8ec] ss:$12 sps:$4 sm:$0xff]  }
 0xa24   : > { %v19567_v40 = vpop.permute.xlu1 %9496  ;;  %11079 = vrot.lane.b32.xlu1 %v10766_v62, %s15089_s17 }
 0xa25   : > { %v10489_v34 = vpop.f32.mrb[20].mxu0 }
 0xa26   : > { %11073 = vrot.lane.b32.xlu0 %v10755_v8, %s15089_s17  ;;  %v10491_v11 = vpop.f32.mrb[21].mxu0  ;;  %v19571_v56 = vpop.permute.xlu0 %9502 }
 0xa27   : > { %v14100_v5 = vpop.f32.mrb[44].mxu1  ;;  %v10492_v30 = vpop.f32.mrb[22].mxu0 }
 0xa28   : > { %v10779_v4 = vadd.f32 %v14100_v5, %v10489_v34  ;;  %v19579_v27 = vpop.permute.xlu1 %9508  ;;  %v10770_v24 = vpop.f32.mrb[45].mxu1  ;;  %11075 = vrot.lane.b32.xlu1 %v10758_v36, %s15089_s17  ;;  %v15026_v36 = vld [vmem:[%s20511_s7 + $0x8e8] ss:$12 sps:$4 sm:$0xff]  }
 0xa29   : > { %v10771_v47 = vadd.f32 %v10770_v24, %v10481_v18  ;;  %v10494_v51 = vpop.f32.mrb[23].mxu0  ;;  %v14101_v17 = vpop.f32.mrb[46].mxu1 }
 0xa2a   : > { %v10782_v52 = vadd.f32 %v14101_v17, %v10492_v30  ;;  %v10773_v45 = vpop.f32.mrb[47].mxu1  ;;  %11085 = vrot.lane.b32.xlu0 %v10779_v4, %s15089_s17  ;;  %10704 = vmatmul.mubr.bf16.gmra.mrb[128].mxu0 %v15022_v60  ;;  %v19583_v8 = vpop.permute.xlu0 %9504 }
 0xa2b   : > { %v10774_v12 = vadd.f32 %v10773_v45, %v10484_v2  ;;  %10711 = vmatprep.mubr.bf16.mxu0 %v15028_v61 }
 0xa2c   : > { %11087 = vrot.lane.b32.xlu1 %v10782_v52, %s15089_s17  ;;  %v19586_v59 = vpop.permute.xlu1 %9516 }
 0xa2d   : > { %20806 = vst [vmem:[#allocation43_spill] sm:$0xff] %v19586_v59  ;;  %v10497_v62 = vpop.f32.mrb[24].mxu0 }
 0xa2e   : > { %11081 = vrot.lane.b32.xlu0 %v10771_v47, %s15089_s17  ;;  %v10499_v57 = vpop.f32.mrb[25].mxu0  ;;  %v19589_v18 = vpop.permute.xlu0 %9514 }
 0xa2f   : > { %20807 = vst [vmem:[#allocation44_spill] sm:$0xff] %v19589_v18  ;;  %v14104_v34 = vpop.f32.mrb[48].mxu1  ;;  %v10500_v11 = vpop.f32.mrb[26].mxu0 }
 0xa30   : > { %v10786_v60 = vpop.f32.mrb[49].mxu1  ;;  %11083 = vrot.lane.b32.xlu1 %v10774_v12, %s15089_s17  ;;  %v10502_v2 = vpop.f32.mrb[27].mxu0 }
 0xa31   : > { %v10787_v5 = vadd.f32 %v10786_v60, %v10497_v62  ;;  %v19595_v30 = vpop.permute.xlu1 %9512  ;;  %v14105_v61 = vpop.f32.mrb[50].mxu1 }
 0xa32   : > { %v10789_v4 = vpop.f32.mrb[51].mxu1  ;;  %10712 = vmatmul.mubr.bf16.gmra.mrb[132].mxu0 %v15026_v36  ;;  %v19597_v24 = vpop.permute.xlu0 %9510 }
 0xa33   : > { %v10790_v47 = vadd.f32 %v10789_v4, %v10500_v11  ;;  %11089 = vrot.lane.b32.xlu0 %v10787_v5, %s15089_s17 }
 0xa35   : > { %v19600_v51 = vpop.permute.xlu1 %9524  ;;  %11091 = vrot.lane.b32.xlu1 %v10790_v47, %s15089_s17  ;;  %v10505_v17 = vpop.f32.mrb[28].mxu0 }
 0xa36   : > { %20808 = vst [vmem:[#allocation45_spill] sm:$0xff] %v19600_v51  ;;  %v10795_v52 = vadd.f32 %v14104_v34, %v10505_v17  ;;  %v10507_v45 = vpop.f32.mrb[29].mxu0  ;;  %v19603_v12 = vpop.permute.xlu0 %9522  ;;  %v6741_v17 = vld [vmem:[%s20512_s8 + $0xe8] sm:$0xff] }
 0xa37   : > { %20809 = vst [vmem:[#allocation46_spill] sm:$0xff] %v19603_v12  ;;  %v10508_v62 = vpop.f32.mrb[30].mxu0  ;;  %v14108_v57 = vpop.f32.mrb[52].mxu1 }
 0xa38   : > { %v10798_v60 = vadd.f32 %v14105_v61, %v10508_v62  ;;  %v10510_v2 = vpop.f32.mrb[31].mxu0  ;;  %11093 = vrot.lane.b32.xlu0 %v10795_v52, %s15089_s17  ;;  %v10802_v36 = vpop.f32.mrb[53].mxu1  ;;  %v6740_v52 = vld [vmem:[%s20512_s8 + $0xe0] sm:$0xff] }
 0xa39   : > { %v19606_v59 = vpop.permute.xlu1 %9520  ;;  %v14109_v11 = vpop.f32.mrb[54].mxu1 }
 0xa3a   : > { %20810 = vst [vmem:[#allocation47_spill] sm:$0xff] %v19606_v59  ;;  %v19608_v5 = vpop.permute.xlu0 %9518  ;;  %11095 = vrot.lane.b32.xlu1 %v10798_v60, %s15089_s17  ;;  %v10805_v4 = vpop.f32.mrb[55].mxu1 }
 0xa3b   : > { %20811 = vst [vmem:[#allocation48_spill] sm:$0xff] %v19608_v5 }
 0xa3d   : > { %v19611_v47 = vpop.permute.xlu1 %9532  ;;  %v10513_v34 = vpop.f32.mrb[32].mxu0 }
 0xa3e   : > { %20812 = vst [vmem:[#allocation49_spill] sm:$0xff] %v19611_v47  ;;  %v10803_v61 = vadd.f32 %v10802_v36, %v10513_v34  ;;  %v10515_v45 = vpop.f32.mrb[33].mxu0  ;;  %v19616_v62 = vpop.permute.xlu0 %9530  ;;  %v8088_v47 = vadd.f32 %v18807_v28, %v6741_v17  ;;  %v8087_v36 = vadd.f32 %v18791_v1, %v6740_v52  ;;  %v6747_v34 = vld [vmem:[%s20512_s8 + $0x118] sm:$0xff]  ;;  %v6746_v28 = vld [vmem:[%s20512_s8 + $0x110] sm:$0xff] }
 0xa3f   : > { %20813 = vst [vmem:[#allocation50_spill] sm:$0xff] %v19616_v62  ;;  %v10516_v2 = vpop.f32.mrb[34].mxu0  ;;  %v19621_v51 = vpop.f32.mrb[56].mxu1  ;;  %v8094_v1 = vadd.f32 %v18891_v58, %v6747_v34  ;;  %v8093_v52 = vadd.f32 %v18875_v49, %v6746_v28 }
 0xa40   : > { %v10806_v60 = vadd.f32 %v10805_v4, %v10516_v2  ;;  %v10518_v12 = vpop.f32.mrb[35].mxu0  ;;  %11097 = vrot.lane.b32.xlu0 %v10803_v61, %s15089_s17  ;;  %v10818_v59 = vpop.f32.mrb[57].mxu1 }
 0xa41   : > { %v9529_v5 = vpop.permute.xlu1 %9528  ;;  %v19629_v45 = vpop.f32.mrb[58].mxu1 }
 0xa42   : > { %v19631_v62 = vadd.f32 %v9529_v5, %v8088_v47  ;;  %v9527_v18 = vpop.permute.xlu0 %9526  ;;  %11099 = vrot.lane.b32.xlu1 %v10806_v60, %s15089_s17  ;;  %v10821_v12 = vpop.f32.mrb[59].mxu1  ;;  %v6745_v5 = vld [vmem:[%s20512_s8 + $0x108] sm:$0xff] }
 0xa43   : > { %v19637_v4 = vadd.f32 %v9527_v18, %v8087_v36  ;;  %v6744_v18 = vld [vmem:[%s20512_s8 + $0x100] sm:$0xff]  ;;  %v8092_v28 = vadd.f32 %v18863_v38, %v6745_v5  ;;  %v6750_v38 = vld [vmem:[%s20512_s8 + $0x130] sm:$0xff] }
 0xa44   : > { %20814 = vst [vmem:[#allocation51_spill] sm:$0xff] %v19631_v62 }
 0xa45   : > { %20815 = vst [vmem:[#allocation52_spill] sm:$0xff] %v19637_v4  ;;  %v9541_v17 = vpop.permute.xlu1 %9540  ;;  %v10521_v61 = vpop.f32.mrb[36].mxu0 }
 0xa46   : > { %v19644_v47 = vadd.f32 %v9541_v17, %v8094_v1  ;;  %v10811_v2 = vadd.f32 %v14108_v57, %v10521_v61  ;;  %v10523_v60 = vpop.f32.mrb[37].mxu0  ;;  %v9539_v62 = vpop.permute.xlu0 %9538  ;;  %v8091_v17 = vadd.f32 %v18847_v55, %v6744_v18  ;;  %v6751_v61 = vld [vmem:[%s20512_s8 + $0x138] sm:$0xff] }
 0xa47   : > { %v19649_v36 = vadd.f32 %v9539_v62, %v8093_v52  ;;  %v10524_v58 = vpop.f32.mrb[38].mxu0  ;;  %v19651_v34 = vpop.f32.mrb[60].mxu1  ;;  %v8098_v55 = vadd.f32 %v18941_v63, %v6751_v61 }
 0xa48   : > { %20816 = vst [vmem:[#allocation53_spill] sm:$0xff] %v19644_v47  ;;  %v10814_v4 = vadd.f32 %v14109_v11, %v10524_v58  ;;  %v10526_v49 = vpop.f32.mrb[39].mxu0  ;;  %11101 = vrot.lane.b32.xlu0 %v10811_v2, %s15089_s17  ;;  %v19655_v1 = vpop.f32.mrb[61].mxu1  ;;  %v8097_v58 = vadd.f32 %v18927_v26, %v6750_v38 }
 0xa49   : > { %20817 = vst [vmem:[#allocation54_spill] sm:$0xff] %v19649_v36  ;;  %v9537_v57 = vpop.permute.xlu1 %9536  ;;  %v19661_v62 = vpop.f32.mrb[62].mxu1  ;;  %v6749_v49 = vld [vmem:[%s20512_s8 + $0x128] sm:$0xff] }
 0xa4a   : > { %v19663_v52 = vadd.f32 %v9537_v57, %v8092_v28  ;;  %v9535_v60 = vpop.permute.xlu0 %9534  ;;  %11103 = vrot.lane.b32.xlu1 %v10814_v4, %s15089_s17  ;;  %v19669_v11 = vpop.f32.mrb[63].mxu1  ;;  %v8096_v38 = vadd.f32 %v18917_v44, %v6749_v49  ;;  %v6754_v44 = vld [vmem:[%s20512_s8 + $0x150] sm:$0xff] }
 0xa4b   : > { %v19671_v5 = vadd.f32 %v9535_v60, %v8091_v17  ;;  %v6748_v17 = vld [vmem:[%s20512_s8 + $0x120] sm:$0xff] }
 0xa4c   : > { %20818 = vst [vmem:[#allocation55_spill] sm:$0xff] %v19663_v52 }
 0xa4d   : > { %20819 = vst [vmem:[#allocation56_spill] sm:$0xff] %v19671_v5  ;;  %v9549_v2 = vpop.permute.xlu1 %9548  ;;  %v10529_v18 = vpop.f32.mrb[40].mxu0 }
 0xa4e   : > { %v19678_v28 = vadd.f32 %v9549_v2, %v8098_v55  ;;  %v10819_v4 = vadd.f32 %v10818_v59, %v10529_v18  ;;  %v10531_v57 = vpop.f32.mrb[41].mxu0  ;;  %v9547_v47 = vpop.permute.xlu0 %9546  ;;  %v8095_v2 = vadd.f32 %v18903_v53, %v6748_v17  ;;  %v6755_v18 = vld [vmem:[%s20512_s8 + $0x158] sm:$0xff] }
 0xa4f   : > { %v19683_v60 = vadd.f32 %v9547_v47, %v8097_v58  ;;  %v10532_v63 = vpop.f32.mrb[42].mxu0  ;;  %v19685_v61 = vpop.f32.mrb[64].mxu1  ;;  %v8102_v53 = vadd.f32 %v18988_v42, %v6755_v18 }
 0xa50   : > { %20820 = vst [vmem:[#allocation57_spill] sm:$0xff] %v19678_v28  ;;  %v10822_v36 = vadd.f32 %v10821_v12, %v10532_v63  ;;  %v10534_v26 = vpop.f32.mrb[43].mxu0  ;;  %11105 = vrot.lane.b32.xlu0 %v10819_v4, %s15089_s17  ;;  %v19689_v55 = vpop.f32.mrb[65].mxu1  ;;  %v8101_v63 = vadd.f32 %v18974_v48, %v6754_v44 }
 0xa51   : > { %20821 = vst [vmem:[#allocation58_spill] sm:$0xff] %v19683_v60  ;;  %v9545_v59 = vpop.permute.xlu1 %9544  ;;  %v19695_v47 = vpop.f32.mrb[66].mxu1  ;;  %v6753_v26 = vld [vmem:[%s20512_s8 + $0x148] sm:$0xff] }
 0xa52   : > { %v19697_v58 = vadd.f32 %v9545_v59, %v8096_v38  ;;  %v9543_v57 = vpop.permute.xlu0 %9542  ;;  %11107 = vrot.lane.b32.xlu1 %v10822_v36, %s15089_s17  ;;  %v19703_v12 = vpop.f32.mrb[67].mxu1  ;;  %v8100_v44 = vadd.f32 %v18965_v20, %v6753_v26  ;;  %v6758_v20 = vld [vmem:[%s20512_s8 + $0x170] sm:$0xff] }
 0xa53   : > { %v19705_v49 = vadd.f32 %v9543_v57, %v8095_v2  ;;  %v6752_v2 = vld [vmem:[%s20512_s8 + $0x140] sm:$0xff] }
 0xa54   : > { %20822 = vst [vmem:[#allocation59_spill] sm:$0xff] %v19697_v58 }
 0xa55   : > { %20823 = vst [vmem:[#allocation60_spill] sm:$0xff] %v19705_v49  ;;  %v9557_v4 = vpop.permute.xlu1 %9556  ;;  %v10537_v17 = vpop.f32.mrb[44].mxu0 }
 0xa56   : > { %v19712_v38 = vadd.f32 %v9557_v4, %v8102_v53  ;;  %v10827_v36 = vadd.f32 %v19621_v51, %v10537_v17  ;;  %v10539_v59 = vpop.f32.mrb[45].mxu0  ;;  %v9555_v28 = vpop.permute.xlu0 %9554  ;;  %v8099_v17 = vadd.f32 %v18951_v14, %v6752_v2 }
 0xa57   : > { %v19718_v57 = vadd.f32 %v9555_v28, %v8101_v63  ;;  %v10540_v42 = vpop.f32.mrb[46].mxu0  ;;  %v19720_v18 = vpop.f32.mrb[68].mxu1  ;;  %v6759_v28 = vld [vmem:[%s20512_s8 + $0x178] sm:$0xff] }
 0xa58   : > { %20824 = vst [vmem:[#allocation61_spill] sm:$0xff] %v19712_v38  ;;  %v10830_v48 = vadd.f32 %v19629_v45, %v10540_v42  ;;  %11109 = vrot.lane.b32.xlu0 %v10827_v36, %s15089_s17  ;;  %v10542_v53 = vpop.f32.mrb[47].mxu0  ;;  %v19725_v4 = vpop.f32.mrb[69].mxu1  ;;  %v8106_v14 = vadd.f32 %v19033_v25, %v6759_v28  ;;  %v8105_v42 = vadd.f32 %v19019_v15, %v6758_v20 }
 0xa59   : > { %20825 = vst [vmem:[#allocation62_spill] sm:$0xff] %v19718_v57  ;;  %v9553_v51 = vpop.permute.xlu1 %9552  ;;  %v19731_v63 = vpop.f32.mrb[70].mxu1 }
 0xa5a   : > { %v19733_v59 = vadd.f32 %v9553_v51, %v8100_v44  ;;  %v9551_v38 = vpop.permute.xlu0 %9550  ;;  %11111 = vrot.lane.b32.xlu1 %v10830_v48, %s15089_s17  ;;  %v19739_v45 = vpop.f32.mrb[71].mxu1  ;;  %v6757_v44 = vld [vmem:[%s20512_s8 + $0x168] sm:$0xff] }
 0xa5b   : > { %v19741_v26 = vadd.f32 %v9551_v38, %v8099_v17  ;;  %v6756_v38 = vld [vmem:[%s20512_s8 + $0x160] sm:$0xff]  ;;  %v8104_v20 = vadd.f32 %v19010_v29, %v6757_v44  ;;  %v6762_v29 = vld [vmem:[%s20512_s8 + $0x190] sm:$0xff] }
 0xa5c   : > { %20826 = vst [vmem:[#allocation63_spill] sm:$0xff] %v19733_v59 }
 0xa5d   : > { %20827 = vst [vmem:[#allocation64_spill] sm:$0xff] %v19741_v26  ;;  %v9565_v36 = vpop.permute.xlu1 %9564  ;;  %v10545_v2 = vpop.f32.mrb[48].mxu0 }
 0xa5e   : > { %v19748_v53 = vadd.f32 %v9565_v36, %v8106_v14  ;;  %v10835_v48 = vadd.f32 %v19655_v1, %v10545_v2  ;;  %v10547_v51 = vpop.f32.mrb[49].mxu0  ;;  %v9563_v57 = vpop.permute.xlu0 %9562  ;;  %v8103_v2 = vadd.f32 %v18996_v22, %v6756_v38 }
 0xa5f   : > { %v19754_v17 = vadd.f32 %v9563_v57, %v8105_v42  ;;  %v10548_v25 = vpop.f32.mrb[50].mxu0  ;;  %v19756_v28 = vpop.f32.mrb[72].mxu1  ;;  %v6763_v57 = vld [vmem:[%s20512_s8 + $0x198] sm:$0xff] }
 0xa60   : > { %20828 = vst [vmem:[#allocation65_spill] sm:$0xff] %v19748_v53  ;;  %v10838_v15 = vadd.f32 %v19669_v11, %v10548_v25  ;;  %11113 = vrot.lane.b32.xlu0 %v10835_v48, %s15089_s17  ;;  %v10550_v14 = vpop.f32.mrb[51].mxu0  ;;  %v19761_v36 = vpop.f32.mrb[73].mxu1  ;;  %v8110_v22 = vadd.f32 %v19081_v31, %v6763_v57  ;;  %v8109_v25 = vadd.f32 %v19067_v37, %v6762_v29 }
 0xa61   : > { %20829 = vst [vmem:[#allocation66_spill] sm:$0xff] %v19754_v17  ;;  %v9561_v1 = vpop.permute.xlu1 %9560  ;;  %v19767_v42 = vpop.f32.mrb[74].mxu1 }
 0xa62   : > { %v19769_v51 = vadd.f32 %v9561_v1, %v8104_v20  ;;  %v9559_v53 = vpop.permute.xlu0 %9558  ;;  %11115 = vrot.lane.b32.xlu1 %v10838_v15, %s15089_s17  ;;  %v19775_v11 = vpop.f32.mrb[75].mxu1  ;;  %v6761_v20 = vld [vmem:[%s20512_s8 + $0x188] sm:$0xff] }
 0xa63   : > { %v19777_v44 = vadd.f32 %v9559_v53, %v8103_v2  ;;  %v6760_v53 = vld [vmem:[%s20512_s8 + $0x180] sm:$0xff]  ;;  %v8108_v29 = vadd.f32 %v19057_v9, %v6761_v20 }
 0xa64   : > { %20830 = vst [vmem:[#allocation67_spill] sm:$0xff] %v19769_v51  ;;  %v6764_v9 = vld [vmem:[%s20512_s8 + $0x1a0] sm:$0xff] }
 0xa65   : > { %20831 = vst [vmem:[#allocation68_spill] sm:$0xff] %v19777_v44  ;;  %v9573_v48 = vpop.permute.xlu1 %9572  ;;  %v10553_v38 = vpop.f32.mrb[52].mxu0 }
 0xa66   : > { %v19784_v14 = vadd.f32 %v9573_v48, %v8110_v22  ;;  %v10843_v15 = vadd.f32 %v19651_v34, %v10553_v38  ;;  %v10555_v1 = vpop.f32.mrb[53].mxu0  ;;  %v9571_v17 = vpop.permute.xlu0 %9570  ;;  %v8107_v38 = vadd.f32 %v19043_v54, %v6760_v53 }
 0xa67   : > { %v19790_v2 = vadd.f32 %v9571_v17, %v8109_v25  ;;  %v10556_v31 = vpop.f32.mrb[54].mxu0  ;;  %v19792_v57 = vpop.f32.mrb[76].mxu1  ;;  %v6765_v17 = vld [vmem:[%s20512_s8 + $0x1a8] sm:$0xff] }
 0xa68   : > { %20832 = vst [vmem:[#allocation69_spill] sm:$0xff] %v19784_v14  ;;  %v10846_v37 = vadd.f32 %v19661_v62, %v10556_v31  ;;  %11117 = vrot.lane.b32.xlu0 %v10843_v15, %s15089_s17  ;;  %v10558_v22 = vpop.f32.mrb[55].mxu0  ;;  %v19797_v48 = vpop.f32.mrb[77].mxu1  ;;  %v8112_v54 = vadd.f32 %v19105_v33, %v6765_v17  ;;  %v8111_v31 = vadd.f32 %v19091_v7, %v6764_v9  ;;  %v20838_v9 = vld [vmem:[#allocation34_spill] sm:$0xff] }
 0xa69   : > { %20833 = vst [vmem:[#allocation70_spill] sm:$0xff] %v19790_v2  ;;  %v9569_v34 = vpop.permute.xlu1 %9568  ;;  %v19803_v25 = vpop.f32.mrb[78].mxu1 }
 0xa6a   : > { %v19805_v1 = vadd.f32 %v9569_v34, %v8108_v29  ;;  %v9567_v14 = vpop.permute.xlu0 %9566  ;;  %11119 = vrot.lane.b32.xlu1 %v10846_v37, %s15089_s17  ;;  %v19811_v62 = vpop.f32.mrb[79].mxu1  ;;  %v6767_v29 = vld [vmem:[%s20512_s8 + $0x1b8] sm:$0xff] }
 0xa6b   : > { %v19813_v20 = vadd.f32 %v9567_v14, %v8107_v38  ;;  %v6766_v14 = vld [vmem:[%s20512_s8 + $0x1b0] sm:$0xff] }
 0xa6c   : > { %20834 = vst [vmem:[#allocation71_spill] sm:$0xff] %v19805_v1 }
 0xa6d   : > { %20835 = vst [vmem:[#allocation72_spill] sm:$0xff] %v19813_v20  ;;  %v10561_v15 = vpop.f32.mrb[56].mxu0  ;;  %v9577_v53 = vpop.permute.xlu1 %9576 }
 0xa6e   : > { %v19820_v22 = vadd.f32 %v9577_v53, %v8112_v54  ;;  %v10851_v37 = vadd.f32 %v19689_v55, %v10561_v15  ;;  %v10563_v34 = vpop.f32.mrb[57].mxu0  ;;  %v9575_v2 = vpop.permute.xlu0 %9574  ;;  %v8114_v54 = vadd.f32 %v20838_v9, %v6767_v29  ;;  %v20839_v15 = vld [vmem:[#allocation33_spill] sm:$0xff] }
 0xa6f   : > { %v19826_v38 = vadd.f32 %v9575_v2, %v8111_v31  ;;  %v10564_v33 = vpop.f32.mrb[58].mxu0  ;;  %v19828_v17 = vpop.f32.mrb[80].mxu1  ;;  %v8113_v34 = vadd.f32 %v20839_v15, %v6766_v14  ;;  %v6769_v2 = vld [vmem:[%s20512_s8 + $0x1c8] sm:$0xff]  ;;  %v20842_v14 = vld [vmem:[#allocation36_spill] sm:$0xff] }
 0xa70   : > { %20836 = vst [vmem:[#allocation73_spill] sm:$0xff] %v19820_v22  ;;  %v10854_v7 = vadd.f32 %v19703_v12, %v10564_v33  ;;  %11121 = vrot.lane.b32.xlu0 %v10851_v37, %s15089_s17  ;;  %v10566_v53 = vpop.f32.mrb[59].mxu0  ;;  %v19833_v22 = vpop.f32.mrb[81].mxu1  ;;  %v6768_v12 = vld [vmem:[%s20512_s8 + $0x1c0] sm:$0xff]  ;;  %v8116_v33 = vadd.f32 %v20842_v14, %v6769_v2  ;;  %v20843_v15 = vld [vmem:[#allocation35_spill] sm:$0xff] }
 0xa71   : > { %20837 = vst [vmem:[#allocation74_spill] sm:$0xff] %v19826_v38  ;;  %v9581_v55 = vpop.permute.xlu1 %9580  ;;  %v19839_v31 = vpop.f32.mrb[82].mxu1  ;;  %v8115_v20 = vadd.f32 %v20843_v15, %v6768_v12 }
 0xa72   : > { %v19841_v38 = vadd.f32 %v9581_v55, %v8114_v54  ;;  %v9579_v1 = vpop.permute.xlu0 %9578  ;;  %11123 = vrot.lane.b32.xlu1 %v10854_v7, %s15089_s17  ;;  %v19847_v29 = vpop.f32.mrb[83].mxu1 }
 0xa73   : > { %v19849_v37 = vadd.f32 %v9579_v1, %v8113_v34  ;;  %v6770_v1 = vld [vmem:[%s20512_s8 + $0x1d0] sm:$0xff] }
 0xa74   : > { %20840 = vst [vmem:[#allocation34_spill] sm:$0xff] %v19841_v38 }
 0xa75   : > { %20841 = vst [vmem:[#allocation33_spill] sm:$0xff] %v19849_v37  ;;  %v10569_v9 = vpop.f32.mrb[60].mxu0  ;;  %v9585_v53 = vpop.permute.xlu1 %9584 }
 0xa76   : > { %v10859_v54 = vadd.f32 %v19685_v61, %v10569_v9  ;;  %v19854_v55 = vadd.f32 %v9585_v53, %v8116_v33  ;;  %v10571_v38 = vpop.f32.mrb[61].mxu0  ;;  %v9583_v7 = vpop.permute.xlu0 %9582  ;;  %v6771_v33 = vld [vmem:[%s20512_s8 + $0x1d8] sm:$0xff] }
 0xa77   : > { %v19856_v51 = vadd.f32 %v9583_v7, %v8115_v20  ;;  %v10572_v44 = vpop.f32.mrb[62].mxu0  ;;  %v19861_v34 = vpop.f32.mrb[84].mxu1  ;;  %v20846_v20 = vld [vmem:[#allocation37_spill] sm:$0xff] }
 0xa78   : > { %20844 = vst [vmem:[#allocation36_spill] sm:$0xff] %v19854_v55  ;;  %v10862_v2 = vadd.f32 %v19695_v47, %v10572_v44  ;;  %11125 = vrot.lane.b32.xlu0 %v10859_v54, %s15089_s17  ;;  %v10574_v12 = vpop.f32.mrb[63].mxu0  ;;  %v19865_v14 = vpop.f32.mrb[85].mxu1  ;;  %v8117_v38 = vadd.f32 %v20846_v20, %v6770_v1  ;;  %v20848_v44 = vld [vmem:[#allocation38_spill] sm:$0xff] }
 0xa79   : > { %20845 = vst [vmem:[#allocation35_spill] sm:$0xff] %v19856_v51  ;;  %v19867_v61 = vpop.f32.mrb[86].mxu1  ;;  %v8118_v54 = vadd.f32 %v20848_v44, %v6771_v33 }
 0xa7a   : > { %11127 = vrot.lane.b32.xlu1 %v10862_v2, %s15089_s17  ;;  %v19874_v9 = vpop.f32.mrb[87].mxu1 }
 0xa7b   : > { %v9587_v53 = vpop.permute.xlu0 %9586 }
 0xa7c   : > { %v19876_v15 = vadd.f32 %v9587_v53, %v8117_v38  ;;  %v6772_v38 = vld [vmem:[%s20512_s8 + $0x1e0] sm:$0xff] }
 0xa7d   : > { %v10577_v47 = vpop.f32.mrb[64].mxu0 }
 0xa7e   : > { %20847 = vst [vmem:[#allocation37_spill] sm:$0xff] %v19876_v15  ;;  %v9589_v7 = vpop.permute.xlu1 %9588  ;;  %v10867_v12 = vadd.f32 %v19725_v4, %v10577_v47  ;;  %v10579_v55 = vpop.f32.mrb[65].mxu0  ;;  %v6773_v4 = vld [vmem:[%s20512_s8 + $0x1e8] sm:$0xff] }
 0xa7f   : > { %v19880_v51 = vadd.f32 %v9589_v7, %v8118_v54  ;;  %v10580_v2 = vpop.f32.mrb[66].mxu0  ;;  %v19882_v1 = vpop.f32.mrb[88].mxu1 }
 0xa80   : > { %v10870_v20 = vadd.f32 %v19739_v45, %v10580_v2  ;;  %11129 = vrot.lane.b32.xlu0 %v10867_v12, %s15089_s17  ;;  %v10582_v53 = vpop.f32.mrb[67].mxu0  ;;  %v19889_v15 = vpop.f32.mrb[89].mxu1  ;;  %v20850_v45 = vld [vmem:[#allocation39_spill] sm:$0xff]  ;;  %v20852_v12 = vld [vmem:[#allocation40_spill] sm:$0xff] }
 0xa81   : > { %20849 = vst [vmem:[#allocation38_spill] sm:$0xff] %v19880_v51  ;;  %v19891_v33 = vpop.f32.mrb[90].mxu1  ;;  %v8119_v47 = vadd.f32 %v20850_v45, %v6772_v38  ;;  %v8120_v2 = vadd.f32 %v20852_v12, %v6773_v4  ;;  %v6774_v38 = vld [vmem:[%s20512_s8 + $0x1f0] sm:$0xff] }
 0xa82   : > { %11131 = vrot.lane.b32.xlu1 %v10870_v20, %s15089_s17  ;;  %v19897_v55 = vpop.f32.mrb[91].mxu1 }
 0xa84   : > { %v9591_v44 = vpop.permute.xlu0 %9590 }
 0xa85   : > { %v19900_v54 = vadd.f32 %v9591_v44, %v8119_v47  ;;  %v10585_v7 = vpop.f32.mrb[68].mxu0 }
 0xa86   : > { %v10875_v53 = vadd.f32 %v19720_v18, %v10585_v7  ;;  %v9593_v51 = vpop.permute.xlu1 %9592  ;;  %v10587_v37 = vpop.f32.mrb[69].mxu0  ;;  %v6775_v18 = vld [vmem:[%s20512_s8 + $0x1f8] sm:$0xff] }
 0xa87   : > { %20851 = vst [vmem:[#allocation39_spill] sm:$0xff] %v19900_v54  ;;  %v19904_v59 = vadd.f32 %v9593_v51, %v8120_v2  ;;  %v10588_v20 = vpop.f32.mrb[70].mxu0  ;;  %v19906_v26 = vpop.f32.mrb[92].mxu1  ;;  %v20856_v2 = vld [vmem:[#allocation42_spill] sm:$0xff] }
 0xa88   : > { %v10878_v60 = vadd.f32 %v19731_v63, %v10588_v20  ;;  %11133 = vrot.lane.b32.xlu0 %v10875_v53, %s15089_s17  ;;  %v10590_v45 = vpop.f32.mrb[71].mxu0  ;;  %v19913_v47 = vpop.f32.mrb[93].mxu1  ;;  %v20854_v63 = vld [vmem:[#allocation41_spill] sm:$0xff]  ;;  %v8122_v53 = vadd.f32 %v20856_v2, %v6775_v18  ;;  %v6714_v20 = vld [vmem:[%s20512_s8 + $0x10] sm:$0xff] }
 0xa89   : > { %20853 = vst [vmem:[#allocation40_spill] sm:$0xff] %v19904_v59  ;;  %v19915_v4 = vpop.f32.mrb[94].mxu1  ;;  %v8121_v37 = vadd.f32 %v20854_v63, %v6774_v38  ;;  %v6715_v38 = vld [vmem:[%s20512_s8 + $0x18] sm:$0xff] }
 0xa8a   : > { %11135 = vrot.lane.b32.xlu1 %v10878_v60, %s15089_s17  ;;  %v19921_v51 = vpop.f32.mrb[95].mxu1 }
 0xa8c   : > { %v9595_v44 = vpop.permute.xlu0 %9594 }
 0xa8d   : > { %v19924_v7 = vadd.f32 %v9595_v44, %v8121_v37  ;;  %v10593_v12 = vpop.f32.mrb[72].mxu0  ;;  %v20859_v44 = vld [vmem:[#allocation7_spill] sm:$0xff] }
 0xa8e   : > { %v9597_v45 = vpop.permute.xlu1 %9596  ;;  %v10883_v60 = vadd.f32 %v19761_v36, %v10593_v12  ;;  %v10595_v59 = vpop.f32.mrb[73].mxu0  ;;  %v8061_v2 = vadd.f32 %v20859_v44, %v6714_v20  ;;  %v20862_v20 = vld [vmem:[#allocation8_spill] sm:$0xff] }
 0xa8f   : > { %20855 = vst [vmem:[#allocation41_spill] sm:$0xff] %v19924_v7  ;;  %v19931_v54 = vadd.f32 %v9597_v45, %v8122_v53  ;;  %v10596_v58 = vpop.f32.mrb[74].mxu0  ;;  %v19933_v49 = vpop.f32.mrb[96].mxu1  ;;  %v6712_v59 = vld [vmem:[%s20512_s8] sm:$0xff]  ;;  %v6713_v45 = vld [vmem:[%s20512_s8 + $0x8] sm:$0xff] }
 0xa90   : > { %20858 = vst [vmem:[#allocation75_spill] sm:$0xff] %v19933_v49  ;;  %v10886_v63 = vadd.f32 %v19775_v11, %v10596_v58  ;;  %11137 = vrot.lane.b32.xlu0 %v10883_v60, %s15089_s17  ;;  %v10598_v18 = vpop.f32.mrb[75].mxu0  ;;  %v19940_v37 = vpop.f32.mrb[97].mxu1  ;;  %v9664_v53 = vadd.f32 %v19506_v41, %v8061_v2  ;;  %v20861_v58 = vld [vmem:[#allocation12_spill] sm:$0xff]  ;;  %v20865_v49 = vld [vmem:[#allocation3_spill] sm:$0xff] }
 0xa91   : > { %20857 = vst [vmem:[#allocation42_spill] sm:$0xff] %v19931_v54  ;;  %v19943_v36 = vpop.f32.mrb[98].mxu1  ;;  %v8062_v11 = vadd.f32 %v20861_v58, %v6715_v38  ;;  %v8059_v18 = vadd.f32 %v20862_v20, %v6712_v59  ;;  %v6718_v54 = vld [vmem:[%s20512_s8 + $0x30] sm:$0xff]  ;;  %v20863_v58 = vld [vmem:[#allocation10_spill] sm:$0xff]  ;;  %v6719_v59 = vld [vmem:[%s20512_s8 + $0x38] sm:$0xff] }
 0xa92   : > { %20860 = vst [vmem:[#allocation7_spill] sm:$0xff] %v19943_v36  ;;  %11139 = vrot.lane.b32.xlu1 %v10886_v63, %s15089_s17  ;;  %v19949_v12 = vpop.f32.mrb[99].mxu1  ;;  %v8060_v5 = vadd.f32 %v20863_v58, %v6713_v45 }
 0xa93   : > { %v9665_v44 = vadd.f32 %v19511_v13, %v8062_v11  ;;  %v9662_v38 = vadd.f32 %v19502_v21, %v8059_v18 }
 0xa94   : > { %v11078_v60 = vpop.permute.xlu0 %11077  ;;  %v9663_v45 = vadd.f32 %v19519_v35, %v8060_v5  ;;  %v6717_v35 = vld [vmem:[%s20512_s8 + $0x28] sm:$0xff] }
 0xa95   : > { %v11267_v63 = vadd.f32 %v11078_v60, %v9664_v53  ;;  %v10601_v7 = vpop.f32.mrb[76].mxu0  ;;  %v8065_v53 = vadd.f32 %v20865_v49, %v6718_v54  ;;  %v6716_v60 = vld [vmem:[%s20512_s8 + $0x20] sm:$0xff] }
 0xa96   : > { %v10891_v52 = vadd.f32 %v19756_v28, %v10601_v7  ;;  %v11080_v41 = vpop.permute.xlu1 %11079  ;;  %v10603_v2 = vpop.f32.mrb[77].mxu0  ;;  %v20867_v54 = vld [vmem:[#allocation6_spill] sm:$0xff] }
 0xa97   : > { %v11395_v20 = vmul.f32 0.01, %v11267_v63  ;;  %v11268_v13 = vadd.f32 %v11080_v41, %v9665_v44  ;;  %v10604_v11 = vpop.f32.mrb[78].mxu0  ;;  %v19967_v36 = vpop.f32.mrb[100].mxu1  ;;  %vm11331_vm7 = vcmp.gt.f32.partialorder %v11267_v63, 0.0  ;;  %v9668_v49 = vadd.f32 %v19517_v50, %v8065_v53 }
 0xa98   : > { %20864 = vst [vmem:[#allocation12_spill] sm:$0xff] %v19967_v36  ;;  %v10894_v28 = vadd.f32 %v19767_v42, %v10604_v11  ;;  %v11074_v7 = vpop.permute.xlu0 %11073  ;;  %11141 = vrot.lane.b32.xlu0 %v10891_v52, %s15089_s17  ;;  %v10606_v21 = vpop.f32.mrb[79].mxu0  ;;  %v8066_v2 = vadd.f32 %v20867_v54, %v6719_v59 }
 0xa99   : > { %vm11332_vm8 = vcmp.gt.f32.partialorder %v11268_v13, 0.0  ;;  %v11396_v18 = vmul.f32 0.01, %v11268_v13  ;;  %v11265_v44 = vadd.f32 %v11074_v7, %v9662_v38  ;;  %v19976_v41 = vpop.f32.mrb[101].mxu1  ;;  %v11459_v5 = vsel %vm11331_vm7, %v11267_v63, %v11395_v20  ;;  %v20869_v21 = vld [vmem:[#allocation9_spill] sm:$0xff]  ;;  %v20870_v63 = vld [vmem:[#allocation11_spill] sm:$0xff] }
 0xa9a   : > { %20866 = vst [vmem:[#allocation8_spill] sm:$0xff] %v19976_v41  ;;  %v11076_v42 = vpop.permute.xlu1 %11075  ;;  %11143 = vrot.lane.b32.xlu1 %v10894_v28, %s15089_s17  ;;  %v19981_v52 = vpop.f32.mrb[102].mxu1  ;;  %v8063_v50 = vadd.f32 %v20869_v21, %v6716_v60  ;;  %v9669_v28 = vadd.f32 %v19530_v46, %v8066_v2  ;;  %v8064_v20 = vadd.f32 %v20870_v63, %v6717_v35  ;;  %v6720_v60 = vld [vmem:[%s20512_s8 + $0x40] sm:$0xff]  ;;  %v6721_v35 = vld [vmem:[%s20512_s8 + $0x48] sm:$0xff] }
 0xa9b   : > { %20868 = vst [vmem:[#allocation10_spill] sm:$0xff] %v19981_v52  ;;  %v11460_v58 = vsel %vm11332_vm8, %v11268_v13, %v11396_v18  ;;  %v11393_v11 = vmul.f32 0.01, %v11265_v44  ;;  %v11266_v38 = vadd.f32 %v11076_v42, %v9663_v45  ;;  %v19987_v7 = vpop.f32.mrb[103].mxu1  ;;  %vm11329_vm0 = vcmp.gt.f32.partialorder %v11265_v44, 0.0 }
 0xa9c   : > { %v19990_v53 = vpack.c.bf16 %v11460_v58, %v11459_v5  ;;  %v11086_v59 = vpop.permute.xlu0 %11085  ;;  %v9666_v41 = vadd.f32 %v19522_v3, %v8063_v50 }
 0xa9d   : > { %vm11330_vm3 = vcmp.gt.f32.partialorder %v11266_v38, 0.0  ;;  %v11394_v54 = vmul.f32 0.01, %v11266_v38  ;;  %v11271_v52 = vadd.f32 %v11086_v59, %v9668_v49  ;;  %v10609_v36 = vpop.f32.mrb[80].mxu0  ;;  %v11457_v42 = vsel %vm11329_vm0, %v11265_v44, %v11393_v11 }
 0xa9e   : > { %v10899_v13 = vadd.f32 %v19797_v48, %v10609_v36  ;;  %v11088_v45 = vpop.permute.xlu1 %11087  ;;  %v10611_v18 = vpop.f32.mrb[81].mxu0  ;;  %v9667_v36 = vadd.f32 %v19535_v32, %v8064_v20  ;;  %v6722_v32 = vld [vmem:[%s20512_s8 + $0x50] sm:$0xff] }
 0xa9f   : > { %v11458_v5 = vsel %vm11330_vm3, %v11266_v38, %v11394_v54  ;;  %v11399_v58 = vmul.f32 0.01, %v11271_v52  ;;  %v11272_v46 = vadd.f32 %v11088_v45, %v9669_v28  ;;  %v10612_v2 = vpop.f32.mrb[82].mxu0  ;;  %vm11335_vm11 = vcmp.gt.f32.partialorder %v11271_v52, 0.0  ;;  %v20871_v38 = vld [vmem:[#allocation5_spill] sm:$0xff] }
 0xaa0   : > { %v19999_v21 = vpack.c.bf16 %v11458_v5, %v11457_v42  ;;  %v10902_v3 = vadd.f32 %v19811_v62, %v10612_v2  ;;  %v11082_v49 = vpop.permute.xlu0 %11081  ;;  %11145 = vrot.lane.b32.xlu0 %v10899_v13, %s15089_s17  ;;  %v10614_v48 = vpop.f32.mrb[83].mxu0  ;;  %v8067_v50 = vadd.f32 %v20871_v38, %v6720_v60  ;;  %v20872_v13 = vld [vmem:[#allocation4_spill] sm:$0xff] }
 0xaa1   : > { %vm11336_vm12 = vcmp.gt.f32.partialorder %v11272_v46, 0.0  ;;  %v11400_v44 = vmul.f32 0.01, %v11272_v46  ;;  %v11269_v11 = vadd.f32 %v11082_v49, %v9666_v41  ;;  %v11463_v28 = vsel %vm11335_vm11, %v11271_v52, %v11399_v58  ;;  %v6723_v52 = vld [vmem:[%s20512_s8 + $0x58] sm:$0xff] }
 0xaa2   : > { %v11084_v59 = vpop.permute.xlu1 %11083  ;;  %11147 = vrot.lane.b32.xlu1 %v10902_v3, %s15089_s17  ;;  %v9670_v20 = vadd.f32 %v19538_v16, %v8067_v50  ;;  %v8068_v45 = vadd.f32 %v20872_v13, %v6721_v35  ;;  %v20873_v16 = vld [vmem:[#allocation13_spill] sm:$0xff] }
 0xaa3   : > { %v11464_v62 = vsel %vm11336_vm12, %v11272_v46, %v11400_v44  ;;  %v11397_v54 = vmul.f32 0.01, %v11269_v11  ;;  %v11270_v63 = vadd.f32 %v11084_v59, %v9667_v36  ;;  %vm11333_vm9 = vcmp.gt.f32.partialorder %v11269_v11, 0.0 }
 0xaa4   : > { %v20014_v18 = vpack.c.bf16 %v11464_v62, %v11463_v28  ;;  %v9671_v5 = vadd.f32 %v19551_v6, %v8068_v45  ;;  %v8069_v3 = vadd.f32 %v20873_v16, %v6722_v32  ;;  %v20874_v6 = vld [vmem:[#allocation14_spill] sm:$0xff] }
 0xaa5   : > { %vm11334_vm2 = vcmp.gt.f32.partialorder %v11270_v63, 0.0  ;;  %v11398_v41 = vmul.f32 0.01, %v11270_v63  ;;  %v11090_v60 = vpop.permute.xlu0 %11089  ;;  %v10617_v42 = vpop.f32.mrb[84].mxu0  ;;  %v11461_v49 = vsel %vm11333_vm9, %v11269_v11, %v11397_v54  ;;  %v8070_v62 = vadd.f32 %v20874_v6, %v6723_v52  ;;  %v6725_v52 = vld [vmem:[%s20512_s8 + $0x68] sm:$0xff] }
 0xaa6   : > { %v11273_v58 = vadd.f32 %v11090_v60, %v9670_v20  ;;  %v10907_v46 = vadd.f32 %v19792_v57, %v10617_v42  ;;  %v10619_v2 = vpop.f32.mrb[85].mxu0  ;;  %v9672_v28 = vadd.f32 %v19533_v43, %v8069_v3  ;;  %v6724_v20 = vld [vmem:[%s20512_s8 + $0x60] sm:$0xff] }
 0xaa7   : > { %v11462_v48 = vsel %vm11334_vm2, %v11270_v63, %v11398_v41  ;;  %v11092_v36 = vpop.permute.xlu1 %11091  ;;  %v10620_v35 = vpop.f32.mrb[86].mxu0  ;;  %v9673_v54 = vadd.f32 %v19546_v10, %v8070_v62 }
 0xaa8   : > { %v20022_v44 = vpack.c.bf16 %v11462_v48, %v11461_v49  ;;  %v11401_v38 = vmul.f32 0.01, %v11273_v58  ;;  %v11274_v50 = vadd.f32 %v11092_v36, %v9671_v5  ;;  %11149 = vrot.lane.b32.xlu0 %v10907_v46, %s15089_s17  ;;  %v10622_v59 = vpop.f32.mrb[87].mxu0  ;;  %vm11337_vm15 = vcmp.gt.f32.partialorder %v11273_v58, 0.0  ;;  %v20875_v46 = vld [vmem:[#allocation15_spill] sm:$0xff]  ;;  %v20876_v36 = vld [vmem:[#allocation16_spill] sm:$0xff] }
 0xaa9   : > { %v10910_v57 = vadd.f32 %v19803_v25, %v10620_v35  ;;  %v8071_v2 = vadd.f32 %v20875_v46, %v6724_v20  ;;  %v8072_v35 = vadd.f32 %v20876_v36, %v6725_v52  ;;  %v20877_v20 = vld [vmem:[#allocation17_spill] sm:$0xff] }
 0xaaa   : > { %vm11338_vm4 = vcmp.gt.f32.partialorder %v11274_v50, 0.0  ;;  %v11402_v32 = vmul.f32 0.01, %v11274_v50  ;;  %v11094_v11 = vpop.permute.xlu0 %11093  ;;  %v11465_v13 = vsel %vm11337_vm15, %v11273_v58, %v11401_v38 }
 0xaab   : > { %11151 = vrot.lane.b32.xlu1 %v10910_v57, %s15089_s17  ;;  %v11275_v63 = vadd.f32 %v11094_v11, %v9672_v28  ;;  %v9674_v48 = vadd.f32 %v19554_v0, %v8071_v2  ;;  %v9675_v28 = vadd.f32 %v19567_v40, %v8072_v35  ;;  %v6727_v11 = vld [vmem:[%s20512_s8 + $0x78] sm:$0xff] }
 0xaac   : > { %v11466_v45 = vsel %vm11338_vm4, %v11274_v50, %v11402_v32  ;;  %v11096_v43 = vpop.permute.xlu1 %11095 }
 0xaad   : > { %v20033_v41 = vpack.c.bf16 %v11466_v45, %v11465_v13  ;;  %v11403_v60 = vmul.f32 0.01, %v11275_v63  ;;  %v11276_v42 = vadd.f32 %v11096_v43, %v9673_v54  ;;  %v10625_v25 = vpop.f32.mrb[88].mxu0  ;;  %vm11339_vm1 = vcmp.gt.f32.partialorder %v11275_v63, 0.0 }
 0xaae   : > { %v10915_v10 = vadd.f32 %v19833_v22, %v10625_v25  ;;  %v10627_v5 = vpop.f32.mrb[89].mxu0  ;;  %v20878_v25 = vld [vmem:[#allocation18_spill] sm:$0xff] }
 0xaaf   : > { %vm11340_vm14 = vcmp.gt.f32.partialorder %v11276_v42, 0.0  ;;  %v11404_v16 = vmul.f32 0.01, %v11276_v42  ;;  %v10628_v58 = vpop.f32.mrb[90].mxu0  ;;  %v11467_v38 = vsel %vm11339_vm1, %v11275_v63, %v11403_v60  ;;  %v8074_v52 = vadd.f32 %v20878_v25, %v6727_v11 }
 0xab0   : > { %v10918_v3 = vadd.f32 %v19847_v29, %v10628_v58  ;;  %11153 = vrot.lane.b32.xlu0 %v10915_v10, %s15089_s17  ;;  %v10630_v49 = vpop.f32.mrb[91].mxu0  ;;  %v6726_v29 = vld [vmem:[%s20512_s8 + $0x70] sm:$0xff] }
 0xab1   : > { %v11468_v50 = vsel %vm11340_vm14, %v11276_v42, %v11404_v16  ;;  %v8073_v13 = vadd.f32 %v20877_v20, %v6726_v29  ;;  %v9677_v2 = vadd.f32 %v19562_v19, %v8074_v52 }
 0xab2   : > { %v20044_v59 = vpack.c.bf16 %v11468_v50, %v11467_v38  ;;  %11155 = vrot.lane.b32.xlu1 %v10918_v3, %s15089_s17  ;;  %v11098_v22 = vpop.permute.xlu0 %11097  ;;  %v20879_v38 = vld [vmem:[#allocation19_spill] sm:$0xff] }
 0xab3   : > { %v11277_v6 = vadd.f32 %v11098_v22, %v9674_v48  ;;  %v9676_v42 = vadd.f32 %v19549_v39, %v8073_v13  ;;  %v6729_v48 = vld [vmem:[%s20512_s8 + $0x88] sm:$0xff] }
 0xab4   : > { %v11100_v62 = vpop.permute.xlu1 %11099 }
 0xab5   : > { %v11405_v57 = vmul.f32 0.01, %v11277_v6  ;;  %v11278_v32 = vadd.f32 %v11100_v62, %v9675_v28  ;;  %v10633_v0 = vpop.f32.mrb[92].mxu0  ;;  %vm11341_vm5 = vcmp.gt.f32.partialorder %v11277_v6, 0.0  ;;  %v20880_v62 = vld [vmem:[#allocation20_spill] sm:$0xff] }
 0xab6   : > { %v10923_v54 = vadd.f32 %v19828_v17, %v10633_v0  ;;  %v10635_v63 = vpop.f32.mrb[93].mxu0 }
 0xab7   : > { %vm11342_vm10 = vcmp.gt.f32.partialorder %v11278_v32, 0.0  ;;  %v11406_v40 = vmul.f32 0.01, %v11278_v32  ;;  %v10636_v45 = vpop.f32.mrb[94].mxu0  ;;  %v11469_v10 = vsel %vm11341_vm5, %v11277_v6, %v11405_v57  ;;  %v8076_v57 = vadd.f32 %v20880_v62, %v6729_v48  ;;  %v6732_v48 = vld [vmem:[%s20512_s8 + $0xa0] sm:$0xff] }
 0xab8   : > { %v10926_v43 = vadd.f32 %v19839_v31, %v10636_v45  ;;  %11157 = vrot.lane.b32.xlu0 %v10923_v54, %s15089_s17  ;;  %v10638_v60 = vpop.f32.mrb[95].mxu0  ;;  %v6728_v31 = vld [vmem:[%s20512_s8 + $0x80] sm:$0xff]  ;;  %v6731_v45 = vld [vmem:[%s20512_s8 + $0x98] sm:$0xff] }
 0xab9   : > { %v11470_v5 = vsel %vm11342_vm10, %v11278_v32, %v11406_v40  ;;  %v8075_v50 = vadd.f32 %v20879_v38, %v6728_v31  ;;  %v9679_v54 = vadd.f32 %v19583_v8, %v8076_v57  ;;  %v20884_v57 = vld [vmem:[#allocation24_spill] sm:$0xff] }
 0xaba   : > { %v20060_v46 = vpack.c.bf16 %v11470_v5, %v11469_v10  ;;  %11159 = vrot.lane.b32.xlu1 %v10926_v43, %s15089_s17  ;;  %v11102_v17 = vpop.permute.xlu0 %11101 }
 0xabb   : > { %v11279_v16 = vadd.f32 %v11102_v17, %v9676_v42  ;;  %v9678_v29 = vadd.f32 %v19571_v56, %v8075_v50  ;;  %v20881_v42 = vld [vmem:[#allocation21_spill] sm:$0xff] }
 0xabc   : > { %v11104_v58 = vpop.permute.xlu1 %11103 }
 0xabd   : > { %v11407_v3 = vmul.f32 0.01, %v11279_v16  ;;  %v11280_v49 = vadd.f32 %v11104_v58, %v9677_v2  ;;  %v10641_v39 = vpop.f32.mrb[96].mxu0  ;;  %vm11343_vm13 = vcmp.gt.f32.partialorder %v11279_v16, 0.0  ;;  %v20882_v2 = vld [vmem:[#allocation22_spill] sm:$0xff] }
 0xabe   : > { %v10931_v36 = vadd.f32 %v19865_v14, %v10641_v39  ;;  %v10643_v35 = vpop.f32.mrb[97].mxu0 }
 0xabf   : > { %vm11344_vm6 = vcmp.gt.f32.partialorder %v11280_v49, 0.0  ;;  %v11408_v19 = vmul.f32 0.01, %v11280_v49  ;;  %v10644_v22 = vpop.f32.mrb[98].mxu0  ;;  %v11471_v32 = vsel %vm11343_vm13, %v11279_v16, %v11407_v3  ;;  %v8078_v16 = vadd.f32 %v20882_v2, %v6731_v45  ;;  %v20886_v2 = vld [vmem:[#allocation26_spill] sm:$0xff] }
 0xac0   : > { %v10934_v28 = vadd.f32 %v19874_v9, %v10644_v22  ;;  %11161 = vrot.lane.b32.xlu0 %v10931_v36, %s15089_s17  ;;  %v10646_v6 = vpop.f32.mrb[99].mxu0  ;;  %v6730_v9 = vld [vmem:[%s20512_s8 + $0x90] sm:$0xff]  ;;  %v20883_v22 = vld [vmem:[#allocation23_spill] sm:$0xff] }
 0xac1   : > { %v11472_v0 = vsel %vm11344_vm6, %v11280_v49, %v11408_v19  ;;  %v8077_v8 = vadd.f32 %v20881_v42, %v6730_v9  ;;  %v15031_v19 = vld [vmem:[%s20513_s9 + $0x84] ss:$16 sps:$4 sm:$0xff]   ;;  %v20885_v42 = vld [vmem:[#allocation25_spill] sm:$0xff] }
 0xac2   : > { %v20076_v11 = vpack.c.bf16 %v11472_v0, %v11471_v32  ;;  %11163 = vrot.lane.b32.xlu1 %v10934_v28, %s15089_s17  ;;  %v11106_v14 = vpop.permute.xlu0 %11105  ;;  %v8079_v28 = vadd.f32 %v20883_v22, %v6732_v48  ;;  %11825 = vmatprep.mubr.bf16.mxu1 %v15031_v19  ;;  %v20889_v19 = vld [vmem:[#allocation27_spill] sm:$0xff] }
 0xac3   : > { %v11281_v63 = vadd.f32 %v11106_v14, %v9678_v29  ;;  %v9680_v17 = vadd.f32 %v19565_v23, %v8077_v8  ;;  %v6733_v23 = vld [vmem:[%s20512_s8 + $0xa8] sm:$0xff] }
 0xac4   : > { %v11108_v20 = vpop.permute.xlu1 %11107  ;;  %v8080_v32 = vadd.f32 %v20884_v57, %v6733_v23  ;;  %v6737_v23 = vld [vmem:[%s20512_s8 + $0xc8] sm:$0xff]  ;;  %v20891_v57 = vld [vmem:[#allocation48_spill] sm:$0xff] }
 0xac5   : > { %v11409_v13 = vmul.f32 0.01, %v11281_v63  ;;  %v11282_v40 = vadd.f32 %v11108_v20, %v9679_v54  ;;  %v10649_v56 = vpop.f32.mrb[100].mxu0  ;;  %vm11345_vm7 = vcmp.gt.f32.partialorder %v11281_v63, 0.0 }
 0xac6   : > { %v20087_v43 = vadd.f32 %v19861_v34, %v10649_v56  ;;  %v10651_v60 = vpop.f32.mrb[101].mxu0  ;;  %v9681_v34 = vadd.f32 %v19579_v27, %v8078_v16  ;;  %v9683_v9 = vadd.f32 %v19595_v30, %v8080_v32  ;;  %v20887_v16 = vld [vmem:[#allocation44_spill] sm:$0xff] }
 0xac7   : > { %vm11346_vm8 = vcmp.gt.f32.partialorder %v11282_v40, 0.0  ;;  %v11410_v25 = vmul.f32 0.01, %v11282_v40  ;;  %v10652_v52 = vpop.f32.mrb[102].mxu0  ;;  %v11473_v31 = vsel %vm11345_vm7, %v11281_v63, %v11409_v13 }
 0xac8   : > { %v20091_v10 = vadd.f32 %v19867_v61, %v10652_v52  ;;  %v10654_v5 = vpop.f32.mrb[103].mxu0 }
 0xac9   : > { %v11474_v58 = vsel %vm11346_vm8, %v11282_v40, %v11410_v25 }
 0xaca   : > { %v11110_v3 = vpop.permute.xlu0 %11109  ;;  %v11561_v49 = vpack.c.bf16 %v11474_v58, %v11473_v31 }
 0xacb   : > { %v11283_v39 = vadd.f32 %v11110_v3, %v9680_v17 }
 0xacc   : > { %v11112_v36 = vpop.permute.xlu1 %11111  ;;  %13432 = vmatprep.subr.bf16.mxu0 %v11561_v49  ;;  %14158 = vmatprep.subr.bf16.mxu1 %v11561_v49 }
 0xacd   : > { %v11411_v61 = vmul.f32 0.01, %v11283_v39  ;;  %v11284_v35 = vadd.f32 %v11112_v36, %v9681_v34  ;;  %v10657_v38 = vpop.f32.mrb[104].mxu0  ;;  %13433 = vmatpush3.bf16.msra.mxu0 %v19999_v21  ;;  %14166 = vmatpush3.bf16.msra.mxu1 %v19999_v21  ;;  %vm11347_vm0 = vcmp.gt.f32.partialorder %v11283_v39, 0.0  ;;  %v20888_v34 = vld [vmem:[#allocation43_spill] sm:$0xff] }
 0xace   : > { %v10947_v27 = vadd.f32 %v19889_v15, %v10657_v38  ;;  %v10659_v50 = vpop.f32.mrb[105].mxu0  ;;  %v9682_v15 = vadd.f32 %v19597_v24, %v8079_v28  ;;  %v6735_v24 = vld [vmem:[%s20512_s8 + $0xb8] sm:$0xff] }
 0xacf   : > { %vm11348_vm3 = vcmp.gt.f32.partialorder %v11284_v35, 0.0  ;;  %v11412_v6 = vmul.f32 0.01, %v11284_v35  ;;  %v10660_v29 = vpop.f32.mrb[106].mxu0  ;;  %v11475_v0 = vsel %vm11347_vm0, %v11283_v39, %v11411_v61 }
 0xad0   : > { %v10950_v62 = vadd.f32 %v19897_v55, %v10660_v29  ;;  %11169 = vrot.lane.b32.xlu0 %v10947_v27, %s15089_s17  ;;  %v10662_v21 = vpop.f32.mrb[107].mxu0  ;;  %v6734_v55 = vld [vmem:[%s20512_s8 + $0xb0] sm:$0xff] }
 0xad1   : > { %v11476_v14 = vsel %vm11348_vm3, %v11284_v35, %v11412_v6  ;;  %v8081_v8 = vadd.f32 %v20885_v42, %v6734_v55  ;;  %v20890_v21 = vld [vmem:[#allocation28_spill] sm:$0xff] }
 0xad2   : > { %11171 = vrot.lane.b32.xlu1 %v10950_v62, %s15089_s17  ;;  %v11114_v54 = vpop.permute.xlu0 %11113  ;;  %v11562_v63 = vpack.c.bf16 %v11476_v14, %v11475_v0 }
 0xad3   : > { %v11285_v20 = vadd.f32 %v11114_v54, %v9682_v15  ;;  %v9684_v31 = vadd.f32 %v20887_v16, %v8081_v8  ;;  %v20892_v54 = vld [vmem:[#allocation47_spill] sm:$0xff] }
 0xad4   : > { %v11116_v13 = vpop.permute.xlu1 %11115  ;;  %13434 = vmatprep.subr.bf16.mxu0 %v11562_v63  ;;  %14159 = vmatprep.subr.bf16.mxu1 %v11562_v63 }
 0xad5   : > { %v11413_v40 = vmul.f32 0.01, %v11285_v20  ;;  %v11286_v56 = vadd.f32 %v11116_v13, %v9683_v9  ;;  %v10665_v45 = vpop.f32.mrb[108].mxu0  ;;  %13435 = vmatpush3.bf16.msra.mxu0 %v19990_v53  ;;  %14167 = vmatpush3.bf16.msra.mxu1 %v19990_v53  ;;  %vm11349_vm11 = vcmp.gt.f32.partialorder %v11285_v20, 0.0  ;;  %v8082_v53 = vadd.f32 %v20886_v2, %v6735_v24 }
 0xad6   : > { %v10955_v30 = vadd.f32 %v19882_v1, %v10665_v45  ;;  %v10667_v60 = vpop.f32.mrb[109].mxu0 }
 0xad7   : > { %vm11350_vm12 = vcmp.gt.f32.partialorder %v11286_v56, 0.0  ;;  %v11414_v25 = vmul.f32 0.01, %v11286_v56  ;;  %v10668_v52 = vpop.f32.mrb[110].mxu0  ;;  %v11477_v58 = vsel %vm11349_vm11, %v11285_v20, %v11413_v40  ;;  %v9685_v39 = vadd.f32 %v20888_v34, %v8082_v53 }
 0xad8   : > { %v10958_v5 = vadd.f32 %v19891_v33, %v10668_v52  ;;  %11173 = vrot.lane.b32.xlu0 %v10955_v30, %s15089_s17  ;;  %v10670_v17 = vpop.f32.mrb[111].mxu0  ;;  %v6736_v33 = vld [vmem:[%s20512_s8 + $0xc0] sm:$0xff]  ;;  %v20893_v30 = vld [vmem:[#allocation29_spill] sm:$0xff] }
 0xad9   : > { %v11478_v3 = vsel %vm11350_vm12, %v11286_v56, %v11414_v25  ;;  %v8083_v22 = vadd.f32 %v20889_v19, %v6736_v33  ;;  %v6739_v56 = vld [vmem:[%s20512_s8 + $0xd8] sm:$0xff]  ;;  %v20895_v17 = vld [vmem:[#allocation46_spill] sm:$0xff] }
 0xada   : > { %11175 = vrot.lane.b32.xlu1 %v10958_v5, %s15089_s17  ;;  %v11118_v1 = vpop.permute.xlu0 %11117  ;;  %v11563_v49 = vpack.c.bf16 %v11478_v3, %v11477_v58  ;;  %v20894_v5 = vld [vmem:[#allocation30_spill] sm:$0xff]  ;;  %v20896_v58 = vld [vmem:[#allocation45_spill] sm:$0xff] }
 0xadb   : > { %v11287_v48 = vadd.f32 %v11118_v1, %v9684_v31  ;;  %v9686_v32 = vadd.f32 %v20891_v57, %v8083_v22  ;;  %v20897_v22 = vld [vmem:[#allocation52_spill] sm:$0xff] }
 0xadc   : > { %v11120_v36 = vpop.permute.xlu1 %11119  ;;  %13436 = vmatprep.subr.bf16.mxu0 %v11563_v49  ;;  %14160 = vmatprep.subr.bf16.mxu1 %v11563_v49 }
 0xadd   : > { %v11415_v61 = vmul.f32 0.01, %v11287_v48  ;;  %v11288_v35 = vadd.f32 %v11120_v36, %v9685_v39  ;;  %v10673_v38 = vpop.f32.mrb[112].mxu0  ;;  %13437 = vmatpush3.bf16.msra.mxu0 %v20022_v44  ;;  %14168 = vmatpush3.bf16.msra.mxu1 %v20022_v44  ;;  %vm11351_vm9 = vcmp.gt.f32.partialorder %v11287_v48, 0.0  ;;  %v8084_v44 = vadd.f32 %v20890_v21, %v6737_v23  ;;  %v6743_v21 = vld [vmem:[%s20512_s8 + $0xf8] sm:$0xff] }
 0xade   : > { %v10963_v27 = vadd.f32 %v19913_v47, %v10673_v38  ;;  %v10675_v50 = vpop.f32.mrb[113].mxu0 }
 0xadf   : > { %vm11352_vm2 = vcmp.gt.f32.partialorder %v11288_v35, 0.0  ;;  %v11416_v28 = vmul.f32 0.01, %v11288_v35  ;;  %v10676_v6 = vpop.f32.mrb[114].mxu0  ;;  %v11479_v15 = vsel %vm11351_vm9, %v11287_v48, %v11415_v61  ;;  %v9687_v63 = vadd.f32 %v20892_v54, %v8084_v44  ;;  %v20899_v44 = vld [vmem:[#allocation75_spill] sm:$0xff] }
 0xae0   : > { %v10966_v29 = vadd.f32 %v19921_v51, %v10676_v6  ;;  %11177 = vrot.lane.b32.xlu0 %v10963_v27, %s15089_s17  ;;  %v10678_v62 = vpop.f32.mrb[115].mxu0  ;;  %v6738_v51 = vld [vmem:[%s20512_s8 + $0xd0] sm:$0xff]  ;;  %v20901_v54 = vld [vmem:[#allocation7_spill] sm:$0xff] }
 0xae1   : > { %v11480_v0 = vsel %vm11352_vm2, %v11288_v35, %v11416_v28  ;;  %v8085_v60 = vadd.f32 %v20893_v30, %v6738_v51  ;;  %v20902_v51 = vld [vmem:[#allocation32_spill] sm:$0xff] }
 0xae2   : > { %11179 = vrot.lane.b32.xlu1 %v10966_v29, %s15089_s17  ;;  %v11122_v47 = vpop.permute.xlu0 %11121  ;;  %v11564_v14 = vpack.c.bf16 %v11480_v0, %v11479_v15  ;;  %v20900_v15 = vld [vmem:[#allocation31_spill] sm:$0xff] }
 0xae3   : > { %v11289_v9 = vadd.f32 %v11122_v47, %v9686_v32  ;;  %v9688_v2 = vadd.f32 %v20895_v17, %v8085_v60 }
 0xae4   : > { %v11124_v20 = vpop.permute.xlu1 %11123  ;;  %13438 = vmatprep.subr.bf16.mxu0 %v11564_v14  ;;  %14161 = vmatprep.subr.bf16.mxu1 %v11564_v14 }
 0xae5   : > { %v11417_v55 = vmul.f32 0.01, %v11289_v9  ;;  %v11290_v13 = vadd.f32 %v11124_v20, %v9687_v63  ;;  %v10681_v40 = vpop.f32.mrb[116].mxu0  ;;  %13439 = vmatpush3.bf16.msra.mxu0 %v20014_v18  ;;  %14169 = vmatpush3.bf16.msra.mxu1 %v20014_v18  ;;  %vm11353_vm15 = vcmp.gt.f32.partialorder %v11289_v9, 0.0  ;;  %v8086_v18 = vadd.f32 %v20894_v5, %v6739_v56  ;;  %v20903_v20 = vld [vmem:[#allocation50_spill] sm:$0xff]  ;;  %v20905_v5 = vld [vmem:[#allocation8_spill] sm:$0xff] }
 0xae6   : > { %v10971_v45 = vadd.f32 %v19906_v26, %v10681_v40  ;;  %v10683_v24 = vpop.f32.mrb[117].mxu0 }
 0xae7   : > { %vm11354_vm4 = vcmp.gt.f32.partialorder %v11290_v13, 0.0  ;;  %v11418_v42 = vmul.f32 0.01, %v11290_v13  ;;  %v10684_v8 = vpop.f32.mrb[118].mxu0  ;;  %v11481_v53 = vsel %vm11353_vm15, %v11289_v9, %v11417_v55  ;;  %v9689_v3 = vadd.f32 %v20896_v58, %v8086_v18  ;;  %v20904_v24 = vld [vmem:[#allocation49_spill] sm:$0xff] }
 0xae8   : > { %v10974_v25 = vadd.f32 %v19915_v4, %v10684_v8  ;;  %11181 = vrot.lane.b32.xlu0 %v10971_v45, %s15089_s17  ;;  %v10686_v52 = vpop.f32.mrb[119].mxu0 }
 0xae9   : > { %v11482_v16 = vsel %vm11354_vm4, %v11290_v13, %v11418_v42 }
 0xaea   : > { %11183 = vrot.lane.b32.xlu1 %v10974_v25, %s15089_s17  ;;  %v11126_v26 = vpop.permute.xlu0 %11125  ;;  %v11565_v31 = vpack.c.bf16 %v11482_v16, %v11481_v53 }
 0xaeb   : > { %v11291_v1 = vadd.f32 %v11126_v26, %v9688_v2 }
 0xaec   : > { %v11128_v49 = vpop.permute.xlu1 %11127  ;;  %13440 = vmatprep.subr.bf16.mxu0 %v11565_v31  ;;  %14162 = vmatprep.subr.bf16.mxu1 %v11565_v31 }
 0xaed   : > { %v11419_v4 = vmul.f32 0.01, %v11291_v1  ;;  %v11292_v34 = vadd.f32 %v11128_v49, %v9689_v3  ;;  %v10689_v39 = vpop.f32.mrb[120].mxu0  ;;  %13441 = vmatpush3.bf16.msra.mxu0 %v20033_v41  ;;  %14170 = vmatpush3.bf16.msra.mxu1 %v20033_v41  ;;  %vm11355_vm1 = vcmp.gt.f32.partialorder %v11291_v1, 0.0  ;;  %v20906_v49 = vld [vmem:[#allocation56_spill] sm:$0xff] }
 0xaee   : > { %v10979_v48 = vadd.f32 %v19940_v37, %v10689_v39  ;;  %v10691_v33 = vpop.f32.mrb[121].mxu0  ;;  %v6742_v37 = vld [vmem:[%s20512_s8 + $0xf0] sm:$0xff] }
 0xaef   : > { %vm11356_vm14 = vcmp.gt.f32.partialorder %v11292_v34, 0.0  ;;  %v11420_v36 = vmul.f32 0.01, %v11292_v34  ;;  %v10692_v61 = vpop.f32.mrb[122].mxu0  ;;  %v11483_v23 = vsel %vm11355_vm1, %v11291_v1, %v11419_v4  ;;  %v8089_v0 = vadd.f32 %v20900_v15, %v6742_v37 }
 0xaf0   : > { %v10982_v35 = vadd.f32 %v19949_v12, %v10692_v61  ;;  %11185 = vrot.lane.b32.xlu0 %v10979_v48, %s15089_s17  ;;  %v10694_v38 = vpop.f32.mrb[123].mxu0  ;;  %v20898_v12 = vld [vmem:[#allocation51_spill] sm:$0xff]  ;;  %v20908_v61 = vld [vmem:[#allocation12_spill] sm:$0xff] }
 0xaf1   : > { %v11484_v27 = vsel %vm11356_vm14, %v11292_v34, %v11420_v36  ;;  %v9692_v55 = vadd.f32 %v20903_v20, %v8089_v0  ;;  %v15029_v34 = vld [vmem:[%s20513_s9 + $0x80] ss:$16 sps:$4 sm:$0xff]   ;;  %v15034_v36 = vld [vmem:[%s20513_s9 + $0xa4] ss:$16 sps:$4 sm:$0xff]  }
 0xaf2   : > { %11187 = vrot.lane.b32.xlu1 %v10982_v35, %s15089_s17  ;;  %v11130_v50 = vpop.permute.xlu0 %11129  ;;  %v11566_v19 = vpack.c.bf16 %v11484_v27, %v11483_v23 }
 0xaf3   : > { %v11293_v41 = vadd.f32 %v11130_v50, %v20897_v22  ;;  %v20909_v50 = vld [vmem:[#allocation10_spill] sm:$0xff] }
 0xaf4   : > { %v11132_v28 = vpop.permute.xlu1 %11131  ;;  %13442 = vmatprep.subr.bf16.mxu0 %v11566_v19  ;;  %14163 = vmatprep.subr.bf16.mxu1 %v11566_v19 }
 0xaf5   : > { %v11421_v6 = vmul.f32 0.01, %v11293_v41  ;;  %v11294_v29 = vadd.f32 %v11132_v28, %v20898_v12  ;;  %v10697_v62 = vpop.f32.mrb[124].mxu0  ;;  %13443 = vmatpush3.bf16.msra.mxu0 %v20044_v59  ;;  %14171 = vmatpush3.bf16.msra.mxu1 %v20044_v59  ;;  %vm11357_vm5 = vcmp.gt.f32.partialorder %v11293_v41, 0.0  ;;  %v8090_v59 = vadd.f32 %v20902_v51, %v6743_v21  ;;  %v15035_v51 = vld [vmem:[%s20513_s9 + $0xc0] ss:$16 sps:$4 sm:$0xff]  }
 0xaf6   : > { %v10987_v57 = vadd.f32 %v20899_v44, %v10697_v62  ;;  %v10699_v32 = vpop.f32.mrb[125].mxu0  ;;  %v15032_v62 = vld [vmem:[%s20513_s9 + $0xa0] ss:$16 sps:$4 sm:$0xff]   ;;  %v20911_v44 = vld [vmem:[#allocation53_spill] sm:$0xff] }
 0xaf7   : > { %vm11358_vm10 = vcmp.gt.f32.partialorder %v11294_v29, 0.0  ;;  %v11422_v47 = vmul.f32 0.01, %v11294_v29  ;;  %v10700_v14 = vpop.f32.mrb[126].mxu0  ;;  %v11485_v13 = vsel %vm11357_vm5, %v11293_v41, %v11421_v6  ;;  %v9693_v30 = vadd.f32 %v20904_v24, %v8090_v59  ;;  %v20910_v6 = vld [vmem:[#allocation54_spill] sm:$0xff]  ;;  %v20913_v59 = vld [vmem:[#allocation59_spill] sm:$0xff] }
 0xaf8   : > { %v10990_v63 = vadd.f32 %v20901_v54, %v10700_v14  ;;  %11189 = vrot.lane.b32.xlu0 %v10987_v57, %s15089_s17  ;;  %v10702_v9 = vpop.f32.mrb[127].mxu0  ;;  %v15037_v32 = vld [vmem:[%s20513_s9 + $0xc4] ss:$16 sps:$4 sm:$0xff]  }
 0xaf9   : > { %v11486_v40 = vsel %vm11358_vm10, %v11294_v29, %v11422_v47  ;;  %v20912_v54 = vld [vmem:[#allocation60_spill] sm:$0xff] }
 0xafa   : > { %11191 = vrot.lane.b32.xlu1 %v10990_v63, %s15089_s17  ;;  %v11134_v56 = vpop.permute.xlu0 %11133  ;;  %v11567_v45 = vpack.c.bf16 %v11486_v40, %v11485_v13 }
 0xafb   : > { %v11295_v60 = vadd.f32 %v11134_v56, %v9692_v55  ;;  %v15040_v55 = vld [vmem:[%s20513_s9 + $0xe4] ss:$16 sps:$4 sm:$0xff]  }
 0xafc   : > { %v11136_v42 = vpop.permute.xlu1 %11135  ;;  %13444 = vmatprep.subr.bf16.mxu0 %v11567_v45  ;;  %14164 = vmatprep.subr.bf16.mxu1 %v11567_v45 }
 0xafd   : > { %v11423_v8 = vmul.f32 0.01, %v11295_v60  ;;  %v11296_v25 = vadd.f32 %v11136_v42, %v9693_v30  ;;  %v10705_v52 = vpop.f32.mrb[128].mxu0  ;;  %13445 = vmatpush3.bf16.msra.mxu0 %v20060_v46  ;;  %14172 = vmatpush3.bf16.msra.mxu1 %v20060_v46  ;;  %vm11359_vm13 = vcmp.gt.f32.partialorder %v11295_v60, 0.0  ;;  %v20914_v30 = vld [vmem:[#allocation58_spill] sm:$0xff] }
 0xafe   : > { %v10995_v18 = vadd.f32 %v20905_v5, %v10705_v52  ;;  %v10707_v17 = vpop.f32.mrb[129].mxu0  ;;  %v15038_v42 = vld [vmem:[%s20513_s9 + $0xe0] ss:$16 sps:$4 sm:$0xff]   ;;  %v20915_v5 = vld [vmem:[#allocation57_spill] sm:$0xff] }
 0xaff   : > { %vm11360_vm6 = vcmp.gt.f32.partialorder %v11296_v25, 0.0  ;;  %v11424_v2 = vmul.f32 0.01, %v11296_v25  ;;  %v10708_v53 = vpop.f32.mrb[130].mxu0  ;;  %v11487_v31 = vsel %vm11359_vm13, %v11295_v60, %v11423_v8 }
 0xb00   : > { %v10998_v16 = vadd.f32 %v19987_v7, %v10708_v53  ;;  %11193 = vrot.lane.b32.xlu0 %v10995_v18, %s15089_s17  ;;  %v10710_v26 = vpop.f32.mrb[131].mxu0  ;;  %v20907_v7 = vld [vmem:[#allocation55_spill] sm:$0xff] }
 0xb01   : > { %v11488_v58 = vsel %vm11360_vm6, %v11296_v25, %v11424_v2  ;;  %v15043_v25 = vld [vmem:[%s20513_s9 + $0xc] ss:$16 sps:$4 sm:$0xff]  }
 0xb02   : > { %11195 = vrot.lane.b32.xlu1 %v10998_v16, %s15089_s17  ;;  %v11138_v3 = vpop.permute.xlu0 %11137  ;;  %v11568_v1 = vpack.c.bf16 %v11488_v58, %v11487_v31  ;;  %v20916_v31 = vld [vmem:[#allocation64_spill] sm:$0xff] }
 0xb03   : > { %v11297_v46 = vadd.f32 %v11138_v3, %v20906_v49  ;;  %v15053_v3 = vld [vmem:[%s20513_s9] ss:$16 sps:$4 sm:$0xff]  }
 0xb04   : > { %v11140_v4 = vpop.permute.xlu1 %11139  ;;  %13446 = vmatprep.subr.bf16.mxu0 %v11568_v1  ;;  %14165 = vmatprep.subr.bf16.mxu1 %v11568_v1  ;;  %v15055_v1 = vld [vmem:[%s20513_s9 + $0x4] ss:$16 sps:$4 sm:$0xff]  }
 0xb05   : > { %v11425_v39 = vmul.f32 0.01, %v11297_v46  ;;  %v11298_v48 = vadd.f32 %v11140_v4, %v20907_v7  ;;  %v10713_v33 = vpop.f32.mrb[132].mxu0  ;;  %13447 = vmatpush3.bf16.msra.mxu0 %v20076_v11  ;;  %14173 = vmatpush3.bf16.msra.mxu1 %v20076_v11  ;;  %vm11361_vm7 = vcmp.gt.f32.partialorder %v11297_v46, 0.0  ;;  %v20917_v4 = vld [vmem:[#allocation63_spill] sm:$0xff] }
 0xb06   : > { %v11003_v35 = vadd.f32 %v20908_v61, %v10713_v33  ;;  %v10715_v38 = vpop.f32.mrb[133].mxu0  ;;  %11793 = vmatprep.mubr.bf16.mxu0 %v15055_v1  ;;  %v20918_v61 = vld [vmem:[#allocation62_spill] sm:$0xff] }
 0xb07   : > { %vm11362_vm8 = vcmp.gt.f32.partialorder %v11298_v48, 0.0  ;;  %v11426_v23 = vmul.f32 0.01, %v11298_v48  ;;  %v10716_v27 = vpop.f32.mrb[134].mxu0  ;;  %v20206_v41 = vsel %vm11361_vm7, %v11297_v46, %v11425_v39  ;;  %v15059_v38 = vld [vmem:[%s20513_s9 + $0x20] ss:$16 sps:$4 sm:$0xff]  }
 0xb08   : > { %v11006_v19 = vadd.f32 %v20909_v50, %v10716_v27  ;;  %11197 = vrot.lane.b32.xlu0 %v11003_v35, %s15089_s17  ;;  %v10718_v22 = vpop.f32.mrb[135].mxu0  ;;  %11826 = vmatmul.mubr.bf16.vlgmr.msra.gmra.mrb[104].mxu1 %v15029_v34 }
 0xb09   : > { %v20208_v11 = vsel %vm11362_vm8, %v11298_v48, %v11426_v23  ;;  %11833 = vmatprep.mubr.bf16.mxu1 %v15034_v36  ;;  %11794 = vmatmul.mubr.bf16.vlgmr.msra.gmra.mrb[136].mxu0 %v15053_v3  ;;  %v15061_v23 = vld [vmem:[%s20513_s9 + $0x24] ss:$16 sps:$4 sm:$0xff]  }
 0xb0a   : > { %v11569_v37 = vpack.c.bf16 %v20208_v11, %v20206_v41  ;;  %11199 = vrot.lane.b32.xlu1 %v11006_v19, %s15089_s17  ;;  %v11142_v28 = vpop.permute.xlu0 %11141  ;;  %v20919_v19 = vld [vmem:[#allocation61_spill] sm:$0xff]  ;;  %11801 = vmatprep.mubr.bf16.mxu0 %v15061_v23 }
 0xb0b   : > { %v11299_v12 = vadd.f32 %v11142_v28, %v20910_v6 }
 0xb0c   : > { %v11144_v29 = vpop.permute.xlu1 %11143  ;;  %11165 = vrot.lane.b32.xlu0 %v20087_v43, %s15089_s17 }
 0xb0d   : > { %v11427_v21 = vmul.f32 0.01, %v11299_v12  ;;  %v11300_v57 = vadd.f32 %v11144_v29, %v20911_v44  ;;  %vm11363_vm0 = vcmp.gt.f32.partialorder %v11299_v12, 0.0 }
 0xb0e   : > { %11167 = vrot.lane.b32.xlu1 %v20091_v10, %s15089_s17 }
 0xb0f   : > { %vm11364_vm3 = vcmp.gt.f32.partialorder %v11300_v57, 0.0  ;;  %v11428_v15 = vmul.f32 0.01, %v11300_v57  ;;  %v20225_v0 = vsel %vm11363_vm0, %v11299_v12, %v11427_v21  ;;  %v20920_v21 = vld [vmem:[#allocation68_spill] sm:$0xff] }
 0xb10   : > { %11834 = vmatmul.mubr.bf16.gmra.mrb[108].mxu1 %v15032_v62 }
 0xb11   : > { %v20227_v43 = vsel %vm11364_vm3, %v11300_v57, %v11428_v15  ;;  %11841 = vmatprep.mubr.bf16.mxu1 %v15037_v32  ;;  %11802 = vmatmul.mubr.bf16.gmra.mrb[140].mxu0 %v15059_v38  ;;  %v15065_v57 = vld [vmem:[%s20513_s9 + $0x40] ss:$16 sps:$4 sm:$0xff]   ;;  %v15067_v32 = vld [vmem:[%s20513_s9 + $0x44] ss:$16 sps:$4 sm:$0xff]  }
 0xb12   : > { %v11570_v47 = vpack.c.bf16 %v20227_v43, %v20225_v0  ;;  %v11146_v14 = vpop.permute.xlu0 %11145  ;;  %11809 = vmatprep.mubr.bf16.mxu0 %v15067_v32  ;;  %v20929_v32 = vld [vmem:[#allocation34_spill] sm:$0xff] }
 0xb13   : > { %v11301_v63 = vadd.f32 %v11146_v14, %v20912_v54  ;;  %v20921_v54 = vld [vmem:[#allocation67_spill] sm:$0xff] }
 0xb14   : > { %v11148_v9 = vpop.permute.xlu1 %11147 }
 0xb15   : > { %v11429_v10 = vmul.f32 0.01, %v11301_v63  ;;  %v11302_v20 = vadd.f32 %v11148_v9, %v20913_v59  ;;  %vm11365_vm11 = vcmp.gt.f32.partialorder %v11301_v63, 0.0 }
 0xb17   : > { %vm11366_vm12 = vcmp.gt.f32.partialorder %v11302_v20, 0.0  ;;  %v11430_v13 = vmul.f32 0.01, %v11302_v20  ;;  %v20239_v40 = vsel %vm11365_vm11, %v11301_v63, %v11429_v10 }
 0xb18   : > { %11842 = vmatmul.mubr.bf16.gmra.mrb[112].mxu1 %v15035_v51 }
 0xb19   : > { %v20241_v56 = vsel %vm11366_vm12, %v11302_v20, %v11430_v13  ;;  %11849 = vmatprep.mubr.bf16.mxu1 %v15040_v55  ;;  %11810 = vmatmul.mubr.bf16.gmra.mrb[144].mxu0 %v15065_v57  ;;  %v15071_v20 = vld [vmem:[%s20513_s9 + $0x60] ss:$16 sps:$4 sm:$0xff]   ;;  %v15073_v55 = vld [vmem:[%s20513_s9 + $0x64] ss:$16 sps:$4 sm:$0xff]  }
 0xb1a   : > { %v11571_v45 = vpack.c.bf16 %v20241_v56, %v20239_v40  ;;  %v11150_v24 = vpop.permute.xlu0 %11149  ;;  %11817 = vmatprep.mubr.bf16.mxu0 %v15073_v55 }
 0xb1b   : > { %v11303_v60 = vadd.f32 %v11150_v24, %v20914_v30  ;;  %v20922_v24 = vld [vmem:[#allocation72_spill] sm:$0xff] }
 0xb1d   : > { %v11152_v8 = vpop.permute.xlu1 %11151  ;;  %v11431_v52 = vmul.f32 0.01, %v11303_v60  ;;  %vm11367_vm9 = vcmp.gt.f32.partialorder %v11303_v60, 0.0 }
 0xb1e   : > { %v11304_v18 = vadd.f32 %v11152_v8, %v20915_v5  ;;  %v20923_v8 = vld [vmem:[#allocation71_spill] sm:$0xff] }
 0xb1f   : > { %v20253_v2 = vsel %vm11367_vm9, %v11303_v60, %v11431_v52 }
 0xb20   : > { %vm11368_vm2 = vcmp.gt.f32.partialorder %v11304_v18, 0.0  ;;  %v11432_v17 = vmul.f32 0.01, %v11304_v18  ;;  %11850 = vmatmul.mubr.bf16.gmra.mrb[116].mxu1 %v15038_v42 }
 0xb21   : > { %11890 = vmatprep.mubr.bf16.mxu1 %v15043_v25  ;;  %11818 = vmatmul.mubr.bf16.gmra.mrb[148].mxu0 %v15071_v20 }
 0xb22   : > { %v20255_v53 = vsel %vm11368_vm2, %v11304_v18, %v11432_v17  ;;  %v11154_v16 = vpop.permute.xlu0 %11153 }
 0xb23   : > { %v11572_v26 = vpack.c.bf16 %v20255_v53, %v20253_v2  ;;  %v11305_v58 = vadd.f32 %v11154_v16, %v20916_v31  ;;  %v20924_v31 = vld [vmem:[#allocation70_spill] sm:$0xff] }
 0xb24   : > { %v11156_v49 = vpop.permute.xlu1 %11155 }
 0xb25   : > { %v11433_v46 = vmul.f32 0.01, %v11305_v58  ;;  %v11306_v34 = vadd.f32 %v11156_v49, %v20917_v4  ;;  %vm11369_vm15 = vcmp.gt.f32.partialorder %v11305_v58, 0.0  ;;  %v20925_v49 = vld [vmem:[#allocation69_spill] sm:$0xff] }
 0xb27   : > { %vm11370_vm4 = vcmp.gt.f32.partialorder %v11306_v34, 0.0  ;;  %v11434_v39 = vmul.f32 0.01, %v11306_v34  ;;  %v20267_v7 = vsel %vm11369_vm15, %v11305_v58, %v11433_v46 }
 0xb29   : > { %v20269_v48 = vsel %vm11370_vm4, %v11306_v34, %v11434_v39 }
 0xb2a   : > { %v11573_v33 = vpack.c.bf16 %v20269_v48, %v20267_v7  ;;  %v11158_v36 = vpop.permute.xlu0 %11157 }
 0xb2b   : > { %v11307_v35 = vadd.f32 %v11158_v36, %v20918_v61 }
 0xb2c   : > { %v11160_v27 = vpop.permute.xlu1 %11159 }
 0xb2d   : > { %v11435_v50 = vmul.f32 0.01, %v11307_v35  ;;  %v11308_v22 = vadd.f32 %v11160_v27, %v20919_v19  ;;  %vm11371_vm1 = vcmp.gt.f32.partialorder %v11307_v35, 0.0 }
 0xb2f   : > { %vm11372_vm14 = vcmp.gt.f32.partialorder %v11308_v22, 0.0  ;;  %v11436_v28 = vmul.f32 0.01, %v11308_v22  ;;  %v20281_v6 = vsel %vm11371_vm1, %v11307_v35, %v11435_v50  ;;  %v20926_v35 = vld [vmem:[#allocation74_spill] sm:$0xff]  ;;  %v20927_v50 = vld [vmem:[#allocation73_spill] sm:$0xff] }
 0xb31   : > { %v20283_v12 = vsel %vm11372_vm14, %v11308_v22, %v11436_v28 }
 0xb32   : > { %v11574_v29 = vpack.c.bf16 %v20283_v12, %v20281_v6  ;;  %v11162_v62 = vpop.permute.xlu0 %11161 }
 0xb33   : > { %v11309_v44 = vadd.f32 %v11162_v62, %v20920_v21  ;;  %v20928_v62 = vld [vmem:[#allocation33_spill] sm:$0xff] }
 0xb34   : > { %v11164_v15 = vpop.permute.xlu1 %11163 }
 0xb35   : > { %v11437_v14 = vmul.f32 0.01, %v11309_v44  ;;  %v11310_v63 = vadd.f32 %v11164_v15, %v20921_v54  ;;  %vm11373_vm5 = vcmp.gt.f32.partialorder %v11309_v44, 0.0 }
 0xb37   : > { %vm11374_vm10 = vcmp.gt.f32.partialorder %v11310_v63, 0.0  ;;  %v11438_v9 = vmul.f32 0.01, %v11310_v63  ;;  %v20295_v51 = vsel %vm11373_vm5, %v11309_v44, %v11437_v14 }
 0xb39   : > { %v20297_v10 = vsel %vm11374_vm10, %v11310_v63, %v11438_v9  ;;  %v20930_v63 = vld [vmem:[#allocation35_spill] sm:$0xff] }
 0xb3a   : > { %v11575_v59 = vpack.c.bf16 %v20297_v10, %v20295_v51 }
 0xb42   : > { %v11170_v13 = vpop.permute.xlu0 %11169 }
 0xb43   : > { %v11313_v30 = vadd.f32 %v11170_v13, %v20922_v24  ;;  %v20931_v13 = vld [vmem:[#allocation36_spill] sm:$0xff] }
 0xb44   : > { %v11172_v60 = vpop.permute.xlu1 %11171 }
 0xb45   : > { %v11441_v42 = vmul.f32 0.01, %v11313_v30  ;;  %v11314_v25 = vadd.f32 %v11172_v60, %v20923_v8  ;;  %vm11377_vm13 = vcmp.gt.f32.partialorder %v11313_v30, 0.0 }
 0xb47   : > { %vm11378_vm6 = vcmp.gt.f32.partialorder %v11314_v25, 0.0  ;;  %v11442_v52 = vmul.f32 0.01, %v11314_v25  ;;  %v11505_v5 = vsel %vm11377_vm13, %v11313_v30, %v11441_v42  ;;  %v20932_v42 = vld [vmem:[#allocation37_spill] sm:$0xff] }
 0xb49   : > { %v11506_v18 = vsel %vm11378_vm6, %v11314_v25, %v11442_v52 }
 0xb4a   : > { %v11174_v17 = vpop.permute.xlu0 %11173  ;;  %v11577_v16 = vpack.c.bf16 %v11506_v18, %v11505_v5  ;;  %v20933_v5 = vld [vmem:[#allocation38_spill] sm:$0xff] }
 0xb4b   : > { %v11315_v58 = vadd.f32 %v11174_v17, %v20924_v31  ;;  %v20934_v31 = vld [vmem:[#allocation39_spill] sm:$0xff] }
 0xb4c   : > { %v11176_v3 = vpop.permute.xlu1 %11175  ;;  %13496 = vmatprep.subr.bf16.mxu1 %v11577_v16 }
 0xb4d   : > { %v11443_v1 = vmul.f32 0.01, %v11315_v58  ;;  %v11316_v46 = vadd.f32 %v11176_v3, %v20925_v49  ;;  %13497 = vmatpush3.bf16.msra.mxu1 %v11569_v37  ;;  %vm11379_vm7 = vcmp.gt.f32.partialorder %v11315_v58, 0.0  ;;  %v20935_v49 = vld [vmem:[#allocation40_spill] sm:$0xff] }
 0xb4f   : > { %vm11380_vm8 = vcmp.gt.f32.partialorder %v11316_v46, 0.0  ;;  %v11444_v4 = vmul.f32 0.01, %v11316_v46  ;;  %v11507_v34 = vsel %vm11379_vm7, %v11315_v58, %v11443_v1  ;;  %vm11955_vm7 = vcmask 7168  }
 0xb51   : > { %v11508_v39 = vsel %vm11380_vm8, %v11316_v46, %v11444_v4 }
 0xb52   : > { %v11178_v36 = vpop.permute.xlu0 %11177  ;;  %v11578_v61 = vpack.c.bf16 %v11508_v39, %v11507_v34  ;;  %v20936_v39 = vld [vmem:[#allocation41_spill] sm:$0xff] }
 0xb53   : > { %v11317_v38 = vadd.f32 %v11178_v36, %v20926_v35 }
 0xb54   : > { %v11180_v23 = vpop.permute.xlu1 %11179  ;;  %13498 = vmatprep.subr.bf16.mxu1 %v11578_v61 }
 0xb55   : > { %v11445_v27 = vmul.f32 0.01, %v11317_v38  ;;  %v11318_v19 = vadd.f32 %v11180_v23, %v20927_v50  ;;  %13499 = vmatpush3.bf16.msra.mxu1 %v11570_v47  ;;  %vm11381_vm0 = vcmp.gt.f32.partialorder %v11317_v38, 0.0 }
 0xb57   : > { %vm11382_vm3 = vcmp.gt.f32.partialorder %v11318_v19, 0.0  ;;  %v11446_v41 = vmul.f32 0.01, %v11318_v19  ;;  %v11509_v11 = vsel %vm11381_vm0, %v11317_v38, %v11445_v27  ;;  %v20937_v38 = vld [vmem:[#allocation42_spill] sm:$0xff] }
 0xb59   : > { %v11510_v37 = vsel %vm11382_vm3, %v11318_v19, %v11446_v41  ;;  %v20939_v41 = vld [vmem:[#allocation65_spill] sm:$0xff] }
 0xb5a   : > { %v11182_v22 = vpop.permute.xlu0 %11181  ;;  %v11579_v28 = vpack.c.bf16 %v11510_v37, %v11509_v11 }
 0xb5b   : > { %v11319_v21 = vadd.f32 %v11182_v22, %v20928_v62 }
 0xb5c   : > { %v11184_v44 = vpop.permute.xlu1 %11183  ;;  %13500 = vmatprep.subr.bf16.mxu1 %v11579_v28 }
 0xb5d   : > { %v11447_v57 = vmul.f32 0.01, %v11319_v21  ;;  %v11320_v15 = vadd.f32 %v11184_v44, %v20929_v32  ;;  %13501 = vmatpush3.bf16.msra.mxu1 %v11571_v45  ;;  %vm11383_vm11 = vcmp.gt.f32.partialorder %v11319_v21, 0.0  ;;  %v15046_v44 = vld [vmem:[%s20513_s9 + $0x2c] ss:$16 sps:$4 sm:$0xff]  }
 0xb5e   : > { %v15049_v32 = vld [vmem:[%s20513_s9 + $0x4c] ss:$16 sps:$4 sm:$0xff]  }
 0xb5f   : > { %vm11384_vm12 = vcmp.gt.f32.partialorder %v11320_v15, 0.0  ;;  %v11448_v0 = vmul.f32 0.01, %v11320_v15  ;;  %v11511_v43 = vsel %vm11383_vm11, %v11319_v21, %v11447_v57  ;;  %v15044_v57 = vld [vmem:[%s20513_s9 + $0x28] ss:$16 sps:$4 sm:$0xff]  }
 0xb61   : > { %v11512_v47 = vsel %vm11384_vm12, %v11320_v15, %v11448_v0  ;;  %v15047_v15 = vld [vmem:[%s20513_s9 + $0x48] ss:$16 sps:$4 sm:$0xff]   ;;  %v15052_v0 = vld [vmem:[%s20513_s9 + $0x6c] ss:$16 sps:$4 sm:$0xff]  }
 0xb62   : > { %v11186_v14 = vpop.permute.xlu0 %11185  ;;  %v11580_v54 = vpack.c.bf16 %v11512_v47, %v11511_v43  ;;  %v15050_v43 = vld [vmem:[%s20513_s9 + $0x68] ss:$16 sps:$4 sm:$0xff]   ;;  %v15058_v47 = vld [vmem:[%s20513_s9 + $0x8c] ss:$16 sps:$4 sm:$0xff]  }
 0xb63   : > { %v11321_v9 = vadd.f32 %v11186_v14, %v20930_v63  ;;  %v15056_v14 = vld [vmem:[%s20513_s9 + $0x88] ss:$16 sps:$4 sm:$0xff]  }
 0xb64   : > { %v11188_v20 = vpop.permute.xlu1 %11187  ;;  %13502 = vmatprep.subr.bf16.mxu1 %v11580_v54  ;;  %v15064_v54 = vld [vmem:[%s20513_s9 + $0xac] ss:$16 sps:$4 sm:$0xff]   ;;  %v15062_v63 = vld [vmem:[%s20513_s9 + $0xa8] ss:$16 sps:$4 sm:$0xff]  }
 0xb65   : > { %v11449_v55 = vmul.f32 0.01, %v11321_v9  ;;  %v11322_v24 = vadd.f32 %v11188_v20, %v20931_v13  ;;  %13503 = vmatpush3.bf16.msra.mxu1 %v11572_v26  ;;  %vm11385_vm9 = vcmp.gt.f32.partialorder %v11321_v9, 0.0  ;;  %v15068_v20 = vld [vmem:[%s20513_s9 + $0xc8] ss:$16 sps:$4 sm:$0xff]  }
 0xb66   : > { %v15074_v13 = vld [vmem:[%s20513_s9 + $0xe8] ss:$16 sps:$4 sm:$0xff]  }
 0xb67   : > { %vm11386_vm2 = vcmp.gt.f32.partialorder %v11322_v24, 0.0  ;;  %v11450_v40 = vmul.f32 0.01, %v11322_v24  ;;  %v11513_v56 = vsel %vm11385_vm9, %v11321_v9, %v11449_v55  ;;  %v15070_v9 = vld [vmem:[%s20513_s9 + $0xcc] ss:$16 sps:$4 sm:$0xff]  }
 0xb68   : > { %v15076_v55 = vld [vmem:[%s20513_s9 + $0xec] ss:$16 sps:$4 sm:$0xff]  }
 0xb69   : > { %v11514_v45 = vsel %vm11386_vm2, %v11322_v24, %v11450_v40 }
 0xb6a   : > { %v11190_v30 = vpop.permute.xlu0 %11189  ;;  %v11581_v60 = vpack.c.bf16 %v11514_v45, %v11513_v56 }
 0xb6b   : > { %v11323_v8 = vadd.f32 %v11190_v30, %v20932_v42 }
 0xb6c   : > { %v11192_v25 = vpop.permute.xlu1 %11191  ;;  %13504 = vmatprep.subr.bf16.mxu1 %v11581_v60 }
 0xb6d   : > { %v11451_v52 = vmul.f32 0.01, %v11323_v8  ;;  %v11324_v18 = vadd.f32 %v11192_v25, %v20933_v5  ;;  %13505 = vmatpush3.bf16.msra.mxu1 %v11573_v33  ;;  %vm11387_vm15 = vcmp.gt.f32.partialorder %v11323_v8, 0.0 }
 0xb6f   : > { %vm11388_vm4 = vcmp.gt.f32.partialorder %v11324_v18, 0.0  ;;  %v11452_v2 = vmul.f32 0.01, %v11324_v18  ;;  %v11515_v53 = vsel %vm11387_vm15, %v11323_v8, %v11451_v52 }
 0xb71   : > { %v11516_v26 = vsel %vm11388_vm4, %v11324_v18, %v11452_v2 }
 0xb72   : > { %v11194_v17 = vpop.permute.xlu0 %11193  ;;  %v11582_v16 = vpack.c.bf16 %v11516_v26, %v11515_v53 }
 0xb73   : > { %v11325_v58 = vadd.f32 %v11194_v17, %v20934_v31 }
 0xb74   : > { %v11196_v3 = vpop.permute.xlu1 %11195  ;;  %13506 = vmatprep.subr.bf16.mxu1 %v11582_v16 }
 0xb75   : > { %v11453_v1 = vmul.f32 0.01, %v11325_v58  ;;  %v11326_v46 = vadd.f32 %v11196_v3, %v20935_v49  ;;  %13507 = vmatpush3.bf16.msra.mxu1 %v11574_v29  ;;  %vm11389_vm1 = vcmp.gt.f32.partialorder %v11325_v58, 0.0  ;;  %v20938_v29 = vld [vmem:[#allocation66_spill] sm:$0xff] }
 0xb77   : > { %vm11390_vm14 = vcmp.gt.f32.partialorder %v11326_v46, 0.0  ;;  %v11454_v7 = vmul.f32 0.01, %v11326_v46  ;;  %v11517_v48 = vsel %vm11389_vm1, %v11325_v58, %v11453_v1 }
 0xb79   : > { %v11518_v33 = vsel %vm11390_vm14, %v11326_v46, %v11454_v7 }
 0xb7a   : > { %v11198_v4 = vpop.permute.xlu0 %11197  ;;  %v11583_v34 = vpack.c.bf16 %v11518_v33, %v11517_v48 }
 0xb7b   : > { %v11327_v36 = vadd.f32 %v11198_v4, %v20936_v39 }
 0xb7c   : > { %v11200_v61 = vpop.permute.xlu1 %11199  ;;  %13508 = vmatprep.subr.bf16.mxu1 %v11583_v34 }
 0xb7d   : > { %v11455_v35 = vmul.f32 0.01, %v11327_v36  ;;  %v11328_v23 = vadd.f32 %v11200_v61, %v20937_v38  ;;  %13509 = vmatpush3.bf16.msra.mxu1 %v11575_v59  ;;  %vm11391_vm5 = vcmp.gt.f32.partialorder %v11327_v36, 0.0  ;;  %v15041_v59 = vld [vmem:[%s20513_s9 + $0x8] ss:$16 sps:$4 sm:$0xff]  }
 0xb7e   : > { %v11166_v6 = vpop.permute.xlu0 %11165 }
 0xb7f   : > { %vm11392_vm10 = vcmp.gt.f32.partialorder %v11328_v23, 0.0  ;;  %v11456_v12 = vmul.f32 0.01, %v11328_v23  ;;  %v11311_v27 = vadd.f32 %v11166_v6, %v20938_v29  ;;  %v11519_v37 = vsel %vm11391_vm5, %v11327_v36, %v11455_v35 }
 0xb80   : > { %v11168_v50 = vpop.permute.xlu1 %11167 }
 0xb81   : > { %v11439_v19 = vmul.f32 0.01, %v11311_v27  ;;  %v11312_v11 = vadd.f32 %v11168_v50, %v20939_v41  ;;  %v11520_v22 = vsel %vm11392_vm10, %v11328_v23, %v11456_v12  ;;  %vm11375_vm13 = vcmp.gt.f32.partialorder %v11311_v27, 0.0 }
 0xb82   : > { %v11584_v28 = vpack.c.bf16 %v11520_v22, %v11519_v37 }
 0xb83   : > { %vm11376_vm6 = vcmp.gt.f32.partialorder %v11312_v11, 0.0  ;;  %v11440_v62 = vmul.f32 0.01, %v11312_v11  ;;  %v11503_v21 = vsel %vm11375_vm13, %v11311_v27, %v11439_v19 }
 0xb84   : > { %13510 = vmatprep.subr.bf16.mxu1 %v11584_v28 }
 0xb85   : > { %v11504_v51 = vsel %vm11376_vm6, %v11312_v11, %v11440_v62 }
 0xb86   : > { %v11576_v10 = vpack.c.bf16 %v11504_v51, %v11503_v21 }
 0xb88   : > { %13511 = vmatpush3.bf16.msra.mxu1 %v11576_v10  ;;  %v11585_v10 = vld [vmem:[%s20514_s10] sm:$0xff] }
 0xb8b   : > { %11891 = vmatmul.mubr.bf16.vlgmr.msra.gmra.mrb[120].mxu1 %v15041_v59  ;;  %v11586_v59 = vld [vmem:[%s20514_s10 + $0x8] sm:$0xff] }
 0xb8c   : > { %11898 = vmatprep.mubr.bf16.mxu1 %v15046_v44 }
 0xb93   : > { %11899 = vmatmul.mubr.bf16.gmra.mrb[124].mxu1 %v15044_v57 }
 0xb94   : > { %11906 = vmatprep.mubr.bf16.mxu1 %v15049_v32 }
 0xb9b   : > { %11907 = vmatmul.mubr.bf16.gmra.mrb[128].mxu1 %v15047_v15 }
 0xb9c   : > { %11914 = vmatprep.mubr.bf16.mxu1 %v15052_v0 }
 0xba3   : > { %11915 = vmatmul.mubr.bf16.gmra.mrb[132].mxu1 %v15050_v43 }
 0xba4   : > { %11922 = vmatprep.mubr.bf16.mxu1 %v15058_v47 }
 0xbab   : > { %11923 = vmatmul.mubr.bf16.gmra.mrb[136].mxu1 %v15056_v14 }
 0xbac   : > { %11930 = vmatprep.mubr.bf16.mxu1 %v15064_v54 }
 0xbb3   : > { %11931 = vmatmul.mubr.bf16.gmra.mrb[140].mxu1 %v15062_v63  ;;  %v11587_v63 = vld [vmem:[%s20514_s10 + $0x10] sm:$0xff] }
 0xbb4   : > { %11938 = vmatprep.mubr.bf16.mxu1 %v15070_v9 }
 0xbbb   : > { %11939 = vmatmul.mubr.bf16.gmra.mrb[144].mxu1 %v15068_v20  ;;  %v11588_v20 = vld [vmem:[%s20514_s10 + $0x18] sm:$0xff] }
 0xbbc   : > { %11946 = vmatprep.mubr.bf16.mxu1 %v15076_v55 }
 0xbc3   : > { %11947 = vmatmul.mubr.bf16.gmra.mrb[148].mxu1 %v15074_v13 }
 0xbdb   : > { %v13472_v24 = vpop.f32.mrb[104].mxu1 }
 0xbdc   : > { %v13473_v40 = vpop.f32.mrb[105].mxu1  ;;  %v13448_v48 = vpop.f32.mrb[136].mxu0 }
 0xbdd   : > { %v20391_v56 = vadd.f32 %v13473_v40, %v13472_v24  ;;  %v13475_v45 = vpop.f32.mrb[106].mxu1  ;;  %v13449_v33 = vpop.f32.mrb[137].mxu0 }
 0xbde   : > { %v13476_v30 = vpop.f32.mrb[107].mxu1  ;;  %v13450_v4 = vadd.f32 %v13449_v33, %v13448_v48  ;;  %v13451_v34 = vpop.f32.mrb[138].mxu0 }
 0xbdf   : > { %v20393_v60 = vadd.f32 %v13476_v30, %v13475_v45  ;;  %v13452_v39 = vpop.f32.mrb[139].mxu0 }
 0xbe0   : > { %v13453_v36 = vadd.f32 %v13452_v39, %v13451_v34  ;;  %v11796_v57 = vadd.f32 %v13450_v4, %v11585_v10  ;;  %v11591_v34 = vld [vmem:[%s20514_s10 + $0x30] sm:$0xff] }
 0xbe2   : > { %v11799_v43 = vadd.f32 %v13453_v36, %v11586_v59  ;;  %v11592_v36 = vld [vmem:[%s20514_s10 + $0x38] sm:$0xff] }
 0xbe3   : > { %v13478_v42 = vpop.f32.mrb[108].mxu1 }
 0xbe4   : > { %v13479_v8 = vpop.f32.mrb[109].mxu1  ;;  %v13454_v61 = vpop.f32.mrb[140].mxu0 }
 0xbe5   : > { %v20395_v25 = vadd.f32 %v13479_v8, %v13478_v42  ;;  %v13481_v52 = vpop.f32.mrb[110].mxu1  ;;  %v13455_v35 = vpop.f32.mrb[141].mxu0 }
 0xbe6   : > { %v13482_v5 = vpop.f32.mrb[111].mxu1  ;;  %v13456_v38 = vadd.f32 %v13455_v35, %v13454_v61  ;;  %v13457_v23 = vpop.f32.mrb[142].mxu0 }
 0xbe7   : > { %v20397_v18 = vadd.f32 %v13482_v5, %v13481_v52  ;;  %v13458_v6 = vpop.f32.mrb[143].mxu0  ;;  %v11589_v5 = vld [vmem:[%s20514_s10 + $0x20] sm:$0xff] }
 0xbe8   : > { %v13459_v12 = vadd.f32 %v13458_v6, %v13457_v23  ;;  %v11804_v13 = vadd.f32 %v13456_v38, %v11587_v63 }
 0xbea   : > { %v11807_v30 = vadd.f32 %v13459_v12, %v11588_v20 }
 0xbeb   : > { %v13484_v2 = vpop.f32.mrb[112].mxu1 }
 0xbec   : > { %v13485_v53 = vpop.f32.mrb[113].mxu1  ;;  %v13460_v29 = vpop.f32.mrb[144].mxu0 }
 0xbed   : > { %v20399_v26 = vadd.f32 %v13485_v53, %v13484_v2  ;;  %v13487_v17 = vpop.f32.mrb[114].mxu1  ;;  %v13461_v27 = vpop.f32.mrb[145].mxu0  ;;  %v11590_v53 = vld [vmem:[%s20514_s10 + $0x28] sm:$0xff] }
 0xbee   : > { %v13488_v16 = vpop.f32.mrb[115].mxu1  ;;  %v13462_v50 = vadd.f32 %v13461_v27, %v13460_v29  ;;  %v13463_v19 = vpop.f32.mrb[146].mxu0 }
 0xbef   : > { %v20401_v31 = vadd.f32 %v13488_v16, %v13487_v17  ;;  %v13464_v41 = vpop.f32.mrb[147].mxu0 }
 0xbf0   : > { %v13465_v11 = vadd.f32 %v13464_v41, %v13463_v19  ;;  %v11812_v16 = vadd.f32 %v13462_v50, %v11589_v5  ;;  %v11593_v41 = vld [vmem:[%s20514_s10 + $0x40] sm:$0xff] }
 0xbf3   : > { %v13490_v58 = vpop.f32.mrb[116].mxu1 }
 0xbf4   : > { %v13491_v3 = vpop.f32.mrb[117].mxu1  ;;  %v13466_v37 = vpop.f32.mrb[148].mxu0 }
 0xbf5   : > { %v20403_v1 = vadd.f32 %v13491_v3, %v13490_v58  ;;  %v13493_v49 = vpop.f32.mrb[118].mxu1  ;;  %v13467_v22 = vpop.f32.mrb[149].mxu0 }
 0xbf6   : > { %v13494_v46 = vpop.f32.mrb[119].mxu1  ;;  %v13468_v28 = vadd.f32 %v13467_v22, %v13466_v37  ;;  %v13469_v62 = vpop.f32.mrb[150].mxu0  ;;  %v11594_v37 = vld [vmem:[%s20514_s10 + $0x48] sm:$0xff] }
 0xbf7   : > { %v20405_v7 = vadd.f32 %v13494_v46, %v13493_v49  ;;  %v13470_v21 = vpop.f32.mrb[151].mxu0  ;;  %v11815_v46 = vadd.f32 %v13465_v11, %v11590_v53  ;;  %v11831_v10 = vadd.f32 %v20393_v60, %v11594_v37 }
 0xbf8   : > { %v13471_v51 = vadd.f32 %v13470_v21, %v13469_v62  ;;  %v11820_v35 = vadd.f32 %v13468_v28, %v11591_v34  ;;  %v11828_v28 = vadd.f32 %v20391_v56, %v11593_v41  ;;  %v11596_v56 = vld [vmem:[%s20514_s10 + $0x58] sm:$0xff] }
 0xbfa   : > { %v11823_v12 = vadd.f32 %v13471_v51, %v11592_v36 }
 0xc5e   : > { %v13512_v44 = vpop.f32.mrb[120].mxu1 }
 0xc5f   : > { %v13513_v32 = vpop.f32.mrb[121].mxu1 }
 0xc60   : > { %v13514_v15 = vadd.f32 %v13513_v32, %v13512_v44  ;;  %v13515_v0 = vpop.f32.mrb[122].mxu1  ;;  %v11595_v32 = vld [vmem:[%s20514_s10 + $0x50] sm:$0xff] }
 0xc61   : > { %v13516_v47 = vpop.f32.mrb[123].mxu1  ;;  %v11836_v60 = vadd.f32 %v20395_v25, %v11595_v32  ;;  %v11598_v25 = vld [vmem:[%s20514_s10 + $0x68] sm:$0xff] }
 0xc62   : > { %v13517_v14 = vadd.f32 %v13516_v47, %v13515_v0  ;;  %v11893_v54 = vadd.f32 %v13514_v15, %v11796_v57 }
 0xc64   : > { %11956 = vst.msk [vmem:[%s20417_s14] sm:$0xff] %vm11955_vm7, %v11893_v54  ;;  %v11896_v9 = vadd.f32 %v13517_v14, %v11799_v43  ;;  %v11839_v54 = vadd.f32 %v20397_v18, %v11596_v56 }
 0xc66   : > { %v13518_v55 = vpop.f32.mrb[124].mxu1  ;;  %11957 = vst.msk [vmem:[%s20417_s14 + $0x8] sm:$0xff] %vm11955_vm7, %v11896_v9 }
 0xc67   : > { %v13519_v24 = vpop.f32.mrb[125].mxu1 }
 0xc68   : > { %v13520_v40 = vadd.f32 %v13519_v24, %v13518_v55  ;;  %v13521_v45 = vpop.f32.mrb[126].mxu1  ;;  %v11597_v55 = vld [vmem:[%s20514_s10 + $0x60] sm:$0xff] }
 0xc69   : > { %v13522_v42 = vpop.f32.mrb[127].mxu1  ;;  %v11844_v18 = vadd.f32 %v20399_v26, %v11597_v55  ;;  %v11600_v26 = vld [vmem:[%s20514_s10 + $0x78] sm:$0xff] }
 0xc6a   : > { %v13523_v8 = vadd.f32 %v13522_v42, %v13521_v45  ;;  %v11901_v52 = vadd.f32 %v13520_v40, %v11804_v13  ;;  %v11847_v42 = vadd.f32 %v20401_v31, %v11598_v25 }
 0xc6c   : > { %11958 = vst.msk [vmem:[%s20417_s14 + $0x10] sm:$0xff] %vm11955_vm7, %v11901_v52  ;;  %v11904_v2 = vadd.f32 %v13523_v8, %v11807_v30 }
 0xc6e   : > { %v13524_v17 = vpop.f32.mrb[128].mxu1  ;;  %11959 = vst.msk [vmem:[%s20417_s14 + $0x18] sm:$0xff] %vm11955_vm7, %v11904_v2  ;;  %v11599_v2 = vld [vmem:[%s20514_s10 + $0x70] sm:$0xff] }
 0xc6f   : > { %v13525_v58 = vpop.f32.mrb[129].mxu1  ;;  %v11852_v31 = vadd.f32 %v20403_v1, %v11599_v2 }
 0xc70   : > { %v13526_v3 = vadd.f32 %v13525_v58, %v13524_v17  ;;  %v13527_v49 = vpop.f32.mrb[130].mxu1 }
 0xc71   : > { %v13528_v48 = vpop.f32.mrb[131].mxu1 }
 0xc72   : > { %v13529_v33 = vadd.f32 %v13528_v48, %v13527_v49  ;;  %v11909_v4 = vadd.f32 %v13526_v3, %v11812_v16  ;;  %v11855_v49 = vadd.f32 %v20405_v7, %v11600_v26 }
 0xc74   : > { %11960 = vst.msk [vmem:[%s20417_s14 + $0x20] sm:$0xff] %vm11955_vm7, %v11909_v4  ;;  %v11912_v39 = vadd.f32 %v13529_v33, %v11815_v46 }
 0xc76   : > { %v13530_v61 = vpop.f32.mrb[132].mxu1  ;;  %11961 = vst.msk [vmem:[%s20417_s14 + $0x28] sm:$0xff] %vm11955_vm7, %v11912_v39 }
 0xc77   : > { %v13531_v38 = vpop.f32.mrb[133].mxu1 }
 0xc78   : > { %v13532_v23 = vadd.f32 %v13531_v38, %v13530_v61  ;;  %v13533_v6 = vpop.f32.mrb[134].mxu1 }
 0xc79   : > { %v13534_v29 = vpop.f32.mrb[135].mxu1 }
 0xc7a   : > { %v13535_v27 = vadd.f32 %v13534_v29, %v13533_v6  ;;  %v11917_v50 = vadd.f32 %v13532_v23, %v11820_v35 }
 0xc7c   : > { %11962 = vst.msk [vmem:[%s20417_s14 + $0x30] sm:$0xff] %vm11955_vm7, %v11917_v50  ;;  %v11920_v19 = vadd.f32 %v13535_v27, %v11823_v12 }
 0xc7e   : > { %v13536_v11 = vpop.f32.mrb[136].mxu1  ;;  %11963 = vst.msk [vmem:[%s20417_s14 + $0x38] sm:$0xff] %vm11955_vm7, %v11920_v19 }
 0xc7f   : > { %v13537_v22 = vpop.f32.mrb[137].mxu1 }
 0xc80   : > { %v13538_v62 = vadd.f32 %v13537_v22, %v13536_v11  ;;  %v13539_v21 = vpop.f32.mrb[138].mxu1 }
 0xc81   : > { %v13540_v51 = vpop.f32.mrb[139].mxu1 }
 0xc82   : > { %v11925_v59 = vadd.f32 %v13538_v62, %v11828_v28  ;;  %v13541_v44 = vadd.f32 %v13540_v51, %v13539_v21 }
 0xc84   : > { %11964 = vst.msk [vmem:[%s20417_s14 + $0x40] sm:$0xff] %vm11955_vm7, %v11925_v59  ;;  %v11928_v57 = vadd.f32 %v13541_v44, %v11831_v10 }
 0xc86   : > { %11965 = vst.msk [vmem:[%s20417_s14 + $0x48] sm:$0xff] %vm11955_vm7, %v11928_v57  ;;  %v13542_v15 = vpop.f32.mrb[140].mxu1 }
 0xc87   : > { %v13543_v0 = vpop.f32.mrb[141].mxu1 }
 0xc88   : > { %v13544_v43 = vadd.f32 %v13543_v0, %v13542_v15  ;;  %v13545_v47 = vpop.f32.mrb[142].mxu1 }
 0xc89   : > { %v13546_v14 = vpop.f32.mrb[143].mxu1 }
 0xc8a   : > { %v11933_v63 = vadd.f32 %v13544_v43, %v11836_v60  ;;  %v13547_v9 = vadd.f32 %v13546_v14, %v13545_v47 }
 0xc8c   : > { %11966 = vst.msk [vmem:[%s20417_s14 + $0x50] sm:$0xff] %vm11955_vm7, %v11933_v63  ;;  %v11936_v20 = vadd.f32 %v13547_v9, %v11839_v54 }
 0xc8e   : > { %11967 = vst.msk [vmem:[%s20417_s14 + $0x58] sm:$0xff] %vm11955_vm7, %v11936_v20  ;;  %v13548_v13 = vpop.f32.mrb[144].mxu1 }
 0xc8f   : > { %v13549_v24 = vpop.f32.mrb[145].mxu1 }
 0xc90   : > { %v13550_v40 = vadd.f32 %v13549_v24, %v13548_v13  ;;  %v13551_v45 = vpop.f32.mrb[146].mxu1 }
 0xc91   : > { %v13552_v30 = vpop.f32.mrb[147].mxu1 }
 0xc92   : > { %v11941_v8 = vadd.f32 %v13550_v40, %v11844_v18  ;;  %v13553_v52 = vadd.f32 %v13552_v30, %v13551_v45 }
 0xc94   : > { %11968 = vst.msk [vmem:[%s20417_s14 + $0x60] sm:$0xff] %vm11955_vm7, %v11941_v8  ;;  %v11944_v5 = vadd.f32 %v13553_v52, %v11847_v42 }
 0xc96   : > { %11969 = vst.msk [vmem:[%s20417_s14 + $0x68] sm:$0xff] %vm11955_vm7, %v11944_v5  ;;  %v13554_v53 = vpop.f32.mrb[148].mxu1 }
 0xc97   : > { %v13555_v17 = vpop.f32.mrb[149].mxu1 }
 0xc98   : > { %v13556_v16 = vadd.f32 %v13555_v17, %v13554_v53  ;;  %v13557_v58 = vpop.f32.mrb[150].mxu1 }
 0xc99   : > { %v13558_v3 = vpop.f32.mrb[151].mxu1 }
 0xc9a   : > { %v11949_v46 = vadd.f32 %v13556_v16, %v11852_v31  ;;  %v13559_v48 = vadd.f32 %v13558_v3, %v13557_v58 }
 0xc9c   : > { %11970 = vst.msk [vmem:[%s20417_s14 + $0x70] sm:$0xff] %vm11955_vm7, %v11949_v46  ;;  %v11952_v33 = vadd.f32 %v13559_v48, %v11855_v49 }
 0xc9e   : > { %11971 = vst.msk [vmem:[%s20417_s14 + $0x78] sm:$0xff] %vm11955_vm7, %v11952_v33 }
 0xc9f PF: > { %s23_s21 = sadd.s32 1, %s15084_s21  }
 0xca0   : > { %p20_p4 = scmp.ge.s32.totalorder %s23_s21, 4  }
 0xca2   :  { %22 = sbr.rel (!%p20_p4) target bundleno = 1 (0x1), region = 120 }

</bundles_post_ra>
